<compile_context>
chip_gen: v6e
topology: v6e:2x2x1
jax: 0.10.0
libtpu: 0.0.40
codegen_flags: <defaults>
</compile_context>

<pallas_src>
import math

import jax
import jax.numpy as jnp
from jax.experimental import pallas as pl
from jax.experimental.pallas import tpu as pltpu

# ---- model hyperparameters (module hardcodes embed_dim=768, num_heads=8) ----
B, S, E = 2, 8, 768
NUM_HEADS = 8
HEAD_DIM = E // NUM_HEADS          # 96
LABEL_NUM = 4
LN_EPS = 1e-5
NEG_INF = -1e30                    # stands in for -inf on masked keys (f32 only)


def _erf(x):
    # Abramowitz & Stegun 7.1.26 rational approximation (~1.5e-7 abs err),
    # built from exp/mul/add/select only so it lowers cleanly on TPU.
    a1, a2, a3, a4, a5 = (0.254829592, -0.284496736, 1.421413741,
                          -1.453152027, 1.061405429)
    pc = 0.3275911
    ax = jnp.abs(x)
    t = 1.0 / (1.0 + pc * ax)
    poly = ((((a5 * t + a4) * t + a3) * t + a2) * t + a1) * t
    y = 1.0 - poly * jnp.exp(-ax * ax)
    return jnp.where(x < 0.0, -y, y)


def _gelu_exact(x):
    # PyTorch nn.GELU() default (erf-based, approximate='none')
    return 0.5 * x * (1.0 + _erf(x * 0.7071067811865476))


def classifier_head_kernel(h_ref, mask_ref,
                           wqkv_ref, bqkv_ref,
                           hsum_ref, hexp_ref,
                           wo_ref, bo_ref, lnw_ref, lnb_ref,
                           fcw_ref, fcb_ref, out_ref):
    """One batch element per grid step.

    h_ref   : [1, S, E]  bf16  encoder last_hidden_state (this batch)
    mask_ref: [1, 1, S]  f32   attention mask (1 valid / 0 pad)
    wqkv_ref: [E, 3E]    bf16  [Wq.T*scale | Wk.T | Wv.T] fused, lane-dense
    bqkv_ref: [1, 3E]    f32   [bq*scale | bk | bv]
    hsum_ref: [E, nH]    bf16  0/1 head-segment sum matrix
    hexp_ref: [nH, E]    bf16  0/1 head-segment broadcast matrix
    wo_ref  : [E, E]     bf16  out_proj.weight.T (lane-dense)
    bo/lnw/lnb : [1, E]  f32
    fcw_ref : [E, L] bf16, fcb_ref: [1, L] f32
    out_ref : [1, 1, L]  f32   logits for this batch
    """
    _, s_len, e_dim = h_ref.shape
    n_heads = hsum_ref.shape[1]

    x = h_ref[...].reshape(s_len, e_dim)              # [S, E] bf16

    # Single fused QKV projection (Q scale pre-folded); f32 MXU accumulate.
    qkv = jnp.dot(x, wqkv_ref[...],
                  preferred_element_type=jnp.float32) + bqkv_ref[...]   # [S, 3E]
    q = qkv[0:1, 0:e_dim]                             # [1, E]  CLS query only
    k = qkv[:, e_dim:2 * e_dim]                       # [S, E]
    v = qkv[:, 2 * e_dim:3 * e_dim]                   # [S, E]

    # scores[s, h] = sum_{d in head h} q[d] * k[s, d]
    # (segmented lane reduction as one small bf16 MXU matmul, f32 accumulate)
    prod = (q * k).astype(jnp.bfloat16)               # [S, E]
    s_c = jnp.dot(prod, hsum_ref[...],
                  preferred_element_type=jnp.float32)                   # [S, nH]

    # key_padding_mask = (1 - attention_mask).bool() -> mask keys where mask==0
    # (applied to the f32 accumulate, so NEG_INF never touches bf16)
    mask = mask_ref[...].reshape(s_len, 1)            # [S, 1]
    s_c = jnp.where(mask > 0.5, s_c, NEG_INF)

    # softmax over the key axis, all heads at once
    m = jnp.max(s_c, axis=0, keepdims=True)
    p = jnp.exp(s_c - m)
    denom = jnp.sum(p, axis=0, keepdims=True)
    p = p * pl.reciprocal(denom, approx=True)         # [S, nH]

    # broadcast head probs back to lane layout, contract over keys
    p_full = jnp.dot(p.astype(jnp.bfloat16), hexp_ref[...],
                     preferred_element_type=jnp.float32)                # [S, E]
    ctx = jnp.sum(p_full * v, axis=0, keepdims=True)  # [1, E] f32

    # out_proj (lane-dense) + bias
    y = jnp.dot(ctx.astype(wo_ref.dtype), wo_ref[...],
                preferred_element_type=jnp.float32) + bo_ref[...]       # [1, E]

    # nn.Dropout(0.1): identity in eval/inference mode
    mu = jnp.mean(y, axis=-1, keepdims=True)
    var = jnp.mean((y - mu) ** 2, axis=-1, keepdims=True)
    y = (y - mu) * jax.lax.rsqrt(var + LN_EPS) * lnw_ref[...] + lnb_ref[...]
    y = _gelu_exact(y)

    logits = jnp.dot(y.astype(fcw_ref.dtype), fcw_ref[...],
                     preferred_element_type=jnp.float32) + fcb_ref[...]  # [1, L]
    out_ref[...] = logits.reshape(1, 1, -1)


def prepare_params(params):
    """One-time (checkpoint-load-time) repacking of PyTorch-layout params into
    the fused, lane-dense, bf16 layout the kernel consumes."""
    e = E
    scale = 1.0 / math.sqrt(HEAD_DIM)

    in_w, in_b = params["in_w"], params["in_b"]       # [3E, E], [3E]
    wq, wk, wv = in_w[0:e], in_w[e:2 * e], in_w[2 * e:3 * e]
    bq, bk, bv = in_b[0:e], in_b[e:2 * e], in_b[2 * e:3 * e]

    # exact 0/1 head-segment matrices (exact in bf16)
    lane = jnp.arange(e)[:, None]                     # [E, 1]
    head = jnp.arange(NUM_HEADS)[None, :]             # [1, nH]
    hsum = (lane // HEAD_DIM == head).astype(jnp.bfloat16)   # [E, nH]
    hexp = jnp.asarray(hsum.T)                               # [nH, E]

    # torch Linear: y = x @ W.T ; fold 1/sqrt(head_dim) into the Q segment.
    wqkv = jnp.concatenate([wq.T * scale, wk.T, wv.T], axis=1)           # [E, 3E]
    bqkv = jnp.concatenate([bq * scale, bk, bv]).reshape(1, 3 * e)

    return {
        "wqkv": wqkv.astype(jnp.bfloat16),
        "bqkv": bqkv.astype(jnp.float32),
        "hsum": hsum,
        "hexp": hexp,
        "wo":   params["out_w"].T.astype(jnp.bfloat16),                  # [E, E]
        "bo":   params["out_b"].reshape(1, e).astype(jnp.float32),
        "lnw":  params["ln_w"].reshape(1, e).astype(jnp.float32),
        "lnb":  params["ln_b"].reshape(1, e).astype(jnp.float32),
        "fcw":  params["fc_w"].T.astype(jnp.bfloat16),                   # [E, L]
        "fcb":  params["fc_b"].reshape(1, -1).astype(jnp.float32),
    }


def bert_classifier_head(hidden, attention_mask, packed):
    """Per-call wrapper: cast activations, invoke the fused kernel on a
    parallel batch grid (weights stay resident via constant index_maps)."""
    b_sz, s_len, e_dim = hidden.shape
    label_num = packed["fcw"].shape[1]
    n_heads = packed["hsum"].shape[1]

    h = hidden.astype(jnp.bfloat16)
    mask = attention_mask.astype(jnp.float32).reshape(b_sz, 1, s_len)

    args = (h, mask,
            packed["wqkv"], packed["bqkv"],
            packed["hsum"], packed["hexp"],
            packed["wo"], packed["bo"], packed["lnw"], packed["lnb"],
            packed["fcw"], packed["fcb"])

    def resident(shape):
        # full-array block, same block index every grid step -> DMA'd once
        return pl.BlockSpec(shape, lambda b: tuple(0 for _ in shape))

    in_specs = [
        pl.BlockSpec((1, s_len, e_dim), lambda b: (b, 0, 0)),   # hidden
        pl.BlockSpec((1, 1, s_len), lambda b: (b, 0, 0)),       # mask
        resident((e_dim, 3 * e_dim)),    # wqkv
        resident((1, 3 * e_dim)),        # bqkv
        resident((e_dim, n_heads)),      # hsum
        resident((n_heads, e_dim)),      # hexp
        resident((e_dim, e_dim)),        # wo
        resident((1, e_dim)),            # bo
        resident((1, e_dim)),            # lnw
        resident((1, e_dim)),            # lnb
        resident((e_dim, label_num)),    # fcw
        resident((1, label_num)),        # fcb
    ]
    out_spec = pl.BlockSpec((1, 1, label_num), lambda b: (b, 0, 0))

    out = pl.pallas_call(
        classifier_head_kernel,
        out_shape=jax.ShapeDtypeStruct((b_sz, 1, label_num), jnp.float32),
        grid_spec=pltpu.PrefetchScalarGridSpec(
            num_scalar_prefetch=0,
            grid=(b_sz,),
            in_specs=in_specs,
            out_specs=out_spec),
        compiler_params=pltpu.CompilerParams(
            dimension_semantics=("parallel",)),
    )(*args)
    return out.reshape(b_sz, label_num)


# ---------------- pure-JAX reference (for a sanity check) -------------------
def reference_forward(hidden, attention_mask, params):
    b_sz, s_len, e_dim = hidden.shape
    wq, wk, wv = jnp.split(params["in_w"], 3, axis=0)
    bq, bk, bv = jnp.split(params["in_b"], 3, axis=0)
    q = hidden @ wq.T + bq
    k = hidden @ wk.T + bk
    v = hidden @ wv.T + bv

    def split_heads(t):
        return t.reshape(b_sz, s_len, NUM_HEADS, HEAD_DIM).transpose(0, 2, 1, 3)

    qh, kh, vh = split_heads(q), split_heads(k), split_heads(v)
    scale = 1.0 / math.sqrt(HEAD_DIM)
    scores = jnp.einsum("bhqd,bhkd->bhqk", qh * scale, kh)
    kpm = (attention_mask == 0)[:, None, None, :]
    scores = jnp.where(kpm, NEG_INF, scores)
    attn = jax.nn.softmax(scores, axis=-1)
    ctx = jnp.einsum("bhqk,bhkd->bhqd", attn, vh)
    ctx = ctx.transpose(0, 2, 1, 3).reshape(b_sz, s_len, e_dim)
    y = ctx @ params["out_w"].T + params["out_b"]
    cls = y[:, 0, :]
    mu = cls.mean(-1, keepdims=True)
    var = ((cls - mu) ** 2).mean(-1, keepdims=True)
    ln = (cls - mu) / jnp.sqrt(var + LN_EPS) * params["ln_w"] + params["ln_b"]
    g = jax.nn.gelu(ln, approximate=False)
    return g @ params["fc_w"].T + params["fc_b"]


def cross_entropy(logits, label):
    # nn.CrossEntropyLoss (mean reduction)
    logz = jax.nn.logsumexp(logits, axis=-1)
    picked = jnp.take_along_axis(logits, label[:, None], axis=-1)[:, 0]
    return jnp.mean(logz - picked)


if __name__ == "__main__":
    key = jax.random.PRNGKey(0)
    k_h, k1, k2, k3, k4, k5, k6, k7, k8 = jax.random.split(key, 9)

    # synthetic encoder output (stands in for BertModel(...).last_hidden_state)
    hidden = jax.random.normal(k_h, (B, S, E), jnp.float32)
    attention_mask = jnp.array([[1, 1, 1, 1, 1, 1, 1, 1],
                                [1, 1, 1, 1, 1, 0, 0, 0]], dtype=jnp.int32)
    label = jnp.array([1, 3], dtype=jnp.int32)

    params = {
        "in_w":  0.02 * jax.random.normal(k1, (3 * E, E), jnp.float32),
        "in_b":  0.02 * jax.random.normal(k2, (3 * E,), jnp.float32),
        "out_w": 0.02 * jax.random.normal(k3, (E, E), jnp.float32),
        "out_b": 0.02 * jax.random.normal(k4, (E,), jnp.float32),
        "ln_w":  jnp.ones((E,), jnp.float32) +
                 0.1 * jax.random.normal(k5, (E,), jnp.float32),
        "ln_b":  0.1 * jax.random.normal(k6, (E,), jnp.float32),
        "fc_w":  0.02 * jax.random.normal(k7, (LABEL_NUM, E), jnp.float32),
        "fc_b":  0.02 * jax.random.normal(k8, (LABEL_NUM,), jnp.float32),
    }

    # weight repacking happens ONCE here (load time), not per forward call
    packed = prepare_params(params)

    logits = bert_classifier_head(hidden, attention_mask, packed)
    logits = jax.block_until_ready(logits)

    ref = reference_forward(hidden, attention_mask, params)
    if not jnp.allclose(logits, ref, atol=5e-2, rtol=5e-2):
        raise AssertionError(
            f"kernel/reference mismatch: max abs diff = "
            f"{float(jnp.max(jnp.abs(logits - ref)))}")

    # label path: (loss, logits); loss computed in plain-JAX glue
    loss = jax.block_until_ready(cross_entropy(logits, label))
    assert logits.shape == (B, LABEL_NUM) and jnp.isfinite(loss)

    print("KERNEL_OK")
</pallas_src>

<mosaic_0001>
module attributes {stable_mosaic.version = 11 : i64} {
  func.func @classifier_head_kernel(%arg0: i32, %arg1: memref<1x8x768xbf16, #tpu.memory_space<vmem>>, %arg2: memref<1x1x8xf32, #tpu.memory_space<vmem>>, %arg3: memref<768x2304xbf16, #tpu.memory_space<vmem>>, %arg4: memref<1x2304xf32, #tpu.memory_space<vmem>>, %arg5: memref<768x8xbf16, #tpu.memory_space<vmem>>, %arg6: memref<8x768xbf16, #tpu.memory_space<vmem>>, %arg7: memref<768x768xbf16, #tpu.memory_space<vmem>>, %arg8: memref<1x768xf32, #tpu.memory_space<vmem>>, %arg9: memref<1x768xf32, #tpu.memory_space<vmem>>, %arg10: memref<1x768xf32, #tpu.memory_space<vmem>>, %arg11: memref<768x4xbf16, #tpu.memory_space<vmem>>, %arg12: memref<1x4xf32, #tpu.memory_space<vmem>>, %arg13: memref<1x1x4xf32, #tpu.memory_space<vmem>>) attributes {dimension_semantics = [#tpu.dimension_semantics<parallel>], iteration_bounds = array<i64: 2>, scalar_prefetch = 0 : i64, scratch_operands = 0 : i64, tpu.core_type = #tpu.core_type<tc>, window_params = [{transform_indices = @transform_0, window_bounds = array<i64: 1, 8, 768>}, {transform_indices = @transform_1, window_bounds = array<i64: 1, 1, 8>}, {pipeline_mode = #tpu.pipeline_mode<synchronous>, transform_indices = @transform_2, window_bounds = array<i64: 768, 2304>}, {pipeline_mode = #tpu.pipeline_mode<synchronous>, transform_indices = @transform_3, window_bounds = array<i64: 1, 2304>}, {pipeline_mode = #tpu.pipeline_mode<synchronous>, transform_indices = @transform_4, window_bounds = array<i64: 768, 8>}, {pipeline_mode = #tpu.pipeline_mode<synchronous>, transform_indices = @transform_5, window_bounds = array<i64: 8, 768>}, {pipeline_mode = #tpu.pipeline_mode<synchronous>, transform_indices = @transform_6, window_bounds = array<i64: 768, 768>}, {pipeline_mode = #tpu.pipeline_mode<synchronous>, transform_indices = @transform_7, window_bounds = array<i64: 1, 768>}, {pipeline_mode = #tpu.pipeline_mode<synchronous>, transform_indices = @transform_8, window_bounds = array<i64: 1, 768>}, {pipeline_mode = #tpu.pipeline_mode<synchronous>, transform_indices = @transform_9, window_bounds = array<i64: 1, 768>}, {pipeline_mode = #tpu.pipeline_mode<synchronous>, transform_indices = @transform_10, window_bounds = array<i64: 768, 4>}, {pipeline_mode = #tpu.pipeline_mode<synchronous>, transform_indices = @transform_11, window_bounds = array<i64: 1, 4>}, {transform_indices = @transform_12, window_bounds = array<i64: 1, 1, 4>}]} {
    %c0 = arith.constant 0 : index
    %c0_0 = arith.constant 0 : index
    %c0_1 = arith.constant 0 : index
    %0 = vector.load %arg1[%c0, %c0_0, %c0_1] : memref<1x8x768xbf16, #tpu.memory_space<vmem>>, vector<1x8x768xbf16>
    %1 = vector.shape_cast %0 : vector<1x8x768xbf16> to vector<8x768xbf16>
    %c0_2 = arith.constant 0 : index
    %c0_3 = arith.constant 0 : index
    %2 = vector.load %arg3[%c0_2, %c0_3] : memref<768x2304xbf16, #tpu.memory_space<vmem>>, vector<768x2304xbf16>
    %cst = arith.constant dense<0.000000e+00> : vector<8x2304xf32>
    %3 = tpu.matmul %1, %2, %cst {dimension_numbers = #tpu.dot_dimension_numbers<[1], [0], [0], [1], [0, 0, 1, 1], [], []>} : vector<8x768xbf16>, vector<768x2304xbf16>, vector<8x2304xf32> -> vector<8x2304xf32>
    %c0_4 = arith.constant 0 : index
    %c0_5 = arith.constant 0 : index
    %4 = vector.load %arg4[%c0_4, %c0_5] : memref<1x2304xf32, #tpu.memory_space<vmem>>, vector<1x2304xf32>
    %5 = vector.broadcast %4 : vector<1x2304xf32> to vector<8x2304xf32>
    %6 = arith.addf %3, %5 : vector<8x2304xf32>
    %7 = vector.extract_strided_slice %6 {offsets = [0, 0], sizes = [1, 768], strides = [1, 1]} : vector<8x2304xf32> to vector<1x768xf32>
    %8 = vector.extract_strided_slice %6 {offsets = [0, 768], sizes = [8, 768], strides = [1, 1]} : vector<8x2304xf32> to vector<8x768xf32>
    %9 = vector.extract_strided_slice %6 {offsets = [0, 1536], sizes = [8, 768], strides = [1, 1]} : vector<8x2304xf32> to vector<8x768xf32>
    %10 = vector.broadcast %7 : vector<1x768xf32> to vector<8x768xf32>
    %11 = arith.mulf %10, %8 : vector<8x768xf32>
    %12 = arith.truncf %11 : vector<8x768xf32> to vector<8x768xbf16>
    %c0_6 = arith.constant 0 : index
    %c0_7 = arith.constant 0 : index
    %13 = vector.load %arg5[%c0_6, %c0_7] : memref<768x8xbf16, #tpu.memory_space<vmem>>, vector<768x8xbf16>
    %cst_8 = arith.constant dense<0.000000e+00> : vector<8x8xf32>
    %14 = tpu.matmul %12, %13, %cst_8 {dimension_numbers = #tpu.dot_dimension_numbers<[1], [0], [0], [1], [0, 0, 1, 1], [], []>} : vector<8x768xbf16>, vector<768x8xbf16>, vector<8x8xf32> -> vector<8x8xf32>
    %c0_9 = arith.constant 0 : index
    %c0_10 = arith.constant 0 : index
    %c0_11 = arith.constant 0 : index
    %15 = vector.load %arg2[%c0_9, %c0_10, %c0_11] : memref<1x1x8xf32, #tpu.memory_space<vmem>>, vector<1x1x8xf32>
    %16 = vector.shape_cast %15 : vector<1x1x8xf32> to vector<8x1xf32>
    %cst_12 = arith.constant 5.000000e-01 : f32
    %17 = vector.broadcast %cst_12 : f32 to vector<8x1xf32>
    %18 = arith.cmpf ogt, %16, %17 : vector<8x1xf32>
    %cst_13 = arith.constant -1.000000e+30 : f32
    %19 = vector.shape_cast %18 : vector<8x1xi1> to vector<8x1xi1>
    %20 = vector.broadcast %19 : vector<8x1xi1> to vector<8x8xi1>
    %21 = vector.broadcast %cst_13 : f32 to vector<8x8xf32>
    %22 = arith.select %20, %14, %21 : vector<8x8xi1>, vector<8x8xf32>
    %cst_14 = arith.constant dense<0xFF800000> : vector<8xf32>
    %23 = vector.multi_reduction <maximumf>, %22, %cst_14 [0] : vector<8x8xf32> to vector<8xf32>
    %24 = vector.shape_cast %23 : vector<8xf32> to vector<1x8xf32>
    %25 = vector.broadcast %24 : vector<1x8xf32> to vector<8x8xf32>
    %26 = arith.subf %22, %25 : vector<8x8xf32>
    %27 = math.exp %26 : vector<8x8xf32>
    %cst_15 = arith.constant dense<0.000000e+00> : vector<8xf32>
    %28 = vector.multi_reduction <add>, %27, %cst_15 [0] : vector<8x8xf32> to vector<8xf32>
    %29 = vector.shape_cast %28 : vector<8xf32> to vector<1x8xf32>
    %30 = tpu.reciprocal %29 {approx = true} : vector<1x8xf32> -> vector<1x8xf32>
    %31 = vector.broadcast %30 : vector<1x8xf32> to vector<8x8xf32>
    %32 = arith.mulf %27, %31 : vector<8x8xf32>
    %33 = arith.truncf %32 : vector<8x8xf32> to vector<8x8xbf16>
    %c0_16 = arith.constant 0 : index
    %c0_17 = arith.constant 0 : index
    %34 = vector.load %arg6[%c0_16, %c0_17] : memref<8x768xbf16, #tpu.memory_space<vmem>>, vector<8x768xbf16>
    %cst_18 = arith.constant dense<0.000000e+00> : vector<8x768xf32>
    %35 = tpu.matmul %33, %34, %cst_18 {dimension_numbers = #tpu.dot_dimension_numbers<[1], [0], [0], [1], [0, 0, 1, 1], [], []>} : vector<8x8xbf16>, vector<8x768xbf16>, vector<8x768xf32> -> vector<8x768xf32>
    %36 = arith.mulf %35, %9 : vector<8x768xf32>
    %cst_19 = arith.constant dense<0.000000e+00> : vector<768xf32>
    %37 = vector.multi_reduction <add>, %36, %cst_19 [0] : vector<8x768xf32> to vector<768xf32>
    %38 = vector.shape_cast %37 : vector<768xf32> to vector<1x768xf32>
    %39 = arith.truncf %38 : vector<1x768xf32> to vector<1x768xbf16>
    %c0_20 = arith.constant 0 : index
    %c0_21 = arith.constant 0 : index
    %40 = vector.load %arg7[%c0_20, %c0_21] : memref<768x768xbf16, #tpu.memory_space<vmem>>, vector<768x768xbf16>
    %cst_22 = arith.constant dense<0.000000e+00> : vector<1x768xf32>
    %41 = tpu.matmul %39, %40, %cst_22 {dimension_numbers = #tpu.dot_dimension_numbers<[1], [0], [0], [1], [0, 0, 1, 1], [], []>} : vector<1x768xbf16>, vector<768x768xbf16>, vector<1x768xf32> -> vector<1x768xf32>
    %c0_23 = arith.constant 0 : index
    %c0_24 = arith.constant 0 : index
    %42 = vector.load %arg8[%c0_23, %c0_24] : memref<1x768xf32, #tpu.memory_space<vmem>>, vector<1x768xf32>
    %43 = arith.addf %41, %42 : vector<1x768xf32>
    %cst_25 = arith.constant dense<0.000000e+00> : vector<1xf32>
    %44 = vector.multi_reduction <add>, %43, %cst_25 [1] : vector<1x768xf32> to vector<1xf32>
    %45 = vector.shape_cast %44 : vector<1xf32> to vector<1x1xf32>
    %cst_26 = arith.constant 7.680000e+02 : f32
    %46 = vector.broadcast %cst_26 : f32 to vector<1x1xf32>
    %47 = arith.divf %45, %46 : vector<1x1xf32>
    %48 = vector.broadcast %47 : vector<1x1xf32> to vector<1x768xf32>
    %49 = arith.subf %43, %48 : vector<1x768xf32>
    %50 = arith.mulf %49, %49 : vector<1x768xf32>
    %cst_27 = arith.constant dense<0.000000e+00> : vector<1xf32>
    %51 = vector.multi_reduction <add>, %50, %cst_27 [1] : vector<1x768xf32> to vector<1xf32>
    %52 = vector.shape_cast %51 : vector<1xf32> to vector<1x1xf32>
    %cst_28 = arith.constant 7.680000e+02 : f32
    %53 = vector.broadcast %cst_28 : f32 to vector<1x1xf32>
    %54 = arith.divf %52, %53 : vector<1x1xf32>
    %55 = vector.broadcast %47 : vector<1x1xf32> to vector<1x768xf32>
    %56 = arith.subf %43, %55 : vector<1x768xf32>
    %cst_29 = arith.constant 9.99999974E-6 : f32
    %57 = vector.broadcast %cst_29 : f32 to vector<1x1xf32>
    %58 = arith.addf %54, %57 : vector<1x1xf32>
    %59 = math.rsqrt %58 : vector<1x1xf32>
    %60 = vector.broadcast %59 : vector<1x1xf32> to vector<1x768xf32>
    %61 = arith.mulf %56, %60 : vector<1x768xf32>
    %c0_30 = arith.constant 0 : index
    %c0_31 = arith.constant 0 : index
    %62 = vector.load %arg9[%c0_30, %c0_31] : memref<1x768xf32, #tpu.memory_space<vmem>>, vector<1x768xf32>
    %63 = arith.mulf %61, %62 : vector<1x768xf32>
    %c0_32 = arith.constant 0 : index
    %c0_33 = arith.constant 0 : index
    %64 = vector.load %arg10[%c0_32, %c0_33] : memref<1x768xf32, #tpu.memory_space<vmem>>, vector<1x768xf32>
    %65 = arith.addf %63, %64 : vector<1x768xf32>
    %cst_34 = arith.constant 5.000000e-01 : f32
    %66 = vector.broadcast %cst_34 : f32 to vector<1x768xf32>
    %67 = arith.mulf %66, %65 : vector<1x768xf32>
    %cst_35 = arith.constant 0.707106769 : f32
    %68 = vector.broadcast %cst_35 : f32 to vector<1x768xf32>
    %69 = arith.mulf %65, %68 : vector<1x768xf32>
    %70 = math.absf %69 : vector<1x768xf32>
    %cst_36 = arith.constant 0.327591091 : f32
    %71 = vector.broadcast %cst_36 : f32 to vector<1x768xf32>
    %72 = arith.mulf %71, %70 : vector<1x768xf32>
    %cst_37 = arith.constant 1.000000e+00 : f32
    %73 = vector.broadcast %cst_37 : f32 to vector<1x768xf32>
    %74 = arith.addf %73, %72 : vector<1x768xf32>
    %cst_38 = arith.constant 1.000000e+00 : f32
    %75 = vector.broadcast %cst_38 : f32 to vector<1x768xf32>
    %76 = arith.divf %75, %74 : vector<1x768xf32>
    %cst_39 = arith.constant 1.06140542 : f32
    %77 = vector.broadcast %cst_39 : f32 to vector<1x768xf32>
    %78 = arith.mulf %77, %76 : vector<1x768xf32>
    %cst_40 = arith.constant -1.45315206 : f32
    %79 = vector.broadcast %cst_40 : f32 to vector<1x768xf32>
    %80 = arith.addf %78, %79 : vector<1x768xf32>
    %81 = arith.mulf %80, %76 : vector<1x768xf32>
    %cst_41 = arith.constant 1.42141378 : f32
    %82 = vector.broadcast %cst_41 : f32 to vector<1x768xf32>
    %83 = arith.addf %81, %82 : vector<1x768xf32>
    %84 = arith.mulf %83, %76 : vector<1x768xf32>
    %cst_42 = arith.constant -0.284496725 : f32
    %85 = vector.broadcast %cst_42 : f32 to vector<1x768xf32>
    %86 = arith.addf %84, %85 : vector<1x768xf32>
    %87 = arith.mulf %86, %76 : vector<1x768xf32>
    %cst_43 = arith.constant 0.254829586 : f32
    %88 = vector.broadcast %cst_43 : f32 to vector<1x768xf32>
    %89 = arith.addf %87, %88 : vector<1x768xf32>
    %90 = arith.mulf %89, %76 : vector<1x768xf32>
    %cst_44 = arith.constant 0.000000e+00 : f32
    %91 = vector.broadcast %cst_44 : f32 to vector<1x768xf32>
    %92 = arith.subf %91, %70 : vector<1x768xf32>
    %93 = arith.mulf %92, %70 : vector<1x768xf32>
    %94 = math.exp %93 : vector<1x768xf32>
    %95 = arith.mulf %90, %94 : vector<1x768xf32>
    %cst_45 = arith.constant 1.000000e+00 : f32
    %96 = vector.broadcast %cst_45 : f32 to vector<1x768xf32>
    %97 = arith.subf %96, %95 : vector<1x768xf32>
    %cst_46 = arith.constant 0.000000e+00 : f32
    %98 = vector.broadcast %cst_46 : f32 to vector<1x768xf32>
    %99 = arith.cmpf olt, %69, %98 : vector<1x768xf32>
    %cst_47 = arith.constant 0.000000e+00 : f32
    %100 = vector.broadcast %cst_47 : f32 to vector<1x768xf32>
    %101 = arith.subf %100, %97 : vector<1x768xf32>
    %102 = arith.select %99, %101, %97 : vector<1x768xi1>, vector<1x768xf32>
    %cst_48 = arith.constant 1.000000e+00 : f32
    %103 = vector.broadcast %cst_48 : f32 to vector<1x768xf32>
    %104 = arith.addf %103, %102 : vector<1x768xf32>
    %105 = arith.mulf %67, %104 : vector<1x768xf32>
    %106 = arith.truncf %105 : vector<1x768xf32> to vector<1x768xbf16>
    %c0_49 = arith.constant 0 : index
    %c0_50 = arith.constant 0 : index
    %107 = vector.load %arg11[%c0_49, %c0_50] : memref<768x4xbf16, #tpu.memory_space<vmem>>, vector<768x4xbf16>
    %cst_51 = arith.constant dense<0.000000e+00> : vector<1x4xf32>
    %108 = tpu.matmul %106, %107, %cst_51 {dimension_numbers = #tpu.dot_dimension_numbers<[1], [0], [0], [1], [0, 0, 1, 1], [], []>} : vector<1x768xbf16>, vector<768x4xbf16>, vector<1x4xf32> -> vector<1x4xf32>
    %c0_52 = arith.constant 0 : index
    %c0_53 = arith.constant 0 : index
    %109 = vector.load %arg12[%c0_52, %c0_53] : memref<1x4xf32, #tpu.memory_space<vmem>>, vector<1x4xf32>
    %110 = arith.addf %108, %109 : vector<1x4xf32>
    %111 = vector.shape_cast %110 : vector<1x4xf32> to vector<1x1x4xf32>
    %c0_54 = arith.constant 0 : index
    %c0_55 = arith.constant 0 : index
    %c0_56 = arith.constant 0 : index
    %112 = vector.load %arg13[%c0_54, %c0_55, %c0_56] : memref<1x1x4xf32, #tpu.memory_space<vmem>>, vector<1x1x4xf32>
    tpu.vector_store %arg13[%c0_54, %c0_55, %c0_56], %111 {strides = array<i32>} : memref<1x1x4xf32, #tpu.memory_space<vmem>>, vector<1x1x4xf32>,
    return
  }
  func.func @transform_0(%arg0: i32) -> (i32, i32, i32) {
    %c0_i32 = arith.constant 0 : i32
    %c0_i32_0 = arith.constant 0 : i32
    %c0_i32_1 = arith.constant 0 : i32
    return %arg0, %c0_i32, %c0_i32_0 : i32, i32, i32
  }
  func.func @transform_1(%arg0: i32) -> (i32, i32, i32) {
    %c0_i32 = arith.constant 0 : i32
    %c0_i32_0 = arith.constant 0 : i32
    %c0_i32_1 = arith.constant 0 : i32
    return %arg0, %c0_i32, %c0_i32_0 : i32, i32, i32
  }
  func.func @transform_2(%arg0: i32) -> (i32, i32) {
    %c0_i32 = arith.constant 0 : i32
    %c0_i32_0 = arith.constant 0 : i32
    %c0_i32_1 = arith.constant 0 : i32
    return %c0_i32, %c0_i32_0 : i32, i32
  }
  func.func @transform_3(%arg0: i32) -> (i32, i32) {
    %c0_i32 = arith.constant 0 : i32
    %c0_i32_0 = arith.constant 0 : i32
    %c0_i32_1 = arith.constant 0 : i32
    return %c0_i32, %c0_i32_0 : i32, i32
  }
  func.func @transform_4(%arg0: i32) -> (i32, i32) {
    %c0_i32 = arith.constant 0 : i32
    %c0_i32_0 = arith.constant 0 : i32
    %c0_i32_1 = arith.constant 0 : i32
    return %c0_i32, %c0_i32_0 : i32, i32
  }
  func.func @transform_5(%arg0: i32) -> (i32, i32) {
    %c0_i32 = arith.constant 0 : i32
    %c0_i32_0 = arith.constant 0 : i32
    %c0_i32_1 = arith.constant 0 : i32
    return %c0_i32, %c0_i32_0 : i32, i32
  }
  func.func @transform_6(%arg0: i32) -> (i32, i32) {
    %c0_i32 = arith.constant 0 : i32
    %c0_i32_0 = arith.constant 0 : i32
    %c0_i32_1 = arith.constant 0 : i32
    return %c0_i32, %c0_i32_0 : i32, i32
  }
  func.func @transform_7(%arg0: i32) -> (i32, i32) {
    %c0_i32 = arith.constant 0 : i32
    %c0_i32_0 = arith.constant 0 : i32
    %c0_i32_1 = arith.constant 0 : i32
    return %c0_i32, %c0_i32_0 : i32, i32
  }
  func.func @transform_8(%arg0: i32) -> (i32, i32) {
    %c0_i32 = arith.constant 0 : i32
    %c0_i32_0 = arith.constant 0 : i32
    %c0_i32_1 = arith.constant 0 : i32
    return %c0_i32, %c0_i32_0 : i32, i32
  }
  func.func @transform_9(%arg0: i32) -> (i32, i32) {
    %c0_i32 = arith.constant 0 : i32
    %c0_i32_0 = arith.constant 0 : i32
    %c0_i32_1 = arith.constant 0 : i32
    return %c0_i32, %c0_i32_0 : i32, i32
  }
  func.func @transform_10(%arg0: i32) -> (i32, i32) {
    %c0_i32 = arith.constant 0 : i32
    %c0_i32_0 = arith.constant 0 : i32
    %c0_i32_1 = arith.constant 0 : i32
    return %c0_i32, %c0_i32_0 : i32, i32
  }
  func.func @transform_11(%arg0: i32) -> (i32, i32) {
    %c0_i32 = arith.constant 0 : i32
    %c0_i32_0 = arith.constant 0 : i32
    %c0_i32_1 = arith.constant 0 : i32
    return %c0_i32, %c0_i32_0 : i32, i32
  }
  func.func @transform_12(%arg0: i32) -> (i32, i32, i32) {
    %c0_i32 = arith.constant 0 : i32
    %c0_i32_0 = arith.constant 0 : i32
    %c0_i32_1 = arith.constant 0 : i32
    return %arg0, %c0_i32, %c0_i32_0 : i32, i32, i32
  }
}

</mosaic_0001>

<bundles_post_ra>
// kernel: tpu_custom_call.1
= control target key start
LH: loop header
LB: loop body
LE: loop exit
PB: predicated region body
PF: predicated region fallthrough
CT: control target
= control target key end

     0   :  { %s15737_s0 = inlined_call_operand.hbm [shape: bf16[2,8,768], index: 0, kind: input, shape index: {}]   ;;  %s15738_s1 = inlined_call_operand.hbm [shape: f32[2,1,8], index: 1, kind: input, shape index: {}]   ;;  %s15739_s2 = inlined_call_operand.hbm [shape: bf16[768,2304], index: 2, kind: input, shape index: {}]   ;;  %s15740_s3 = inlined_call_operand.hbm [shape: f32[1,2304], index: 3, kind: input, shape index: {}]   ;;  %s15741_s4 = inlined_call_operand.vmem [shape: bf16[768,8], index: 4, kind: input, shape index: {}]   ;;  %s15742_s5 = inlined_call_operand.hbm [shape: bf16[8,768], index: 5, kind: input, shape index: {}]   ;;  %s15743_s6 = inlined_call_operand.hbm [shape: bf16[768,768], index: 6, kind: input, shape index: {}]   ;;  %s15744_s7 = inlined_call_operand.hbm [shape: f32[1,768], index: 7, kind: input, shape index: {}]   ;;  %s15745_s8 = inlined_call_operand.hbm [shape: f32[1,768], index: 8, kind: input, shape index: {}]   ;;  %s15746_s9 = inlined_call_operand.hbm [shape: f32[1,768], index: 9, kind: input, shape index: {}]   ;;  %s15747_s10 = inlined_call_operand.vmem [shape: bf16[768,4], index: 10, kind: input, shape index: {}]   ;;  %s15748_s11 = inlined_call_operand.hbm [shape: f32[1,4], index: 11, kind: input, shape index: {}]   ;;  %s15749_s12 = inlined_call_operand.hbm [shape: f32[2,1,4], index: 12, kind: output, shape index: {}]  }
   0x1   :  { %15754 = sst [smem:[#allocation28_spill]] %s15737_s0 }
   0x2   :  { %15755 = sst [smem:[#allocation29_spill]] %s15739_s2 }
   0x3   :  { %15756 = sst [smem:[#allocation30_spill]] %s15740_s3 }
   0x4   :  { %15757 = sst [smem:[#allocation31_spill]] %s15742_s5 }
   0x5   :  { %15758 = sst [smem:[#allocation32_spill]] %s15743_s6 }
   0x6   :  { %15759 = sst [smem:[#allocation33_spill]] %s15744_s7 }
   0x7   :  { %15760 = sst [smem:[#allocation34_spill]] %s15745_s8 }
   0x8   :  { %15761 = sst [smem:[#allocation35_spill]] %s15746_s9 }
   0x9   :  { %15762 = sst [smem:[#allocation36_spill]] %s15748_s11 }
   0xa   :  { %17 = vsyncpa [#allocation3], 0 }
   0xb   :  { %19 = vsyncpa [#allocation3 + $0x1], 0 }
   0xc   :  { %20 = vsyncpa [#allocation6], 0 }
   0xd   :  { %22 = vsyncpa [#allocation6 + $0x1], 0 }
   0xe   :  { %23 = vsyncpa [#allocation9], 0 }
   0xf   :  { %24 = vsyncpa [#allocation12], 0 }
  0x10   :  { %25 = vsyncpa [#allocation15], 0 }
  0x11   :  { %26 = vsyncpa [#allocation18], 0 }
  0x12   :  { %27 = vsyncpa [#allocation4], 0 }
  0x13   :  { %29 = vsyncpa [#allocation4 + $0x1], 0  ;;  %s14736_s21 = smov 0   ;;  %s14738_s22 = smov 0  }
  0x14   :  { %s14740_s23 = smov 0   ;;  %s14742_s24 = smov 0  }
  0x15 LB: > { %s14655_s25 = smov [#allocation7]   ;;  %s14757_s27 = sadd.s32 4294967295, %s14653_s24   ;;  %s14653_s24 = sphi %s14742_s24, %s15799_s24   ;;  %s14649_s23 = sphi %s14740_s23, %s15798_s23   ;;  %s14645_s22 = sphi %s14738_s22, %s15797_s22   ;;  %s14641_s21 = sphi %s14736_s21, %s15796_s21  }
  0x16   : > { %s340_s26 = sshll.u32 %s14655_s25, 4  ;;  %p10869_p0 = scmp.ge.s32.totalorder %s14653_s24, 1  ;;  %s341_s26 = int_to_ptr.vmem [resolvable:$true] %s340_s26 }
  0x17   : > { %p15750_p1 = scmp.eq.s32.totalorder %s14757_s27, 0  ;;  %p328_p2 = scmp.lt.s32.totalorder %s14653_s24, 3 }
  0x18   : > { %s14656_s29 = smov [#allocation8]   ;;  %s14657_s14 = smov [#allocation11]  }
  0x19   : > { %p14762_p3 = pnand %p10869_p0, %p328_p2  ;;  %s354_s30 = sshll.u32 %s14656_s29, 4  ;;  %s355_s30 = int_to_ptr.vmem [resolvable:$true] %s354_s30 }
  0x1a   : > { %s378_s15 = sshll.u32 %s14657_s14, 4  ;;  %s14312_s17 = scalar_lea.vmem %s341_s26, 110592  ;;  %s14775_s15 = int_to_ptr.vmem [resolvable:$true] %s378_s15 }
  0x1b   : > { %s15763_s28 = scalar_select %p14762_p3, 1, 0 }
  0x1c   : > { %p12333_p5 = pneg %p14762_p3  ;;  %p14313_p8 = scmp.ne.s32.totalorder %s341_s26, %s14312_s17 }
  0x1d   : > { %p14320_p11 = scmp.lt.s32.totalorder %s341_s26, %s341_s26  ;;  %p14321_p12 = scmp.lt.s32.totalorder %s14312_s17, %s14312_s17 }
  0x1e   : > { %p14771_p6 = pnand %p12333_p5, %p15750_p1 }
  0x1f   : > { %p14322_p13 = por %p14321_p12, %p14320_p11 }
  0x20   : > { %p14779_p7 = pneg %p14771_p6 }
  0x22   : > { %p14315_p9 = pnand %p14313_p8, %p14779_p7 }
  0x24   : > { %p14316_p10 = pneg %p14315_p9 }
  0x26   : > { %p14323_p0 = pnand %p14322_p13, %p14316_p10 }
  0x28   : > { %14326 = shalt.err (!%p14323_p0)
}
  0x29   : > { %s14658_s18 = smov 1152   ;;  %s14659_s19 = smov 72  }
  0x2a   : > { %s15766_s2 = sld [smem:[#allocation29_spill]]  ;;  %s14338_s29 = scalar_lea.vmem %s355_s30, 288 }
  0x2b   : > { %p14339_p2 = scmp.ne.s32.totalorder %s355_s30, %s14338_s29  ;;  %p14346_p9 = scmp.lt.s32.totalorder %s355_s30, %s355_s30 }
  0x2c   : > { %p14347_p4 = scmp.lt.s32.totalorder %s14338_s29, %s14338_s29 }
  0x2d   : > { %p14341_p5 = pnand %p14339_p2, %p14779_p7 }
  0x2e   : > { %p14348_p1 = por %p14347_p4, %p14346_p9 }
  0x2f   : > { %p14342_p8 = pneg %p14341_p5 }
  0x30   : > { %12336 = dma.hbm_to_vmem [thread:$0]  (!%p14771_p6), %s15766_s2, 110592, %s341_s26, [#allocation6], %s14658_s18, %s14658_s18, %s14659_s19  }
  0x31   : > { %p14349_p11 = pnand %p14348_p1, %p14342_p8 }
  0x33   : > { %14352 = shalt.err (!%p14349_p11)
}
  0x34   : > { %s15767_s3 = sld [smem:[#allocation30_spill]]  ;;  %s14364_s26 = scalar_lea.vmem %s14775_s15, 36864 }
  0x35   : > { %p14365_p10 = scmp.ne.s32.totalorder %s14775_s15, %s14364_s26  ;;  %p14372_p0 = scmp.lt.s32.totalorder %s14775_s15, %s14775_s15 }
  0x36   : > { %p14373_p4 = scmp.lt.s32.totalorder %s14364_s26, %s14364_s26 }
  0x37   : > { %p14367_p12 = pnand %p14365_p10, %p14779_p7 }
  0x38   : > { %p14374_p1 = por %p14373_p4, %p14372_p0 }
  0x39   : > { %p14368_p13 = pneg %p14367_p12 }
  0x3a   : > { %12339 = dma.hbm_to_vmem [thread:$0]  (!%p14771_p6), %s15767_s3, 288, %s355_s30, [#allocation9]  }
  0x3b   : > { %p14375_p2 = pnand %p14374_p1, %p14368_p13 }
  0x3d   : > { %14378 = shalt.err (!%p14375_p2)
}
  0x3e   : > { %s14660_s18 = smov 384   ;;  %s14661_s19 = smov 24  }
  0x3f   : > { %s15768_s6 = sld [smem:[#allocation32_spill]]  ;;  %s14662_s30 = smov [#allocation14]  }
  0x40   : > { %s403_s29 = sshll.u32 %s14662_s30, 4  ;;  %s14663_s14 = smov [#allocation10]   ;;  %s404_s29 = int_to_ptr.vmem [resolvable:$true] %s403_s29 }
  0x41   : > { %s368_s17 = sshll.u32 %s14663_s14, 4  ;;  %s14390_s2 = scalar_lea.vmem %s404_s29, 96  ;;  %s369_s17 = int_to_ptr.vmem [resolvable:$true] %s368_s17 }
  0x42   : > { %p14391_p5 = scmp.ne.s32.totalorder %s404_s29, %s14390_s2  ;;  %p14398_p11 = scmp.lt.s32.totalorder %s404_s29, %s404_s29 }
  0x43   : > { %p14399_p10 = scmp.lt.s32.totalorder %s14390_s2, %s14390_s2 }
  0x44   : > { %p14393_p8 = pnand %p14391_p5, %p14779_p7 }
  0x45   : > { %12345 = dma.hbm_to_vmem [thread:$0]  (!%p14771_p6), %s15768_s6, 36864, %s14775_s15, [#allocation12], %s14660_s18, %s14660_s18, %s14661_s19  }
  0x46   : > { %p14394_p9 = pneg %p14393_p8  ;;  %p14400_p12 = por %p14399_p10, %p14398_p11 }
  0x48   : > { %p14401_p13 = pnand %p14400_p12, %p14394_p9 }
  0x4a   : > { %14404 = shalt.err (!%p14401_p13)
}
  0x4b   : > { %s15769_s8 = sld [smem:[#allocation34_spill]]  ;;  %s14416_s15 = scalar_lea.vmem %s369_s17, 384 }
  0x4c   : > { %p14417_p0 = scmp.ne.s32.totalorder %s369_s17, %s14416_s15  ;;  %p14424_p2 = scmp.lt.s32.totalorder %s369_s17, %s369_s17 }
  0x4d   : > { %p14425_p5 = scmp.lt.s32.totalorder %s14416_s15, %s14416_s15 }
  0x4e   : > { %p14419_p4 = pnand %p14417_p0, %p14779_p7 }
  0x4f   : > { %p14426_p8 = por %p14425_p5, %p14424_p2 }
  0x50   : > { %p14420_p1 = pneg %p14419_p4 }
  0x51   : > { %12351 = dma.hbm_to_vmem [thread:$0]  (!%p14771_p6), %s15769_s8, 96, %s404_s29, [#allocation15]  }
  0x52   : > { %p14427_p3 = pnand %p14426_p8, %p14420_p1 }
  0x54   : > { %14430 = shalt.err (!%p14427_p3)
}
  0x55   : > { %s15770_s5 = sld [smem:[#allocation31_spill]]  ;;  %s14664_s19 = smov [#allocation13]  }
  0x56   : > { %s392_s25 = sshll.u32 %s14664_s19, 4  ;;  %s14665_s30 = smov [#allocation16]   ;;  %s393_s25 = int_to_ptr.vmem [resolvable:$true] %s392_s25 }
  0x57   : > { %s414_s29 = sshll.u32 %s14665_s30, 4  ;;  %s14442_s14 = scalar_lea.vmem %s393_s25, 96  ;;  %s415_s29 = int_to_ptr.vmem [resolvable:$true] %s414_s29 }
  0x58   : > { %p14443_p9 = scmp.ne.s32.totalorder %s393_s25, %s14442_s14  ;;  %p14450_p12 = scmp.lt.s32.totalorder %s393_s25, %s393_s25 }
  0x59   : > { %p14451_p13 = scmp.lt.s32.totalorder %s14442_s14, %s14442_s14 }
  0x5a   : > { %p14445_p11 = pnand %p14443_p9, %p14779_p7 }
  0x5b   : > { %12342 = dma.hbm_to_vmem [thread:$0]  (!%p14771_p6), %s15770_s5, 384, %s369_s17, [#allocation9]  }
  0x5c   : > { %p14446_p10 = pneg %p14445_p11  ;;  %p14452_p3 = por %p14451_p13, %p14450_p12 }
  0x5e   : > { %p14453_p0 = pnand %p14452_p3, %p14446_p10 }
  0x60   : > { %14456 = shalt.err (!%p14453_p0)
}
  0x61   : > { %s15771_s7 = sld [smem:[#allocation33_spill]]  ;;  %s14468_s17 = scalar_lea.vmem %s415_s29, 96 }
  0x62   : > { %p14469_p4 = scmp.ne.s32.totalorder %s415_s29, %s14468_s17  ;;  %p14476_p5 = scmp.lt.s32.totalorder %s415_s29, %s415_s29 }
  0x63   : > { %p14477_p8 = scmp.lt.s32.totalorder %s14468_s17, %s14468_s17 }
  0x64   : > { %p14471_p1 = pnand %p14469_p4, %p14779_p7 }
  0x65   : > { %p14478_p9 = por %p14477_p8, %p14476_p5 }
  0x66   : > { %p14472_p2 = pneg %p14471_p1 }
  0x67   : > { %12348 = dma.hbm_to_vmem [thread:$0]  (!%p14771_p6), %s15771_s7, 96, %s393_s25, [#allocation12]  }
  0x68   : > { %p14479_p11 = pnand %p14478_p9, %p14472_p2 }
  0x6a   : > { %14482 = shalt.err (!%p14479_p11)
}
  0x6b   : > { %s15772_s9 = sld [smem:[#allocation35_spill]]  ;;  %s14666_s18 = smov [#allocation17]  }
  0x6c   : > { %s428_s19 = sshll.u32 %s14666_s18, 4  ;;  %s429_s19 = int_to_ptr.vmem [resolvable:$true] %s428_s19 }
  0x6d   : > { %s14494_s25 = scalar_lea.vmem %s429_s19, 16  ;;  %s14501_s30 = scalar_lea.vmem %s429_s19, 32 }
  0x6e   : > { %p14495_p10 = scmp.ne.s32.totalorder %s429_s19, %s14494_s25  ;;  %p14502_p3 = scmp.lt.s32.totalorder %s429_s19, %s429_s19 }
  0x6f   : > { %p14503_p0 = scmp.lt.s32.totalorder %s14501_s30, %s14494_s25 }
  0x70   : > { %p14497_p12 = pnand %p14495_p10, %p14779_p7 }
  0x71   : > { %12354 = dma.hbm_to_vmem [thread:$0]  (!%p14771_p6), %s15772_s9, 96, %s415_s29, [#allocation15]  }
  0x72   : > { %p14498_p13 = pneg %p14497_p12  ;;  %p14504_p4 = por %p14503_p0, %p14502_p3 }
  0x74   : > { %p14505_p1 = pnand %p14504_p4, %p14498_p13 }
  0x76   : > { %14508 = shalt.err (!%p14505_p1)
}
  0x77   : > { %s15773_s11 = sld [smem:[#allocation36_spill]]  ;;  %s10868_s16 = sadd.s32 4294967294, %s14653_s24  }
  0x78   : > { %s14846_s13 = sadd.s32 1, %s14653_s24   ;;  %s42_s20 = sadd.s32 1, %s14649_s23 }
  0x79   : > { %s39_s29 = ssub.s32 %s14653_s24, %s14846_s13  ;;  %p49_p2 = scmp.ne.s32.totalorder %s14649_s23, %s14645_s22 }
  0x7a   : > { %p40_p7 = scmp.eq.s32.totalorder %s39_s29, 0  ;;  %p50_p5 = scmp.eq.s32.totalorder %s14653_s24, 0 }
  0x7b   : > { %p55_p8 = scmp.ne.s32.totalorder %s14645_s22, %s14641_s21  ;;  %p15774_p11 = scmp.eq.s32.totalorder %s14757_s27, 0 }
  0x7c   : > { %s14857_s17 = scalar_select %p40_p7, %s14649_s23, %s42_s20  }
  0x7d   : > { %12357 = dma.hbm_to_vmem [thread:$0]  (!%p14771_p6), %s15773_s11, 16, %s429_s19, [#allocation18]  }
  0x7e   : > { %p51_p9 = por %p50_p5, %p49_p2  ;;  %p14861_p10 = por %p15774_p11, %p55_p8 }
  0x7f   : > { %p315_p6 = scmp.eq.s32.totalorder %s14757_s27, 1  ;;  %p321_p12 = scmp.eq.s32.totalorder %s10868_s16, 1 }
  0x80   : > { %s15775_s15 = scalar_select %p14861_p10, 1, 0 }
  0x81   : > { %p12377_p13 = scmp.lt.s32.totalorder %s14653_s24, 2  ;;  %s14868_s2 = sand.u32 1, %s14649_s23  }
  0x82   : > { %p14870_p3 = por %p315_p6, %p49_p2  ;;  %p14874_p0 = por %p321_p12, %p55_p8 }
  0x83   : > { %s12292_s25 = smul.u32 24, %s14868_s2  ;;  %p14880_p4 = pnand %p12377_p13, %p51_p9 }
  0x84   : > { %s15776_s18 = scalar_select %p14870_p3, 1, 0 }
  0x85   : > { %s15777_s19 = scalar_select %p14874_p0, 1, 0 }
  0x86   : > { %s12293_s30 = smul.u32 384, %s14653_s24  ;;  %s15779_s0 = sld [smem:[#allocation28_spill]] }
  0x87   : > { %s443_s3 = scalar_lea.vmem [#allocation2], %s12292_s25  ;;  %s440_s6 = scalar_lea.sflag [#allocation3], %s14868_s2 }
  0x88   : > { %s451_s5 = sshll.u32 %s443_s3, 4  ;;  %p14511_p7 = pneg %p14880_p4  ;;  %s452_s5 = int_to_ptr.vmem [resolvable:$true] %s451_s5 }
  0x8c   : > { %s14888_s20 = scalar_lea.hbm %s15779_s0, %s12293_s30  ;;  %s14514_s30 = scalar_lea.hbm %s15779_s0, 768 }
  0x8d   : > { %s14509_s7 = scalar_lea.hbm %s14888_s20, 384  ;;  %p14515_p8 = scmp.lt.s32.totalorder %s14888_s20, %s15779_s0 }
  0x8e   : > { %p14510_p1 = scmp.ne.s32.totalorder %s14888_s20, %s14509_s7  ;;  %p14516_p9 = scmp.lt.s32.totalorder %s14514_s30, %s14509_s7 }
  0x90   : > { %p14512_p2 = pnand %p14511_p7, %p14510_p1  ;;  %p14517_p11 = por %p14516_p9, %p14515_p8 }
  0x92   : > { %p14513_p5 = pneg %p14512_p2 }
  0x94   : > { %p14518_p6 = pnand %p14517_p11, %p14513_p5 }
  0x96   : > { %14521 = shalt.err (!%p14518_p6)
}
  0x97   : > { %s14522_s3 = scalar_lea.vmem %s452_s5, 384  ;;  %s14667_s25 = smov [#allocation2]  }
  0x98   : > { %p14523_p12 = scmp.ne.s32.totalorder %s452_s5, %s14522_s3  ;;  %s14527_s9 = sshll.u32 %s14667_s25, 4  ;;  %s14528_s9 = int_to_ptr.vmem [resolvable:$false] %s14527_s9 }
  0x99   : > { %s14529_s8 = scalar_lea.vmem %s14528_s9, 768  ;;  %p14530_p2 = scmp.lt.s32.totalorder %s452_s5, %s14528_s9 }
  0x9a   : > { %p14525_p13 = pnand %p14523_p12, %p14511_p7  ;;  %p14531_p0 = scmp.lt.s32.totalorder %s14529_s8, %s14522_s3 }
  0x9c   : > { %p14526_p1 = pneg %p14525_p13  ;;  %p14532_p3 = por %p14531_p0, %p14530_p2 }
  0x9e   : > { %p14533_p10 = pnand %p14532_p3, %p14526_p1 }
  0xa0   : > { %14536 = shalt.err (!%p14533_p10)
}
  0xa1   : > { %12361 = dma.hbm_to_vmem [thread:$0]  (!%p14880_p4), %s14888_s20, 384, %s452_s5, %s440_s6  }
  0xa2   : > { %s10880_s7 = sshll.u32 %s14653_s24, 4  ;;  %s461_s26 = scalar_lea.vmem [#allocation5], %s14868_s2 }
  0xa3   : > { %s468_s30 = sshll.u32 %s461_s26, 4  ;;  %s466_s25 = scalar_lea.hbm %s15738_s1, %s10880_s7  ;;  %s469_s30 = int_to_ptr.vmem [resolvable:$true] %s468_s30 }
  0xa4   : > { %s15780_s9 = sand.u32 1, %s14653_s24   ;;  %s14537_s8 = scalar_lea.hbm %s466_s25, 16 }
  0xa5   : > { %s459_s3 = scalar_lea.sflag [#allocation6], %s15780_s9  ;;  %p14538_p10 = scmp.ne.s32.totalorder %s466_s25, %s14537_s8 }
  0xa6   : > { %s14542_s5 = scalar_lea.hbm %s15738_s1, 32  ;;  %p14543_p5 = scmp.lt.s32.totalorder %s466_s25, %s15738_s1 }
  0xa7   : > { %p14540_p3 = pnand %p14538_p10, %p14511_p7  ;;  %p14544_p8 = scmp.lt.s32.totalorder %s14542_s5, %s14537_s8 }
  0xa9   : > { %p14541_p0 = pneg %p14540_p3  ;;  %p14545_p9 = por %p14544_p8, %p14543_p5 }
  0xab   : > { %p14546_p11 = pnand %p14545_p9, %p14541_p0 }
  0xad   : > { %14549 = shalt.err (!%p14546_p11)
}
  0xae   : > { %s14550_s20 = scalar_lea.vmem %s469_s30, 16  ;;  %s14668_s7 = smov [#allocation5]  }
  0xaf   : > { %p14551_p6 = scmp.ne.s32.totalorder %s469_s30, %s14550_s20  ;;  %s14555_s26 = sshll.u32 %s14668_s7, 4  ;;  %s14556_s26 = int_to_ptr.vmem [resolvable:$false] %s14555_s26 }
  0xb0   : > { %s14557_s0 = scalar_lea.vmem %s14556_s26, 32  ;;  %p14558_p1 = scmp.lt.s32.totalorder %s469_s30, %s14556_s26 }
  0xb1   : > { %p14553_p12 = pnand %p14551_p6, %p14511_p7  ;;  %p14559_p2 = scmp.lt.s32.totalorder %s14557_s0, %s14550_s20 }
  0xb3   : > { %p14554_p13 = pneg %p14553_p12  ;;  %p14560_p10 = por %p14559_p2, %p14558_p1 }
  0xb5   : > { %p14561_p3 = pnand %p14560_p10, %p14554_p13 }
  0xb7   : > { %14564 = shalt.err (!%p14561_p3)
}
  0xb8   : > { %12364 = dma.hbm_to_vmem [thread:$0]  (!%p14880_p4), %s466_s25, 16, %s469_s30, %s459_s3  }
  0xb9   : > { %p15781_p0 = scmp.ne.s32.totalorder %s15763_s28, 0 }
  0xba   : > { %s14935_s11 = sand.u32 (!%p15781_p0), 1, %s14645_s22   ;;  %p15782_p7 = scmp.ne.s32.totalorder (!%p15781_p0), %s15775_s15, 0 }
  0xbb   : > { %477 = sbr.rel (%p15781_p0) target bundleno = 2688 (0xa80), region = 68  ;;  %s480_s29 = scalar_lea.sflag (!%p15781_p0), [#allocation3], %s14935_s11 }
  0xbc   : > { %s12294_s16 = smul.u32 (!%p15781_p0), 24, %s14935_s11 }
  0xbe   : > { %s14939_s9 = scalar_lea.vmem (!%p15781_p0), [#allocation2], %s12294_s16 }
  0xc0   : > { %14608 = dma.done.wait (%p15782_p7), %s480_s29, 384  }
  0xc1   : > { %14610 = vsyncadd (%p15782_p7), %s480_s29, 4294966912  ;;  %s488_s28 = sand.u32 1, %s14757_s27   ;;  %s491_s30 = scalar_lea.vmem [#allocation5], %s14935_s11 }
  0xc2   : > { %s489_s14 = scalar_lea.sflag [#allocation6], %s488_s28 }
  0xc3   : > { %14612 = dma.done.wait (%p15782_p7), %s489_s14, 16  }
  0xc4   : > { %14614 = vsyncadd (%p15782_p7), %s489_s14, 4294967280  ;;  %p15783_p4 = scmp.eq.s32.totalorder %s14757_s27, 0 }
  0xc6   : > { %14616 = dma.done.wait (%p15783_p4), [#allocation6], 110592   ;;  %p15784_p5 = pmov %p15783_p4 }
  0xc7   : > { %p15785_p8 = pmov %p15783_p4 }
  0xc8   : > { %14618 = vsyncadd (%p15784_p5), [#allocation6], 4294856704 }
  0xc9   : > { %14620 = dma.done.wait (%p15785_p8), [#allocation9], 672   ;;  %p15786_p9 = pmov %p15783_p4 }
  0xca   : > { %p15787_p11 = pmov %p15783_p4 }
  0xcb   : > { %14622 = vsyncadd (%p15786_p9), [#allocation9], 4294966624 }
  0xcc   : > { %14624 = dma.done.wait (%p15787_p11), [#allocation12], 36960   ;;  %p15788_p6 = pmov %p15783_p4 }
  0xcd   : > { %p15789_p12 = pmov %p15783_p4 }
  0xce   : > { %14626 = vsyncadd (%p15788_p6), [#allocation12], 4294930336 }
  0xcf   : > { %14628 = dma.done.wait (%p15789_p12), [#allocation15], 192   ;;  %p15790_p13 = pmov %p15783_p4 }
  0xd0   : > { %p15791_p1 = pmov %p15783_p4 }
  0xd1   : > { %14630 = vsyncadd (%p15790_p13), [#allocation15], 4294967104 }
  0xd2   : > { %14632 = dma.done.wait (%p15791_p1), [#allocation18], 16   ;;  %p15792_p2 = pmov %p15791_p1 }
  0xd3   : > { %v12432_v0 = vld [vmem:[#allocation7 + $0x3f4] ss:$72 sps:$4 sm:$0xff]   ;;  %v12436_v2 = vld [vmem:[#allocation7 + $0x3f0] ss:$72 sps:$4 sm:$0xff]   ;;  %v12438_v4 = vld [vmem:[#allocation7 + $0x364] ss:$72 sps:$4 sm:$0xff]  }
  0xd4   : > { %14634 = vsyncadd (%p15792_p2), [#allocation18], 4294967280  ;;  %v12434_v1 = vld [vmem:[#allocation7 + $0xcf4] ss:$72 sps:$4 sm:$0xff]   ;;  %5872 = vmatprep.subr.bf16.mxu0 %v12432_v0  ;;  %v12437_v3 = vld [vmem:[#allocation7 + $0xcf0] ss:$72 sps:$4 sm:$0xff]  }
  0xd5   : > { %5913 = vmatprep.subr.bf16.mxu1 %v12434_v1  ;;  %5873 = vmatpush1.bf16.msra.mxu0 %v12436_v2  ;;  %v12440_v5 = vld [vmem:[#allocation7 + $0xc64] ss:$72 sps:$4 sm:$0xff]   ;;  %v12442_v6 = vld [vmem:[#allocation7 + $0x360] ss:$72 sps:$4 sm:$0xff]   ;;  %v12444_v8 = vld [vmem:[#allocation7 + $0x2d4] ss:$72 sps:$4 sm:$0xff]  }
  0xd6   : > { %5914 = vmatpush1.bf16.msra.mxu1 %v12437_v3  ;;  %5874 = vmatprep.subr.bf16.mxu0 %v12438_v4  ;;  %v12443_v7 = vld [vmem:[#allocation7 + $0xc60] ss:$72 sps:$4 sm:$0xff]   ;;  %v12446_v9 = vld [vmem:[#allocation7 + $0xbd4] ss:$72 sps:$4 sm:$0xff]   ;;  %v12448_v10 = vld [vmem:[#allocation7 + $0x2d0] ss:$72 sps:$4 sm:$0xff]  }
  0xd7   : > { %5915 = vmatprep.subr.bf16.mxu1 %v12440_v5  ;;  %v12449_v11 = vld [vmem:[#allocation7 + $0xbd0] ss:$72 sps:$4 sm:$0xff]   ;;  %v12450_v12 = vld [vmem:[#allocation7 + $0x244] ss:$72 sps:$4 sm:$0xff]   ;;  %v12454_v14 = vld [vmem:[#allocation7 + $0x240] ss:$72 sps:$4 sm:$0xff]  }
  0xd8   : > { %v12452_v13 = vld [vmem:[#allocation7 + $0xb44] ss:$72 sps:$4 sm:$0xff]   ;;  %v12455_v15 = vld [vmem:[#allocation7 + $0xb40] ss:$72 sps:$4 sm:$0xff]   ;;  %v12456_v16 = vld [vmem:[#allocation7 + $0x1b4] ss:$72 sps:$4 sm:$0xff]  }
  0xd9   : > { %5875 = vmatpush1.bf16.msra.mxu0 %v12442_v6  ;;  %v12458_v17 = vld [vmem:[#allocation7 + $0xab4] ss:$72 sps:$4 sm:$0xff]   ;;  %v12460_v18 = vld [vmem:[#allocation7 + $0x1b0] ss:$72 sps:$4 sm:$0xff]   ;;  %v12462_v20 = vld [vmem:[#allocation7 + $0x124] ss:$72 sps:$4 sm:$0xff]  }
  0xda   : > { %5916 = vmatpush1.bf16.msra.mxu1 %v12443_v7  ;;  %5876 = vmatprep.subr.bf16.mxu0 %v12444_v8  ;;  %v12461_v19 = vld [vmem:[#allocation7 + $0xab0] ss:$72 sps:$4 sm:$0xff]   ;;  %v12464_v21 = vld [vmem:[#allocation7 + $0xa24] ss:$72 sps:$4 sm:$0xff]   ;;  %v12466_v22 = vld [vmem:[#allocation7 + $0x120] ss:$72 sps:$4 sm:$0xff]  }
  0xdb   : > { %5917 = vmatprep.subr.bf16.mxu1 %v12446_v9  ;;  %v12467_v23 = vld [vmem:[#allocation7 + $0xa20] ss:$72 sps:$4 sm:$0xff]   ;;  %v12468_v24 = vld [vmem:[#allocation7 + $0x94] ss:$72 sps:$4 sm:$0xff]   ;;  %v12472_v26 = vld [vmem:[#allocation7 + $0x90] ss:$72 sps:$4 sm:$0xff]  }
  0xdc   : > { %v12470_v25 = vld [vmem:[#allocation7 + $0x994] ss:$72 sps:$4 sm:$0xff]   ;;  %v12473_v27 = vld [vmem:[#allocation7 + $0x990] ss:$72 sps:$4 sm:$0xff]   ;;  %v12474_v28 = vld [vmem:[#allocation7 + $0x4] ss:$72 sps:$4 sm:$0xff]  }
  0xdd   : > { %5877 = vmatpush1.bf16.msra.mxu0 %v12448_v10  ;;  %v12476_v29 = vld [vmem:[#allocation7 + $0x904] ss:$72 sps:$4 sm:$0xff]   ;;  %v12478_v30 = vld [vmem:[#allocation7] ss:$72 sps:$4 sm:$0xff]   ;;  %v12480_v32 = vld [vmem:[#allocation7 + $0x874] ss:$72 sps:$4 sm:$0xff]  }
  0xde   : > { %5918 = vmatpush1.bf16.msra.mxu1 %v12449_v11  ;;  %5878 = vmatprep.subr.bf16.mxu0 %v12450_v12  ;;  %v12479_v31 = vld [vmem:[#allocation7 + $0x900] ss:$72 sps:$4 sm:$0xff]   ;;  %v12482_v33 = vld [vmem:[#allocation7 + $0x1174] ss:$72 sps:$4 sm:$0xff]   ;;  %v12484_v34 = vld [vmem:[#allocation7 + $0x870] ss:$72 sps:$4 sm:$0xff]  }
  0xdf   : > { %5919 = vmatprep.subr.bf16.mxu1 %v12452_v13  ;;  %v12485_v35 = vld [vmem:[#allocation7 + $0x1170] ss:$72 sps:$4 sm:$0xff]   ;;  %v12486_v36 = vld [vmem:[#allocation7 + $0x7e4] ss:$72 sps:$4 sm:$0xff]   ;;  %v12490_v38 = vld [vmem:[#allocation7 + $0x7e0] ss:$72 sps:$4 sm:$0xff]  }
  0xe0   : > { %v12488_v37 = vld [vmem:[#allocation7 + $0x10e4] ss:$72 sps:$4 sm:$0xff]   ;;  %v12491_v39 = vld [vmem:[#allocation7 + $0x10e0] ss:$72 sps:$4 sm:$0xff]   ;;  %v12492_v40 = vld [vmem:[#allocation7 + $0x754] ss:$72 sps:$4 sm:$0xff]  }
  0xe1   : > { %5879 = vmatpush1.bf16.msra.mxu0 %v12454_v14  ;;  %v12494_v41 = vld [vmem:[#allocation7 + $0x1054] ss:$72 sps:$4 sm:$0xff]   ;;  %v12496_v42 = vld [vmem:[#allocation7 + $0x750] ss:$72 sps:$4 sm:$0xff]   ;;  %v12498_v44 = vld [vmem:[#allocation7 + $0x6c4] ss:$72 sps:$4 sm:$0xff]  }
  0xe2   : > { %5920 = vmatpush1.bf16.msra.mxu1 %v12455_v15  ;;  %5880 = vmatprep.subr.bf16.mxu0 %v12456_v16  ;;  %v12497_v43 = vld [vmem:[#allocation7 + $0x1050] ss:$72 sps:$4 sm:$0xff]   ;;  %v12500_v45 = vld [vmem:[#allocation7 + $0xfc4] ss:$72 sps:$4 sm:$0xff]   ;;  %v12502_v49 = vld [vmem:[#allocation7 + $0x6c0] ss:$72 sps:$4 sm:$0xff]  }
  0xe3   : > { %5921 = vmatprep.subr.bf16.mxu1 %v12458_v17  ;;  %v568_v46 = vld [vmem:[%s14939_s9] sm:$0xff]  ;;  %v569_v48 = vld [vmem:[%s14939_s9 + $0x8] sm:$0xff]  ;;  %vm7573_vm0 = vcmask 1043456   ;;  %vm7531_vm2 = vcmask 64512   ;;  %vm9892_vm3 = vcmask 1040384   ;;  %s12157_s6 = sshll.u32 %s14757_s27, 4 }
  0xe4   : > { %v14972_v47 = vcombine.high %v568_v46, %v568_v46  ;;  %v12503_v50 = vld [vmem:[#allocation7 + $0xfc0] ss:$72 sps:$4 sm:$0xff]   ;;  %v14975_v51 = vcombine.high %v569_v48, %v569_v48  ;;  %v12504_v52 = vld [vmem:[#allocation7 + $0x634] ss:$72 sps:$4 sm:$0xff]   ;;  %v12508_v54 = vld [vmem:[#allocation7 + $0x630] ss:$72 sps:$4 sm:$0xff]   ;;  %v14979_v6 = vcombine.low %v568_v46, %v568_v46  ;;  %v14981_v7 = vcombine.low %v569_v48, %v569_v48  ;;  %s10704_s0 = scalar_lea.hbm %s15749_s12, %s12157_s6 }
  0xe5   : > { %5881 = vmatpush1.bf16.msra.mxu0 %v12460_v18  ;;  %v12506_v53 = vld [vmem:[#allocation7 + $0xf34] ss:$72 sps:$4 sm:$0xff]   ;;  %v12509_v55 = vld [vmem:[#allocation7 + $0xf30] ss:$72 sps:$4 sm:$0xff]   ;;  %v12510_v56 = vld [vmem:[#allocation7 + $0x5a4] ss:$72 sps:$4 sm:$0xff]  }
  0xe6   : > { %5922 = vmatpush1.bf16.msra.mxu1 %v12461_v19  ;;  %5882 = vmatprep.subr.bf16.mxu0 %v12462_v20  ;;  %v12512_v57 = vld [vmem:[#allocation7 + $0xea4] ss:$72 sps:$4 sm:$0xff]   ;;  %v12514_v58 = vld [vmem:[#allocation7 + $0x5a0] ss:$72 sps:$4 sm:$0xff]   ;;  %v12516_v60 = vld [vmem:[#allocation7 + $0x514] ss:$72 sps:$4 sm:$0xff]  }
  0xe7   : > { %5923 = vmatprep.subr.bf16.mxu1 %v12464_v21  ;;  %5904 = vmatprep.mubr.bf16.mxu0 %v14972_v47  ;;  %v12515_v59 = vld [vmem:[#allocation7 + $0xea0] ss:$72 sps:$4 sm:$0xff]   ;;  %v12518_v61 = vld [vmem:[#allocation7 + $0xe14] ss:$72 sps:$4 sm:$0xff]   ;;  %v12520_v62 = vld [vmem:[#allocation7 + $0x510] ss:$72 sps:$4 sm:$0xff]  }
  0xe8   : > { %5945 = vmatprep.mubr.bf16.mxu1 %v14975_v51  ;;  %v12521_v63 = vld [vmem:[#allocation7 + $0xe10] ss:$72 sps:$4 sm:$0xff]   ;;  %v12522_v0 = vld [vmem:[#allocation7 + $0x484] ss:$72 sps:$4 sm:$0xff]   ;;  %v12526_v2 = vld [vmem:[#allocation7 + $0x480] ss:$72 sps:$4 sm:$0xff]  }
  0xe9   : > { %5883 = vmatpush1.bf16.msra.mxu0 %v12466_v22  ;;  %v12524_v1 = vld [vmem:[#allocation7 + $0xd84] ss:$72 sps:$4 sm:$0xff]   ;;  %v12527_v3 = vld [vmem:[#allocation7 + $0xd80] ss:$72 sps:$4 sm:$0xff]   ;;  %v12533_v4 = vld [vmem:[#allocation7 + $0x15f4] ss:$72 sps:$4 sm:$0xff]  }
  0xea   : > { %5924 = vmatpush1.bf16.msra.mxu1 %v12467_v23  ;;  %5884 = vmatprep.subr.bf16.mxu0 %v12468_v24  ;;  %v12536_v5 = vld [vmem:[#allocation7 + $0x3fc] ss:$72 sps:$4 sm:$0xff]   ;;  %v12531_v8 = vld [vmem:[#allocation7 + $0x15f0] ss:$72 sps:$4 sm:$0xff]   ;;  %v12543_v11 = vld [vmem:[#allocation7 + $0x36c] ss:$72 sps:$4 sm:$0xff]  }
  0xeb   : > { %5925 = vmatprep.subr.bf16.mxu1 %v12470_v25  ;;  %v12534_v9 = vld [vmem:[#allocation7 + $0x3f8] ss:$72 sps:$4 sm:$0xff]   ;;  %v12540_v10 = vld [vmem:[#allocation7 + $0x1564] ss:$72 sps:$4 sm:$0xff]   ;;  %v12541_v13 = vld [vmem:[#allocation7 + $0x368] ss:$72 sps:$4 sm:$0xff]  }
  0xec   : > { %v12538_v12 = vld [vmem:[#allocation7 + $0x1560] ss:$72 sps:$4 sm:$0xff]   ;;  %v12546_v14 = vld [vmem:[#allocation7 + $0x14d4] ss:$72 sps:$4 sm:$0xff]   ;;  %v12544_v16 = vld [vmem:[#allocation7 + $0x14d0] ss:$72 sps:$4 sm:$0xff]  }
  0xed   : > { %5885 = vmatpush1.bf16.msra.mxu0 %v12472_v26  ;;  %v12549_v15 = vld [vmem:[#allocation7 + $0x2dc] ss:$72 sps:$4 sm:$0xff]   ;;  %v12547_v17 = vld [vmem:[#allocation7 + $0x2d8] ss:$72 sps:$4 sm:$0xff]   ;;  %v12555_v19 = vld [vmem:[#allocation7 + $0x24c] ss:$72 sps:$4 sm:$0xff]  }
  0xee   : > { %5926 = vmatpush1.bf16.msra.mxu1 %v12473_v27  ;;  %5886 = vmatprep.subr.bf16.mxu0 %v12474_v28  ;;  %v12552_v18 = vld [vmem:[#allocation7 + $0x1444] ss:$72 sps:$4 sm:$0xff]   ;;  %v12550_v20 = vld [vmem:[#allocation7 + $0x1440] ss:$72 sps:$4 sm:$0xff]   ;;  %v12558_v22 = vld [vmem:[#allocation7 + $0x13b4] ss:$72 sps:$4 sm:$0xff]  }
  0xef   : > { %5927 = vmatprep.subr.bf16.mxu1 %v12476_v29  ;;  %v12553_v21 = vld [vmem:[#allocation7 + $0x248] ss:$72 sps:$4 sm:$0xff]   ;;  %v12561_v23 = vld [vmem:[#allocation7 + $0x1bc] ss:$72 sps:$4 sm:$0xff]   ;;  %v12559_v25 = vld [vmem:[#allocation7 + $0x1b8] ss:$72 sps:$4 sm:$0xff]  }
  0xf0   : > { %v12556_v24 = vld [vmem:[#allocation7 + $0x13b0] ss:$72 sps:$4 sm:$0xff]   ;;  %v12564_v26 = vld [vmem:[#allocation7 + $0x1324] ss:$72 sps:$4 sm:$0xff]   ;;  %v12562_v28 = vld [vmem:[#allocation7 + $0x1320] ss:$72 sps:$4 sm:$0xff]  }
  0xf1   : > { %5887 = vmatpush1.bf16.msra.mxu0 %v12478_v30  ;;  %v12567_v27 = vld [vmem:[#allocation7 + $0x12c] ss:$72 sps:$4 sm:$0xff]   ;;  %v12565_v29 = vld [vmem:[#allocation7 + $0x128] ss:$72 sps:$4 sm:$0xff]   ;;  %s566_s2 = scalar_lea.vmem [#allocation19], %s14935_s11  ;;  %vm10691_vm10 = vcmask 24576  }
  0xf2   : > { %5928 = vmatpush1.bf16.msra.mxu1 %v12479_v31  ;;  %5888 = vmatprep.subr.bf16.mxu0 %v12480_v32  ;;  %v12570_v30 = vld [vmem:[#allocation7 + $0x1294] ss:$72 sps:$4 sm:$0xff]   ;;  %v12586_v46 = vld [vmem:[#allocation7 + $0x19e0] ss:$72 sps:$4 sm:$0xff]   ;;  %s10706_s20 = sshll.u32 %s566_s2, 4  ;;  %s10694_s16 = scalar_lea.sflag [#allocation4], %s14935_s11  ;;  %s10707_s20 = int_to_ptr.vmem [resolvable:$true] %s10706_s20 }
  0xf3   : > { %5929 = vmatprep.subr.bf16.mxu1 %v12482_v33  ;;  %v12573_v31 = vld [vmem:[#allocation7 + $0x9c] ss:$72 sps:$4 sm:$0xff]   ;;  %v12568_v33 = vld [vmem:[#allocation7 + $0x1290] ss:$72 sps:$4 sm:$0xff]   ;;  %s14565_s29 = scalar_lea.vmem %s10707_s20, 16  ;;  %p15793_p3 = scmp.ne.s32.totalorder %s15776_s18, 0 }
  0xf4   : > { %v14987_v32 = vld [vmem:[%s14939_s9 + $0x10] sm:$0xff]  ;;  %v12589_v48 = vld [vmem:[#allocation7 + $0x7e8] ss:$72 sps:$4 sm:$0xff]   ;;  %p14566_p10 = scmp.ne.s32.totalorder %s10707_s20, %s14565_s29  ;;  %s14670_s27 = smov [#allocation19]  }
  0xf5   : > { %5889 = vmatpush2.bf16.msra.mxu0 %v12484_v34  ;;  %v14991_v34 = vcombine.high %v14987_v32, %v14987_v32  ;;  %s14569_s9 = sshll.u32 %s14670_s27, 4  ;;  %s14570_s9 = int_to_ptr.vmem [resolvable:$false] %s14569_s9 }
  0xf6   : > { %5930 = vmatpush2.bf16.msra.mxu1 %v12485_v35  ;;  %5890 = vmatprep.subr.bf16.mxu0 %v12486_v36  ;;  %v12571_v35 = vld [vmem:[#allocation7 + $0x98] ss:$72 sps:$4 sm:$0xff]   ;;  %v12576_v36 = vld [vmem:[#allocation7 + $0x1204] ss:$72 sps:$4 sm:$0xff]   ;;  %p14567_p0 = pnand %p14566_p10, %p15793_p3  ;;  %s14571_s28 = scalar_lea.vmem %s14570_s9, 32 }
  0xf7   : > { %5931 = vmatprep.subr.bf16.mxu1 %v12488_v37  ;;  %v12579_v37 = vld [vmem:[#allocation7 + $0xc] ss:$72 sps:$4 sm:$0xff]   ;;  %p14572_p4 = scmp.lt.s32.totalorder %s10707_s20, %s14570_s9  ;;  %p14573_p5 = scmp.lt.s32.totalorder %s14571_s28, %s14565_s29 }
  0xf8   : > { %p14568_p7 = pneg %p14567_p0 }
  0xf9   : > { %5891 = vmatpush2.bf16.msra.mxu0 %v12490_v38  ;;  %v12574_v38 = vld [vmem:[#allocation7 + $0x1200] ss:$72 sps:$4 sm:$0xff]   ;;  %p14574_p8 = por %p14573_p5, %p14572_p4 }
  0xfa   : > { %5932 = vmatpush2.bf16.msra.mxu1 %v12491_v39  ;;  %5892 = vmatprep.subr.bf16.mxu0 %v12492_v40  ;;  %v12577_v39 = vld [vmem:[#allocation7 + $0x8] ss:$72 sps:$4 sm:$0xff]   ;;  %v12582_v40 = vld [vmem:[#allocation7 + $0x1a74] ss:$72 sps:$4 sm:$0xff]  }
  0xfb   : > { %5933 = vmatprep.subr.bf16.mxu1 %v12494_v41  ;;  %v12585_v41 = vld [vmem:[#allocation7 + $0x87c] ss:$72 sps:$4 sm:$0xff]   ;;  %p14575_p9 = pnand %p14574_p8, %p14568_p7 }
  0xfd   : > { %5893 = vmatpush2.bf16.msra.mxu0 %v12496_v42  ;;  %v12580_v42 = vld [vmem:[#allocation7 + $0x1a70] ss:$72 sps:$4 sm:$0xff]  }
  0xfe   : > { %5934 = vmatpush2.bf16.msra.mxu1 %v12497_v43  ;;  %5894 = vmatprep.subr.bf16.mxu0 %v12498_v44  ;;  %v12583_v43 = vld [vmem:[#allocation7 + $0x878] ss:$72 sps:$4 sm:$0xff]   ;;  %v12588_v44 = vld [vmem:[#allocation7 + $0x19e4] ss:$72 sps:$4 sm:$0xff]  }
  0xff   : > { %5935 = vmatprep.subr.bf16.mxu1 %v12500_v45  ;;  %v12591_v45 = vld [vmem:[#allocation7 + $0x7ec] ss:$72 sps:$4 sm:$0xff]  }
 0x101   : > { %5895 = vmatpush2.bf16.msra.mxu0 %v12502_v49  ;;  %v12594_v49 = vld [vmem:[#allocation7 + $0x1954] ss:$72 sps:$4 sm:$0xff]  }
 0x102   : > { %5936 = vmatpush2.bf16.msra.mxu1 %v12503_v50  ;;  %5896 = vmatprep.subr.bf16.mxu0 %v12504_v52  ;;  %v12597_v50 = vld [vmem:[#allocation7 + $0x75c] ss:$72 sps:$4 sm:$0xff]   ;;  %v12592_v52 = vld [vmem:[#allocation7 + $0x1950] ss:$72 sps:$4 sm:$0xff]  }
 0x103   : > { %5937 = vmatprep.subr.bf16.mxu1 %v12506_v53  ;;  %v12595_v53 = vld [vmem:[#allocation7 + $0x758] ss:$72 sps:$4 sm:$0xff]  }
 0x105   : > { %5897 = vmatpush2.bf16.msra.mxu0 %v12508_v54  ;;  %v12600_v54 = vld [vmem:[#allocation7 + $0x18c4] ss:$72 sps:$4 sm:$0xff]  }
 0x106   : > { %5938 = vmatpush2.bf16.msra.mxu1 %v12509_v55  ;;  %5898 = vmatprep.subr.bf16.mxu0 %v12510_v56  ;;  %v12603_v55 = vld [vmem:[#allocation7 + $0x6cc] ss:$72 sps:$4 sm:$0xff]   ;;  %v12598_v56 = vld [vmem:[#allocation7 + $0x18c0] ss:$72 sps:$4 sm:$0xff]  }
 0x107   : > { %5939 = vmatprep.subr.bf16.mxu1 %v12512_v57  ;;  %v12601_v57 = vld [vmem:[#allocation7 + $0x6c8] ss:$72 sps:$4 sm:$0xff]  }
 0x109   : > { %5899 = vmatpush2.bf16.msra.mxu0 %v12514_v58  ;;  %v12606_v58 = vld [vmem:[#allocation7 + $0x1834] ss:$72 sps:$4 sm:$0xff]  }
 0x10a   : > { %5940 = vmatpush2.bf16.msra.mxu1 %v12515_v59  ;;  %5900 = vmatprep.subr.bf16.mxu0 %v12516_v60  ;;  %v12609_v59 = vld [vmem:[#allocation7 + $0x63c] ss:$72 sps:$4 sm:$0xff]   ;;  %v12604_v60 = vld [vmem:[#allocation7 + $0x1830] ss:$72 sps:$4 sm:$0xff]  }
 0x10b   : > { %5941 = vmatprep.subr.bf16.mxu1 %v12518_v61  ;;  %v12607_v61 = vld [vmem:[#allocation7 + $0x638] ss:$72 sps:$4 sm:$0xff]  }
 0x10d   : > { %5901 = vmatpush2.bf16.msra.mxu0 %v12520_v62  ;;  %v12612_v62 = vld [vmem:[#allocation7 + $0x17a4] ss:$72 sps:$4 sm:$0xff]  }
 0x10e   : > { %5942 = vmatpush2.bf16.msra.mxu1 %v12521_v63  ;;  %5902 = vmatprep.subr.bf16.mxu0 %v12522_v0  ;;  %v12615_v63 = vld [vmem:[#allocation7 + $0x5ac] ss:$72 sps:$4 sm:$0xff]   ;;  %v12610_v0 = vld [vmem:[#allocation7 + $0x17a0] ss:$72 sps:$4 sm:$0xff]  }
 0x10f   : > { %5943 = vmatprep.subr.bf16.mxu1 %v12524_v1  ;;  %v12613_v1 = vld [vmem:[#allocation7 + $0x5a8] ss:$72 sps:$4 sm:$0xff]  }
 0x111   : > { %5903 = vmatpush2.bf16.msra.mxu0 %v12526_v2  ;;  %v12618_v2 = vld [vmem:[#allocation7 + $0x1714] ss:$72 sps:$4 sm:$0xff]  }
 0x112   : > { %5944 = vmatpush2.bf16.msra.mxu1 %v12527_v3  ;;  %5954 = vmatprep.subr.bf16.mxu0 %v12533_v4  ;;  %v12621_v3 = vld [vmem:[#allocation7 + $0x51c] ss:$72 sps:$4 sm:$0xff]   ;;  %v12616_v4 = vld [vmem:[#allocation7 + $0x1710] ss:$72 sps:$4 sm:$0xff]  }
 0x113   : > { %5995 = vmatprep.subr.bf16.mxu1 %v12536_v5  ;;  %v12619_v5 = vld [vmem:[#allocation7 + $0x518] ss:$72 sps:$4 sm:$0xff]  }
 0x114   : > { %5905 = vmatmul.mubr.bf16.vlgmr.msra.gmra.mxu0 %v14979_v6 }
 0x115   : > { %5946 = vmatmul.mubr.bf16.vlgmr.msra.gmra.mxu1 %v14981_v7  ;;  %5955 = vmatpush1.bf16.msra.mxu0 %v12531_v8  ;;  %v12624_v8 = vld [vmem:[#allocation7 + $0x1684] ss:$72 sps:$4 sm:$0xff]  }
 0x116   : > { %5996 = vmatpush1.bf16.msra.mxu1 %v12534_v9  ;;  %5956 = vmatprep.subr.bf16.mxu0 %v12540_v10  ;;  %v12627_v9 = vld [vmem:[#allocation7 + $0x48c] ss:$72 sps:$4 sm:$0xff]   ;;  %v12622_v10 = vld [vmem:[#allocation7 + $0x1680] ss:$72 sps:$4 sm:$0xff]  }
 0x117   : > { %5997 = vmatprep.subr.bf16.mxu1 %v12543_v11  ;;  %6027 = vmatprep.mubr.bf16.mxu1 %v14972_v47  ;;  %v12625_v11 = vld [vmem:[#allocation7 + $0x488] ss:$72 sps:$4 sm:$0xff]  }
 0x118   : > { %5986 = vmatprep.mubr.bf16.mxu0 %v14991_v34 }
 0x119   : > { %5957 = vmatpush1.bf16.msra.mxu0 %v12538_v12  ;;  %v12632_v12 = vld [vmem:[#allocation7 + $0xcfc] ss:$72 sps:$4 sm:$0xff]  }
 0x11a   : > { %5998 = vmatpush1.bf16.msra.mxu1 %v12541_v13  ;;  %5958 = vmatprep.subr.bf16.mxu0 %v12546_v14  ;;  %v12635_v13 = vld [vmem:[#allocation7 + $0x15fc] ss:$72 sps:$4 sm:$0xff]   ;;  %v14996_v14 = vcombine.low %v14987_v32, %v14987_v32  ;;  %v12657_v32 = vld [vmem:[#allocation7 + $0x13b8] ss:$72 sps:$4 sm:$0xff]  }
 0x11b   : > { %5999 = vmatprep.subr.bf16.mxu1 %v12549_v15  ;;  %v12630_v15 = vld [vmem:[#allocation7 + $0xcf8] ss:$72 sps:$4 sm:$0xff]  }
 0x11d   : > { %5959 = vmatpush1.bf16.msra.mxu0 %v12544_v16  ;;  %v12633_v16 = vld [vmem:[#allocation7 + $0x15f8] ss:$72 sps:$4 sm:$0xff]  }
 0x11e   : > { %6000 = vmatpush1.bf16.msra.mxu1 %v12547_v17  ;;  %5960 = vmatprep.subr.bf16.mxu0 %v12552_v18  ;;  %v12638_v17 = vld [vmem:[#allocation7 + $0xc6c] ss:$72 sps:$4 sm:$0xff]  }
 0x11f   : > { %6001 = vmatprep.subr.bf16.mxu1 %v12555_v19  ;;  %v12641_v18 = vld [vmem:[#allocation7 + $0x156c] ss:$72 sps:$4 sm:$0xff]   ;;  %v12636_v19 = vld [vmem:[#allocation7 + $0xc68] ss:$72 sps:$4 sm:$0xff]  }
 0x121   : > { %5961 = vmatpush1.bf16.msra.mxu0 %v12550_v20  ;;  %v12639_v20 = vld [vmem:[#allocation7 + $0x1568] ss:$72 sps:$4 sm:$0xff]  }
 0x122   : > { %6002 = vmatpush1.bf16.msra.mxu1 %v12553_v21  ;;  %5962 = vmatprep.subr.bf16.mxu0 %v12558_v22  ;;  %v12644_v21 = vld [vmem:[#allocation7 + $0xbdc] ss:$72 sps:$4 sm:$0xff]  }
 0x123   : > { %6003 = vmatprep.subr.bf16.mxu1 %v12561_v23  ;;  %v12647_v22 = vld [vmem:[#allocation7 + $0x14dc] ss:$72 sps:$4 sm:$0xff]   ;;  %v12642_v23 = vld [vmem:[#allocation7 + $0xbd8] ss:$72 sps:$4 sm:$0xff]  }
 0x125   : > { %5963 = vmatpush1.bf16.msra.mxu0 %v12556_v24  ;;  %v12645_v24 = vld [vmem:[#allocation7 + $0x14d8] ss:$72 sps:$4 sm:$0xff]  }
 0x126   : > { %6004 = vmatpush1.bf16.msra.mxu1 %v12559_v25  ;;  %5964 = vmatprep.subr.bf16.mxu0 %v12564_v26  ;;  %v12650_v25 = vld [vmem:[#allocation7 + $0xb4c] ss:$72 sps:$4 sm:$0xff]  }
 0x127   : > { %6005 = vmatprep.subr.bf16.mxu1 %v12567_v27  ;;  %v12653_v26 = vld [vmem:[#allocation7 + $0x144c] ss:$72 sps:$4 sm:$0xff]   ;;  %v12648_v27 = vld [vmem:[#allocation7 + $0xb48] ss:$72 sps:$4 sm:$0xff]  }
 0x129   : > { %5965 = vmatpush1.bf16.msra.mxu0 %v12562_v28  ;;  %v12651_v28 = vld [vmem:[#allocation7 + $0x1448] ss:$72 sps:$4 sm:$0xff]  }
 0x12a   : > { %6006 = vmatpush1.bf16.msra.mxu1 %v12565_v29  ;;  %5966 = vmatprep.subr.bf16.mxu0 %v12570_v30  ;;  %v12656_v29 = vld [vmem:[#allocation7 + $0xabc] ss:$72 sps:$4 sm:$0xff]  }
 0x12b   : > { %6007 = vmatprep.subr.bf16.mxu1 %v12573_v31  ;;  %v12659_v30 = vld [vmem:[#allocation7 + $0x13bc] ss:$72 sps:$4 sm:$0xff]   ;;  %v12654_v31 = vld [vmem:[#allocation7 + $0xab8] ss:$72 sps:$4 sm:$0xff]  }
 0x12d   : > { %5967 = vmatpush1.bf16.msra.mxu0 %v12568_v33  ;;  %v12662_v33 = vld [vmem:[#allocation7 + $0xa2c] ss:$72 sps:$4 sm:$0xff]  }
 0x12e   : > { %6008 = vmatpush1.bf16.msra.mxu1 %v12571_v35  ;;  %5968 = vmatprep.subr.bf16.mxu0 %v12576_v36  ;;  %v12665_v35 = vld [vmem:[#allocation7 + $0x132c] ss:$72 sps:$4 sm:$0xff]   ;;  %v12660_v36 = vld [vmem:[#allocation7 + $0xa28] ss:$72 sps:$4 sm:$0xff]  }
 0x12f   : > { %6009 = vmatprep.subr.bf16.mxu1 %v12579_v37  ;;  %v12663_v37 = vld [vmem:[#allocation7 + $0x1328] ss:$72 sps:$4 sm:$0xff]  }
 0x131   : > { %5969 = vmatpush1.bf16.msra.mxu0 %v12574_v38  ;;  %v12668_v38 = vld [vmem:[#allocation7 + $0x99c] ss:$72 sps:$4 sm:$0xff]  }
 0x132   : > { %6010 = vmatpush1.bf16.msra.mxu1 %v12577_v39  ;;  %5970 = vmatprep.subr.bf16.mxu0 %v12582_v40  ;;  %v12671_v39 = vld [vmem:[#allocation7 + $0x129c] ss:$72 sps:$4 sm:$0xff]   ;;  %v12666_v40 = vld [vmem:[#allocation7 + $0x998] ss:$72 sps:$4 sm:$0xff]  }
 0x133   : > { %6011 = vmatprep.subr.bf16.mxu1 %v12585_v41  ;;  %v12669_v41 = vld [vmem:[#allocation7 + $0x1298] ss:$72 sps:$4 sm:$0xff]  }
 0x135   : > { %5971 = vmatpush2.bf16.msra.mxu0 %v12580_v42  ;;  %v12674_v42 = vld [vmem:[#allocation7 + $0x90c] ss:$72 sps:$4 sm:$0xff]  }
 0x136   : > { %6012 = vmatpush2.bf16.msra.mxu1 %v12583_v43  ;;  %5972 = vmatprep.subr.bf16.mxu0 %v12588_v44  ;;  %v12677_v43 = vld [vmem:[#allocation7 + $0x120c] ss:$72 sps:$4 sm:$0xff]   ;;  %v12672_v44 = vld [vmem:[#allocation7 + $0x908] ss:$72 sps:$4 sm:$0xff]  }
 0x137   : > { %6013 = vmatprep.subr.bf16.mxu1 %v12591_v45  ;;  %v12675_v45 = vld [vmem:[#allocation7 + $0x1208] ss:$72 sps:$4 sm:$0xff]  }
 0x139   : > { %5973 = vmatpush2.bf16.msra.mxu0 %v12586_v46  ;;  %v12680_v46 = vld [vmem:[#allocation7 + $0x117c] ss:$72 sps:$4 sm:$0xff]  }
 0x13a   : > { %6014 = vmatpush2.bf16.msra.mxu1 %v12589_v48  ;;  %5974 = vmatprep.subr.bf16.mxu0 %v12594_v49  ;;  %v12683_v48 = vld [vmem:[#allocation7 + $0x1a7c] ss:$72 sps:$4 sm:$0xff]   ;;  %v12678_v49 = vld [vmem:[#allocation7 + $0x1178] ss:$72 sps:$4 sm:$0xff]  }
 0x13b   : > { %6015 = vmatprep.subr.bf16.mxu1 %v12597_v50  ;;  %v12681_v50 = vld [vmem:[#allocation7 + $0x1a78] ss:$72 sps:$4 sm:$0xff]  }
 0x13d   : > { %5975 = vmatpush2.bf16.msra.mxu0 %v12592_v52  ;;  %v12686_v52 = vld [vmem:[#allocation7 + $0x10ec] ss:$72 sps:$4 sm:$0xff]  }
 0x13e   : > { %6016 = vmatpush2.bf16.msra.mxu1 %v12595_v53  ;;  %5976 = vmatprep.subr.bf16.mxu0 %v12600_v54  ;;  %v12689_v53 = vld [vmem:[#allocation7 + $0x19ec] ss:$72 sps:$4 sm:$0xff]   ;;  %v12684_v54 = vld [vmem:[#allocation7 + $0x10e8] ss:$72 sps:$4 sm:$0xff]  }
 0x13f   : > { %6017 = vmatprep.subr.bf16.mxu1 %v12603_v55  ;;  %v12687_v55 = vld [vmem:[#allocation7 + $0x19e8] ss:$72 sps:$4 sm:$0xff]  }
 0x141   : > { %5977 = vmatpush2.bf16.msra.mxu0 %v12598_v56  ;;  %v12692_v56 = vld [vmem:[#allocation7 + $0x105c] ss:$72 sps:$4 sm:$0xff]  }
 0x142   : > { %6018 = vmatpush2.bf16.msra.mxu1 %v12601_v57  ;;  %5978 = vmatprep.subr.bf16.mxu0 %v12606_v58  ;;  %v12695_v57 = vld [vmem:[#allocation7 + $0x195c] ss:$72 sps:$4 sm:$0xff]   ;;  %v12690_v58 = vld [vmem:[#allocation7 + $0x1058] ss:$72 sps:$4 sm:$0xff]  }
 0x143   : > { %6019 = vmatprep.subr.bf16.mxu1 %v12609_v59  ;;  %v12693_v59 = vld [vmem:[#allocation7 + $0x1958] ss:$72 sps:$4 sm:$0xff]  }
 0x145   : > { %5979 = vmatpush2.bf16.msra.mxu0 %v12604_v60  ;;  %v12698_v60 = vld [vmem:[#allocation7 + $0xfcc] ss:$72 sps:$4 sm:$0xff]  }
 0x146   : > { %6020 = vmatpush2.bf16.msra.mxu1 %v12607_v61  ;;  %5980 = vmatprep.subr.bf16.mxu0 %v12612_v62  ;;  %v12701_v61 = vld [vmem:[#allocation7 + $0x18cc] ss:$72 sps:$4 sm:$0xff]   ;;  %v12696_v62 = vld [vmem:[#allocation7 + $0xfc8] ss:$72 sps:$4 sm:$0xff]  }
 0x147   : > { %6021 = vmatprep.subr.bf16.mxu1 %v12615_v63  ;;  %v12699_v63 = vld [vmem:[#allocation7 + $0x18c8] ss:$72 sps:$4 sm:$0xff]  }
 0x149   : > { %5981 = vmatpush2.bf16.msra.mxu0 %v12610_v0  ;;  %v12704_v0 = vld [vmem:[#allocation7 + $0xf3c] ss:$72 sps:$4 sm:$0xff]  }
 0x14a   : > { %6022 = vmatpush2.bf16.msra.mxu1 %v12613_v1  ;;  %5982 = vmatprep.subr.bf16.mxu0 %v12618_v2  ;;  %v12707_v1 = vld [vmem:[#allocation7 + $0x183c] ss:$72 sps:$4 sm:$0xff]   ;;  %v12702_v2 = vld [vmem:[#allocation7 + $0xf38] ss:$72 sps:$4 sm:$0xff]  }
 0x14b   : > { %6023 = vmatprep.subr.bf16.mxu1 %v12621_v3  ;;  %v12705_v3 = vld [vmem:[#allocation7 + $0x1838] ss:$72 sps:$4 sm:$0xff]  }
 0x14d   : > { %5983 = vmatpush2.bf16.msra.mxu0 %v12616_v4  ;;  %v12710_v4 = vld [vmem:[#allocation7 + $0xeac] ss:$72 sps:$4 sm:$0xff]  }
 0x14e   : > { %6024 = vmatpush2.bf16.msra.mxu1 %v12619_v5  ;;  %5984 = vmatprep.subr.bf16.mxu0 %v12624_v8  ;;  %v12713_v5 = vld [vmem:[#allocation7 + $0x17ac] ss:$72 sps:$4 sm:$0xff]   ;;  %v12708_v8 = vld [vmem:[#allocation7 + $0xea8] ss:$72 sps:$4 sm:$0xff]  }
 0x14f   : > { %6025 = vmatprep.subr.bf16.mxu1 %v12627_v9  ;;  %v12711_v9 = vld [vmem:[#allocation7 + $0x17a8] ss:$72 sps:$4 sm:$0xff]  }
 0x151   : > { %5985 = vmatpush2.bf16.msra.mxu0 %v12622_v10  ;;  %v12716_v10 = vld [vmem:[#allocation7 + $0xe1c] ss:$72 sps:$4 sm:$0xff]  }
 0x152   : > { %6026 = vmatpush2.bf16.msra.mxu1 %v12625_v11  ;;  %6036 = vmatprep.subr.bf16.mxu0 %v12632_v12  ;;  %v12719_v11 = vld [vmem:[#allocation7 + $0x171c] ss:$72 sps:$4 sm:$0xff]   ;;  %v12714_v12 = vld [vmem:[#allocation7 + $0xe18] ss:$72 sps:$4 sm:$0xff]  }
 0x153   : > { %6077 = vmatprep.subr.bf16.mxu1 %v12635_v13  ;;  %v12717_v13 = vld [vmem:[#allocation7 + $0x1718] ss:$72 sps:$4 sm:$0xff]  }
 0x154   : > { %5987 = vmatmul.mubr.bf16.vlgmr.msra.gmra.mxu0 %v14996_v14 }
 0x155   : > { %6028 = vmatmul.mubr.bf16.vlgmr.msra.gmra.mxu1 %v14979_v6  ;;  %6037 = vmatpush1.bf16.msra.mxu0 %v12630_v15  ;;  %v12722_v15 = vld [vmem:[#allocation7 + $0xd8c] ss:$72 sps:$4 sm:$0xff]  }
 0x156   : > { %6078 = vmatpush1.bf16.msra.mxu1 %v12633_v16  ;;  %6038 = vmatprep.subr.bf16.mxu0 %v12638_v17  ;;  %v12725_v16 = vld [vmem:[#allocation7 + $0x168c] ss:$72 sps:$4 sm:$0xff]   ;;  %v12720_v17 = vld [vmem:[#allocation7 + $0xd88] ss:$72 sps:$4 sm:$0xff]  }
 0x157   : > { %6079 = vmatprep.subr.bf16.mxu1 %v12641_v18  ;;  %6068 = vmatprep.mubr.bf16.mxu0 %v14975_v51  ;;  %v12723_v18 = vld [vmem:[#allocation7 + $0x1688] ss:$72 sps:$4 sm:$0xff]  }
 0x158   : > { %6109 = vmatprep.mubr.bf16.mxu1 %v14991_v34 }
 0x159   : > { %6039 = vmatpush1.bf16.msra.mxu0 %v12636_v19  ;;  %v12728_v19 = vld [vmem:[#allocation7 + $0x404] ss:$72 sps:$4 sm:$0xff]  }
 0x15a   : > { %6080 = vmatpush1.bf16.msra.mxu1 %v12639_v20  ;;  %6040 = vmatprep.subr.bf16.mxu0 %v12644_v21  ;;  %v12731_v20 = vld [vmem:[#allocation7 + $0xd04] ss:$72 sps:$4 sm:$0xff]   ;;  %v12726_v21 = vld [vmem:[#allocation7 + $0x400] ss:$72 sps:$4 sm:$0xff]  }
 0x15b   : > { %6081 = vmatprep.subr.bf16.mxu1 %v12647_v22  ;;  %v12729_v22 = vld [vmem:[#allocation7 + $0xd00] ss:$72 sps:$4 sm:$0xff]  }
 0x15d   : > { %6041 = vmatpush1.bf16.msra.mxu0 %v12642_v23  ;;  %v12734_v23 = vld [vmem:[#allocation7 + $0x374] ss:$72 sps:$4 sm:$0xff]  }
 0x15e   : > { %6082 = vmatpush1.bf16.msra.mxu1 %v12645_v24  ;;  %6042 = vmatprep.subr.bf16.mxu0 %v12650_v25  ;;  %v12737_v24 = vld [vmem:[#allocation7 + $0xc74] ss:$72 sps:$4 sm:$0xff]   ;;  %v12732_v25 = vld [vmem:[#allocation7 + $0x370] ss:$72 sps:$4 sm:$0xff]  }
 0x15f   : > { %6083 = vmatprep.subr.bf16.mxu1 %v12653_v26  ;;  %v12735_v26 = vld [vmem:[#allocation7 + $0xc70] ss:$72 sps:$4 sm:$0xff]  }
 0x161   : > { %6043 = vmatpush1.bf16.msra.mxu0 %v12648_v27  ;;  %v12740_v27 = vld [vmem:[#allocation7 + $0x2e4] ss:$72 sps:$4 sm:$0xff]  }
 0x162   : > { %6084 = vmatpush1.bf16.msra.mxu1 %v12651_v28  ;;  %6044 = vmatprep.subr.bf16.mxu0 %v12656_v29  ;;  %v12743_v28 = vld [vmem:[#allocation7 + $0xbe4] ss:$72 sps:$4 sm:$0xff]   ;;  %v12738_v29 = vld [vmem:[#allocation7 + $0x2e0] ss:$72 sps:$4 sm:$0xff]  }
 0x163   : > { %6085 = vmatprep.subr.bf16.mxu1 %v12659_v30  ;;  %v12741_v30 = vld [vmem:[#allocation7 + $0xbe0] ss:$72 sps:$4 sm:$0xff]  }
 0x165   : > { %6045 = vmatpush1.bf16.msra.mxu0 %v12654_v31  ;;  %v12746_v31 = vld [vmem:[#allocation7 + $0x254] ss:$72 sps:$4 sm:$0xff]  }
 0x166   : > { %6086 = vmatpush1.bf16.msra.mxu1 %v12657_v32  ;;  %6046 = vmatprep.subr.bf16.mxu0 %v12662_v33  ;;  %v12749_v32 = vld [vmem:[#allocation7 + $0xb54] ss:$72 sps:$4 sm:$0xff]   ;;  %v12744_v33 = vld [vmem:[#allocation7 + $0x250] ss:$72 sps:$4 sm:$0xff]  }
 0x167   : > { %6087 = vmatprep.subr.bf16.mxu1 %v12665_v35  ;;  %v12747_v35 = vld [vmem:[#allocation7 + $0xb50] ss:$72 sps:$4 sm:$0xff]  }
 0x169   : > { %6047 = vmatpush1.bf16.msra.mxu0 %v12660_v36  ;;  %v12752_v36 = vld [vmem:[#allocation7 + $0x1c4] ss:$72 sps:$4 sm:$0xff]  }
 0x16a   : > { %6088 = vmatpush1.bf16.msra.mxu1 %v12663_v37  ;;  %6048 = vmatprep.subr.bf16.mxu0 %v12668_v38  ;;  %v12755_v37 = vld [vmem:[#allocation7 + $0xac4] ss:$72 sps:$4 sm:$0xff]   ;;  %v12750_v38 = vld [vmem:[#allocation7 + $0x1c0] ss:$72 sps:$4 sm:$0xff]  }
 0x16b   : > { %6089 = vmatprep.subr.bf16.mxu1 %v12671_v39  ;;  %v12753_v39 = vld [vmem:[#allocation7 + $0xac0] ss:$72 sps:$4 sm:$0xff]  }
 0x16d   : > { %6049 = vmatpush1.bf16.msra.mxu0 %v12666_v40  ;;  %v12758_v40 = vld [vmem:[#allocation7 + $0x134] ss:$72 sps:$4 sm:$0xff]  }
 0x16e   : > { %6090 = vmatpush1.bf16.msra.mxu1 %v12669_v41  ;;  %6050 = vmatprep.subr.bf16.mxu0 %v12674_v42  ;;  %v12761_v41 = vld [vmem:[#allocation7 + $0xa34] ss:$72 sps:$4 sm:$0xff]   ;;  %v12756_v42 = vld [vmem:[#allocation7 + $0x130] ss:$72 sps:$4 sm:$0xff]  }
 0x16f   : > { %6091 = vmatprep.subr.bf16.mxu1 %v12677_v43  ;;  %v12759_v43 = vld [vmem:[#allocation7 + $0xa30] ss:$72 sps:$4 sm:$0xff]  }
 0x171   : > { %6051 = vmatpush1.bf16.msra.mxu0 %v12672_v44  ;;  %v12764_v44 = vld [vmem:[#allocation7 + $0xa4] ss:$72 sps:$4 sm:$0xff]  }
 0x172   : > { %6092 = vmatpush1.bf16.msra.mxu1 %v12675_v45  ;;  %6052 = vmatprep.subr.bf16.mxu0 %v12680_v46  ;;  %v12767_v45 = vld [vmem:[#allocation7 + $0x9a4] ss:$72 sps:$4 sm:$0xff]   ;;  %v12762_v46 = vld [vmem:[#allocation7 + $0xa0] ss:$72 sps:$4 sm:$0xff]  }
 0x173   : > { %6093 = vmatprep.subr.bf16.mxu1 %v12683_v48  ;;  %v12765_v48 = vld [vmem:[#allocation7 + $0x9a0] ss:$72 sps:$4 sm:$0xff]  }
 0x175   : > { %6053 = vmatpush2.bf16.msra.mxu0 %v12678_v49  ;;  %v12770_v49 = vld [vmem:[#allocation7 + $0x14] ss:$72 sps:$4 sm:$0xff]  }
 0x176   : > { %6094 = vmatpush2.bf16.msra.mxu1 %v12681_v50  ;;  %6054 = vmatprep.subr.bf16.mxu0 %v12686_v52  ;;  %v12773_v50 = vld [vmem:[#allocation7 + $0x914] ss:$72 sps:$4 sm:$0xff]   ;;  %v12768_v52 = vld [vmem:[#allocation7 + $0x10] ss:$72 sps:$4 sm:$0xff]  }
 0x177   : > { %6095 = vmatprep.subr.bf16.mxu1 %v12689_v53  ;;  %v12771_v53 = vld [vmem:[#allocation7 + $0x910] ss:$72 sps:$4 sm:$0xff]  }
 0x179   : > { %6055 = vmatpush2.bf16.msra.mxu0 %v12684_v54  ;;  %v12776_v54 = vld [vmem:[#allocation7 + $0x884] ss:$72 sps:$4 sm:$0xff]  }
 0x17a   : > { %6096 = vmatpush2.bf16.msra.mxu1 %v12687_v55  ;;  %6056 = vmatprep.subr.bf16.mxu0 %v12692_v56  ;;  %v12779_v55 = vld [vmem:[#allocation7 + $0x1184] ss:$72 sps:$4 sm:$0xff]   ;;  %v12774_v56 = vld [vmem:[#allocation7 + $0x880] ss:$72 sps:$4 sm:$0xff]  }
 0x17b   : > { %6097 = vmatprep.subr.bf16.mxu1 %v12695_v57  ;;  %v12777_v57 = vld [vmem:[#allocation7 + $0x1180] ss:$72 sps:$4 sm:$0xff]  }
 0x17d   : > { %6057 = vmatpush2.bf16.msra.mxu0 %v12690_v58  ;;  %v12782_v58 = vld [vmem:[#allocation7 + $0x7f4] ss:$72 sps:$4 sm:$0xff]  }
 0x17e   : > { %6098 = vmatpush2.bf16.msra.mxu1 %v12693_v59  ;;  %6058 = vmatprep.subr.bf16.mxu0 %v12698_v60  ;;  %v12785_v59 = vld [vmem:[#allocation7 + $0x10f4] ss:$72 sps:$4 sm:$0xff]   ;;  %v12780_v60 = vld [vmem:[#allocation7 + $0x7f0] ss:$72 sps:$4 sm:$0xff]  }
 0x17f   : > { %6099 = vmatprep.subr.bf16.mxu1 %v12701_v61  ;;  %v12783_v61 = vld [vmem:[#allocation7 + $0x10f0] ss:$72 sps:$4 sm:$0xff]  }
 0x181   : > { %6059 = vmatpush2.bf16.msra.mxu0 %v12696_v62  ;;  %v12788_v62 = vld [vmem:[#allocation7 + $0x764] ss:$72 sps:$4 sm:$0xff]  }
 0x182   : > { %6100 = vmatpush2.bf16.msra.mxu1 %v12699_v63  ;;  %6060 = vmatprep.subr.bf16.mxu0 %v12704_v0  ;;  %v12791_v63 = vld [vmem:[#allocation7 + $0x1064] ss:$72 sps:$4 sm:$0xff]   ;;  %v12786_v0 = vld [vmem:[#allocation7 + $0x760] ss:$72 sps:$4 sm:$0xff]  }
 0x183   : > { %6101 = vmatprep.subr.bf16.mxu1 %v12707_v1  ;;  %v12789_v1 = vld [vmem:[#allocation7 + $0x1060] ss:$72 sps:$4 sm:$0xff]  }
 0x185   : > { %6061 = vmatpush2.bf16.msra.mxu0 %v12702_v2  ;;  %v12794_v2 = vld [vmem:[#allocation7 + $0x6d4] ss:$72 sps:$4 sm:$0xff]  }
 0x186   : > { %6102 = vmatpush2.bf16.msra.mxu1 %v12705_v3  ;;  %6062 = vmatprep.subr.bf16.mxu0 %v12710_v4  ;;  %v12797_v3 = vld [vmem:[#allocation7 + $0xfd4] ss:$72 sps:$4 sm:$0xff]   ;;  %v12792_v4 = vld [vmem:[#allocation7 + $0x6d0] ss:$72 sps:$4 sm:$0xff]  }
 0x187   : > { %6103 = vmatprep.subr.bf16.mxu1 %v12713_v5  ;;  %v12795_v5 = vld [vmem:[#allocation7 + $0xfd0] ss:$72 sps:$4 sm:$0xff]  }
 0x189   : > { %6063 = vmatpush2.bf16.msra.mxu0 %v12708_v8  ;;  %v12800_v8 = vld [vmem:[#allocation7 + $0x644] ss:$72 sps:$4 sm:$0xff]  }
 0x18a   : > { %6104 = vmatpush2.bf16.msra.mxu1 %v12711_v9  ;;  %6064 = vmatprep.subr.bf16.mxu0 %v12716_v10  ;;  %v12803_v9 = vld [vmem:[#allocation7 + $0xf44] ss:$72 sps:$4 sm:$0xff]   ;;  %v12798_v10 = vld [vmem:[#allocation7 + $0x640] ss:$72 sps:$4 sm:$0xff]  }
 0x18b   : > { %6105 = vmatprep.subr.bf16.mxu1 %v12719_v11  ;;  %v12801_v11 = vld [vmem:[#allocation7 + $0xf40] ss:$72 sps:$4 sm:$0xff]  }
 0x18d   : > { %6065 = vmatpush2.bf16.msra.mxu0 %v12714_v12  ;;  %v12806_v12 = vld [vmem:[#allocation7 + $0x5b4] ss:$72 sps:$4 sm:$0xff]  }
 0x18e   : > { %6106 = vmatpush2.bf16.msra.mxu1 %v12717_v13  ;;  %6066 = vmatprep.subr.bf16.mxu0 %v12722_v15  ;;  %v12809_v13 = vld [vmem:[#allocation7 + $0xeb4] ss:$72 sps:$4 sm:$0xff]   ;;  %v12804_v15 = vld [vmem:[#allocation7 + $0x5b0] ss:$72 sps:$4 sm:$0xff]  }
 0x18f   : > { %6107 = vmatprep.subr.bf16.mxu1 %v12725_v16  ;;  %v12807_v16 = vld [vmem:[#allocation7 + $0xeb0] ss:$72 sps:$4 sm:$0xff]  }
 0x191   : > { %6067 = vmatpush2.bf16.msra.mxu0 %v12720_v17  ;;  %v12812_v17 = vld [vmem:[#allocation7 + $0x524] ss:$72 sps:$4 sm:$0xff]  }
 0x192   : > { %6108 = vmatpush2.bf16.msra.mxu1 %v12723_v18  ;;  %6118 = vmatprep.subr.bf16.mxu0 %v12728_v19  ;;  %v1441_v18 = vlaneseq  ;;  %v12815_v19 = vld [vmem:[#allocation7 + $0xe24] ss:$72 sps:$4 sm:$0xff]  }
 0x193   : > { %6159 = vmatprep.subr.bf16.mxu1 %v12731_v20  ;;  %v12810_v20 = vld [vmem:[#allocation7 + $0x520] ss:$72 sps:$4 sm:$0xff]  }
 0x194   : > { %6069 = vmatmul.mubr.bf16.vlgmr.msra.gmra.mxu0 %v14981_v7 }
 0x195   : > { %6110 = vmatmul.mubr.bf16.vlgmr.msra.gmra.mxu1 %v14996_v14  ;;  %6119 = vmatpush1.bf16.msra.mxu0 %v12726_v21  ;;  %v12813_v21 = vld [vmem:[#allocation7 + $0xe20] ss:$72 sps:$4 sm:$0xff]  }
 0x196   : > { %6160 = vmatpush1.bf16.msra.mxu1 %v12729_v22  ;;  %6120 = vmatprep.subr.bf16.mxu0 %v12734_v23  ;;  %v12818_v22 = vld [vmem:[#allocation7 + $0x494] ss:$72 sps:$4 sm:$0xff]   ;;  %v15006_v23 = vshrl.u32 %v1441_v18, 7  ;;  %v12872_v18 = vld [vmem:[#allocation7 + $0x1a84] ss:$72 sps:$4 sm:$0xff]  }
 0x197   : > { %6161 = vmatprep.subr.bf16.mxu1 %v12737_v24  ;;  %6150 = vmatprep.mubr.bf16.mxu0 %v14972_v47  ;;  %v12821_v24 = vld [vmem:[#allocation7 + $0xd94] ss:$72 sps:$4 sm:$0xff]  }
 0x198   : > { %6191 = vmatprep.mubr.bf16.mxu1 %v14975_v51 }
 0x199   : > { %6121 = vmatpush1.bf16.msra.mxu0 %v12732_v25  ;;  %v12816_v25 = vld [vmem:[#allocation7 + $0x490] ss:$72 sps:$4 sm:$0xff]  }
 0x19a   : > { %6162 = vmatpush1.bf16.msra.mxu1 %v12735_v26  ;;  %6122 = vmatprep.subr.bf16.mxu0 %v12740_v27  ;;  %v12819_v26 = vld [vmem:[#allocation7 + $0xd90] ss:$72 sps:$4 sm:$0xff]   ;;  %v1435_v27 = vld [vmem:[#allocation8] sm:$0xff] }
 0x19b   : > { %6163 = vmatprep.subr.bf16.mxu1 %v12743_v28  ;;  %v15009_v28 = vsub.s32 0, %v15006_v23 }
 0x19d   : > { %6123 = vmatpush1.bf16.msra.mxu0 %v12738_v29  ;;  %v12824_v29 = vld [vmem:[#allocation7 + $0x1604] ss:$72 sps:$4 sm:$0xff]  }
 0x19e   : > { %6164 = vmatpush1.bf16.msra.mxu1 %v12741_v30  ;;  %6124 = vmatprep.subr.bf16.mxu0 %v12746_v31  ;;  %v12827_v30 = vld [vmem:[#allocation7 + $0x40c] ss:$72 sps:$4 sm:$0xff]   ;;  %v15012_v31 = vsub.s32 1, %v15006_v23 }
 0x19f   : > { %6165 = vmatprep.subr.bf16.mxu1 %v12749_v32  ;;  %v12822_v32 = vld [vmem:[#allocation7 + $0x1600] ss:$72 sps:$4 sm:$0xff]  }
 0x1a1   : > { %6125 = vmatpush1.bf16.msra.mxu0 %v12744_v33  ;;  %v12825_v33 = vld [vmem:[#allocation7 + $0x408] ss:$72 sps:$4 sm:$0xff]  }
 0x1a2   : > { %6166 = vmatpush1.bf16.msra.mxu1 %v12747_v35  ;;  %6126 = vmatprep.subr.bf16.mxu0 %v12752_v36  ;;  %v1444_v35 = vrot.slane %v1435_v27, %v15009_v28  ;;  %v12830_v36 = vld [vmem:[#allocation7 + $0x1574] ss:$72 sps:$4 sm:$0xff]  }
 0x1a3   : > { %6167 = vmatprep.subr.bf16.mxu1 %v12755_v37  ;;  %v12833_v37 = vld [vmem:[#allocation7 + $0x37c] ss:$72 sps:$4 sm:$0xff]  }
 0x1a5   : > { %6127 = vmatpush1.bf16.msra.mxu0 %v12750_v38  ;;  %v1448_v38 = vrot.slane %v1435_v27, %v15012_v31  ;;  %v12884_v27 = vld [vmem:[#allocation7 + $0x1964] ss:$72 sps:$4 sm:$0xff]  }
 0x1a6   : > { %6168 = vmatpush1.bf16.msra.mxu1 %v12753_v39  ;;  %6128 = vmatprep.subr.bf16.mxu0 %v12758_v40 }
 0x1a7   : > { %6169 = vmatprep.subr.bf16.mxu1 %v12761_v41  ;;  %v12828_v41 = vld [vmem:[#allocation7 + $0x1570] ss:$72 sps:$4 sm:$0xff]  }
 0x1a9   : > { %6129 = vmatpush1.bf16.msra.mxu0 %v12756_v42  ;;  %v12831_v42 = vld [vmem:[#allocation7 + $0x378] ss:$72 sps:$4 sm:$0xff]  }
 0x1aa   : > { %6170 = vmatpush1.bf16.msra.mxu1 %v12759_v43  ;;  %6130 = vmatprep.subr.bf16.mxu0 %v12764_v44 }
 0x1ab   : > { %6171 = vmatprep.subr.bf16.mxu1 %v12767_v45 }
 0x1ad   : > { %6131 = vmatpush1.bf16.msra.mxu0 %v12762_v46  ;;  %v12836_v46 = vld [vmem:[#allocation7 + $0x14e4] ss:$72 sps:$4 sm:$0xff]  }
 0x1ae   : > { %6172 = vmatpush1.bf16.msra.mxu1 %v12765_v48  ;;  %6132 = vmatprep.subr.bf16.mxu0 %v12770_v49  ;;  %v12839_v48 = vld [vmem:[#allocation7 + $0x2ec] ss:$72 sps:$4 sm:$0xff]  }
 0x1af   : > { %6173 = vmatprep.subr.bf16.mxu1 %v12773_v50 }
 0x1b1   : > { %6133 = vmatpush1.bf16.msra.mxu0 %v12768_v52  ;;  %v12834_v52 = vld [vmem:[#allocation7 + $0x14e0] ss:$72 sps:$4 sm:$0xff]  }
 0x1b2   : > { %6174 = vmatpush1.bf16.msra.mxu1 %v12771_v53  ;;  %6134 = vmatprep.subr.bf16.mxu0 %v12776_v54  ;;  %v12837_v53 = vld [vmem:[#allocation7 + $0x2e8] ss:$72 sps:$4 sm:$0xff]  }
 0x1b3   : > { %6175 = vmatprep.subr.bf16.mxu1 %v12779_v55 }
 0x1b5   : > { %6135 = vmatpush2.bf16.msra.mxu0 %v12774_v56 }
 0x1b6   : > { %6176 = vmatpush2.bf16.msra.mxu1 %v12777_v57  ;;  %6136 = vmatprep.subr.bf16.mxu0 %v12782_v58  ;;  %v12842_v58 = vld [vmem:[#allocation7 + $0x1454] ss:$72 sps:$4 sm:$0xff]  }
 0x1b7   : > { %6177 = vmatprep.subr.bf16.mxu1 %v12785_v59  ;;  %v12845_v59 = vld [vmem:[#allocation7 + $0x25c] ss:$72 sps:$4 sm:$0xff]  }
 0x1b9   : > { %6137 = vmatpush2.bf16.msra.mxu0 %v12780_v60 }
 0x1ba   : > { %6178 = vmatpush2.bf16.msra.mxu1 %v12783_v61  ;;  %6138 = vmatprep.subr.bf16.mxu0 %v12788_v62  ;;  %v12840_v61 = vld [vmem:[#allocation7 + $0x1450] ss:$72 sps:$4 sm:$0xff]  }
 0x1bb   : > { %6179 = vmatprep.subr.bf16.mxu1 %v12791_v63  ;;  %v12843_v62 = vld [vmem:[#allocation7 + $0x258] ss:$72 sps:$4 sm:$0xff]   ;;  %v12848_v63 = vld [vmem:[#allocation7 + $0x13c4] ss:$72 sps:$4 sm:$0xff]  }
 0x1bd   : > { %6139 = vmatpush2.bf16.msra.mxu0 %v12786_v0  ;;  %v12851_v0 = vld [vmem:[#allocation7 + $0x1cc] ss:$72 sps:$4 sm:$0xff]  }
 0x1be   : > { %6180 = vmatpush2.bf16.msra.mxu1 %v12789_v1  ;;  %6140 = vmatprep.subr.bf16.mxu0 %v12794_v2  ;;  %v12846_v1 = vld [vmem:[#allocation7 + $0x13c0] ss:$72 sps:$4 sm:$0xff]  }
 0x1bf   : > { %6181 = vmatprep.subr.bf16.mxu1 %v12797_v3  ;;  %v12849_v2 = vld [vmem:[#allocation7 + $0x1c8] ss:$72 sps:$4 sm:$0xff]   ;;  %v12854_v3 = vld [vmem:[#allocation7 + $0x1334] ss:$72 sps:$4 sm:$0xff]  }
 0x1c1   : > { %6141 = vmatpush2.bf16.msra.mxu0 %v12792_v4  ;;  %v12857_v4 = vld [vmem:[#allocation7 + $0x13c] ss:$72 sps:$4 sm:$0xff]  }
 0x1c2   : > { %6182 = vmatpush2.bf16.msra.mxu1 %v12795_v5  ;;  %6142 = vmatprep.subr.bf16.mxu0 %v12800_v8  ;;  %v12852_v5 = vld [vmem:[#allocation7 + $0x1330] ss:$72 sps:$4 sm:$0xff]  }
 0x1c3   : > { %6183 = vmatprep.subr.bf16.mxu1 %v12803_v9  ;;  %v12855_v8 = vld [vmem:[#allocation7 + $0x138] ss:$72 sps:$4 sm:$0xff]   ;;  %v12860_v9 = vld [vmem:[#allocation7 + $0x12a4] ss:$72 sps:$4 sm:$0xff]  }
 0x1c5   : > { %6143 = vmatpush2.bf16.msra.mxu0 %v12798_v10  ;;  %v12863_v10 = vld [vmem:[#allocation7 + $0xac] ss:$72 sps:$4 sm:$0xff]  }
 0x1c6   : > { %6184 = vmatpush2.bf16.msra.mxu1 %v12801_v11  ;;  %6144 = vmatprep.subr.bf16.mxu0 %v12806_v12  ;;  %v12858_v11 = vld [vmem:[#allocation7 + $0x12a0] ss:$72 sps:$4 sm:$0xff]  }
 0x1c7   : > { %6185 = vmatprep.subr.bf16.mxu1 %v12809_v13  ;;  %v12861_v12 = vld [vmem:[#allocation7 + $0xa8] ss:$72 sps:$4 sm:$0xff]   ;;  %v12866_v13 = vld [vmem:[#allocation7 + $0x1214] ss:$72 sps:$4 sm:$0xff]  }
 0x1c9   : > { %6145 = vmatpush2.bf16.msra.mxu0 %v12804_v15  ;;  %v12869_v15 = vld [vmem:[#allocation7 + $0x1c] ss:$72 sps:$4 sm:$0xff]  }
 0x1ca   : > { %6186 = vmatpush2.bf16.msra.mxu1 %v12807_v16  ;;  %6146 = vmatprep.subr.bf16.mxu0 %v12812_v17  ;;  %v12864_v16 = vld [vmem:[#allocation7 + $0x1210] ss:$72 sps:$4 sm:$0xff]  }
 0x1cb   : > { %6187 = vmatprep.subr.bf16.mxu1 %v12815_v19  ;;  %v12867_v17 = vld [vmem:[#allocation7 + $0x18] ss:$72 sps:$4 sm:$0xff]   ;;  %v12875_v19 = vld [vmem:[#allocation7 + $0x88c] ss:$72 sps:$4 sm:$0xff]  }
 0x1cd   : > { %6147 = vmatpush2.bf16.msra.mxu0 %v12810_v20  ;;  %v12870_v20 = vld [vmem:[#allocation7 + $0x1a80] ss:$72 sps:$4 sm:$0xff]  }
 0x1ce   : > { %6188 = vmatpush2.bf16.msra.mxu1 %v12813_v21  ;;  %6148 = vmatprep.subr.bf16.mxu0 %v12818_v22  ;;  %v12873_v21 = vld [vmem:[#allocation7 + $0x888] ss:$72 sps:$4 sm:$0xff]   ;;  %v12878_v22 = vld [vmem:[#allocation7 + $0x19f4] ss:$72 sps:$4 sm:$0xff]  }
 0x1cf   : > { %6189 = vmatprep.subr.bf16.mxu1 %v12821_v24  ;;  %v12881_v24 = vld [vmem:[#allocation7 + $0x7fc] ss:$72 sps:$4 sm:$0xff]  }
 0x1d1   : > { %6149 = vmatpush2.bf16.msra.mxu0 %v12816_v25  ;;  %v12876_v25 = vld [vmem:[#allocation7 + $0x19f0] ss:$72 sps:$4 sm:$0xff]  }
 0x1d2   : > { %6190 = vmatpush2.bf16.msra.mxu1 %v12819_v26  ;;  %6200 = vmatprep.subr.bf16.mxu0 %v12824_v29  ;;  %v12879_v26 = vld [vmem:[#allocation7 + $0x7f8] ss:$72 sps:$4 sm:$0xff]   ;;  %v12887_v29 = vld [vmem:[#allocation7 + $0x76c] ss:$72 sps:$4 sm:$0xff]  }
 0x1d3   : > { %6241 = vmatprep.subr.bf16.mxu1 %v12827_v30  ;;  %v12882_v30 = vld [vmem:[#allocation7 + $0x1960] ss:$72 sps:$4 sm:$0xff]  }
 0x1d4   : > { %v5906_v39 = vpop.f32.mrf.mxu0  ;;  %6151 = vmatmul.mubr.bf16.vlgmr.msra.gmra.mxu0 %v14979_v6 }
 0x1d5   : > { %6192 = vmatmul.mubr.bf16.vlgmr.msra.gmra.mxu1 %v14981_v7  ;;  %v5947_v40 = vpop.f32.mrf.mxu1  ;;  %v5907_v43 = vadd.f32 %v5906_v39, %v1444_v35  ;;  %6201 = vmatpush1.bf16.msra.mxu0 %v12822_v32  ;;  %v12885_v32 = vld [vmem:[#allocation7 + $0x768] ss:$72 sps:$4 sm:$0xff]   ;;  %v12893_v35 = vld [vmem:[#allocation7 + $0x6dc] ss:$72 sps:$4 sm:$0xff]   ;;  %v12899_v39 = vld [vmem:[#allocation7 + $0x64c] ss:$72 sps:$4 sm:$0xff]  }
 0x1d6   : > { %6242 = vmatpush1.bf16.msra.mxu1 %v12825_v33  ;;  %v5908_v44 = vpop.f32.mrf.mxu0  ;;  %6202 = vmatprep.subr.bf16.mxu0 %v12830_v36  ;;  %v12890_v33 = vld [vmem:[#allocation7 + $0x18d4] ss:$72 sps:$4 sm:$0xff]   ;;  %v12888_v36 = vld [vmem:[#allocation7 + $0x18d0] ss:$72 sps:$4 sm:$0xff]  }
 0x1d7   : > { %v5949_v45 = vpop.f32.mrf.mxu1  ;;  %6243 = vmatprep.subr.bf16.mxu1 %v12833_v37  ;;  %v5909_v49 = vadd.f32 %v5908_v44, %v1448_v38  ;;  %v15018_v50 = vadd.f32 %v5947_v40, %v5907_v43  ;;  %6232 = vmatprep.mubr.bf16.mxu0 %v14991_v34  ;;  %v12891_v37 = vld [vmem:[#allocation7 + $0x6d8] ss:$72 sps:$4 sm:$0xff]   ;;  %v12896_v38 = vld [vmem:[#allocation7 + $0x1844] ss:$72 sps:$4 sm:$0xff]  }
 0x1d8   : > { %6273 = vmatprep.mubr.bf16.mxu1 %v14972_v47  ;;  %v5910_v54 = vpop.f32.mrf.mxu0  ;;  %v12894_v40 = vld [vmem:[#allocation7 + $0x1840] ss:$72 sps:$4 sm:$0xff]   ;;  %v12905_v43 = vld [vmem:[#allocation7 + $0x5bc] ss:$72 sps:$4 sm:$0xff]   ;;  %v12900_v44 = vld [vmem:[#allocation7 + $0x17b0] ss:$72 sps:$4 sm:$0xff]  }
 0x1d9   : > { %v5951_v55 = vpop.f32.mrf.mxu1  ;;  %v15022_v56 = vadd.f32 %v5949_v45, %v5909_v49  ;;  %6203 = vmatpush1.bf16.msra.mxu0 %v12828_v41  ;;  %v12897_v41 = vld [vmem:[#allocation7 + $0x648] ss:$72 sps:$4 sm:$0xff]   ;;  %v12903_v45 = vld [vmem:[#allocation7 + $0x5b8] ss:$72 sps:$4 sm:$0xff]   ;;  %v12917_v54 = vld [vmem:[#allocation7 + $0x49c] ss:$72 sps:$4 sm:$0xff]  }
 0x1da   : > { %6244 = vmatpush1.bf16.msra.mxu1 %v12831_v42  ;;  %v5911_v57 = vpop.f32.mrf.mxu0  ;;  %6204 = vmatprep.subr.bf16.mxu0 %v12836_v46  ;;  %v12902_v42 = vld [vmem:[#allocation7 + $0x17b4] ss:$72 sps:$4 sm:$0xff]   ;;  %v12908_v46 = vld [vmem:[#allocation7 + $0x1724] ss:$72 sps:$4 sm:$0xff]   ;;  %v12906_v49 = vld [vmem:[#allocation7 + $0x1720] ss:$72 sps:$4 sm:$0xff]  }
 0x1db   : > { %6245 = vmatprep.subr.bf16.mxu1 %v12839_v48  ;;  %v5952_v60 = vpop.f32.mrf.mxu1  ;;  %v12911_v48 = vld [vmem:[#allocation7 + $0x52c] ss:$72 sps:$4 sm:$0xff]   ;;  %v12912_v55 = vld [vmem:[#allocation7 + $0x1690] ss:$72 sps:$4 sm:$0xff]  }
 0x1dc   : > { %v12915_v57 = vld [vmem:[#allocation7 + $0x498] ss:$72 sps:$4 sm:$0xff]   ;;  %v12918_v60 = vld [vmem:[#allocation7 + $0xd08] ss:$72 sps:$4 sm:$0xff]  }
 0x1dd   : > { %6205 = vmatpush1.bf16.msra.mxu0 %v12834_v52  ;;  %v12909_v52 = vld [vmem:[#allocation7 + $0x528] ss:$72 sps:$4 sm:$0xff]  }
 0x1de   : > { %6246 = vmatpush1.bf16.msra.mxu1 %v12837_v53  ;;  %6206 = vmatprep.subr.bf16.mxu0 %v12842_v58  ;;  %v12914_v53 = vld [vmem:[#allocation7 + $0x1694] ss:$72 sps:$4 sm:$0xff]  }
 0x1df   : > { %6247 = vmatprep.subr.bf16.mxu1 %v12845_v59  ;;  %v12920_v58 = vld [vmem:[#allocation7 + $0xd0c] ss:$72 sps:$4 sm:$0xff]  }
 0x1e0   : > { %v12923_v59 = vld [vmem:[#allocation7 + $0x160c] ss:$72 sps:$4 sm:$0xff]  }
 0x1e1   : > { %6207 = vmatpush1.bf16.msra.mxu0 %v12840_v61  ;;  %v12921_v61 = vld [vmem:[#allocation7 + $0x1608] ss:$72 sps:$4 sm:$0xff]  }
 0x1e2   : > { %6248 = vmatpush1.bf16.msra.mxu1 %v12843_v62  ;;  %6208 = vmatprep.subr.bf16.mxu0 %v12848_v63  ;;  %v12926_v62 = vld [vmem:[#allocation7 + $0xc7c] ss:$72 sps:$4 sm:$0xff]  }
 0x1e3   : > { %6249 = vmatprep.subr.bf16.mxu1 %v12851_v0  ;;  %v12929_v63 = vld [vmem:[#allocation7 + $0x157c] ss:$72 sps:$4 sm:$0xff]   ;;  %v12924_v0 = vld [vmem:[#allocation7 + $0xc78] ss:$72 sps:$4 sm:$0xff]  }
 0x1e5   : > { %6209 = vmatpush1.bf16.msra.mxu0 %v12846_v1  ;;  %v12927_v1 = vld [vmem:[#allocation7 + $0x1578] ss:$72 sps:$4 sm:$0xff]  }
 0x1e6   : > { %6250 = vmatpush1.bf16.msra.mxu1 %v12849_v2  ;;  %6210 = vmatprep.subr.bf16.mxu0 %v12854_v3 }
 0x1e7   : > { %6251 = vmatprep.subr.bf16.mxu1 %v12857_v4 }
 0x1e9   : > { %6211 = vmatpush1.bf16.msra.mxu0 %v12852_v5 }
 0x1ea   : > { %6252 = vmatpush1.bf16.msra.mxu1 %v12855_v8  ;;  %6212 = vmatprep.subr.bf16.mxu0 %v12860_v9  ;;  %v12932_v8 = vld [vmem:[#allocation7 + $0xbec] ss:$72 sps:$4 sm:$0xff]  }
 0x1eb   : > { %6253 = vmatprep.subr.bf16.mxu1 %v12863_v10  ;;  %v12935_v9 = vld [vmem:[#allocation7 + $0x14ec] ss:$72 sps:$4 sm:$0xff]  }
 0x1ed   : > { %6213 = vmatpush1.bf16.msra.mxu0 %v12858_v11 }
 0x1ee   : > { %6254 = vmatpush1.bf16.msra.mxu1 %v12861_v12  ;;  %6214 = vmatprep.subr.bf16.mxu0 %v12866_v13  ;;  %v12930_v12 = vld [vmem:[#allocation7 + $0xbe8] ss:$72 sps:$4 sm:$0xff]  }
 0x1ef   : > { %6255 = vmatprep.subr.bf16.mxu1 %v12869_v15  ;;  %v12933_v13 = vld [vmem:[#allocation7 + $0x14e8] ss:$72 sps:$4 sm:$0xff]  }
 0x1f1   : > { %6215 = vmatpush1.bf16.msra.mxu0 %v12864_v16 }
 0x1f2   : > { %6256 = vmatpush1.bf16.msra.mxu1 %v12867_v17  ;;  %6216 = vmatprep.subr.bf16.mxu0 %v12872_v18  ;;  %v12938_v17 = vld [vmem:[#allocation7 + $0xb5c] ss:$72 sps:$4 sm:$0xff]  }
 0x1f3   : > { %6257 = vmatprep.subr.bf16.mxu1 %v12875_v19  ;;  %v12941_v18 = vld [vmem:[#allocation7 + $0x145c] ss:$72 sps:$4 sm:$0xff]  }
 0x1f5   : > { %6217 = vmatpush2.bf16.msra.mxu0 %v12870_v20  ;;  %v12939_v20 = vld [vmem:[#allocation7 + $0x1458] ss:$72 sps:$4 sm:$0xff]  }
 0x1f6   : > { %6258 = vmatpush2.bf16.msra.mxu1 %v12873_v21  ;;  %6218 = vmatprep.subr.bf16.mxu0 %v12878_v22  ;;  %v12944_v21 = vld [vmem:[#allocation7 + $0xacc] ss:$72 sps:$4 sm:$0xff]  }
 0x1f7   : > { %6259 = vmatprep.subr.bf16.mxu1 %v12881_v24  ;;  %v12947_v22 = vld [vmem:[#allocation7 + $0x13cc] ss:$72 sps:$4 sm:$0xff]   ;;  %v12942_v24 = vld [vmem:[#allocation7 + $0xac8] ss:$72 sps:$4 sm:$0xff]  }
 0x1f9   : > { %6219 = vmatpush2.bf16.msra.mxu0 %v12876_v25  ;;  %v12945_v25 = vld [vmem:[#allocation7 + $0x13c8] ss:$72 sps:$4 sm:$0xff]  }
 0x1fa   : > { %6260 = vmatpush2.bf16.msra.mxu1 %v12879_v26  ;;  %6220 = vmatprep.subr.bf16.mxu0 %v12884_v27  ;;  %v12950_v26 = vld [vmem:[#allocation7 + $0xa3c] ss:$72 sps:$4 sm:$0xff]  }
 0x1fb   : > { %6261 = vmatprep.subr.bf16.mxu1 %v12887_v29  ;;  %v12953_v27 = vld [vmem:[#allocation7 + $0x133c] ss:$72 sps:$4 sm:$0xff]   ;;  %v12948_v29 = vld [vmem:[#allocation7 + $0xa38] ss:$72 sps:$4 sm:$0xff]  }
 0x1fd   : > { %6221 = vmatpush2.bf16.msra.mxu0 %v12882_v30  ;;  %v12951_v30 = vld [vmem:[#allocation7 + $0x1338] ss:$72 sps:$4 sm:$0xff]  }
 0x1fe   : > { %6262 = vmatpush2.bf16.msra.mxu1 %v12885_v32  ;;  %6222 = vmatprep.subr.bf16.mxu0 %v12890_v33  ;;  %v12956_v32 = vld [vmem:[#allocation7 + $0x9ac] ss:$72 sps:$4 sm:$0xff]  }
 0x1ff   : > { %6263 = vmatprep.subr.bf16.mxu1 %v12893_v35  ;;  %v12959_v33 = vld [vmem:[#allocation7 + $0x12ac] ss:$72 sps:$4 sm:$0xff]   ;;  %v12954_v35 = vld [vmem:[#allocation7 + $0x9a8] ss:$72 sps:$4 sm:$0xff]  }
 0x201   : > { %6223 = vmatpush2.bf16.msra.mxu0 %v12888_v36  ;;  %v12957_v36 = vld [vmem:[#allocation7 + $0x12a8] ss:$72 sps:$4 sm:$0xff]  }
 0x202   : > { %6264 = vmatpush2.bf16.msra.mxu1 %v12891_v37  ;;  %6224 = vmatprep.subr.bf16.mxu0 %v12896_v38  ;;  %v12962_v37 = vld [vmem:[#allocation7 + $0x91c] ss:$72 sps:$4 sm:$0xff]  }
 0x203   : > { %6265 = vmatprep.subr.bf16.mxu1 %v12899_v39  ;;  %v12965_v38 = vld [vmem:[#allocation7 + $0x121c] ss:$72 sps:$4 sm:$0xff]   ;;  %v12960_v39 = vld [vmem:[#allocation7 + $0x918] ss:$72 sps:$4 sm:$0xff]  }
 0x205   : > { %6225 = vmatpush2.bf16.msra.mxu0 %v12894_v40  ;;  %v12963_v40 = vld [vmem:[#allocation7 + $0x1218] ss:$72 sps:$4 sm:$0xff]  }
 0x206   : > { %6266 = vmatpush2.bf16.msra.mxu1 %v12897_v41  ;;  %6226 = vmatprep.subr.bf16.mxu0 %v12902_v42  ;;  %v12968_v41 = vld [vmem:[#allocation7 + $0x118c] ss:$72 sps:$4 sm:$0xff]  }
 0x207   : > { %6267 = vmatprep.subr.bf16.mxu1 %v12905_v43  ;;  %v12971_v42 = vld [vmem:[#allocation7 + $0x1a8c] ss:$72 sps:$4 sm:$0xff]   ;;  %v12966_v43 = vld [vmem:[#allocation7 + $0x1188] ss:$72 sps:$4 sm:$0xff]  }
 0x209   : > { %6227 = vmatpush2.bf16.msra.mxu0 %v12900_v44  ;;  %v12969_v44 = vld [vmem:[#allocation7 + $0x1a88] ss:$72 sps:$4 sm:$0xff]  }
 0x20a   : > { %6268 = vmatpush2.bf16.msra.mxu1 %v12903_v45  ;;  %6228 = vmatprep.subr.bf16.mxu0 %v12908_v46  ;;  %v12974_v45 = vld [vmem:[#allocation7 + $0x10fc] ss:$72 sps:$4 sm:$0xff]  }
 0x20b   : > { %6269 = vmatprep.subr.bf16.mxu1 %v12911_v48  ;;  %v12977_v46 = vld [vmem:[#allocation7 + $0x19fc] ss:$72 sps:$4 sm:$0xff]   ;;  %v12972_v48 = vld [vmem:[#allocation7 + $0x10f8] ss:$72 sps:$4 sm:$0xff]  }
 0x20d   : > { %6229 = vmatpush2.bf16.msra.mxu0 %v12906_v49  ;;  %v12975_v49 = vld [vmem:[#allocation7 + $0x19f8] ss:$72 sps:$4 sm:$0xff]  }
 0x20e   : > { %6270 = vmatpush2.bf16.msra.mxu1 %v12909_v52  ;;  %6230 = vmatprep.subr.bf16.mxu0 %v12914_v53  ;;  %v12980_v52 = vld [vmem:[#allocation7 + $0x106c] ss:$72 sps:$4 sm:$0xff]  }
 0x20f   : > { %6271 = vmatprep.subr.bf16.mxu1 %v12917_v54  ;;  %v12983_v53 = vld [vmem:[#allocation7 + $0x196c] ss:$72 sps:$4 sm:$0xff]   ;;  %v12978_v54 = vld [vmem:[#allocation7 + $0x1068] ss:$72 sps:$4 sm:$0xff]  }
 0x211   : > { %6231 = vmatpush2.bf16.msra.mxu0 %v12912_v55  ;;  %v12981_v55 = vld [vmem:[#allocation7 + $0x1968] ss:$72 sps:$4 sm:$0xff]  }
 0x212   : > { %6272 = vmatpush2.bf16.msra.mxu1 %v12915_v57  ;;  %6282 = vmatprep.subr.bf16.mxu0 %v12920_v58  ;;  %v12986_v57 = vld [vmem:[#allocation7 + $0xfdc] ss:$72 sps:$4 sm:$0xff]  }
 0x213   : > { %6323 = vmatprep.subr.bf16.mxu1 %v12923_v59  ;;  %v12989_v58 = vld [vmem:[#allocation7 + $0x18dc] ss:$72 sps:$4 sm:$0xff]   ;;  %v12984_v59 = vld [vmem:[#allocation7 + $0xfd8] ss:$72 sps:$4 sm:$0xff]  }
 0x214   : > { %v5988_v2 = vpop.f32.mrf.mxu0  ;;  %6233 = vmatmul.mubr.bf16.vlgmr.msra.gmra.mxu0 %v14996_v14 }
 0x215   : > { %6274 = vmatmul.mubr.bf16.vlgmr.msra.gmra.mxu1 %v14979_v6  ;;  %v15026_v3 = vpop.f32.mrf.mxu1  ;;  %v15029_v4 = vadd.f32 %v5988_v2, %v15018_v50  ;;  %6283 = vmatpush1.bf16.msra.mxu0 %v12918_v60  ;;  %v12987_v60 = vld [vmem:[#allocation7 + $0x18d8] ss:$72 sps:$4 sm:$0xff]   ;;  %v13001_v2 = vld [vmem:[#allocation7 + $0x17bc] ss:$72 sps:$4 sm:$0xff]  }
 0x216   : > { %6324 = vmatpush1.bf16.msra.mxu1 %v12921_v61  ;;  %v5990_v5 = vpop.f32.mrf.mxu0  ;;  %6284 = vmatprep.subr.bf16.mxu0 %v12926_v62  ;;  %v12992_v61 = vld [vmem:[#allocation7 + $0xf4c] ss:$72 sps:$4 sm:$0xff]  }
 0x217   : > { %6325 = vmatprep.subr.bf16.mxu1 %v12929_v63  ;;  %v15031_v10 = vpop.f32.mrf.mxu1  ;;  %v15034_v11 = vadd.f32 %v5990_v5, %v15022_v56  ;;  %6314 = vmatprep.mubr.bf16.mxu0 %v14975_v51  ;;  %v12936_v56 = vld [vmem:[#allocation7 + $0xb58] ss:$72 sps:$4 sm:$0xff]   ;;  %v12995_v62 = vld [vmem:[#allocation7 + $0x184c] ss:$72 sps:$4 sm:$0xff]   ;;  %v12990_v63 = vld [vmem:[#allocation7 + $0xf48] ss:$72 sps:$4 sm:$0xff]  }
 0x218   : > { %6355 = vmatprep.mubr.bf16.mxu1 %v14991_v34  ;;  %v5992_v50 = vpop.f32.mrf.mxu0  ;;  %v12996_v5 = vld [vmem:[#allocation7 + $0xeb8] ss:$72 sps:$4 sm:$0xff]  }
 0x219   : > { %v6033_v15 = vpop.f32.mrf.mxu1  ;;  %6285 = vmatpush1.bf16.msra.mxu0 %v12924_v0  ;;  %v12993_v0 = vld [vmem:[#allocation7 + $0x1848] ss:$72 sps:$4 sm:$0xff]  }
 0x21a   : > { %6326 = vmatpush1.bf16.msra.mxu1 %v12927_v1  ;;  %v5993_v16 = vpop.f32.mrf.mxu0  ;;  %6286 = vmatprep.subr.bf16.mxu0 %v12932_v8  ;;  %v12998_v1 = vld [vmem:[#allocation7 + $0xebc] ss:$72 sps:$4 sm:$0xff]   ;;  %v12999_v8 = vld [vmem:[#allocation7 + $0x17b8] ss:$72 sps:$4 sm:$0xff]   ;;  %v13005_v50 = vld [vmem:[#allocation7 + $0x1728] ss:$72 sps:$4 sm:$0xff]  }
 0x21b   : > { %6327 = vmatprep.subr.bf16.mxu1 %v12935_v9  ;;  %v6034_v19 = vpop.f32.mrf.mxu1  ;;  %v13004_v9 = vld [vmem:[#allocation7 + $0xe2c] ss:$72 sps:$4 sm:$0xff]   ;;  %v13010_v15 = vld [vmem:[#allocation7 + $0xd9c] ss:$72 sps:$4 sm:$0xff]  }
 0x21c   : > { %v13013_v16 = vld [vmem:[#allocation7 + $0x169c] ss:$72 sps:$4 sm:$0xff]   ;;  %v13008_v19 = vld [vmem:[#allocation7 + $0xd98] ss:$72 sps:$4 sm:$0xff]  }
 0x21d   : > { %6287 = vmatpush1.bf16.msra.mxu0 %v12930_v12  ;;  %v13007_v12 = vld [vmem:[#allocation7 + $0x172c] ss:$72 sps:$4 sm:$0xff]  }
 0x21e   : > { %6328 = vmatpush1.bf16.msra.mxu1 %v12933_v13  ;;  %6288 = vmatprep.subr.bf16.mxu0 %v12938_v17  ;;  %v13002_v13 = vld [vmem:[#allocation7 + $0xe28] ss:$72 sps:$4 sm:$0xff]   ;;  %v15039_v17 = vsub.s32 2, %v15006_v23 }
 0x21f   : > { %6329 = vmatprep.subr.bf16.mxu1 %v12941_v18  ;;  %v15042_v18 = vsub.s32 3, %v15006_v23 }
 0x221   : > { %6289 = vmatpush1.bf16.msra.mxu0 %v12936_v56  ;;  %v13011_v56 = vld [vmem:[#allocation7 + $0x1698] ss:$72 sps:$4 sm:$0xff]  }
 0x222   : > { %6330 = vmatpush1.bf16.msra.mxu1 %v12939_v20  ;;  %6290 = vmatprep.subr.bf16.mxu0 %v12944_v21  ;;  %v13016_v20 = vld [vmem:[#allocation7 + $0x414] ss:$72 sps:$4 sm:$0xff]  }
 0x223   : > { %6331 = vmatprep.subr.bf16.mxu1 %v12947_v22  ;;  %v13019_v21 = vld [vmem:[#allocation7 + $0xd14] ss:$72 sps:$4 sm:$0xff]   ;;  %v15044_v22 = vld [vmem:[#allocation8] sm:$0xff] }
 0x225   : > { %6291 = vmatpush1.bf16.msra.mxu0 %v12942_v24  ;;  %v1452_v24 = vrot.slane %v15044_v22, %v15039_v17 }
 0x226   : > { %6332 = vmatpush1.bf16.msra.mxu1 %v12945_v25  ;;  %6292 = vmatprep.subr.bf16.mxu0 %v12950_v26  ;;  %v13014_v25 = vld [vmem:[#allocation7 + $0x410] ss:$72 sps:$4 sm:$0xff]  }
 0x227   : > { %6333 = vmatprep.subr.bf16.mxu1 %v12953_v27  ;;  %v13017_v26 = vld [vmem:[#allocation7 + $0xd10] ss:$72 sps:$4 sm:$0xff]   ;;  %v1456_v27 = vrot.slane %v15044_v22, %v15042_v18 }
 0x229   : > { %6293 = vmatpush1.bf16.msra.mxu0 %v12948_v29  ;;  %v13022_v29 = vld [vmem:[#allocation7 + $0x384] ss:$72 sps:$4 sm:$0xff]  }
 0x22a   : > { %6334 = vmatpush1.bf16.msra.mxu1 %v12951_v30  ;;  %6294 = vmatprep.subr.bf16.mxu0 %v12956_v32  ;;  %v13025_v30 = vld [vmem:[#allocation7 + $0xc84] ss:$72 sps:$4 sm:$0xff]   ;;  %v6030_v32 = vadd.f32 %v15026_v3, %v1452_v24 }
 0x22b   : > { %6335 = vmatprep.subr.bf16.mxu1 %v12959_v33  ;;  %v13020_v33 = vld [vmem:[#allocation7 + $0x380] ss:$72 sps:$4 sm:$0xff]   ;;  %v13070_v24 = vld [vmem:[#allocation7 + $0x804] ss:$72 sps:$4 sm:$0xff]  }
 0x22d   : > { %6295 = vmatpush1.bf16.msra.mxu0 %v12954_v35  ;;  %v13023_v35 = vld [vmem:[#allocation7 + $0xc80] ss:$72 sps:$4 sm:$0xff]  }
 0x22e   : > { %6336 = vmatpush1.bf16.msra.mxu1 %v12957_v36  ;;  %6296 = vmatprep.subr.bf16.mxu0 %v12962_v37 }
 0x22f   : > { %6337 = vmatprep.subr.bf16.mxu1 %v12965_v38  ;;  %v6032_v38 = vadd.f32 %v15031_v10, %v1456_v27  ;;  %v13071_v27 = vld [vmem:[#allocation7 + $0x1100] ss:$72 sps:$4 sm:$0xff]  }
 0x231   : > { %6297 = vmatpush1.bf16.msra.mxu0 %v12960_v39 }
 0x232   : > { %6338 = vmatpush1.bf16.msra.mxu1 %v12963_v40  ;;  %6298 = vmatprep.subr.bf16.mxu0 %v12968_v41 }
 0x233   : > { %6339 = vmatprep.subr.bf16.mxu1 %v12971_v42  ;;  %v13028_v42 = vld [vmem:[#allocation7 + $0x2f4] ss:$72 sps:$4 sm:$0xff]  }
 0x235   : > { %6299 = vmatpush2.bf16.msra.mxu0 %v12966_v43  ;;  %v13031_v43 = vld [vmem:[#allocation7 + $0xbf4] ss:$72 sps:$4 sm:$0xff]  }
 0x236   : > { %6340 = vmatpush2.bf16.msra.mxu1 %v12969_v44  ;;  %6300 = vmatprep.subr.bf16.mxu0 %v12974_v45  ;;  %v13026_v45 = vld [vmem:[#allocation7 + $0x2f0] ss:$72 sps:$4 sm:$0xff]  }
 0x237   : > { %6341 = vmatprep.subr.bf16.mxu1 %v12977_v46  ;;  %v13029_v46 = vld [vmem:[#allocation7 + $0xbf0] ss:$72 sps:$4 sm:$0xff]  }
 0x239   : > { %6301 = vmatpush2.bf16.msra.mxu0 %v12972_v48 }
 0x23a   : > { %6342 = vmatpush2.bf16.msra.mxu1 %v12975_v49  ;;  %6302 = vmatprep.subr.bf16.mxu0 %v12980_v52 }
 0x23b   : > { %6343 = vmatprep.subr.bf16.mxu1 %v12983_v53  ;;  %v13034_v53 = vld [vmem:[#allocation7 + $0x264] ss:$72 sps:$4 sm:$0xff]  }
 0x23d   : > { %6303 = vmatpush2.bf16.msra.mxu0 %v12978_v54  ;;  %v13037_v54 = vld [vmem:[#allocation7 + $0xb64] ss:$72 sps:$4 sm:$0xff]  }
 0x23e   : > { %6344 = vmatpush2.bf16.msra.mxu1 %v12981_v55  ;;  %6304 = vmatprep.subr.bf16.mxu0 %v12986_v57  ;;  %v13032_v57 = vld [vmem:[#allocation7 + $0x260] ss:$72 sps:$4 sm:$0xff]  }
 0x23f   : > { %6345 = vmatprep.subr.bf16.mxu1 %v12989_v58  ;;  %v13035_v58 = vld [vmem:[#allocation7 + $0xb60] ss:$72 sps:$4 sm:$0xff]  }
 0x241   : > { %6305 = vmatpush2.bf16.msra.mxu0 %v12984_v59  ;;  %v13040_v59 = vld [vmem:[#allocation7 + $0x1d4] ss:$72 sps:$4 sm:$0xff]  }
 0x242   : > { %6346 = vmatpush2.bf16.msra.mxu1 %v12987_v60  ;;  %6306 = vmatprep.subr.bf16.mxu0 %v12992_v61  ;;  %v13043_v60 = vld [vmem:[#allocation7 + $0xad4] ss:$72 sps:$4 sm:$0xff]   ;;  %v13038_v61 = vld [vmem:[#allocation7 + $0x1d0] ss:$72 sps:$4 sm:$0xff]  }
 0x243   : > { %6347 = vmatprep.subr.bf16.mxu1 %v12995_v62  ;;  %v13041_v62 = vld [vmem:[#allocation7 + $0xad0] ss:$72 sps:$4 sm:$0xff]  }
 0x245   : > { %6307 = vmatpush2.bf16.msra.mxu0 %v12990_v63  ;;  %v13046_v63 = vld [vmem:[#allocation7 + $0x144] ss:$72 sps:$4 sm:$0xff]  }
 0x246   : > { %6348 = vmatpush2.bf16.msra.mxu1 %v12993_v0  ;;  %6308 = vmatprep.subr.bf16.mxu0 %v12998_v1  ;;  %v13049_v0 = vld [vmem:[#allocation7 + $0xa44] ss:$72 sps:$4 sm:$0xff]   ;;  %v13044_v1 = vld [vmem:[#allocation7 + $0x140] ss:$72 sps:$4 sm:$0xff]  }
 0x247   : > { %6349 = vmatprep.subr.bf16.mxu1 %v13001_v2  ;;  %v13047_v2 = vld [vmem:[#allocation7 + $0xa40] ss:$72 sps:$4 sm:$0xff]  }
 0x249   : > { %6309 = vmatpush2.bf16.msra.mxu0 %v12996_v5  ;;  %v13052_v5 = vld [vmem:[#allocation7 + $0xb4] ss:$72 sps:$4 sm:$0xff]  }
 0x24a   : > { %6350 = vmatpush2.bf16.msra.mxu1 %v12999_v8  ;;  %6310 = vmatprep.subr.bf16.mxu0 %v13004_v9  ;;  %v13055_v8 = vld [vmem:[#allocation7 + $0x9b4] ss:$72 sps:$4 sm:$0xff]   ;;  %v13050_v9 = vld [vmem:[#allocation7 + $0xb0] ss:$72 sps:$4 sm:$0xff]  }
 0x24b   : > { %6351 = vmatprep.subr.bf16.mxu1 %v13007_v12  ;;  %v13053_v12 = vld [vmem:[#allocation7 + $0x9b0] ss:$72 sps:$4 sm:$0xff]  }
 0x24d   : > { %6311 = vmatpush2.bf16.msra.mxu0 %v13002_v13  ;;  %v13058_v13 = vld [vmem:[#allocation7 + $0x24] ss:$72 sps:$4 sm:$0xff]  }
 0x24e   : > { %6352 = vmatpush2.bf16.msra.mxu1 %v13005_v50  ;;  %6312 = vmatprep.subr.bf16.mxu0 %v13010_v15  ;;  %v13061_v50 = vld [vmem:[#allocation7 + $0x924] ss:$72 sps:$4 sm:$0xff]   ;;  %v13056_v15 = vld [vmem:[#allocation7 + $0x20] ss:$72 sps:$4 sm:$0xff]  }
 0x24f   : > { %6353 = vmatprep.subr.bf16.mxu1 %v13013_v16  ;;  %v13059_v16 = vld [vmem:[#allocation7 + $0x920] ss:$72 sps:$4 sm:$0xff]  }
 0x251   : > { %6313 = vmatpush2.bf16.msra.mxu0 %v13008_v19  ;;  %v13064_v19 = vld [vmem:[#allocation7 + $0x894] ss:$72 sps:$4 sm:$0xff]  }
 0x252   : > { %6354 = vmatpush2.bf16.msra.mxu1 %v13011_v56  ;;  %6364 = vmatprep.subr.bf16.mxu0 %v13016_v20  ;;  %v13067_v56 = vld [vmem:[#allocation7 + $0x1194] ss:$72 sps:$4 sm:$0xff]   ;;  %v13062_v20 = vld [vmem:[#allocation7 + $0x890] ss:$72 sps:$4 sm:$0xff]  }
 0x253   : > { %6405 = vmatprep.subr.bf16.mxu1 %v13019_v21  ;;  %v13065_v21 = vld [vmem:[#allocation7 + $0x1190] ss:$72 sps:$4 sm:$0xff]  }
 0x254   : > { %v6070_v36 = vpop.f32.mrf.mxu0  ;;  %6315 = vmatmul.mubr.bf16.vlgmr.msra.gmra.mxu0 %v14981_v7 }
 0x255   : > { %6356 = vmatmul.mubr.bf16.vlgmr.msra.gmra.mxu1 %v14996_v14  ;;  %v6111_v37 = vpop.f32.mrf.mxu1  ;;  %v6071_v39 = vadd.f32 %v6070_v36, %v6030_v32  ;;  %6365 = vmatpush1.bf16.msra.mxu0 %v13014_v25  ;;  %v13073_v25 = vld [vmem:[#allocation7 + $0x1104] ss:$72 sps:$4 sm:$0xff]   ;;  %v13074_v32 = vld [vmem:[#allocation7 + $0x770] ss:$72 sps:$4 sm:$0xff]  }
 0x256   : > { %6406 = vmatpush1.bf16.msra.mxu1 %v13017_v26  ;;  %v6072_v40 = vpop.f32.mrf.mxu0  ;;  %6366 = vmatprep.subr.bf16.mxu0 %v13022_v29  ;;  %v13068_v26 = vld [vmem:[#allocation7 + $0x800] ss:$72 sps:$4 sm:$0xff]   ;;  %v13076_v29 = vld [vmem:[#allocation7 + $0x774] ss:$72 sps:$4 sm:$0xff]   ;;  %v13085_v36 = vld [vmem:[#allocation7 + $0xfe4] ss:$72 sps:$4 sm:$0xff]  }
 0x257   : > { %v6113_v41 = vpop.f32.mrf.mxu1  ;;  %6407 = vmatprep.subr.bf16.mxu1 %v13025_v30  ;;  %v6073_v3 = vadd.f32 %v6072_v40, %v6032_v38  ;;  %v15054_v44 = vadd.f32 %v6111_v37, %v6071_v39  ;;  %6396 = vmatprep.mubr.bf16.mxu0 %v14972_v47  ;;  %v13079_v30 = vld [vmem:[#allocation7 + $0x1074] ss:$72 sps:$4 sm:$0xff]   ;;  %v13080_v37 = vld [vmem:[#allocation7 + $0x6e0] ss:$72 sps:$4 sm:$0xff]  }
 0x258   : > { %6437 = vmatprep.mubr.bf16.mxu1 %v14975_v51  ;;  %v6074_v48 = vpop.f32.mrf.mxu0  ;;  %v13083_v38 = vld [vmem:[#allocation7 + $0xfe0] ss:$72 sps:$4 sm:$0xff]   ;;  %v13088_v39 = vld [vmem:[#allocation7 + $0x654] ss:$72 sps:$4 sm:$0xff]  }
 0x259   : > { %v6115_v10 = vpop.f32.mrf.mxu1  ;;  %v15058_v49 = vadd.f32 %v6113_v41, %v6073_v3  ;;  %6367 = vmatpush1.bf16.msra.mxu0 %v13020_v33  ;;  %v13077_v33 = vld [vmem:[#allocation7 + $0x1070] ss:$72 sps:$4 sm:$0xff]   ;;  %v13091_v40 = vld [vmem:[#allocation7 + $0xf54] ss:$72 sps:$4 sm:$0xff]   ;;  %v13097_v3 = vld [vmem:[#allocation7 + $0xec4] ss:$72 sps:$4 sm:$0xff]  }
 0x25a   : > { %6408 = vmatpush1.bf16.msra.mxu1 %v13023_v35  ;;  %v6075_v52 = vpop.f32.mrf.mxu0  ;;  %6368 = vmatprep.subr.bf16.mxu0 %v13028_v42  ;;  %v13082_v35 = vld [vmem:[#allocation7 + $0x6e4] ss:$72 sps:$4 sm:$0xff]   ;;  %v13086_v41 = vld [vmem:[#allocation7 + $0x650] ss:$72 sps:$4 sm:$0xff]   ;;  %v13100_v48 = vld [vmem:[#allocation7 + $0x534] ss:$72 sps:$4 sm:$0xff]  }
 0x25b   : > { %6409 = vmatprep.subr.bf16.mxu1 %v13031_v43  ;;  %v6116_v55 = vpop.f32.mrf.mxu1  ;;  %v13089_v42 = vld [vmem:[#allocation7 + $0xf50] ss:$72 sps:$4 sm:$0xff]   ;;  %v13094_v43 = vld [vmem:[#allocation7 + $0x5c4] ss:$72 sps:$4 sm:$0xff]   ;;  %v13103_v10 = vld [vmem:[#allocation7 + $0xe34] ss:$72 sps:$4 sm:$0xff]  }
 0x25c   : > { %v13098_v52 = vld [vmem:[#allocation7 + $0x530] ss:$72 sps:$4 sm:$0xff]   ;;  %v13109_v55 = vld [vmem:[#allocation7 + $0xda4] ss:$72 sps:$4 sm:$0xff]  }
 0x25d   : > { %6369 = vmatpush1.bf16.msra.mxu0 %v13026_v45  ;;  %v13092_v45 = vld [vmem:[#allocation7 + $0x5c0] ss:$72 sps:$4 sm:$0xff]  }
 0x25e   : > { %6410 = vmatpush1.bf16.msra.mxu1 %v13029_v46  ;;  %6370 = vmatprep.subr.bf16.mxu0 %v13034_v53  ;;  %v13095_v46 = vld [vmem:[#allocation7 + $0xec0] ss:$72 sps:$4 sm:$0xff]   ;;  %v13101_v53 = vld [vmem:[#allocation7 + $0xe30] ss:$72 sps:$4 sm:$0xff]  }
 0x25f   : > { %6411 = vmatprep.subr.bf16.mxu1 %v13037_v54  ;;  %v13106_v54 = vld [vmem:[#allocation7 + $0x4a4] ss:$72 sps:$4 sm:$0xff]  }
 0x261   : > { %6371 = vmatpush1.bf16.msra.mxu0 %v13032_v57  ;;  %v13104_v57 = vld [vmem:[#allocation7 + $0x4a0] ss:$72 sps:$4 sm:$0xff]  }
 0x262   : > { %6412 = vmatpush1.bf16.msra.mxu1 %v13035_v58  ;;  %6372 = vmatprep.subr.bf16.mxu0 %v13040_v59  ;;  %v13107_v58 = vld [vmem:[#allocation7 + $0xda0] ss:$72 sps:$4 sm:$0xff]   ;;  %v15061_v59 = vsub.s32 4, %v15006_v23 }
 0x263   : > { %6413 = vmatprep.subr.bf16.mxu1 %v13043_v60  ;;  %v13112_v60 = vld [vmem:[#allocation7 + $0x1614] ss:$72 sps:$4 sm:$0xff]  }
 0x265   : > { %6373 = vmatpush1.bf16.msra.mxu0 %v13038_v61  ;;  %v13115_v61 = vld [vmem:[#allocation7 + $0x41c] ss:$72 sps:$4 sm:$0xff]  }
 0x266   : > { %6414 = vmatpush1.bf16.msra.mxu1 %v13041_v62  ;;  %6374 = vmatprep.subr.bf16.mxu0 %v13046_v63  ;;  %v13110_v62 = vld [vmem:[#allocation7 + $0x1610] ss:$72 sps:$4 sm:$0xff]  }
 0x267   : > { %6415 = vmatprep.subr.bf16.mxu1 %v13049_v0  ;;  %v13113_v63 = vld [vmem:[#allocation7 + $0x418] ss:$72 sps:$4 sm:$0xff]   ;;  %v15064_v0 = vsub.s32 5, %v15006_v23 }
 0x269   : > { %6375 = vmatpush1.bf16.msra.mxu0 %v13044_v1  ;;  %v1460_v1 = vrot.slane %v15044_v22, %v15061_v59 }
 0x26a   : > { %6416 = vmatpush1.bf16.msra.mxu1 %v13047_v2  ;;  %6376 = vmatprep.subr.bf16.mxu0 %v13052_v5  ;;  %v13118_v2 = vld [vmem:[#allocation7 + $0x1584] ss:$72 sps:$4 sm:$0xff]  }
 0x26b   : > { %6417 = vmatprep.subr.bf16.mxu1 %v13055_v8  ;;  %v13121_v5 = vld [vmem:[#allocation7 + $0x38c] ss:$72 sps:$4 sm:$0xff]   ;;  %v1464_v8 = vrot.slane %v15044_v22, %v15064_v0  ;;  %v13122_v22 = vld [vmem:[#allocation7 + $0x14f0] ss:$72 sps:$4 sm:$0xff]  }
 0x26d   : > { %6377 = vmatpush1.bf16.msra.mxu0 %v13050_v9  ;;  %v13116_v9 = vld [vmem:[#allocation7 + $0x1580] ss:$72 sps:$4 sm:$0xff]  }
 0x26e   : > { %6418 = vmatpush1.bf16.msra.mxu1 %v13053_v12  ;;  %6378 = vmatprep.subr.bf16.mxu0 %v13058_v13  ;;  %v13119_v12 = vld [vmem:[#allocation7 + $0x388] ss:$72 sps:$4 sm:$0xff]  }
 0x26f   : > { %6419 = vmatprep.subr.bf16.mxu1 %v13061_v50 }
 0x271   : > { %6379 = vmatpush1.bf16.msra.mxu0 %v13056_v15 }
 0x272   : > { %6420 = vmatpush1.bf16.msra.mxu1 %v13059_v16  ;;  %6380 = vmatprep.subr.bf16.mxu0 %v13064_v19 }
 0x273   : > { %6421 = vmatprep.subr.bf16.mxu1 %v13067_v56  ;;  %v13124_v56 = vld [vmem:[#allocation7 + $0x14f4] ss:$72 sps:$4 sm:$0xff]  }
 0x275   : > { %6381 = vmatpush2.bf16.msra.mxu0 %v13062_v20  ;;  %v13127_v20 = vld [vmem:[#allocation7 + $0x2fc] ss:$72 sps:$4 sm:$0xff]  }
 0x276   : > { %6422 = vmatpush2.bf16.msra.mxu1 %v13065_v21  ;;  %6382 = vmatprep.subr.bf16.mxu0 %v13070_v24 }
 0x277   : > { %6423 = vmatprep.subr.bf16.mxu1 %v13073_v25  ;;  %v13125_v25 = vld [vmem:[#allocation7 + $0x2f8] ss:$72 sps:$4 sm:$0xff]  }
 0x279   : > { %6383 = vmatpush2.bf16.msra.mxu0 %v13068_v26 }
 0x27a   : > { %6424 = vmatpush2.bf16.msra.mxu1 %v13071_v27  ;;  %6384 = vmatprep.subr.bf16.mxu0 %v13076_v29 }
 0x27b   : > { %6425 = vmatprep.subr.bf16.mxu1 %v13079_v30 }
 0x27d   : > { %6385 = vmatpush2.bf16.msra.mxu0 %v13074_v32  ;;  %v13130_v32 = vld [vmem:[#allocation7 + $0x1464] ss:$72 sps:$4 sm:$0xff]  }
 0x27e   : > { %6426 = vmatpush2.bf16.msra.mxu1 %v13077_v33  ;;  %6386 = vmatprep.subr.bf16.mxu0 %v13082_v35  ;;  %v13133_v33 = vld [vmem:[#allocation7 + $0x26c] ss:$72 sps:$4 sm:$0xff]  }
 0x27f   : > { %6427 = vmatprep.subr.bf16.mxu1 %v13085_v36  ;;  %v13128_v36 = vld [vmem:[#allocation7 + $0x1460] ss:$72 sps:$4 sm:$0xff]  }
 0x281   : > { %6387 = vmatpush2.bf16.msra.mxu0 %v13080_v37  ;;  %v13131_v37 = vld [vmem:[#allocation7 + $0x268] ss:$72 sps:$4 sm:$0xff]  }
 0x282   : > { %6428 = vmatpush2.bf16.msra.mxu1 %v13083_v38  ;;  %6388 = vmatprep.subr.bf16.mxu0 %v13088_v39  ;;  %v13136_v38 = vld [vmem:[#allocation7 + $0x13d4] ss:$72 sps:$4 sm:$0xff]  }
 0x283   : > { %6429 = vmatprep.subr.bf16.mxu1 %v13091_v40  ;;  %v13139_v39 = vld [vmem:[#allocation7 + $0x1dc] ss:$72 sps:$4 sm:$0xff]   ;;  %v13134_v40 = vld [vmem:[#allocation7 + $0x13d0] ss:$72 sps:$4 sm:$0xff]  }
 0x285   : > { %6389 = vmatpush2.bf16.msra.mxu0 %v13086_v41  ;;  %v13137_v41 = vld [vmem:[#allocation7 + $0x1d8] ss:$72 sps:$4 sm:$0xff]  }
 0x286   : > { %6430 = vmatpush2.bf16.msra.mxu1 %v13089_v42  ;;  %6390 = vmatprep.subr.bf16.mxu0 %v13094_v43  ;;  %v13142_v42 = vld [vmem:[#allocation7 + $0x1344] ss:$72 sps:$4 sm:$0xff]  }
 0x287   : > { %6431 = vmatprep.subr.bf16.mxu1 %v13097_v3  ;;  %v13145_v43 = vld [vmem:[#allocation7 + $0x14c] ss:$72 sps:$4 sm:$0xff]   ;;  %v13140_v3 = vld [vmem:[#allocation7 + $0x1340] ss:$72 sps:$4 sm:$0xff]  }
 0x289   : > { %6391 = vmatpush2.bf16.msra.mxu0 %v13092_v45  ;;  %v13143_v45 = vld [vmem:[#allocation7 + $0x148] ss:$72 sps:$4 sm:$0xff]  }
 0x28a   : > { %6432 = vmatpush2.bf16.msra.mxu1 %v13095_v46  ;;  %6392 = vmatprep.subr.bf16.mxu0 %v13100_v48  ;;  %v13148_v46 = vld [vmem:[#allocation7 + $0x12b4] ss:$72 sps:$4 sm:$0xff]  }
 0x28b   : > { %6433 = vmatprep.subr.bf16.mxu1 %v13103_v10  ;;  %v13151_v48 = vld [vmem:[#allocation7 + $0xbc] ss:$72 sps:$4 sm:$0xff]   ;;  %v13146_v10 = vld [vmem:[#allocation7 + $0x12b0] ss:$72 sps:$4 sm:$0xff]  }
 0x28d   : > { %6393 = vmatpush2.bf16.msra.mxu0 %v13098_v52  ;;  %v13149_v52 = vld [vmem:[#allocation7 + $0xb8] ss:$72 sps:$4 sm:$0xff]  }
 0x28e   : > { %6434 = vmatpush2.bf16.msra.mxu1 %v13101_v53  ;;  %6394 = vmatprep.subr.bf16.mxu0 %v13106_v54  ;;  %v13154_v53 = vld [vmem:[#allocation7 + $0x1224] ss:$72 sps:$4 sm:$0xff]  }
 0x28f   : > { %6435 = vmatprep.subr.bf16.mxu1 %v13109_v55  ;;  %v13157_v54 = vld [vmem:[#allocation7 + $0x2c] ss:$72 sps:$4 sm:$0xff]   ;;  %v13152_v55 = vld [vmem:[#allocation7 + $0x1220] ss:$72 sps:$4 sm:$0xff]  }
 0x291   : > { %6395 = vmatpush2.bf16.msra.mxu0 %v13104_v57  ;;  %v13155_v57 = vld [vmem:[#allocation7 + $0x28] ss:$72 sps:$4 sm:$0xff]  }
 0x292   : > { %6436 = vmatpush2.bf16.msra.mxu1 %v13107_v58  ;;  %6446 = vmatprep.subr.bf16.mxu0 %v13112_v60  ;;  %v13160_v58 = vld [vmem:[#allocation7 + $0x1a94] ss:$72 sps:$4 sm:$0xff]  }
 0x293   : > { %6487 = vmatprep.subr.bf16.mxu1 %v13115_v61  ;;  %v13163_v60 = vld [vmem:[#allocation7 + $0x89c] ss:$72 sps:$4 sm:$0xff]   ;;  %v13158_v61 = vld [vmem:[#allocation7 + $0x1a90] ss:$72 sps:$4 sm:$0xff]  }
 0x294   : > { %v6152_v13 = vpop.f32.mrf.mxu0  ;;  %6397 = vmatmul.mubr.bf16.vlgmr.msra.gmra.mxu0 %v14979_v6 }
 0x295   : > { %6438 = vmatmul.mubr.bf16.vlgmr.msra.gmra.mxu1 %v14981_v7  ;;  %v6193_v50 = vpop.f32.mrf.mxu1  ;;  %v6153_v15 = vadd.f32 %v6152_v13, %v1460_v1  ;;  %6447 = vmatpush1.bf16.msra.mxu0 %v13110_v62  ;;  %v13161_v62 = vld [vmem:[#allocation7 + $0x898] ss:$72 sps:$4 sm:$0xff]   ;;  %v13169_v1 = vld [vmem:[#allocation7 + $0x80c] ss:$72 sps:$4 sm:$0xff]  }
 0x296   : > { %6488 = vmatpush1.bf16.msra.mxu1 %v13113_v63  ;;  %v6154_v16 = vpop.f32.mrf.mxu0  ;;  %6448 = vmatprep.subr.bf16.mxu0 %v13118_v2  ;;  %v13166_v63 = vld [vmem:[#allocation7 + $0x1a04] ss:$72 sps:$4 sm:$0xff]   ;;  %v13164_v2 = vld [vmem:[#allocation7 + $0x1a00] ss:$72 sps:$4 sm:$0xff]  }
 0x297   : > { %v6195_v19 = vpop.f32.mrf.mxu1  ;;  %6489 = vmatprep.subr.bf16.mxu1 %v13121_v5  ;;  %v6155_v21 = vadd.f32 %v6154_v16, %v1464_v8  ;;  %v15072_v24 = vadd.f32 %v6193_v50, %v6153_v15  ;;  %6478 = vmatprep.mubr.bf16.mxu0 %v14991_v34  ;;  %v13167_v5 = vld [vmem:[#allocation7 + $0x808] ss:$72 sps:$4 sm:$0xff]   ;;  %v13172_v8 = vld [vmem:[#allocation7 + $0x1974] ss:$72 sps:$4 sm:$0xff]   ;;  %v13173_v13 = vld [vmem:[#allocation7 + $0x778] ss:$72 sps:$4 sm:$0xff]  }
 0x298   : > { %6519 = vmatprep.mubr.bf16.mxu1 %v14972_v47  ;;  %v6156_v26 = vpop.f32.mrf.mxu0  ;;  %v13178_v50 = vld [vmem:[#allocation7 + $0x18e4] ss:$72 sps:$4 sm:$0xff]   ;;  %v13176_v16 = vld [vmem:[#allocation7 + $0x18e0] ss:$72 sps:$4 sm:$0xff]  }
 0x299   : > { %v6197_v27 = vpop.f32.mrf.mxu1  ;;  %v15076_v29 = vadd.f32 %v6195_v19, %v6155_v21  ;;  %6449 = vmatpush1.bf16.msra.mxu0 %v13116_v9  ;;  %v13175_v9 = vld [vmem:[#allocation7 + $0x77c] ss:$72 sps:$4 sm:$0xff]   ;;  %v13181_v15 = vld [vmem:[#allocation7 + $0x6ec] ss:$72 sps:$4 sm:$0xff]   ;;  %v13179_v19 = vld [vmem:[#allocation7 + $0x6e8] ss:$72 sps:$4 sm:$0xff]  }
 0x29a   : > { %6490 = vmatpush1.bf16.msra.mxu1 %v13119_v12  ;;  %v6157_v30 = vpop.f32.mrf.mxu0  ;;  %6450 = vmatprep.subr.bf16.mxu0 %v13124_v56  ;;  %v13170_v12 = vld [vmem:[#allocation7 + $0x1970] ss:$72 sps:$4 sm:$0xff]   ;;  %v13184_v56 = vld [vmem:[#allocation7 + $0x1854] ss:$72 sps:$4 sm:$0xff]   ;;  %v13188_v27 = vld [vmem:[#allocation7 + $0x17c0] ss:$72 sps:$4 sm:$0xff]  }
 0x29b   : > { %6491 = vmatprep.subr.bf16.mxu1 %v13127_v20  ;;  %v6198_v35 = vpop.f32.mrf.mxu1  ;;  %v13187_v20 = vld [vmem:[#allocation7 + $0x65c] ss:$72 sps:$4 sm:$0xff]   ;;  %v13182_v21 = vld [vmem:[#allocation7 + $0x1850] ss:$72 sps:$4 sm:$0xff]   ;;  %v13193_v26 = vld [vmem:[#allocation7 + $0x5cc] ss:$72 sps:$4 sm:$0xff]  }
 0x29c   : > { %v13191_v30 = vld [vmem:[#allocation7 + $0x5c8] ss:$72 sps:$4 sm:$0xff]  }
 0x29d   : > { %6451 = vmatpush1.bf16.msra.mxu0 %v13122_v22  ;;  %v13185_v22 = vld [vmem:[#allocation7 + $0x658] ss:$72 sps:$4 sm:$0xff]  }
 0x29e   : > { %6492 = vmatpush1.bf16.msra.mxu1 %v13125_v25  ;;  %6452 = vmatprep.subr.bf16.mxu0 %v13130_v32  ;;  %v13190_v25 = vld [vmem:[#allocation7 + $0x17c4] ss:$72 sps:$4 sm:$0xff]   ;;  %v13196_v32 = vld [vmem:[#allocation7 + $0x1734] ss:$72 sps:$4 sm:$0xff]   ;;  %v13194_v35 = vld [vmem:[#allocation7 + $0x1730] ss:$72 sps:$4 sm:$0xff]  }
 0x29f   : > { %6493 = vmatprep.subr.bf16.mxu1 %v13133_v33  ;;  %v13199_v33 = vld [vmem:[#allocation7 + $0x53c] ss:$72 sps:$4 sm:$0xff]  }
 0x2a1   : > { %6453 = vmatpush1.bf16.msra.mxu0 %v13128_v36  ;;  %v13197_v36 = vld [vmem:[#allocation7 + $0x538] ss:$72 sps:$4 sm:$0xff]  }
 0x2a2   : > { %6494 = vmatpush1.bf16.msra.mxu1 %v13131_v37  ;;  %6454 = vmatprep.subr.bf16.mxu0 %v13136_v38  ;;  %v13202_v37 = vld [vmem:[#allocation7 + $0x16a4] ss:$72 sps:$4 sm:$0xff]  }
 0x2a3   : > { %6495 = vmatprep.subr.bf16.mxu1 %v13139_v39  ;;  %v13205_v38 = vld [vmem:[#allocation7 + $0x4ac] ss:$72 sps:$4 sm:$0xff]   ;;  %v13200_v39 = vld [vmem:[#allocation7 + $0x16a0] ss:$72 sps:$4 sm:$0xff]  }
 0x2a5   : > { %6455 = vmatpush1.bf16.msra.mxu0 %v13134_v40  ;;  %v13203_v40 = vld [vmem:[#allocation7 + $0x4a8] ss:$72 sps:$4 sm:$0xff]  }
 0x2a6   : > { %6496 = vmatpush1.bf16.msra.mxu1 %v13137_v41  ;;  %6456 = vmatprep.subr.bf16.mxu0 %v13142_v42  ;;  %v13208_v41 = vld [vmem:[#allocation7 + $0xd1c] ss:$72 sps:$4 sm:$0xff]  }
 0x2a7   : > { %6497 = vmatprep.subr.bf16.mxu1 %v13145_v43  ;;  %v13211_v42 = vld [vmem:[#allocation7 + $0x161c] ss:$72 sps:$4 sm:$0xff]   ;;  %v13206_v43 = vld [vmem:[#allocation7 + $0xd18] ss:$72 sps:$4 sm:$0xff]  }
 0x2a9   : > { %6457 = vmatpush1.bf16.msra.mxu0 %v13140_v3  ;;  %v13209_v3 = vld [vmem:[#allocation7 + $0x1618] ss:$72 sps:$4 sm:$0xff]  }
 0x2aa   : > { %6498 = vmatpush1.bf16.msra.mxu1 %v13143_v45  ;;  %6458 = vmatprep.subr.bf16.mxu0 %v13148_v46  ;;  %v13214_v45 = vld [vmem:[#allocation7 + $0xc8c] ss:$72 sps:$4 sm:$0xff]  }
 0x2ab   : > { %6499 = vmatprep.subr.bf16.mxu1 %v13151_v48  ;;  %v13217_v46 = vld [vmem:[#allocation7 + $0x158c] ss:$72 sps:$4 sm:$0xff]   ;;  %v13212_v48 = vld [vmem:[#allocation7 + $0xc88] ss:$72 sps:$4 sm:$0xff]  }
 0x2ad   : > { %6459 = vmatpush1.bf16.msra.mxu0 %v13146_v10  ;;  %v13215_v10 = vld [vmem:[#allocation7 + $0x1588] ss:$72 sps:$4 sm:$0xff]  }
 0x2ae   : > { %6500 = vmatpush1.bf16.msra.mxu1 %v13149_v52  ;;  %6460 = vmatprep.subr.bf16.mxu0 %v13154_v53 }
 0x2af   : > { %6501 = vmatprep.subr.bf16.mxu1 %v13157_v54 }
 0x2b1   : > { %6461 = vmatpush1.bf16.msra.mxu0 %v13152_v55 }
 0x2b2   : > { %6502 = vmatpush1.bf16.msra.mxu1 %v13155_v57  ;;  %6462 = vmatprep.subr.bf16.mxu0 %v13160_v58  ;;  %v13220_v57 = vld [vmem:[#allocation7 + $0xbfc] ss:$72 sps:$4 sm:$0xff]  }
 0x2b3   : > { %6503 = vmatprep.subr.bf16.mxu1 %v13163_v60  ;;  %v13223_v58 = vld [vmem:[#allocation7 + $0x14fc] ss:$72 sps:$4 sm:$0xff]  }
 0x2b5   : > { %6463 = vmatpush2.bf16.msra.mxu0 %v13158_v61 }
 0x2b6   : > { %6504 = vmatpush2.bf16.msra.mxu1 %v13161_v62  ;;  %6464 = vmatprep.subr.bf16.mxu0 %v13166_v63  ;;  %v13218_v62 = vld [vmem:[#allocation7 + $0xbf8] ss:$72 sps:$4 sm:$0xff]  }
 0x2b7   : > { %6505 = vmatprep.subr.bf16.mxu1 %v13169_v1  ;;  %v13221_v63 = vld [vmem:[#allocation7 + $0x14f8] ss:$72 sps:$4 sm:$0xff]  }
 0x2b9   : > { %6465 = vmatpush2.bf16.msra.mxu0 %v13164_v2 }
 0x2ba   : > { %6506 = vmatpush2.bf16.msra.mxu1 %v13167_v5  ;;  %6466 = vmatprep.subr.bf16.mxu0 %v13172_v8  ;;  %v13226_v5 = vld [vmem:[#allocation7 + $0xb6c] ss:$72 sps:$4 sm:$0xff]  }
 0x2bb   : > { %6507 = vmatprep.subr.bf16.mxu1 %v13175_v9  ;;  %v13229_v8 = vld [vmem:[#allocation7 + $0x146c] ss:$72 sps:$4 sm:$0xff]  }
 0x2bd   : > { %6467 = vmatpush2.bf16.msra.mxu0 %v13170_v12  ;;  %v13227_v12 = vld [vmem:[#allocation7 + $0x1468] ss:$72 sps:$4 sm:$0xff]  }
 0x2be   : > { %6508 = vmatpush2.bf16.msra.mxu1 %v13173_v13  ;;  %6468 = vmatprep.subr.bf16.mxu0 %v13178_v50  ;;  %v13232_v13 = vld [vmem:[#allocation7 + $0xadc] ss:$72 sps:$4 sm:$0xff]  }
 0x2bf   : > { %6509 = vmatprep.subr.bf16.mxu1 %v13181_v15  ;;  %v13235_v50 = vld [vmem:[#allocation7 + $0x13dc] ss:$72 sps:$4 sm:$0xff]   ;;  %v13230_v15 = vld [vmem:[#allocation7 + $0xad8] ss:$72 sps:$4 sm:$0xff]  }
 0x2c1   : > { %6469 = vmatpush2.bf16.msra.mxu0 %v13176_v16  ;;  %v13233_v16 = vld [vmem:[#allocation7 + $0x13d8] ss:$72 sps:$4 sm:$0xff]  }
 0x2c2   : > { %6510 = vmatpush2.bf16.msra.mxu1 %v13179_v19  ;;  %6470 = vmatprep.subr.bf16.mxu0 %v13184_v56  ;;  %v13238_v19 = vld [vmem:[#allocation7 + $0xa4c] ss:$72 sps:$4 sm:$0xff]  }
 0x2c3   : > { %6511 = vmatprep.subr.bf16.mxu1 %v13187_v20  ;;  %v13241_v56 = vld [vmem:[#allocation7 + $0x134c] ss:$72 sps:$4 sm:$0xff]   ;;  %v13236_v20 = vld [vmem:[#allocation7 + $0xa48] ss:$72 sps:$4 sm:$0xff]  }
 0x2c5   : > { %6471 = vmatpush2.bf16.msra.mxu0 %v13182_v21  ;;  %v13239_v21 = vld [vmem:[#allocation7 + $0x1348] ss:$72 sps:$4 sm:$0xff]  }
 0x2c6   : > { %6512 = vmatpush2.bf16.msra.mxu1 %v13185_v22  ;;  %6472 = vmatprep.subr.bf16.mxu0 %v13190_v25  ;;  %v13244_v22 = vld [vmem:[#allocation7 + $0x9bc] ss:$72 sps:$4 sm:$0xff]  }
 0x2c7   : > { %6513 = vmatprep.subr.bf16.mxu1 %v13193_v26  ;;  %v13247_v25 = vld [vmem:[#allocation7 + $0x12bc] ss:$72 sps:$4 sm:$0xff]   ;;  %v13242_v26 = vld [vmem:[#allocation7 + $0x9b8] ss:$72 sps:$4 sm:$0xff]  }
 0x2c9   : > { %6473 = vmatpush2.bf16.msra.mxu0 %v13188_v27  ;;  %v13245_v27 = vld [vmem:[#allocation7 + $0x12b8] ss:$72 sps:$4 sm:$0xff]  }
 0x2ca   : > { %6514 = vmatpush2.bf16.msra.mxu1 %v13191_v30  ;;  %6474 = vmatprep.subr.bf16.mxu0 %v13196_v32  ;;  %v13250_v30 = vld [vmem:[#allocation7 + $0x92c] ss:$72 sps:$4 sm:$0xff]  }
 0x2cb   : > { %6515 = vmatprep.subr.bf16.mxu1 %v13199_v33  ;;  %v13253_v32 = vld [vmem:[#allocation7 + $0x122c] ss:$72 sps:$4 sm:$0xff]   ;;  %v13248_v33 = vld [vmem:[#allocation7 + $0x928] ss:$72 sps:$4 sm:$0xff]  }
 0x2cd   : > { %6475 = vmatpush2.bf16.msra.mxu0 %v13194_v35  ;;  %v13251_v35 = vld [vmem:[#allocation7 + $0x1228] ss:$72 sps:$4 sm:$0xff]  }
 0x2ce   : > { %6516 = vmatpush2.bf16.msra.mxu1 %v13197_v36  ;;  %6476 = vmatprep.subr.bf16.mxu0 %v13202_v37  ;;  %v13256_v36 = vld [vmem:[#allocation7 + $0x119c] ss:$72 sps:$4 sm:$0xff]  }
 0x2cf   : > { %6517 = vmatprep.subr.bf16.mxu1 %v13205_v38  ;;  %v13259_v37 = vld [vmem:[#allocation7 + $0x1a9c] ss:$72 sps:$4 sm:$0xff]   ;;  %v13254_v38 = vld [vmem:[#allocation7 + $0x1198] ss:$72 sps:$4 sm:$0xff]  }
 0x2d1   : > { %6477 = vmatpush2.bf16.msra.mxu0 %v13200_v39  ;;  %v13257_v39 = vld [vmem:[#allocation7 + $0x1a98] ss:$72 sps:$4 sm:$0xff]  }
 0x2d2   : > { %6518 = vmatpush2.bf16.msra.mxu1 %v13203_v40  ;;  %6528 = vmatprep.subr.bf16.mxu0 %v13208_v41  ;;  %v13262_v40 = vld [vmem:[#allocation7 + $0x110c] ss:$72 sps:$4 sm:$0xff]  }
 0x2d3   : > { %6569 = vmatprep.subr.bf16.mxu1 %v13211_v42  ;;  %v13265_v41 = vld [vmem:[#allocation7 + $0x1a0c] ss:$72 sps:$4 sm:$0xff]   ;;  %v13260_v42 = vld [vmem:[#allocation7 + $0x1108] ss:$72 sps:$4 sm:$0xff]  }
 0x2d4   : > { %v6234_v52 = vpop.f32.mrf.mxu0  ;;  %6479 = vmatmul.mubr.bf16.vlgmr.msra.gmra.mxu0 %v14996_v14 }
 0x2d5   : > { %6520 = vmatmul.mubr.bf16.vlgmr.msra.gmra.mxu1 %v14979_v6  ;;  %v15080_v53 = vpop.f32.mrf.mxu1  ;;  %v15083_v54 = vadd.f32 %v6234_v52, %v15072_v24  ;;  %6529 = vmatpush1.bf16.msra.mxu0 %v13206_v43  ;;  %v13263_v43 = vld [vmem:[#allocation7 + $0x1a08] ss:$72 sps:$4 sm:$0xff]   ;;  %v13277_v52 = vld [vmem:[#allocation7 + $0x18ec] ss:$72 sps:$4 sm:$0xff]  }
 0x2d6   : > { %6570 = vmatpush1.bf16.msra.mxu1 %v13209_v3  ;;  %v6236_v55 = vpop.f32.mrf.mxu0  ;;  %6530 = vmatprep.subr.bf16.mxu0 %v13214_v45  ;;  %v13268_v3 = vld [vmem:[#allocation7 + $0x107c] ss:$72 sps:$4 sm:$0xff]  }
 0x2d7   : > { %6571 = vmatprep.subr.bf16.mxu1 %v13217_v46  ;;  %v15085_v60 = vpop.f32.mrf.mxu1  ;;  %v15088_v61 = vadd.f32 %v6236_v55, %v15076_v29  ;;  %6560 = vmatprep.mubr.bf16.mxu0 %v14975_v51  ;;  %v13224_v29 = vld [vmem:[#allocation7 + $0xb68] ss:$72 sps:$4 sm:$0xff]   ;;  %v13271_v45 = vld [vmem:[#allocation7 + $0x197c] ss:$72 sps:$4 sm:$0xff]   ;;  %v13266_v46 = vld [vmem:[#allocation7 + $0x1078] ss:$72 sps:$4 sm:$0xff]  }
 0x2d8   : > { %6601 = vmatprep.mubr.bf16.mxu1 %v14991_v34  ;;  %v6238_v24 = vpop.f32.mrf.mxu0  ;;  %v13272_v55 = vld [vmem:[#allocation7 + $0xfe8] ss:$72 sps:$4 sm:$0xff]  }
 0x2d9   : > { %v6279_v1 = vpop.f32.mrf.mxu1  ;;  %6531 = vmatpush1.bf16.msra.mxu0 %v13212_v48  ;;  %v13269_v48 = vld [vmem:[#allocation7 + $0x1978] ss:$72 sps:$4 sm:$0xff]  }
 0x2da   : > { %6572 = vmatpush1.bf16.msra.mxu1 %v13215_v10  ;;  %v6239_v2 = vpop.f32.mrf.mxu0  ;;  %6532 = vmatprep.subr.bf16.mxu0 %v13220_v57  ;;  %v13274_v10 = vld [vmem:[#allocation7 + $0xfec] ss:$72 sps:$4 sm:$0xff]   ;;  %v13275_v57 = vld [vmem:[#allocation7 + $0x18e8] ss:$72 sps:$4 sm:$0xff]   ;;  %v13281_v24 = vld [vmem:[#allocation7 + $0x1858] ss:$72 sps:$4 sm:$0xff]  }
 0x2db   : > { %6573 = vmatprep.subr.bf16.mxu1 %v13223_v58  ;;  %v6280_v9 = vpop.f32.mrf.mxu1  ;;  %v13280_v58 = vld [vmem:[#allocation7 + $0xf5c] ss:$72 sps:$4 sm:$0xff]   ;;  %v13286_v1 = vld [vmem:[#allocation7 + $0xecc] ss:$72 sps:$4 sm:$0xff]  }
 0x2dc   : > { %v13289_v2 = vld [vmem:[#allocation7 + $0x17cc] ss:$72 sps:$4 sm:$0xff]   ;;  %v13292_v9 = vld [vmem:[#allocation7 + $0xe3c] ss:$72 sps:$4 sm:$0xff]  }
 0x2dd   : > { %6533 = vmatpush1.bf16.msra.mxu0 %v13218_v62  ;;  %v13283_v62 = vld [vmem:[#allocation7 + $0x185c] ss:$72 sps:$4 sm:$0xff]  }
 0x2de   : > { %6574 = vmatpush1.bf16.msra.mxu1 %v13221_v63  ;;  %6534 = vmatprep.subr.bf16.mxu0 %v13226_v5  ;;  %v13278_v63 = vld [vmem:[#allocation7 + $0xf58] ss:$72 sps:$4 sm:$0xff]   ;;  %v13284_v5 = vld [vmem:[#allocation7 + $0xec8] ss:$72 sps:$4 sm:$0xff]  }
 0x2df   : > { %6575 = vmatprep.subr.bf16.mxu1 %v13229_v8  ;;  %v13287_v8 = vld [vmem:[#allocation7 + $0x17c8] ss:$72 sps:$4 sm:$0xff]  }
 0x2e1   : > { %6535 = vmatpush1.bf16.msra.mxu0 %v13224_v29  ;;  %v13295_v29 = vld [vmem:[#allocation7 + $0x173c] ss:$72 sps:$4 sm:$0xff]  }
 0x2e2   : > { %6576 = vmatpush1.bf16.msra.mxu1 %v13227_v12  ;;  %6536 = vmatprep.subr.bf16.mxu0 %v13232_v13  ;;  %v13290_v12 = vld [vmem:[#allocation7 + $0xe38] ss:$72 sps:$4 sm:$0xff]  }
 0x2e3   : > { %6577 = vmatprep.subr.bf16.mxu1 %v13235_v50  ;;  %v13293_v13 = vld [vmem:[#allocation7 + $0x1738] ss:$72 sps:$4 sm:$0xff]   ;;  %v13298_v50 = vld [vmem:[#allocation7 + $0xdac] ss:$72 sps:$4 sm:$0xff]  }
 0x2e5   : > { %6537 = vmatpush1.bf16.msra.mxu0 %v13230_v15  ;;  %v13301_v15 = vld [vmem:[#allocation7 + $0x16ac] ss:$72 sps:$4 sm:$0xff]  }
 0x2e6   : > { %6578 = vmatpush1.bf16.msra.mxu1 %v13233_v16  ;;  %6538 = vmatprep.subr.bf16.mxu0 %v13238_v19  ;;  %v1467_v16 = vsub.s32 6, %v15006_v23  ;;  %v1471_v19 = vsub.s32 7, %v15006_v23 }
 0x2e7   : > { %6579 = vmatprep.subr.bf16.mxu1 %v13241_v56  ;;  %v13296_v56 = vld [vmem:[#allocation7 + $0xda8] ss:$72 sps:$4 sm:$0xff]  }
 0x2e9   : > { %6539 = vmatpush1.bf16.msra.mxu0 %v13236_v20  ;;  %v13299_v20 = vld [vmem:[#allocation7 + $0x16a8] ss:$72 sps:$4 sm:$0xff]  }
 0x2ea   : > { %6580 = vmatpush1.bf16.msra.mxu1 %v13239_v21  ;;  %6540 = vmatprep.subr.bf16.mxu0 %v13244_v22  ;;  %v13304_v21 = vld [vmem:[#allocation7 + $0x424] ss:$72 sps:$4 sm:$0xff]  }
 0x2eb   : > { %6581 = vmatprep.subr.bf16.mxu1 %v13247_v25  ;;  %v13307_v22 = vld [vmem:[#allocation7 + $0xd24] ss:$72 sps:$4 sm:$0xff]  }
 0x2ec   : > { %v14299_v25 = vld [vmem:[#allocation8] sm:$0xff] }
 0x2ed   : > { %6541 = vmatpush1.bf16.msra.mxu0 %v13242_v26  ;;  %v1468_v26 = vrot.slane %v14299_v25, %v1467_v16 }
 0x2ee   : > { %6582 = vmatpush1.bf16.msra.mxu1 %v13245_v27  ;;  %6542 = vmatprep.subr.bf16.mxu0 %v13250_v30  ;;  %v13302_v27 = vld [vmem:[#allocation7 + $0x420] ss:$72 sps:$4 sm:$0xff]  }
 0x2ef   : > { %6583 = vmatprep.subr.bf16.mxu1 %v13253_v32  ;;  %v13305_v30 = vld [vmem:[#allocation7 + $0xd20] ss:$72 sps:$4 sm:$0xff]   ;;  %v1472_v32 = vrot.slane %v14299_v25, %v1471_v19 }
 0x2f0   : > { %v13338_v25 = vld [vmem:[#allocation7 + $0xc0] ss:$72 sps:$4 sm:$0xff]  }
 0x2f1   : > { %6543 = vmatpush1.bf16.msra.mxu0 %v13248_v33  ;;  %v13310_v33 = vld [vmem:[#allocation7 + $0x394] ss:$72 sps:$4 sm:$0xff]  }
 0x2f2   : > { %6584 = vmatpush1.bf16.msra.mxu1 %v13251_v35  ;;  %6544 = vmatprep.subr.bf16.mxu0 %v13256_v36  ;;  %v13313_v35 = vld [vmem:[#allocation7 + $0xc94] ss:$72 sps:$4 sm:$0xff]   ;;  %v6276_v36 = vadd.f32 %v15080_v53, %v1468_v26  ;;  %v6982_v53 = vrot.slane %v15029_v4, %v15009_v28  ;;  %v13341_v26 = vld [vmem:[#allocation7 + $0x9c0] ss:$72 sps:$4 sm:$0xff]  }
 0x2f3   : > { %6585 = vmatprep.subr.bf16.mxu1 %v13259_v37  ;;  %v13308_v37 = vld [vmem:[#allocation7 + $0x390] ss:$72 sps:$4 sm:$0xff]   ;;  %v13322_v4 = vld [vmem:[#allocation7 + $0x274] ss:$72 sps:$4 sm:$0xff]  }
 0x2f5   : > { %6545 = vmatpush2.bf16.msra.mxu0 %v13254_v38  ;;  %v13311_v38 = vld [vmem:[#allocation7 + $0xc90] ss:$72 sps:$4 sm:$0xff]  }
 0x2f6   : > { %6586 = vmatpush2.bf16.msra.mxu1 %v13257_v39  ;;  %6546 = vmatprep.subr.bf16.mxu0 %v13262_v40 }
 0x2f7   : > { %6587 = vmatprep.subr.bf16.mxu1 %v13265_v41  ;;  %v6278_v41 = vadd.f32 %v15085_v60, %v1472_v32  ;;  %v13344_v32 = vld [vmem:[#allocation7 + $0x30] ss:$72 sps:$4 sm:$0xff]  }
 0x2f9   : > { %6547 = vmatpush2.bf16.msra.mxu0 %v13260_v42 }
 0x2fa   : > { %6588 = vmatpush2.bf16.msra.mxu1 %v13263_v43  ;;  %6548 = vmatprep.subr.bf16.mxu0 %v13268_v3 }
 0x2fb   : > { %6589 = vmatprep.subr.bf16.mxu1 %v13271_v45  ;;  %v13316_v45 = vld [vmem:[#allocation7 + $0x304] ss:$72 sps:$4 sm:$0xff]  }
 0x2fd   : > { %6549 = vmatpush2.bf16.msra.mxu0 %v13266_v46  ;;  %v13319_v46 = vld [vmem:[#allocation7 + $0xc04] ss:$72 sps:$4 sm:$0xff]  }
 0x2fe   : > { %6590 = vmatpush2.bf16.msra.mxu1 %v13269_v48  ;;  %6550 = vmatprep.subr.bf16.mxu0 %v13274_v10 }
 0x2ff   : > { %6591 = vmatprep.subr.bf16.mxu1 %v13277_v52  ;;  %v13314_v52 = vld [vmem:[#allocation7 + $0x300] ss:$72 sps:$4 sm:$0xff]  }
 0x301   : > { %6551 = vmatpush2.bf16.msra.mxu0 %v13272_v55  ;;  %v13317_v55 = vld [vmem:[#allocation7 + $0xc00] ss:$72 sps:$4 sm:$0xff]  }
 0x302   : > { %6592 = vmatpush2.bf16.msra.mxu1 %v13275_v57  ;;  %6552 = vmatprep.subr.bf16.mxu0 %v13280_v58  ;;  %v6986_v58 = vrot.slane %v15034_v11, %v15009_v28  ;;  %v13328_v11 = vld [vmem:[#allocation7 + $0x1e4] ss:$72 sps:$4 sm:$0xff]  }
 0x303   : > { %6593 = vmatprep.subr.bf16.mxu1 %v13283_v62 }
 0x305   : > { %6553 = vmatpush2.bf16.msra.mxu0 %v13278_v63 }
 0x306   : > { %6594 = vmatpush2.bf16.msra.mxu1 %v13281_v24  ;;  %6554 = vmatprep.subr.bf16.mxu0 %v13286_v1  ;;  %v13325_v1 = vld [vmem:[#allocation7 + $0xb74] ss:$72 sps:$4 sm:$0xff]  }
 0x307   : > { %6595 = vmatprep.subr.bf16.mxu1 %v13289_v2 }
 0x309   : > { %6555 = vmatpush2.bf16.msra.mxu0 %v13284_v5 }
 0x30a   : > { %6596 = vmatpush2.bf16.msra.mxu1 %v13287_v8  ;;  %6556 = vmatprep.subr.bf16.mxu0 %v13292_v9  ;;  %v13320_v8 = vld [vmem:[#allocation7 + $0x270] ss:$72 sps:$4 sm:$0xff]  }
 0x30b   : > { %6597 = vmatprep.subr.bf16.mxu1 %v13295_v29  ;;  %v13323_v9 = vld [vmem:[#allocation7 + $0xb70] ss:$72 sps:$4 sm:$0xff]   ;;  %v13331_v29 = vld [vmem:[#allocation7 + $0xae4] ss:$72 sps:$4 sm:$0xff]  }
 0x30d   : > { %6557 = vmatpush2.bf16.msra.mxu0 %v13290_v12  ;;  %v13326_v12 = vld [vmem:[#allocation7 + $0x1e0] ss:$72 sps:$4 sm:$0xff]  }
 0x30e   : > { %6598 = vmatpush2.bf16.msra.mxu1 %v13293_v13  ;;  %6558 = vmatprep.subr.bf16.mxu0 %v13298_v50  ;;  %v13329_v13 = vld [vmem:[#allocation7 + $0xae0] ss:$72 sps:$4 sm:$0xff]   ;;  %v13334_v50 = vld [vmem:[#allocation7 + $0x154] ss:$72 sps:$4 sm:$0xff]  }
 0x30f   : > { %6599 = vmatprep.subr.bf16.mxu1 %v13301_v15  ;;  %v13337_v15 = vld [vmem:[#allocation7 + $0xa54] ss:$72 sps:$4 sm:$0xff]  }
 0x311   : > { %6559 = vmatpush2.bf16.msra.mxu0 %v13296_v56  ;;  %v13332_v56 = vld [vmem:[#allocation7 + $0x150] ss:$72 sps:$4 sm:$0xff]  }
 0x312   : > { %6600 = vmatpush2.bf16.msra.mxu1 %v13299_v20  ;;  %6610 = vmatprep.subr.bf16.mxu0 %v13304_v21  ;;  %v13335_v20 = vld [vmem:[#allocation7 + $0xa50] ss:$72 sps:$4 sm:$0xff]   ;;  %v13340_v21 = vld [vmem:[#allocation7 + $0xc4] ss:$72 sps:$4 sm:$0xff]  }
 0x313   : > { %6651 = vmatprep.subr.bf16.mxu1 %v13307_v22  ;;  %v13343_v22 = vld [vmem:[#allocation7 + $0x9c4] ss:$72 sps:$4 sm:$0xff]  }
 0x314   : > { %v6316_v39 = vpop.f32.mrf.mxu0  ;;  %6561 = vmatmul.mubr.bf16.vlgmr.msra.gmra.mxu0 %v14981_v7 }
 0x315   : > { %6602 = vmatmul.mubr.bf16.vlgmr.msra.gmra.mxu1 %v14996_v14  ;;  %v6357_v40 = vpop.f32.mrf.mxu1  ;;  %v6317_v42 = vadd.f32 %v6316_v39, %v6276_v36  ;;  %6611 = vmatpush1.bf16.msra.mxu0 %v13302_v27  ;;  %v13346_v27 = vld [vmem:[#allocation7 + $0x34] ss:$72 sps:$4 sm:$0xff]   ;;  %v13355_v36 = vld [vmem:[#allocation7 + $0x11a4] ss:$72 sps:$4 sm:$0xff]  }
 0x316   : > { %6652 = vmatpush1.bf16.msra.mxu1 %v13305_v30  ;;  %v6318_v43 = vpop.f32.mrf.mxu0  ;;  %6612 = vmatprep.subr.bf16.mxu0 %v13310_v33  ;;  %v13349_v30 = vld [vmem:[#allocation7 + $0x934] ss:$72 sps:$4 sm:$0xff]   ;;  %v13347_v33 = vld [vmem:[#allocation7 + $0x930] ss:$72 sps:$4 sm:$0xff]  }
 0x317   : > { %v6359_v3 = vpop.f32.mrf.mxu1  ;;  %6653 = vmatprep.subr.bf16.mxu1 %v13313_v35  ;;  %v6319_v48 = vadd.f32 %v6318_v43, %v6278_v41  ;;  %v6358_v10 = vadd.f32 %v6357_v40, %v6317_v42  ;;  %6642 = vmatprep.mubr.bf16.mxu0 %v14972_v47  ;;  %v13352_v35 = vld [vmem:[#allocation7 + $0x8a4] ss:$72 sps:$4 sm:$0xff]   ;;  %v13358_v39 = vld [vmem:[#allocation7 + $0x814] ss:$72 sps:$4 sm:$0xff]   ;;  %v13356_v41 = vld [vmem:[#allocation7 + $0x810] ss:$72 sps:$4 sm:$0xff]  }
 0x318   : > { %6683 = vmatprep.mubr.bf16.mxu1 %v14975_v51  ;;  %v6320_v60 = vpop.f32.mrf.mxu0  ;;  %v13361_v40 = vld [vmem:[#allocation7 + $0x1114] ss:$72 sps:$4 sm:$0xff]   ;;  %v13359_v42 = vld [vmem:[#allocation7 + $0x1110] ss:$72 sps:$4 sm:$0xff]   ;;  %v13364_v43 = vld [vmem:[#allocation7 + $0x784] ss:$72 sps:$4 sm:$0xff]  }
 0x319   : > { %v6361_v57 = vpop.f32.mrf.mxu1  ;;  %v15108_v62 = vmul.f32 %v6982_v53, %v6358_v10  ;;  %v6360_v63 = vadd.f32 %v6359_v3, %v6319_v48  ;;  %6613 = vmatpush1.bf16.msra.mxu0 %v13308_v37  ;;  %v13350_v37 = vld [vmem:[#allocation7 + $0x8a0] ss:$72 sps:$4 sm:$0xff]   ;;  %v13367_v3 = vld [vmem:[#allocation7 + $0x1084] ss:$72 sps:$4 sm:$0xff]   ;;  %v13370_v53 = vld [vmem:[#allocation7 + $0x6f4] ss:$72 sps:$4 sm:$0xff]  }
 0x31a   : > { %6654 = vmatpush1.bf16.msra.mxu1 %v13311_v38  ;;  %v6321_v24 = vpop.f32.mrf.mxu0  ;;  %6614 = vmatprep.subr.bf16.mxu0 %v13316_v45  ;;  %v13353_v38 = vld [vmem:[#allocation7 + $0x11a0] ss:$72 sps:$4 sm:$0xff]   ;;  %v13373_v48 = vld [vmem:[#allocation7 + $0xff4] ss:$72 sps:$4 sm:$0xff]   ;;  %v13368_v10 = vld [vmem:[#allocation7 + $0x6f0] ss:$72 sps:$4 sm:$0xff]  }
 0x31b   : > { %6655 = vmatprep.subr.bf16.mxu1 %v13319_v46  ;;  %v6362_v2 = vpop.f32.mrf.mxu1  ;;  %v15110_v5 = vmul.f32 %v6986_v58, %v6360_v63  ;;  %v13362_v45 = vld [vmem:[#allocation7 + $0x780] ss:$72 sps:$4 sm:$0xff]   ;;  %v13379_v60 = vld [vmem:[#allocation7 + $0xf64] ss:$72 sps:$4 sm:$0xff]   ;;  %v13382_v63 = vld [vmem:[#allocation7 + $0x5d4] ss:$72 sps:$4 sm:$0xff]  }
 0x31c   : > { %v13365_v46 = vld [vmem:[#allocation7 + $0x1080] ss:$72 sps:$4 sm:$0xff]   ;;  %v13385_v24 = vld [vmem:[#allocation7 + $0xed4] ss:$72 sps:$4 sm:$0xff]   ;;  %v13388_v2 = vld [vmem:[#allocation7 + $0x544] ss:$72 sps:$4 sm:$0xff]  }
 0x31d   : > { %6615 = vmatpush1.bf16.msra.mxu0 %v13314_v52  ;;  %v13371_v52 = vld [vmem:[#allocation7 + $0xff0] ss:$72 sps:$4 sm:$0xff]   ;;  %v13374_v57 = vld [vmem:[#allocation7 + $0x660] ss:$72 sps:$4 sm:$0xff]  }
 0x31e   : > { %6656 = vmatpush1.bf16.msra.mxu1 %v13317_v55  ;;  %6616 = vmatprep.subr.bf16.mxu0 %v13322_v4  ;;  %v13376_v55 = vld [vmem:[#allocation7 + $0x664] ss:$72 sps:$4 sm:$0xff]   ;;  %v13377_v58 = vld [vmem:[#allocation7 + $0xf60] ss:$72 sps:$4 sm:$0xff]   ;;  %v13380_v4 = vld [vmem:[#allocation7 + $0x5d0] ss:$72 sps:$4 sm:$0xff]  }
 0x31f   : > { %6657 = vmatprep.subr.bf16.mxu1 %v13325_v1  ;;  %v13383_v1 = vld [vmem:[#allocation7 + $0xed0] ss:$72 sps:$4 sm:$0xff]  }
 0x321   : > { %6617 = vmatpush1.bf16.msra.mxu0 %v13320_v8  ;;  %v13391_v8 = vld [vmem:[#allocation7 + $0xe44] ss:$72 sps:$4 sm:$0xff]  }
 0x322   : > { %6658 = vmatpush1.bf16.msra.mxu1 %v13323_v9  ;;  %6618 = vmatprep.subr.bf16.mxu0 %v13328_v11  ;;  %v13386_v9 = vld [vmem:[#allocation7 + $0x540] ss:$72 sps:$4 sm:$0xff]  }
 0x323   : > { %6659 = vmatprep.subr.bf16.mxu1 %v13331_v29  ;;  %v13389_v11 = vld [vmem:[#allocation7 + $0xe40] ss:$72 sps:$4 sm:$0xff]   ;;  %v13394_v29 = vld [vmem:[#allocation7 + $0x4b4] ss:$72 sps:$4 sm:$0xff]  }
 0x325   : > { %6619 = vmatpush1.bf16.msra.mxu0 %v13326_v12  ;;  %v13397_v12 = vld [vmem:[#allocation7 + $0xdb4] ss:$72 sps:$4 sm:$0xff]  }
 0x326   : > { %6660 = vmatpush1.bf16.msra.mxu1 %v13329_v13  ;;  %6620 = vmatprep.subr.bf16.mxu0 %v13334_v50  ;;  %v13392_v13 = vld [vmem:[#allocation7 + $0x4b0] ss:$72 sps:$4 sm:$0xff]  }
 0x327   : > { %6661 = vmatprep.subr.bf16.mxu1 %v13337_v15  ;;  %v13395_v50 = vld [vmem:[#allocation7 + $0xdb0] ss:$72 sps:$4 sm:$0xff]   ;;  %v15112_v15 = vld [vmem:[#allocation8 + $0x8] sm:$0xff] }
 0x329   : > { %6621 = vmatpush1.bf16.msra.mxu0 %v13332_v56  ;;  %v13400_v56 = vld [vmem:[#allocation7 + $0x1624] ss:$72 sps:$4 sm:$0xff]  }
 0x32a   : > { %6662 = vmatpush1.bf16.msra.mxu1 %v13335_v20  ;;  %6622 = vmatprep.subr.bf16.mxu0 %v13340_v21  ;;  %v13403_v20 = vld [vmem:[#allocation7 + $0x42c] ss:$72 sps:$4 sm:$0xff]   ;;  %v13398_v21 = vld [vmem:[#allocation7 + $0x1620] ss:$72 sps:$4 sm:$0xff]  }
 0x32b   : > { %6663 = vmatprep.subr.bf16.mxu1 %v13343_v22  ;;  %v13401_v22 = vld [vmem:[#allocation7 + $0x428] ss:$72 sps:$4 sm:$0xff]  }
 0x32d   : > { %6623 = vmatpush1.bf16.msra.mxu0 %v13338_v25  ;;  %v1476_v25 = vrot.slane %v15112_v15, %v15009_v28 }
 0x32e   : > { %6664 = vmatpush1.bf16.msra.mxu1 %v13341_v26  ;;  %6624 = vmatprep.subr.bf16.mxu0 %v13346_v27  ;;  %v13406_v26 = vld [vmem:[#allocation7 + $0x1594] ss:$72 sps:$4 sm:$0xff]  }
 0x32f   : > { %6665 = vmatprep.subr.bf16.mxu1 %v13349_v30  ;;  %v13409_v27 = vld [vmem:[#allocation7 + $0x39c] ss:$72 sps:$4 sm:$0xff]   ;;  %v1480_v30 = vrot.slane %v15112_v15, %v15012_v31 }
 0x331   : > { %6625 = vmatpush1.bf16.msra.mxu0 %v13344_v32  ;;  %v13404_v32 = vld [vmem:[#allocation7 + $0x1590] ss:$72 sps:$4 sm:$0xff]  }
 0x332   : > { %6666 = vmatpush1.bf16.msra.mxu1 %v13347_v33  ;;  %6626 = vmatprep.subr.bf16.mxu0 %v13352_v35  ;;  %v13407_v33 = vld [vmem:[#allocation7 + $0x398] ss:$72 sps:$4 sm:$0xff]  }
 0x333   : > { %6667 = vmatprep.subr.bf16.mxu1 %v13355_v36 }
 0x335   : > { %6627 = vmatpush2.bf16.msra.mxu0 %v13350_v37 }
 0x336   : > { %6668 = vmatpush2.bf16.msra.mxu1 %v13353_v38  ;;  %6628 = vmatprep.subr.bf16.mxu0 %v13358_v39 }
 0x337   : > { %6669 = vmatprep.subr.bf16.mxu1 %v13361_v40  ;;  %v13412_v40 = vld [vmem:[#allocation7 + $0x1504] ss:$72 sps:$4 sm:$0xff]  }
 0x339   : > { %6629 = vmatpush2.bf16.msra.mxu0 %v13356_v41  ;;  %v13415_v41 = vld [vmem:[#allocation7 + $0x30c] ss:$72 sps:$4 sm:$0xff]  }
 0x33a   : > { %6670 = vmatpush2.bf16.msra.mxu1 %v13359_v42  ;;  %6630 = vmatprep.subr.bf16.mxu0 %v13364_v43 }
 0x33b   : > { %6671 = vmatprep.subr.bf16.mxu1 %v13367_v3  ;;  %v13410_v3 = vld [vmem:[#allocation7 + $0x1500] ss:$72 sps:$4 sm:$0xff]  }
 0x33d   : > { %6631 = vmatpush2.bf16.msra.mxu0 %v13362_v45  ;;  %v13413_v45 = vld [vmem:[#allocation7 + $0x308] ss:$72 sps:$4 sm:$0xff]  }
 0x33e   : > { %6672 = vmatpush2.bf16.msra.mxu1 %v13365_v46  ;;  %6632 = vmatprep.subr.bf16.mxu0 %v13370_v53 }
 0x33f   : > { %6673 = vmatprep.subr.bf16.mxu1 %v13373_v48 }
 0x341   : > { %6633 = vmatpush2.bf16.msra.mxu0 %v13368_v10 }
 0x342   : > { %6674 = vmatpush2.bf16.msra.mxu1 %v13371_v52  ;;  %6634 = vmatprep.subr.bf16.mxu0 %v13376_v55  ;;  %v13418_v52 = vld [vmem:[#allocation7 + $0x1474] ss:$72 sps:$4 sm:$0xff]  }
 0x343   : > { %6675 = vmatprep.subr.bf16.mxu1 %v13379_v60  ;;  %v13421_v55 = vld [vmem:[#allocation7 + $0x27c] ss:$72 sps:$4 sm:$0xff]  }
 0x345   : > { %6635 = vmatpush2.bf16.msra.mxu0 %v13374_v57  ;;  %v13416_v57 = vld [vmem:[#allocation7 + $0x1470] ss:$72 sps:$4 sm:$0xff]  }
 0x346   : > { %6676 = vmatpush2.bf16.msra.mxu1 %v13377_v58  ;;  %6636 = vmatprep.subr.bf16.mxu0 %v13382_v63  ;;  %v13419_v58 = vld [vmem:[#allocation7 + $0x278] ss:$72 sps:$4 sm:$0xff]   ;;  %v13424_v63 = vld [vmem:[#allocation7 + $0x13e4] ss:$72 sps:$4 sm:$0xff]  }
 0x347   : > { %6677 = vmatprep.subr.bf16.mxu1 %v13385_v24  ;;  %v13427_v24 = vld [vmem:[#allocation7 + $0x1ec] ss:$72 sps:$4 sm:$0xff]  }
 0x349   : > { %6637 = vmatpush2.bf16.msra.mxu0 %v13380_v4  ;;  %v13422_v4 = vld [vmem:[#allocation7 + $0x13e0] ss:$72 sps:$4 sm:$0xff]  }
 0x34a   : > { %6678 = vmatpush2.bf16.msra.mxu1 %v13383_v1  ;;  %6638 = vmatprep.subr.bf16.mxu0 %v13388_v2  ;;  %v13425_v1 = vld [vmem:[#allocation7 + $0x1e8] ss:$72 sps:$4 sm:$0xff]   ;;  %v13430_v2 = vld [vmem:[#allocation7 + $0x1354] ss:$72 sps:$4 sm:$0xff]  }
 0x34b   : > { %6679 = vmatprep.subr.bf16.mxu1 %v13391_v8  ;;  %v13433_v8 = vld [vmem:[#allocation7 + $0x15c] ss:$72 sps:$4 sm:$0xff]  }
 0x34d   : > { %6639 = vmatpush2.bf16.msra.mxu0 %v13386_v9  ;;  %v13428_v9 = vld [vmem:[#allocation7 + $0x1350] ss:$72 sps:$4 sm:$0xff]  }
 0x34e   : > { %6680 = vmatpush2.bf16.msra.mxu1 %v13389_v11  ;;  %6640 = vmatprep.subr.bf16.mxu0 %v13394_v29  ;;  %v13431_v11 = vld [vmem:[#allocation7 + $0x158] ss:$72 sps:$4 sm:$0xff]   ;;  %v13436_v29 = vld [vmem:[#allocation7 + $0x12c4] ss:$72 sps:$4 sm:$0xff]  }
 0x34f   : > { %6681 = vmatprep.subr.bf16.mxu1 %v13397_v12  ;;  %v13439_v12 = vld [vmem:[#allocation7 + $0xcc] ss:$72 sps:$4 sm:$0xff]  }
 0x351   : > { %6641 = vmatpush2.bf16.msra.mxu0 %v13392_v13  ;;  %v13434_v13 = vld [vmem:[#allocation7 + $0x12c0] ss:$72 sps:$4 sm:$0xff]  }
 0x352   : > { %6682 = vmatpush2.bf16.msra.mxu1 %v13395_v50  ;;  %6692 = vmatprep.subr.bf16.mxu0 %v13400_v56  ;;  %v13437_v50 = vld [vmem:[#allocation7 + $0xc8] ss:$72 sps:$4 sm:$0xff]   ;;  %v13442_v56 = vld [vmem:[#allocation7 + $0x1234] ss:$72 sps:$4 sm:$0xff]  }
 0x353   : > { %6733 = vmatprep.subr.bf16.mxu1 %v13403_v20  ;;  %v13445_v20 = vld [vmem:[#allocation7 + $0x3c] ss:$72 sps:$4 sm:$0xff]  }
 0x354   : > { %v6398_v35 = vpop.f32.mrf.mxu0  ;;  %6643 = vmatmul.mubr.bf16.vlgmr.msra.gmra.mxu0 %v14979_v6 }
 0x355   : > { %6684 = vmatmul.mubr.bf16.vlgmr.msra.gmra.mxu1 %v14981_v7  ;;  %v6439_v36 = vpop.f32.mrf.mxu1  ;;  %v6399_v37 = vadd.f32 %v6398_v35, %v1476_v25  ;;  %6693 = vmatpush1.bf16.msra.mxu0 %v13398_v21  ;;  %v13440_v21 = vld [vmem:[#allocation7 + $0x1230] ss:$72 sps:$4 sm:$0xff]   ;;  %v13448_v25 = vld [vmem:[#allocation7 + $0x1aa4] ss:$72 sps:$4 sm:$0xff]  }
 0x356   : > { %6734 = vmatpush1.bf16.msra.mxu1 %v13401_v22  ;;  %v6400_v38 = vpop.f32.mrf.mxu0  ;;  %6694 = vmatprep.subr.bf16.mxu0 %v13406_v26  ;;  %v13443_v22 = vld [vmem:[#allocation7 + $0x38] ss:$72 sps:$4 sm:$0xff]   ;;  %v13451_v26 = vld [vmem:[#allocation7 + $0x8ac] ss:$72 sps:$4 sm:$0xff]  }
 0x357   : > { %v6441_v39 = vpop.f32.mrf.mxu1  ;;  %6735 = vmatprep.subr.bf16.mxu1 %v13409_v27  ;;  %v6401_v42 = vadd.f32 %v6400_v38, %v1480_v30  ;;  %v15120_v43 = vadd.f32 %v6439_v36, %v6399_v37  ;;  %6724 = vmatprep.mubr.bf16.mxu0 %v14991_v34  ;;  %v13446_v27 = vld [vmem:[#allocation7 + $0x1aa0] ss:$72 sps:$4 sm:$0xff]   ;;  %v13452_v35 = vld [vmem:[#allocation7 + $0x1a10] ss:$72 sps:$4 sm:$0xff]   ;;  %v13460_v37 = vld [vmem:[#allocation7 + $0x1984] ss:$72 sps:$4 sm:$0xff]  }
 0x358   : > { %6765 = vmatprep.mubr.bf16.mxu1 %v14972_v47  ;;  %v6402_v46 = vpop.f32.mrf.mxu0  ;;  %v13449_v30 = vld [vmem:[#allocation7 + $0x8a8] ss:$72 sps:$4 sm:$0xff]   ;;  %v13455_v36 = vld [vmem:[#allocation7 + $0x818] ss:$72 sps:$4 sm:$0xff]   ;;  %v13463_v38 = vld [vmem:[#allocation7 + $0x78c] ss:$72 sps:$4 sm:$0xff]  }
 0x359   : > { %v6443_v53 = vpop.f32.mrf.mxu1  ;;  %v15124_v48 = vadd.f32 %v6441_v39, %v6401_v42  ;;  %6695 = vmatpush1.bf16.msra.mxu0 %v13404_v32  ;;  %v13454_v32 = vld [vmem:[#allocation7 + $0x1a14] ss:$72 sps:$4 sm:$0xff]   ;;  %v13458_v39 = vld [vmem:[#allocation7 + $0x1980] ss:$72 sps:$4 sm:$0xff]   ;;  %v13472_v46 = vld [vmem:[#allocation7 + $0x1864] ss:$72 sps:$4 sm:$0xff]  }
 0x35a   : > { %6736 = vmatpush1.bf16.msra.mxu1 %v13407_v33  ;;  %v6403_v10 = vpop.f32.mrf.mxu0  ;;  %6696 = vmatprep.subr.bf16.mxu0 %v13412_v40  ;;  %v13457_v33 = vld [vmem:[#allocation7 + $0x81c] ss:$72 sps:$4 sm:$0xff]   ;;  %v13461_v40 = vld [vmem:[#allocation7 + $0x788] ss:$72 sps:$4 sm:$0xff]   ;;  %v13475_v53 = vld [vmem:[#allocation7 + $0x66c] ss:$72 sps:$4 sm:$0xff]  }
 0x35b   : > { %6737 = vmatprep.subr.bf16.mxu1 %v13415_v41  ;;  %v6444_v60 = vpop.f32.mrf.mxu1  ;;  %v13466_v41 = vld [vmem:[#allocation7 + $0x18f4] ss:$72 sps:$4 sm:$0xff]   ;;  %v13470_v10 = vld [vmem:[#allocation7 + $0x1860] ss:$72 sps:$4 sm:$0xff]  }
 0x35c   : > { %v13469_v42 = vld [vmem:[#allocation7 + $0x6fc] ss:$72 sps:$4 sm:$0xff]  }
 0x35d   : > { %6697 = vmatpush1.bf16.msra.mxu0 %v13410_v3  ;;  %v13464_v3 = vld [vmem:[#allocation7 + $0x18f0] ss:$72 sps:$4 sm:$0xff]   ;;  %v13481_v60 = vld [vmem:[#allocation7 + $0x5dc] ss:$72 sps:$4 sm:$0xff]  }
 0x35e   : > { %6738 = vmatpush1.bf16.msra.mxu1 %v13413_v45  ;;  %6698 = vmatprep.subr.bf16.mxu0 %v13418_v52  ;;  %v13467_v45 = vld [vmem:[#allocation7 + $0x6f8] ss:$72 sps:$4 sm:$0xff]   ;;  %v13473_v52 = vld [vmem:[#allocation7 + $0x668] ss:$72 sps:$4 sm:$0xff]  }
 0x35f   : > { %6739 = vmatprep.subr.bf16.mxu1 %v13421_v55  ;;  %v13478_v55 = vld [vmem:[#allocation7 + $0x17d4] ss:$72 sps:$4 sm:$0xff]  }
 0x361   : > { %6699 = vmatpush1.bf16.msra.mxu0 %v13416_v57  ;;  %v13476_v57 = vld [vmem:[#allocation7 + $0x17d0] ss:$72 sps:$4 sm:$0xff]  }
 0x362   : > { %6740 = vmatpush1.bf16.msra.mxu1 %v13419_v58  ;;  %6700 = vmatprep.subr.bf16.mxu0 %v13424_v63  ;;  %v13479_v58 = vld [vmem:[#allocation7 + $0x5d8] ss:$72 sps:$4 sm:$0xff]   ;;  %v13484_v63 = vld [vmem:[#allocation7 + $0x1744] ss:$72 sps:$4 sm:$0xff]  }
 0x363   : > { %6741 = vmatprep.subr.bf16.mxu1 %v13427_v24  ;;  %v13487_v24 = vld [vmem:[#allocation7 + $0x54c] ss:$72 sps:$4 sm:$0xff]  }
 0x365   : > { %6701 = vmatpush1.bf16.msra.mxu0 %v13422_v4  ;;  %v13482_v4 = vld [vmem:[#allocation7 + $0x1740] ss:$72 sps:$4 sm:$0xff]  }
 0x366   : > { %6742 = vmatpush1.bf16.msra.mxu1 %v13425_v1  ;;  %6702 = vmatprep.subr.bf16.mxu0 %v13430_v2  ;;  %v13485_v1 = vld [vmem:[#allocation7 + $0x548] ss:$72 sps:$4 sm:$0xff]   ;;  %v13490_v2 = vld [vmem:[#allocation7 + $0x16b4] ss:$72 sps:$4 sm:$0xff]  }
 0x367   : > { %6743 = vmatprep.subr.bf16.mxu1 %v13433_v8  ;;  %v13493_v8 = vld [vmem:[#allocation7 + $0x4bc] ss:$72 sps:$4 sm:$0xff]  }
 0x369   : > { %6703 = vmatpush1.bf16.msra.mxu0 %v13428_v9  ;;  %v13488_v9 = vld [vmem:[#allocation7 + $0x16b0] ss:$72 sps:$4 sm:$0xff]  }
 0x36a   : > { %6744 = vmatpush1.bf16.msra.mxu1 %v13431_v11  ;;  %6704 = vmatprep.subr.bf16.mxu0 %v13436_v29  ;;  %v13491_v11 = vld [vmem:[#allocation7 + $0x4b8] ss:$72 sps:$4 sm:$0xff]   ;;  %v13496_v29 = vld [vmem:[#allocation7 + $0xd2c] ss:$72 sps:$4 sm:$0xff]  }
 0x36b   : > { %6745 = vmatprep.subr.bf16.mxu1 %v13439_v12  ;;  %v13499_v12 = vld [vmem:[#allocation7 + $0x162c] ss:$72 sps:$4 sm:$0xff]  }
 0x36d   : > { %6705 = vmatpush1.bf16.msra.mxu0 %v13434_v13  ;;  %v13494_v13 = vld [vmem:[#allocation7 + $0xd28] ss:$72 sps:$4 sm:$0xff]  }
 0x36e   : > { %6746 = vmatpush1.bf16.msra.mxu1 %v13437_v50  ;;  %6706 = vmatprep.subr.bf16.mxu0 %v13442_v56  ;;  %v13497_v50 = vld [vmem:[#allocation7 + $0x1628] ss:$72 sps:$4 sm:$0xff]   ;;  %v13502_v56 = vld [vmem:[#allocation7 + $0xc9c] ss:$72 sps:$4 sm:$0xff]  }
 0x36f   : > { %6747 = vmatprep.subr.bf16.mxu1 %v13445_v20  ;;  %v13505_v20 = vld [vmem:[#allocation7 + $0x159c] ss:$72 sps:$4 sm:$0xff]  }
 0x371   : > { %6707 = vmatpush1.bf16.msra.mxu0 %v13440_v21  ;;  %v13500_v21 = vld [vmem:[#allocation7 + $0xc98] ss:$72 sps:$4 sm:$0xff]  }
 0x372   : > { %6748 = vmatpush1.bf16.msra.mxu1 %v13443_v22  ;;  %6708 = vmatprep.subr.bf16.mxu0 %v13448_v25  ;;  %v13503_v22 = vld [vmem:[#allocation7 + $0x1598] ss:$72 sps:$4 sm:$0xff]  }
 0x373   : > { %6749 = vmatprep.subr.bf16.mxu1 %v13451_v26  ;;  %v13508_v26 = vld [vmem:[#allocation7 + $0xc0c] ss:$72 sps:$4 sm:$0xff]  }
 0x375   : > { %6709 = vmatpush2.bf16.msra.mxu0 %v13446_v27  ;;  %v13511_v27 = vld [vmem:[#allocation7 + $0x150c] ss:$72 sps:$4 sm:$0xff]  }
 0x376   : > { %6750 = vmatpush2.bf16.msra.mxu1 %v13449_v30  ;;  %6710 = vmatprep.subr.bf16.mxu0 %v13454_v32  ;;  %v6990_v32 = vrot.slane %v15054_v44, %v15009_v28 }
 0x377   : > { %6751 = vmatprep.subr.bf16.mxu1 %v13457_v33 }
 0x379   : > { %6711 = vmatpush2.bf16.msra.mxu0 %v13452_v35 }
 0x37a   : > { %6752 = vmatpush2.bf16.msra.mxu1 %v13455_v36  ;;  %6712 = vmatprep.subr.bf16.mxu0 %v13460_v37  ;;  %v6994_v37 = vrot.slane %v15058_v49, %v15009_v28  ;;  %v13514_v49 = vld [vmem:[#allocation7 + $0xb7c] ss:$72 sps:$4 sm:$0xff]  }
 0x37b   : > { %6753 = vmatprep.subr.bf16.mxu1 %v13463_v38 }
 0x37d   : > { %6713 = vmatpush2.bf16.msra.mxu0 %v13458_v39 }
 0x37e   : > { %6754 = vmatpush2.bf16.msra.mxu1 %v13461_v40  ;;  %6714 = vmatprep.subr.bf16.mxu0 %v13466_v41  ;;  %v13509_v40 = vld [vmem:[#allocation7 + $0x1508] ss:$72 sps:$4 sm:$0xff]  }
 0x37f   : > { %6755 = vmatprep.subr.bf16.mxu1 %v13469_v42 }
 0x381   : > { %6715 = vmatpush2.bf16.msra.mxu0 %v13464_v3 }
 0x382   : > { %6756 = vmatpush2.bf16.msra.mxu1 %v13467_v45  ;;  %6716 = vmatprep.subr.bf16.mxu0 %v13472_v46  ;;  %v13517_v45 = vld [vmem:[#allocation7 + $0x147c] ss:$72 sps:$4 sm:$0xff]  }
 0x383   : > { %6757 = vmatprep.subr.bf16.mxu1 %v13475_v53  ;;  %v13512_v53 = vld [vmem:[#allocation7 + $0xb78] ss:$72 sps:$4 sm:$0xff]  }
 0x385   : > { %6717 = vmatpush2.bf16.msra.mxu0 %v13470_v10  ;;  %v13520_v10 = vld [vmem:[#allocation7 + $0xaec] ss:$72 sps:$4 sm:$0xff]  }
 0x386   : > { %6758 = vmatpush2.bf16.msra.mxu1 %v13473_v52  ;;  %6718 = vmatprep.subr.bf16.mxu0 %v13478_v55  ;;  %v13523_v52 = vld [vmem:[#allocation7 + $0x13ec] ss:$72 sps:$4 sm:$0xff]   ;;  %v13518_v55 = vld [vmem:[#allocation7 + $0xae8] ss:$72 sps:$4 sm:$0xff]  }
 0x387   : > { %6759 = vmatprep.subr.bf16.mxu1 %v13481_v60  ;;  %v13521_v60 = vld [vmem:[#allocation7 + $0x13e8] ss:$72 sps:$4 sm:$0xff]  }
 0x389   : > { %6719 = vmatpush2.bf16.msra.mxu0 %v13476_v57  ;;  %v13526_v57 = vld [vmem:[#allocation7 + $0xa5c] ss:$72 sps:$4 sm:$0xff]  }
 0x38a   : > { %6760 = vmatpush2.bf16.msra.mxu1 %v13479_v58  ;;  %6720 = vmatprep.subr.bf16.mxu0 %v13484_v63  ;;  %v13529_v58 = vld [vmem:[#allocation7 + $0x135c] ss:$72 sps:$4 sm:$0xff]   ;;  %v13524_v63 = vld [vmem:[#allocation7 + $0xa58] ss:$72 sps:$4 sm:$0xff]  }
 0x38b   : > { %6761 = vmatprep.subr.bf16.mxu1 %v13487_v24  ;;  %v13527_v24 = vld [vmem:[#allocation7 + $0x1358] ss:$72 sps:$4 sm:$0xff]  }
 0x38d   : > { %6721 = vmatpush2.bf16.msra.mxu0 %v13482_v4  ;;  %v13532_v4 = vld [vmem:[#allocation7 + $0x9cc] ss:$72 sps:$4 sm:$0xff]  }
 0x38e   : > { %6762 = vmatpush2.bf16.msra.mxu1 %v13485_v1  ;;  %6722 = vmatprep.subr.bf16.mxu0 %v13490_v2  ;;  %v13535_v1 = vld [vmem:[#allocation7 + $0x12cc] ss:$72 sps:$4 sm:$0xff]   ;;  %v13530_v2 = vld [vmem:[#allocation7 + $0x9c8] ss:$72 sps:$4 sm:$0xff]  }
 0x38f   : > { %6763 = vmatprep.subr.bf16.mxu1 %v13493_v8  ;;  %v13533_v8 = vld [vmem:[#allocation7 + $0x12c8] ss:$72 sps:$4 sm:$0xff]  }
 0x391   : > { %6723 = vmatpush2.bf16.msra.mxu0 %v13488_v9  ;;  %v13538_v9 = vld [vmem:[#allocation7 + $0x93c] ss:$72 sps:$4 sm:$0xff]  }
 0x392   : > { %6764 = vmatpush2.bf16.msra.mxu1 %v13491_v11  ;;  %6774 = vmatprep.subr.bf16.mxu0 %v13496_v29  ;;  %v13541_v11 = vld [vmem:[#allocation7 + $0x123c] ss:$72 sps:$4 sm:$0xff]   ;;  %v13536_v29 = vld [vmem:[#allocation7 + $0x938] ss:$72 sps:$4 sm:$0xff]  }
 0x393   : > { %6815 = vmatprep.subr.bf16.mxu1 %v13499_v12  ;;  %v13539_v12 = vld [vmem:[#allocation7 + $0x1238] ss:$72 sps:$4 sm:$0xff]  }
 0x394   : > { %v6480_v25 = vpop.f32.mrf.mxu0  ;;  %6725 = vmatmul.mubr.bf16.vlgmr.msra.gmra.mxu0 %v14996_v14 }
 0x395   : > { %6766 = vmatmul.mubr.bf16.vlgmr.msra.gmra.mxu1 %v14979_v6  ;;  %v15128_v30 = vpop.f32.mrf.mxu1  ;;  %v6481_v33 = vadd.f32 %v6480_v25, %v15120_v43  ;;  %6775 = vmatpush1.bf16.msra.mxu0 %v13494_v13  ;;  %v13506_v43 = vld [vmem:[#allocation7 + $0xc08] ss:$72 sps:$4 sm:$0xff]   ;;  %v13544_v13 = vld [vmem:[#allocation7 + $0x11ac] ss:$72 sps:$4 sm:$0xff]   ;;  %v13548_v25 = vld [vmem:[#allocation7 + $0x1118] ss:$72 sps:$4 sm:$0xff]  }
 0x396   : > { %6816 = vmatpush1.bf16.msra.mxu1 %v13497_v50  ;;  %v6482_v35 = vpop.f32.mrf.mxu0  ;;  %6776 = vmatprep.subr.bf16.mxu0 %v13502_v56  ;;  %v13547_v50 = vld [vmem:[#allocation7 + $0x1aac] ss:$72 sps:$4 sm:$0xff]   ;;  %v13542_v56 = vld [vmem:[#allocation7 + $0x11a8] ss:$72 sps:$4 sm:$0xff]  }
 0x397   : > { %6817 = vmatprep.subr.bf16.mxu1 %v13505_v20  ;;  %v15133_v36 = vpop.f32.mrf.mxu1  ;;  %v15137_v38 = vmul.f32 %v6990_v32, %v6481_v33  ;;  %v6483_v39 = vadd.f32 %v6482_v35, %v15124_v48  ;;  %6806 = vmatprep.mubr.bf16.mxu0 %v14975_v51  ;;  %v13515_v48 = vld [vmem:[#allocation7 + $0x1478] ss:$72 sps:$4 sm:$0xff]   ;;  %v13545_v20 = vld [vmem:[#allocation7 + $0x1aa8] ss:$72 sps:$4 sm:$0xff]   ;;  %v13559_v32 = vld [vmem:[#allocation7 + $0x198c] ss:$72 sps:$4 sm:$0xff]  }
 0x398   : > { %6847 = vmatprep.mubr.bf16.mxu1 %v14991_v34  ;;  %v6484_v44 = vpop.f32.mrf.mxu0  ;;  %v13554_v33 = vld [vmem:[#allocation7 + $0x1088] ss:$72 sps:$4 sm:$0xff]  }
 0x399   : > { %v6525_v41 = vpop.f32.mrf.mxu1  ;;  %v15142_v42 = vmul.f32 %v6994_v37, %v6483_v39  ;;  %6777 = vmatpush1.bf16.msra.mxu0 %v13500_v21  ;;  %v13550_v21 = vld [vmem:[#allocation7 + $0x111c] ss:$72 sps:$4 sm:$0xff]   ;;  %v13557_v35 = vld [vmem:[#allocation7 + $0x1988] ss:$72 sps:$4 sm:$0xff]   ;;  %v13560_v44 = vld [vmem:[#allocation7 + $0xff8] ss:$72 sps:$4 sm:$0xff]  }
 0x39a   : > { %6818 = vmatpush1.bf16.msra.mxu1 %v13503_v22  ;;  %v6485_v3 = vpop.f32.mrf.mxu0  ;;  %6778 = vmatprep.subr.bf16.mxu0 %v13508_v26  ;;  %v13553_v22 = vld [vmem:[#allocation7 + $0x1a1c] ss:$72 sps:$4 sm:$0xff]   ;;  %v13551_v26 = vld [vmem:[#allocation7 + $0x1a18] ss:$72 sps:$4 sm:$0xff]   ;;  %v13571_v41 = vld [vmem:[#allocation7 + $0x186c] ss:$72 sps:$4 sm:$0xff]  }
 0x39b   : > { %6819 = vmatprep.subr.bf16.mxu1 %v13511_v27  ;;  %v6526_v46 = vpop.f32.mrf.mxu1  ;;  %v13556_v27 = vld [vmem:[#allocation7 + $0x108c] ss:$72 sps:$4 sm:$0xff]   ;;  %v13562_v37 = vld [vmem:[#allocation7 + $0xffc] ss:$72 sps:$4 sm:$0xff]   ;;  %v13566_v3 = vld [vmem:[#allocation7 + $0xf68] ss:$72 sps:$4 sm:$0xff]  }
 0x39c   : > { %v13565_v39 = vld [vmem:[#allocation7 + $0x18fc] ss:$72 sps:$4 sm:$0xff]  }
 0x39d   : > { %6779 = vmatpush1.bf16.msra.mxu0 %v13506_v43  ;;  %v13563_v43 = vld [vmem:[#allocation7 + $0x18f8] ss:$72 sps:$4 sm:$0xff]   ;;  %v13577_v46 = vld [vmem:[#allocation7 + $0x17dc] ss:$72 sps:$4 sm:$0xff]  }
 0x39e   : > { %6820 = vmatpush1.bf16.msra.mxu1 %v13509_v40  ;;  %6780 = vmatprep.subr.bf16.mxu0 %v13514_v49  ;;  %v13568_v40 = vld [vmem:[#allocation7 + $0xf6c] ss:$72 sps:$4 sm:$0xff]   ;;  %v13569_v49 = vld [vmem:[#allocation7 + $0x1868] ss:$72 sps:$4 sm:$0xff]  }
 0x39f   : > { %6821 = vmatprep.subr.bf16.mxu1 %v13517_v45  ;;  %v13574_v45 = vld [vmem:[#allocation7 + $0xedc] ss:$72 sps:$4 sm:$0xff]  }
 0x3a1   : > { %6781 = vmatpush1.bf16.msra.mxu0 %v13512_v53  ;;  %v13572_v53 = vld [vmem:[#allocation7 + $0xed8] ss:$72 sps:$4 sm:$0xff]  }
 0x3a2   : > { %6822 = vmatpush1.bf16.msra.mxu1 %v13515_v48  ;;  %6782 = vmatprep.subr.bf16.mxu0 %v13520_v10  ;;  %v13575_v48 = vld [vmem:[#allocation7 + $0x17d8] ss:$72 sps:$4 sm:$0xff]   ;;  %v13580_v10 = vld [vmem:[#allocation7 + $0xe4c] ss:$72 sps:$4 sm:$0xff]  }
 0x3a3   : > { %6823 = vmatprep.subr.bf16.mxu1 %v13523_v52  ;;  %v13583_v52 = vld [vmem:[#allocation7 + $0x174c] ss:$72 sps:$4 sm:$0xff]  }
 0x3a5   : > { %6783 = vmatpush1.bf16.msra.mxu0 %v13518_v55  ;;  %v13578_v55 = vld [vmem:[#allocation7 + $0xe48] ss:$72 sps:$4 sm:$0xff]  }
 0x3a6   : > { %6824 = vmatpush1.bf16.msra.mxu1 %v13521_v60  ;;  %6784 = vmatprep.subr.bf16.mxu0 %v13526_v57  ;;  %v13581_v60 = vld [vmem:[#allocation7 + $0x1748] ss:$72 sps:$4 sm:$0xff]   ;;  %v13586_v57 = vld [vmem:[#allocation7 + $0xdbc] ss:$72 sps:$4 sm:$0xff]  }
 0x3a7   : > { %6825 = vmatprep.subr.bf16.mxu1 %v13529_v58  ;;  %v13589_v58 = vld [vmem:[#allocation7 + $0x16bc] ss:$72 sps:$4 sm:$0xff]  }
 0x3a9   : > { %6785 = vmatpush1.bf16.msra.mxu0 %v13524_v63  ;;  %v13584_v63 = vld [vmem:[#allocation7 + $0xdb8] ss:$72 sps:$4 sm:$0xff]  }
 0x3aa   : > { %6826 = vmatpush1.bf16.msra.mxu1 %v13527_v24  ;;  %6786 = vmatprep.subr.bf16.mxu0 %v13532_v4  ;;  %v13587_v24 = vld [vmem:[#allocation7 + $0x16b8] ss:$72 sps:$4 sm:$0xff]   ;;  %v13592_v4 = vld [vmem:[#allocation7 + $0x434] ss:$72 sps:$4 sm:$0xff]  }
 0x3ab   : > { %6827 = vmatprep.subr.bf16.mxu1 %v13535_v1  ;;  %v13595_v1 = vld [vmem:[#allocation7 + $0xd34] ss:$72 sps:$4 sm:$0xff]  }
 0x3ad   : > { %6787 = vmatpush1.bf16.msra.mxu0 %v13530_v2  ;;  %v1484_v2 = vrot.slane %v15112_v15, %v15039_v17 }
 0x3ae   : > { %6828 = vmatpush1.bf16.msra.mxu1 %v13533_v8  ;;  %6788 = vmatprep.subr.bf16.mxu0 %v13538_v9  ;;  %v1488_v8 = vrot.slane %v15112_v15, %v15042_v18  ;;  %v13590_v9 = vld [vmem:[#allocation7 + $0x430] ss:$72 sps:$4 sm:$0xff]   ;;  %v13596_v15 = vld [vmem:[#allocation7 + $0x3a0] ss:$72 sps:$4 sm:$0xff]  }
 0x3af   : > { %6829 = vmatprep.subr.bf16.mxu1 %v13541_v11  ;;  %v13593_v11 = vld [vmem:[#allocation7 + $0xd30] ss:$72 sps:$4 sm:$0xff]  }
 0x3b1   : > { %6789 = vmatpush1.bf16.msra.mxu0 %v13536_v29  ;;  %v13598_v29 = vld [vmem:[#allocation7 + $0x3a4] ss:$72 sps:$4 sm:$0xff]  }
 0x3b2   : > { %6830 = vmatpush1.bf16.msra.mxu1 %v13539_v12  ;;  %6790 = vmatprep.subr.bf16.mxu0 %v13544_v13  ;;  %v13601_v12 = vld [vmem:[#allocation7 + $0xca4] ss:$72 sps:$4 sm:$0xff]   ;;  %v6522_v13 = vadd.f32 %v15128_v30, %v1484_v2  ;;  %v6998_v30 = vrot.slane %v15083_v54, %v15009_v28 }
 0x3b3   : > { %6831 = vmatprep.subr.bf16.mxu1 %v13547_v50  ;;  %v13610_v54 = vld [vmem:[#allocation7 + $0x284] ss:$72 sps:$4 sm:$0xff]  }
 0x3b4   : > { %v13637_v2 = vld [vmem:[#allocation7 + $0x944] ss:$72 sps:$4 sm:$0xff]  }
 0x3b5   : > { %6791 = vmatpush2.bf16.msra.mxu0 %v13542_v56 }
 0x3b6   : > { %6832 = vmatpush2.bf16.msra.mxu1 %v13545_v20  ;;  %6792 = vmatprep.subr.bf16.mxu0 %v13550_v21  ;;  %v6524_v20 = vadd.f32 %v15133_v36, %v1488_v8  ;;  %v13632_v8 = vld [vmem:[#allocation7 + $0x40] ss:$72 sps:$4 sm:$0xff]  }
 0x3b7   : > { %6833 = vmatprep.subr.bf16.mxu1 %v13553_v22  ;;  %v13599_v22 = vld [vmem:[#allocation7 + $0xca0] ss:$72 sps:$4 sm:$0xff]  }
 0x3b9   : > { %6793 = vmatpush2.bf16.msra.mxu0 %v13548_v25 }
 0x3ba   : > { %6834 = vmatpush2.bf16.msra.mxu1 %v13551_v26  ;;  %6794 = vmatprep.subr.bf16.mxu0 %v13556_v27  ;;  %v13604_v27 = vld [vmem:[#allocation7 + $0x314] ss:$72 sps:$4 sm:$0xff]  }
 0x3bb   : > { %6835 = vmatprep.subr.bf16.mxu1 %v13559_v32  ;;  %v13607_v32 = vld [vmem:[#allocation7 + $0xc14] ss:$72 sps:$4 sm:$0xff]  }
 0x3bd   : > { %6795 = vmatpush2.bf16.msra.mxu0 %v13554_v33 }
 0x3be   : > { %6836 = vmatpush2.bf16.msra.mxu1 %v13557_v35  ;;  %6796 = vmatprep.subr.bf16.mxu0 %v13562_v37 }
 0x3bf   : > { %6837 = vmatprep.subr.bf16.mxu1 %v13565_v39  ;;  %v7002_v39 = vrot.slane %v15088_v61, %v15009_v28  ;;  %v13616_v61 = vld [vmem:[#allocation7 + $0x1f4] ss:$72 sps:$4 sm:$0xff]  }
 0x3c1   : > { %6797 = vmatpush2.bf16.msra.mxu0 %v13560_v44 }
 0x3c2   : > { %6838 = vmatpush2.bf16.msra.mxu1 %v13563_v43  ;;  %6798 = vmatprep.subr.bf16.mxu0 %v13568_v40  ;;  %v13602_v40 = vld [vmem:[#allocation7 + $0x310] ss:$72 sps:$4 sm:$0xff]  }
 0x3c3   : > { %6839 = vmatprep.subr.bf16.mxu1 %v13571_v41  ;;  %v13605_v41 = vld [vmem:[#allocation7 + $0xc10] ss:$72 sps:$4 sm:$0xff]  }
 0x3c5   : > { %6799 = vmatpush2.bf16.msra.mxu0 %v13566_v3 }
 0x3c6   : > { %6840 = vmatpush2.bf16.msra.mxu1 %v13569_v49  ;;  %6800 = vmatprep.subr.bf16.mxu0 %v13574_v45  ;;  %v13613_v49 = vld [vmem:[#allocation7 + $0xb84] ss:$72 sps:$4 sm:$0xff]  }
 0x3c7   : > { %6841 = vmatprep.subr.bf16.mxu1 %v13577_v46  ;;  %v13611_v46 = vld [vmem:[#allocation7 + $0xb80] ss:$72 sps:$4 sm:$0xff]  }
 0x3c9   : > { %6801 = vmatpush2.bf16.msra.mxu0 %v13572_v53  ;;  %v13619_v53 = vld [vmem:[#allocation7 + $0xaf4] ss:$72 sps:$4 sm:$0xff]  }
 0x3ca   : > { %6842 = vmatpush2.bf16.msra.mxu1 %v13575_v48  ;;  %6802 = vmatprep.subr.bf16.mxu0 %v13580_v10  ;;  %v13614_v48 = vld [vmem:[#allocation7 + $0x1f0] ss:$72 sps:$4 sm:$0xff]  }
 0x3cb   : > { %6843 = vmatprep.subr.bf16.mxu1 %v13583_v52  ;;  %v13617_v10 = vld [vmem:[#allocation7 + $0xaf0] ss:$72 sps:$4 sm:$0xff]   ;;  %v13622_v52 = vld [vmem:[#allocation7 + $0x164] ss:$72 sps:$4 sm:$0xff]  }
 0x3cd   : > { %6803 = vmatpush2.bf16.msra.mxu0 %v13578_v55  ;;  %v13625_v55 = vld [vmem:[#allocation7 + $0xa64] ss:$72 sps:$4 sm:$0xff]  }
 0x3ce   : > { %6844 = vmatpush2.bf16.msra.mxu1 %v13581_v60  ;;  %6804 = vmatprep.subr.bf16.mxu0 %v13586_v57  ;;  %v13620_v60 = vld [vmem:[#allocation7 + $0x160] ss:$72 sps:$4 sm:$0xff]  }
 0x3cf   : > { %6845 = vmatprep.subr.bf16.mxu1 %v13589_v58  ;;  %v13623_v57 = vld [vmem:[#allocation7 + $0xa60] ss:$72 sps:$4 sm:$0xff]   ;;  %v13628_v58 = vld [vmem:[#allocation7 + $0xd4] ss:$72 sps:$4 sm:$0xff]  }
 0x3d1   : > { %6805 = vmatpush2.bf16.msra.mxu0 %v13584_v63  ;;  %v13631_v63 = vld [vmem:[#allocation7 + $0x9d4] ss:$72 sps:$4 sm:$0xff]  }
 0x3d2   : > { %6846 = vmatpush2.bf16.msra.mxu1 %v13587_v24  ;;  %6856 = vmatprep.subr.bf16.mxu0 %v13592_v4  ;;  %v13626_v24 = vld [vmem:[#allocation7 + $0xd0] ss:$72 sps:$4 sm:$0xff]  }
 0x3d3   : > { %6897 = vmatprep.subr.bf16.mxu1 %v13595_v1  ;;  %v13629_v4 = vld [vmem:[#allocation7 + $0x9d0] ss:$72 sps:$4 sm:$0xff]   ;;  %v13634_v1 = vld [vmem:[#allocation7 + $0x44] ss:$72 sps:$4 sm:$0xff]  }
 0x3d4   : > { %v6562_v50 = vpop.f32.mrf.mxu0  ;;  %6807 = vmatmul.mubr.bf16.vlgmr.msra.gmra.mxu0 %v14981_v7 }
 0x3d5   : > { %6848 = vmatmul.mubr.bf16.vlgmr.msra.gmra.mxu1 %v14996_v14  ;;  %v6603_v56 = vpop.f32.mrf.mxu1  ;;  %v6563_v21 = vadd.f32 %v6562_v50, %v6522_v13  ;;  %6857 = vmatpush1.bf16.msra.mxu0 %v13590_v9  ;;  %v13635_v9 = vld [vmem:[#allocation7 + $0x940] ss:$72 sps:$4 sm:$0xff]   ;;  %v13641_v13 = vld [vmem:[#allocation7 + $0x11b0] ss:$72 sps:$4 sm:$0xff]   ;;  %v13646_v50 = vld [vmem:[#allocation7 + $0x824] ss:$72 sps:$4 sm:$0xff]  }
 0x3d6   : > { %6898 = vmatpush1.bf16.msra.mxu1 %v13593_v11  ;;  %v6564_v25 = vpop.f32.mrf.mxu0  ;;  %6858 = vmatprep.subr.bf16.mxu0 %v13598_v29  ;;  %v13640_v11 = vld [vmem:[#allocation7 + $0x8b4] ss:$72 sps:$4 sm:$0xff]  }
 0x3d7   : > { %v6605_v26 = vpop.f32.mrf.mxu1  ;;  %6899 = vmatprep.subr.bf16.mxu1 %v13601_v12  ;;  %v6565_v33 = vadd.f32 %v6564_v25, %v6524_v20  ;;  %v6604_v35 = vadd.f32 %v6603_v56, %v6563_v21  ;;  %6888 = vmatprep.mubr.bf16.mxu0 %v14972_v47  ;;  %v13643_v29 = vld [vmem:[#allocation7 + $0x11b4] ss:$72 sps:$4 sm:$0xff]   ;;  %v13638_v12 = vld [vmem:[#allocation7 + $0x8b0] ss:$72 sps:$4 sm:$0xff]   ;;  %v13649_v56 = vld [vmem:[#allocation7 + $0x1124] ss:$72 sps:$4 sm:$0xff]  }
 0x3d8   : > { %6929 = vmatprep.mubr.bf16.mxu1 %v14975_v51  ;;  %v6566_v36 = vpop.f32.mrf.mxu0  ;;  %v13608_v51 = vld [vmem:[#allocation7 + $0x280] ss:$72 sps:$4 sm:$0xff]   ;;  %v13650_v25 = vld [vmem:[#allocation7 + $0x790] ss:$72 sps:$4 sm:$0xff]  }
 0x3d9   : > { %v6607_v37 = vpop.f32.mrf.mxu1  ;;  %v15158_v44 = vmul.f32 %v6998_v30, %v6604_v35  ;;  %v6606_v43 = vadd.f32 %v6605_v26, %v6565_v33  ;;  %6859 = vmatpush1.bf16.msra.mxu0 %v13596_v15  ;;  %v13644_v20 = vld [vmem:[#allocation7 + $0x820] ss:$72 sps:$4 sm:$0xff]   ;;  %v13652_v15 = vld [vmem:[#allocation7 + $0x794] ss:$72 sps:$4 sm:$0xff]   ;;  %v13653_v26 = vld [vmem:[#allocation7 + $0x1090] ss:$72 sps:$4 sm:$0xff]  }
 0x3da   : > { %6900 = vmatpush1.bf16.msra.mxu1 %v13599_v22  ;;  %v6567_v3 = vpop.f32.mrf.mxu0  ;;  %6860 = vmatprep.subr.bf16.mxu0 %v13604_v27  ;;  %v13647_v21 = vld [vmem:[#allocation7 + $0x1120] ss:$72 sps:$4 sm:$0xff]   ;;  %v13655_v22 = vld [vmem:[#allocation7 + $0x1094] ss:$72 sps:$4 sm:$0xff]   ;;  %v13658_v27 = vld [vmem:[#allocation7 + $0x704] ss:$72 sps:$4 sm:$0xff]  }
 0x3db   : > { %6901 = vmatprep.subr.bf16.mxu1 %v13607_v32  ;;  %v6608_v47 = vpop.f32.mrf.mxu1  ;;  %v15160_v45 = vmul.f32 %v7002_v39, %v6606_v43  ;;  %v13661_v32 = vld [vmem:[#allocation7 + $0x1004] ss:$72 sps:$4 sm:$0xff]   ;;  %v13656_v30 = vld [vmem:[#allocation7 + $0x700] ss:$72 sps:$4 sm:$0xff]   ;;  %v13664_v35 = vld [vmem:[#allocation7 + $0x674] ss:$72 sps:$4 sm:$0xff]  }
 0x3dc   : > { %v13659_v33 = vld [vmem:[#allocation7 + $0x1000] ss:$72 sps:$4 sm:$0xff]   ;;  %v13667_v36 = vld [vmem:[#allocation7 + $0xf74] ss:$72 sps:$4 sm:$0xff]   ;;  %v13662_v37 = vld [vmem:[#allocation7 + $0x670] ss:$72 sps:$4 sm:$0xff]  }
 0x3dd   : > { %6861 = vmatpush1.bf16.msra.mxu0 %v13602_v40  ;;  %v13665_v39 = vld [vmem:[#allocation7 + $0xf70] ss:$72 sps:$4 sm:$0xff]   ;;  %v13670_v43 = vld [vmem:[#allocation7 + $0x5e4] ss:$72 sps:$4 sm:$0xff]   ;;  %v13671_v3 = vld [vmem:[#allocation7 + $0xee0] ss:$72 sps:$4 sm:$0xff]  }
 0x3de   : > { %6902 = vmatpush1.bf16.msra.mxu1 %v13605_v41  ;;  %6862 = vmatprep.subr.bf16.mxu0 %v13610_v54  ;;  %v13673_v40 = vld [vmem:[#allocation7 + $0xee4] ss:$72 sps:$4 sm:$0xff]   ;;  %v13668_v41 = vld [vmem:[#allocation7 + $0x5e0] ss:$72 sps:$4 sm:$0xff]   ;;  %v13676_v54 = vld [vmem:[#allocation7 + $0x554] ss:$72 sps:$4 sm:$0xff]  }
 0x3df   : > { %6903 = vmatprep.subr.bf16.mxu1 %v13613_v49  ;;  %v13679_v49 = vld [vmem:[#allocation7 + $0xe54] ss:$72 sps:$4 sm:$0xff]   ;;  %v13674_v47 = vld [vmem:[#allocation7 + $0x550] ss:$72 sps:$4 sm:$0xff]  }
 0x3e1   : > { %6863 = vmatpush1.bf16.msra.mxu0 %v13608_v51  ;;  %v13677_v51 = vld [vmem:[#allocation7 + $0xe50] ss:$72 sps:$4 sm:$0xff]  }
 0x3e2   : > { %6904 = vmatpush1.bf16.msra.mxu1 %v13611_v46  ;;  %6864 = vmatprep.subr.bf16.mxu0 %v13616_v61  ;;  %v13682_v46 = vld [vmem:[#allocation7 + $0x4c4] ss:$72 sps:$4 sm:$0xff]  }
 0x3e3   : > { %6905 = vmatprep.subr.bf16.mxu1 %v13619_v53  ;;  %v13685_v61 = vld [vmem:[#allocation7 + $0xdc4] ss:$72 sps:$4 sm:$0xff]   ;;  %v13680_v53 = vld [vmem:[#allocation7 + $0x4c0] ss:$72 sps:$4 sm:$0xff]  }
 0x3e5   : > { %6865 = vmatpush1.bf16.msra.mxu0 %v13614_v48  ;;  %v13683_v48 = vld [vmem:[#allocation7 + $0xdc0] ss:$72 sps:$4 sm:$0xff]  }
 0x3e6   : > { %6906 = vmatpush1.bf16.msra.mxu1 %v13617_v10  ;;  %6866 = vmatprep.subr.bf16.mxu0 %v13622_v52  ;;  %v13688_v10 = vld [vmem:[#allocation7 + $0x1634] ss:$72 sps:$4 sm:$0xff]   ;;  %v13689_v52 = vld [vmem:[%s15741_s4 + $0x78] sm:$0xff]  }
 0x3e7   : > { %6907 = vmatprep.subr.bf16.mxu1 %v13625_v55  ;;  %v15165_v55 = vld [vmem:[#allocation8 + $0x8] sm:$0xff] }
 0x3e9   : > { %6867 = vmatpush1.bf16.msra.mxu0 %v13620_v60  ;;  %v1492_v60 = vrot.slane %v15165_v55, %v15061_v59 }
 0x3ea   : > { %6908 = vmatpush1.bf16.msra.mxu1 %v13623_v57  ;;  %6868 = vmatprep.subr.bf16.mxu0 %v13628_v58  ;;  %v13686_v57 = vld [vmem:[#allocation7 + $0x1630] ss:$72 sps:$4 sm:$0xff]   ;;  %v13690_v58 = vld [vmem:[%s15741_s4 + $0x38] sm:$0xff]  }
 0x3eb   : > { %6909 = vmatprep.subr.bf16.mxu1 %v13631_v63  ;;  %v13693_v63 = vld [vmem:[#allocation7 + $0x15a4] ss:$72 sps:$4 sm:$0xff]  }
 0x3ed   : > { %6869 = vmatpush1.bf16.msra.mxu0 %v13626_v24  ;;  %v1496_v24 = vrot.slane %v15165_v55, %v15064_v0 }
 0x3ee   : > { %6910 = vmatpush1.bf16.msra.mxu1 %v13629_v4  ;;  %6870 = vmatprep.subr.bf16.mxu0 %v13634_v1  ;;  %v13694_v4 = vld [vmem:[%s15741_s4 + $0x70] sm:$0xff]   ;;  %v7010_v1 = vpack.c.bf16 %v15110_v5, %v15110_v5 }
 0x3ef   : > { %6911 = vmatprep.subr.bf16.mxu1 %v13637_v2 }
 0x3f1   : > { %6871 = vmatpush1.bf16.msra.mxu0 %v13632_v8 }
 0x3f2   : > { %6912 = vmatpush1.bf16.msra.mxu1 %v13635_v9  ;;  %6872 = vmatprep.subr.bf16.mxu0 %v13640_v11  ;;  %v13691_v11 = vld [vmem:[#allocation7 + $0x15a0] ss:$72 sps:$4 sm:$0xff]  }
 0x3f3   : > { %6913 = vmatprep.subr.bf16.mxu1 %v13643_v29  ;;  %v13695_v29 = vld [vmem:[%s15741_s4 + $0x30] sm:$0xff]  }
 0x3f5   : > { %6873 = vmatpush2.bf16.msra.mxu0 %v13638_v12 }
 0x3f6   : > { %6914 = vmatpush2.bf16.msra.mxu1 %v13641_v13  ;;  %6874 = vmatprep.subr.bf16.mxu0 %v13646_v50  ;;  %v13698_v50 = vld [vmem:[#allocation7 + $0x1514] ss:$72 sps:$4 sm:$0xff]  }
 0x3f7   : > { %6915 = vmatprep.subr.bf16.mxu1 %v13649_v56 }
 0x3f9   : > { %6875 = vmatpush2.bf16.msra.mxu0 %v13644_v20 }
 0x3fa   : > { %6916 = vmatpush2.bf16.msra.mxu1 %v13647_v21  ;;  %6876 = vmatprep.subr.bf16.mxu0 %v13652_v15  ;;  %v13696_v15 = vld [vmem:[#allocation7 + $0x1510] ss:$72 sps:$4 sm:$0xff]  }
 0x3fb   : > { %6917 = vmatprep.subr.bf16.mxu1 %v13655_v22  ;;  %v13700_v22 = vld [vmem:[%s15741_s4 + $0x28] sm:$0xff]  }
 0x3fd   : > { %6877 = vmatpush2.bf16.msra.mxu0 %v13650_v25 }
 0x3fe   : > { %6918 = vmatpush2.bf16.msra.mxu1 %v13653_v26  ;;  %6878 = vmatprep.subr.bf16.mxu0 %v13658_v27  ;;  %v13703_v26 = vld [vmem:[#allocation7 + $0x1484] ss:$72 sps:$4 sm:$0xff]  }
 0x3ff   : > { %6919 = vmatprep.subr.bf16.mxu1 %v13661_v32  ;;  %v13704_v27 = vld [vmem:[%s15741_s4 + $0x60] sm:$0xff]  }
 0x400   : > { %v11808_v32 = vld [vmem:[%s491_s30] ss:$0 sm:$0xff] }
 0x401   : > { %6879 = vmatpush2.bf16.msra.mxu0 %v13656_v30  ;;  %7525 = vbcast.lane.b32.xlu0 %v11808_v32, 256  ;;  %v13701_v30 = vld [vmem:[#allocation7 + $0x1480] ss:$72 sps:$4 sm:$0xff]   ;;  %v13760_v32 = vld [vmem:[%s15741_s4 + $0x88] sm:$0xff]  }
 0x402   : > { %6920 = vmatpush2.bf16.msra.mxu1 %v13659_v33  ;;  %6880 = vmatprep.subr.bf16.mxu0 %v13664_v35  ;;  %v13705_v33 = vld [vmem:[%s15741_s4 + $0x20] sm:$0xff]  }
 0x403   : > { %6921 = vmatprep.subr.bf16.mxu1 %v13667_v36  ;;  %v13708_v35 = vld [vmem:[#allocation7 + $0x13f4] ss:$72 sps:$4 sm:$0xff]   ;;  %v13709_v36 = vld [vmem:[%s15741_s4 + $0x58] sm:$0xff]  }
 0x405   : > { %6881 = vmatpush2.bf16.msra.mxu0 %v13662_v37  ;;  %v13706_v37 = vld [vmem:[#allocation7 + $0x13f0] ss:$72 sps:$4 sm:$0xff]  }
 0x406   : > { %6922 = vmatpush2.bf16.msra.mxu1 %v13665_v39  ;;  %6882 = vmatprep.subr.bf16.mxu0 %v13670_v43  ;;  %v13710_v39 = vld [vmem:[%s15741_s4 + $0x18] sm:$0xff]  }
 0x407   : > { %6923 = vmatprep.subr.bf16.mxu1 %v13673_v40  ;;  %v13713_v43 = vld [vmem:[#allocation7 + $0x1364] ss:$72 sps:$4 sm:$0xff]  }
 0x408   : > { %v13714_v40 = vld [vmem:[%s15741_s4 + $0x50] sm:$0xff]  }
 0x409   : > { %6883 = vmatpush2.bf16.msra.mxu0 %v13668_v41  ;;  %v13711_v41 = vld [vmem:[#allocation7 + $0x1360] ss:$72 sps:$4 sm:$0xff]  }
 0x40a   : > { %6924 = vmatpush2.bf16.msra.mxu1 %v13671_v3  ;;  %6884 = vmatprep.subr.bf16.mxu0 %v13676_v54  ;;  %v13715_v3 = vld [vmem:[%s15741_s4 + $0x10] sm:$0xff]  }
 0x40b   : > { %6925 = vmatprep.subr.bf16.mxu1 %v13679_v49  ;;  %v13718_v54 = vld [vmem:[#allocation7 + $0x12d4] ss:$72 sps:$4 sm:$0xff]  }
 0x40c   : > { %v13719_v49 = vld [vmem:[%s15741_s4 + $0x48] sm:$0xff]  }
 0x40d   : > { %6885 = vmatpush2.bf16.msra.mxu0 %v13674_v47  ;;  %v13716_v47 = vld [vmem:[#allocation7 + $0x12d0] ss:$72 sps:$4 sm:$0xff]  }
 0x40e   : > { %6926 = vmatpush2.bf16.msra.mxu1 %v13677_v51  ;;  %6886 = vmatprep.subr.bf16.mxu0 %v13682_v46  ;;  %v13720_v51 = vld [vmem:[%s15741_s4 + $0x8] sm:$0xff]   ;;  %v13723_v46 = vld [vmem:[#allocation7 + $0x1244] ss:$72 sps:$4 sm:$0xff]  }
 0x40f   : > { %6927 = vmatprep.subr.bf16.mxu1 %v13685_v61  ;;  %v13724_v61 = vld [vmem:[%s15741_s4 + $0x40] sm:$0xff]  }
 0x411   : > { %6887 = vmatpush2.bf16.msra.mxu0 %v13680_v53  ;;  %v13721_v53 = vld [vmem:[#allocation7 + $0x1240] ss:$72 sps:$4 sm:$0xff]  }
 0x412   : > { %6928 = vmatpush2.bf16.msra.mxu1 %v13683_v48  ;;  %6938 = vmatprep.subr.bf16.mxu0 %v13688_v10  ;;  %v13725_v48 = vld [vmem:[%s15741_s4] sm:$0xff]  }
 0x413   : > { %12160 = vmatprep.subr.bf16.mxu1 %v13689_v52  ;;  %v13728_v10 = vld [vmem:[#allocation7 + $0x1ab4] ss:$72 sps:$4 sm:$0xff]   ;;  %v13729_v52 = vld [vmem:[%s15741_s4 + $0xf8] sm:$0xff]  }
 0x414   : > { %v6644_v2 = vpop.f32.mrf.mxu0  ;;  %6889 = vmatmul.mubr.bf16.vlgmr.msra.gmra.mxu0 %v14979_v6  ;;  %v13699_v6 = vld [vmem:[%s15741_s4 + $0x68] sm:$0xff]  }
 0x415   : > { %6930 = vmatmul.mubr.bf16.vlgmr.msra.gmra.mxu1 %v14981_v7  ;;  %v6685_v8 = vpop.f32.mrf.mxu1  ;;  %v6645_v9 = vadd.f32 %v6644_v2, %v1492_v60  ;;  %6939 = vmatpush1.bf16.msra.mxu0 %v13686_v57  ;;  %v13726_v60 = vld [vmem:[#allocation7 + $0x1ab0] ss:$72 sps:$4 sm:$0xff]   ;;  %v13730_v57 = vld [vmem:[%s15741_s4 + $0xb8] sm:$0xff]   ;;  %v13735_v2 = vld [vmem:[%s15741_s4 + $0xb0] sm:$0xff]  }
 0x416   : > { %12161 = vmatpush3.bf16.msra.mxu1 %v13690_v58  ;;  %7431 = vmatprep.mubr.bf16.mxu1 %v7010_v1  ;;  %v6646_v12 = vpop.f32.mrf.mxu0  ;;  %v7009_v58 = vpack.c.bf16 %v15108_v62, %v15108_v62  ;;  %v13731_v1 = vld [vmem:[#allocation7 + $0x1a20] ss:$72 sps:$4 sm:$0xff]   ;;  %v13738_v62 = vld [vmem:[#allocation7 + $0x1994] ss:$72 sps:$4 sm:$0xff]  }
 0x417   : > { %v6687_v13 = vpop.f32.mrf.mxu1  ;;  %6940 = vmatprep.subr.bf16.mxu0 %v13693_v63  ;;  %v6647_v5 = vadd.f32 %v6646_v12, %v1496_v24  ;;  %v15187_v7 = vadd.f32 %v6685_v8, %v6645_v9  ;;  %12162 = vmatprep.subr.bf16.mxu1 %v13694_v4  ;;  %v13733_v63 = vld [vmem:[#allocation7 + $0x1a24] ss:$72 sps:$4 sm:$0xff]   ;;  %v7012_v4 = vpack.c.bf16 %v15142_v42, %v15142_v42  ;;  %v13739_v8 = vld [vmem:[%s15741_s4 + $0xe8] sm:$0xff]   ;;  %v13741_v12 = vld [vmem:[#allocation7 + $0x1900] ss:$72 sps:$4 sm:$0xff]  }
 0x418   : > { %6970 = vmatprep.mubr.bf16.mxu0 %v14991_v34  ;;  %v6648_v56 = vpop.f32.mrf.mxu0  ;;  %v13734_v24 = vld [vmem:[%s15741_s4 + $0xf0] sm:$0xff]   ;;  %v13736_v9 = vld [vmem:[#allocation7 + $0x1990] ss:$72 sps:$4 sm:$0xff]  }
 0x419   : > { %v6689_v20 = vpop.f32.mrf.mxu1  ;;  %v15190_v21 = vadd.f32 %v6687_v13, %v6647_v5  ;;  %6941 = vmatpush1.bf16.msra.mxu0 %v13691_v11  ;;  %v13740_v42 = vld [vmem:[%s15741_s4 + $0xa8] sm:$0xff]   ;;  %v13743_v11 = vld [vmem:[#allocation7 + $0x1904] ss:$72 sps:$4 sm:$0xff]  }
 0x41a   : > { %12163 = vmatpush3.bf16.msra.mxu1 %v13695_v29  ;;  %v6649_v25 = vpop.f32.mrf.mxu0  ;;  %6942 = vmatprep.subr.bf16.mxu0 %v13698_v50  ;;  %v13744_v29 = vld [vmem:[%s15741_s4 + $0xe0] sm:$0xff]   ;;  %v13750_v56 = vld [vmem:[%s15741_s4 + $0x98] sm:$0xff]  }
 0x41b   : > { %12164 = vmatprep.subr.bf16.mxu1 %v13699_v6  ;;  %v6690_v34 = vpop.f32.mrf.mxu1  ;;  %v13745_v13 = vld [vmem:[%s15741_s4 + $0xa0] sm:$0xff]   ;;  %v13749_v6 = vld [vmem:[%s15741_s4 + $0xd8] sm:$0xff]   ;;  %v13755_v25 = vld [vmem:[%s15741_s4 + $0x90] sm:$0xff]  }
 0x41c   : > { %v13748_v50 = vld [vmem:[#allocation7 + $0x1874] ss:$72 sps:$4 sm:$0xff]   ;;  %v13746_v5 = vld [vmem:[#allocation7 + $0x1870] ss:$72 sps:$4 sm:$0xff]   ;;  %v13753_v20 = vld [vmem:[#allocation7 + $0x17e4] ss:$72 sps:$4 sm:$0xff]  }
 0x41d   : > { %6943 = vmatpush1.bf16.msra.mxu0 %v13696_v15  ;;  %v13754_v15 = vld [vmem:[%s15741_s4 + $0xd0] sm:$0xff]   ;;  %v13756_v34 = vld [vmem:[#allocation7 + $0x1750] ss:$72 sps:$4 sm:$0xff]  }
 0x41e   : > { %12165 = vmatpush3.bf16.msra.mxu1 %v13700_v22  ;;  %6944 = vmatprep.subr.bf16.mxu0 %v13703_v26  ;;  %v13751_v22 = vld [vmem:[#allocation7 + $0x17e0] ss:$72 sps:$4 sm:$0xff]   ;;  %v13758_v26 = vld [vmem:[#allocation7 + $0x1754] ss:$72 sps:$4 sm:$0xff]  }
 0x41f   : > { %12166 = vmatprep.subr.bf16.mxu1 %v13704_v27  ;;  %v13759_v27 = vld [vmem:[%s15741_s4 + $0xc8] sm:$0xff]  }
 0x421   : > { %6945 = vmatpush1.bf16.msra.mxu0 %v13701_v30  ;;  %v13763_v30 = vld [vmem:[#allocation7 + $0x16c4] ss:$72 sps:$4 sm:$0xff]  }
 0x422   : > { %12167 = vmatpush3.bf16.msra.mxu1 %v13705_v33  ;;  %6946 = vmatprep.subr.bf16.mxu0 %v13708_v35  ;;  %v13764_v33 = vld [vmem:[%s15741_s4 + $0xc0] sm:$0xff]   ;;  %v13761_v35 = vld [vmem:[#allocation7 + $0x16c0] ss:$72 sps:$4 sm:$0xff]  }
 0x423   : > { %12168 = vmatprep.subr.bf16.mxu1 %v13709_v36  ;;  %v13765_v36 = vld [vmem:[%s15741_s4 + $0x80] sm:$0xff]  }
 0x425   : > { %6947 = vmatpush1.bf16.msra.mxu0 %v13706_v37  ;;  %v13766_v37 = vld [vmem:[%s15741_s4 + $0x178] sm:$0xff]  }
 0x426   : > { %12169 = vmatpush3.bf16.msra.mxu1 %v13710_v39  ;;  %6948 = vmatprep.subr.bf16.mxu0 %v13713_v43  ;;  %v13767_v39 = vld [vmem:[%s15741_s4 + $0x138] sm:$0xff]   ;;  %v7011_v43 = vpack.c.bf16 %v15137_v38, %v15137_v38  ;;  %v13769_v38 = vld [vmem:[%s15741_s4 + $0x130] sm:$0xff]  }
 0x427   : > { %12170 = vmatprep.subr.bf16.mxu1 %v13714_v40  ;;  %v13768_v40 = vld [vmem:[%s15741_s4 + $0x170] sm:$0xff]  }
 0x429   : > { %6949 = vmatpush1.bf16.msra.mxu0 %v13711_v41  ;;  %v7014_v41 = vpack.c.bf16 %v15160_v45, %v15160_v45  ;;  %v13770_v45 = vld [vmem:[%s15741_s4 + $0x168] sm:$0xff]  }
 0x42a   : > { %12171 = vmatpush3.bf16.msra.mxu1 %v13715_v3  ;;  %6950 = vmatprep.subr.bf16.mxu0 %v13718_v54 }
 0x42b   : > { %12172 = vmatprep.subr.bf16.mxu1 %v13719_v49 }
 0x42d   : > { %6951 = vmatpush1.bf16.msra.mxu0 %v13716_v47 }
 0x42e   : > { %12173 = vmatpush3.bf16.msra.mxu1 %v13720_v51  ;;  %6952 = vmatprep.subr.bf16.mxu0 %v13723_v46 }
 0x42f   : > { %12174 = vmatprep.subr.bf16.mxu1 %v13724_v61 }
 0x431   : > { %6953 = vmatpush1.bf16.msra.mxu0 %v13721_v53 }
 0x432   : > { %12175 = vmatpush3.bf16.msra.mxu1 %v13725_v48  ;;  %6954 = vmatprep.subr.bf16.mxu0 %v13728_v10  ;;  %v13772_v48 = vld [vmem:[%s15741_s4 + $0x160] sm:$0xff]  }
 0x433   : > { %12182 = vmatprep.subr.bf16.mxu1 %v13729_v52  ;;  %v13774_v52 = vld [vmem:[%s15741_s4 + $0x158] sm:$0xff]  }
 0x435   : > { %7432 = vmatmul.mubr.bf16.vlgmr.msra.gmra.mxu1 %v7009_v58  ;;  %6955 = vmatpush2.bf16.msra.mxu0 %v13726_v60  ;;  %v13775_v60 = vld [vmem:[%s15741_s4 + $0x118] sm:$0xff]   ;;  %v13777_v58 = vld [vmem:[%s15741_s4 + $0x110] sm:$0xff]  }
 0x436   : > { %12183 = vmatpush3.bf16.msra.mxu1 %v13730_v57  ;;  %7471 = vmatprep.mubr.bf16.mxu1 %v7012_v4  ;;  %v13776_v57 = vld [vmem:[%s15741_s4 + $0x150] sm:$0xff]   ;;  %v13780_v4 = vld [vmem:[%s15741_s4 + $0x140] sm:$0xff]  }
 0x437   : > { %6956 = vmatprep.subr.bf16.mxu0 %v13733_v63  ;;  %12184 = vmatprep.subr.bf16.mxu1 %v13734_v24  ;;  %v13778_v63 = vld [vmem:[%s15741_s4 + $0x148] sm:$0xff]  }
 0x438   : > { %v13779_v24 = vld [vmem:[%s15741_s4 + $0x108] sm:$0xff]  }
 0x439   : > { %6957 = vmatpush2.bf16.msra.mxu0 %v13731_v1  ;;  %v13781_v1 = vld [vmem:[%s15741_s4 + $0x100] sm:$0xff]  }
 0x43a   : > { %12185 = vmatpush3.bf16.msra.mxu1 %v13735_v2  ;;  %6958 = vmatprep.subr.bf16.mxu0 %v13738_v62  ;;  %v7013_v2 = vpack.c.bf16 %v15158_v44, %v15158_v44  ;;  %v1500_v62 = vrot.slane %v15165_v55, %v1467_v16 }
 0x43b   : > { %12186 = vmatprep.subr.bf16.mxu1 %v13739_v8  ;;  %v1504_v8 = vrot.slane %v15165_v55, %v1471_v19 }
 0x43d   : > { %6959 = vmatpush2.bf16.msra.mxu0 %v13736_v9 }
 0x43e   : > { %12187 = vmatpush3.bf16.msra.mxu1 %v13740_v42  ;;  %6960 = vmatprep.subr.bf16.mxu0 %v13743_v11 }
 0x43f   : > { %12188 = vmatprep.subr.bf16.mxu1 %v13744_v29 }
 0x441   : > { %6961 = vmatpush2.bf16.msra.mxu0 %v13741_v12 }
 0x442   : > { %12189 = vmatpush3.bf16.msra.mxu1 %v13745_v13  ;;  %6962 = vmatprep.subr.bf16.mxu0 %v13748_v50 }
 0x443   : > { %12190 = vmatprep.subr.bf16.mxu1 %v13749_v6 }
 0x445   : > { %6963 = vmatpush2.bf16.msra.mxu0 %v13746_v5 }
 0x446   : > { %12191 = vmatpush3.bf16.msra.mxu1 %v13750_v56  ;;  %6964 = vmatprep.subr.bf16.mxu0 %v13753_v20 }
 0x447   : > { %12192 = vmatprep.subr.bf16.mxu1 %v13754_v15 }
 0x449   : > { %6965 = vmatpush2.bf16.msra.mxu0 %v13751_v22  ;;  %v1437_v22 = vld [vmem:[#allocation8 + $0x10] sm:$0x3] }
 0x44a   : > { %12193 = vmatpush3.bf16.msra.mxu1 %v13755_v25  ;;  %6966 = vmatprep.subr.bf16.mxu0 %v13758_v26  ;;  %v1508_v23 = vrot.slane %v1437_v22, %v15009_v28  ;;  %v1512_v19 = vrot.slane %v1437_v22, %v15012_v31 }
 0x44b   : > { %12194 = vmatprep.subr.bf16.mxu1 %v13759_v27 }
 0x44d   : > { %6967 = vmatpush2.bf16.msra.mxu0 %v13756_v34 }
 0x44e   : > { %12195 = vmatpush3.bf16.msra.mxu1 %v13760_v32  ;;  %6968 = vmatprep.subr.bf16.mxu0 %v13763_v30 }
 0x44f   : > { %12196 = vmatprep.subr.bf16.mxu1 %v13764_v33 }
 0x451   : > { %6969 = vmatpush2.bf16.msra.mxu0 %v13761_v35 }
 0x452   : > { %12197 = vmatpush3.bf16.msra.mxu1 %v13765_v36  ;;  %12204 = vmatprep.subr.bf16.mxu0 %v13766_v37 }
 0x454   : > { %v6726_v3 = vpop.f32.mrf.mxu0  ;;  %6971 = vmatmul.mubr.bf16.vlgmr.msra.gmra.mxu0 %v14996_v14 }
 0x455   : > { %7472 = vmatmul.mubr.bf16.vlgmr.msra.gmra.mxu1 %v7011_v43  ;;  %v6767_v54 = vpop.f32.mrf.mxu1  ;;  %v15294_v49 = vadd.f32 %v6726_v3, %v15187_v7  ;;  %12205 = vmatpush3.bf16.msra.mxu0 %v13767_v39  ;;  %v13771_v7 = vld [vmem:[%s15741_s4 + $0x128] sm:$0xff]  }
 0x456   : > { %7511 = vmatprep.mubr.bf16.mxu0 %v7014_v41  ;;  %v6728_v47 = vpop.f32.mrf.mxu0  ;;  %12206 = vmatprep.subr.bf16.mxu0 %v13768_v40  ;;  %v6768_v9 = vadd.f32 %v6767_v54, %v1500_v62  ;;  %v7552_v43 = vld [vmem:[#allocation10] sm:$0xff]  ;;  %v7553_v40 = vld [vmem:[#allocation10 + $0x8] sm:$0xff] }
 0x457   : > { %v6769_v51 = vpop.f32.mrf.mxu1  ;;  %v15303_v14 = vadd.f32 %v6728_v47, %v15190_v21  ;;  %v13773_v21 = vld [vmem:[%s15741_s4 + $0x120] sm:$0xff]   ;;  %v11810_v41 = vcombine.high %v7552_v43, %v7552_v43  ;;  %v11809_v3 = vcombine.low %v7552_v43, %v7552_v43  ;;  %v11812_v54 = vcombine.high %v7553_v40, %v7553_v40 }
 0x458   : > { %v6730_v46 = vpop.f32.mrf.mxu0  ;;  %v6770_v29 = vadd.f32 %v6769_v51, %v1504_v8  ;;  %v14669_v47 = vmov 0  }
 0x459   : > { %v6771_v61 = vpop.f32.mrf.mxu1  ;;  %12207 = vmatpush3.bf16.msra.mxu0 %v13769_v38  ;;  %v11811_v38 = vcombine.low %v7553_v40, %v7553_v40  ;;  %7665 = vmatprep.mubr.bf16.mxu1 %v14669_v47 }
 0x45a   : > { %v6731_v53 = vpop.f32.mrf.mxu0  ;;  %12208 = vmatprep.subr.bf16.mxu0 %v13770_v45  ;;  %v7575_v45 = vsel %vm7573_vm0, %v11809_v3, 0  ;;  %11817 = vmatprep.subr.msk.bf16.mxu1 %vm7573_vm0, %v11812_v54 }
 0x45b   : > { %v6772_v10 = vpop.f32.mrf.mxu1  ;;  %v7581_v51 = vsel %vm7573_vm0, %v11811_v38, 0  ;;  %v13790_v38 = vld [vmem:[#allocation11 + $0x154] ss:$24 sps:$4 sm:$0xff]  }
 0x45c   : > { %7648 = vmatpush1.bf16.msra.mxu1 %v7581_v51  ;;  %v13799_v51 = vld [vmem:[#allocation11 + $0x424] ss:$24 sps:$4 sm:$0xff]  }
 0x45d   : > { %12209 = vmatpush3.bf16.msra.mxu0 %v13771_v7 }
 0x45e   : > { %12210 = vmatprep.subr.bf16.mxu0 %v13772_v48  ;;  %v7554_v48 = vld [vmem:[#allocation10 + $0x10] sm:$0xff] }
 0x45f   : > { %v11814_v10 = vcombine.high %v7554_v48, %v7554_v48 }
 0x461   : > { %12211 = vmatpush3.bf16.msra.mxu0 %v13773_v21  ;;  %v11813_v21 = vcombine.low %v7554_v48, %v7554_v48  ;;  %11819 = vmatprep.subr.msk.bf16.mxu1 %vm7573_vm0, %v11814_v10  ;;  %v13803_v48 = vld [vmem:[#allocation11 + $0x3f0] ss:$24 sps:$4 sm:$0xff]   ;;  %v13811_v10 = vld [vmem:[#allocation11 + $0x3c4] ss:$24 sps:$4 sm:$0xff]  }
 0x462   : > { %12212 = vmatprep.subr.bf16.mxu0 %v13774_v52 }
 0x463   : > { %v7587_v52 = vsel %vm7573_vm0, %v11813_v21, 0  ;;  %v13794_v21 = vld [vmem:[#allocation11 + $0x120] ss:$24 sps:$4 sm:$0xff]  }
 0x465   : > { %12213 = vmatpush3.bf16.msra.mxu0 %v13775_v60  ;;  %v13793_v60 = vld [vmem:[#allocation11 + $0x454] ss:$24 sps:$4 sm:$0xff]  }
 0x466   : > { %12214 = vmatprep.subr.bf16.mxu0 %v13776_v57 }
 0x469   : > { %12215 = vmatpush3.bf16.msra.mxu0 %v13777_v58 }
 0x46a   : > { %12216 = vmatprep.subr.bf16.mxu0 %v13778_v63 }
 0x46d   : > { %12217 = vmatpush3.bf16.msra.mxu0 %v13779_v24 }
 0x46e   : > { %12218 = vmatprep.subr.bf16.mxu0 %v13780_v4 }
 0x471   : > { %12219 = vmatpush3.bf16.msra.mxu0 %v13781_v1 }
 0x472   : > { %11815 = vmatprep.subr.msk.bf16.mxu0 %vm7573_vm0, %v11810_v41 }
 0x474   : > { %7512 = vmatmul.mubr.bf16.vlgmr.msra.gmra.mxu0 %v7013_v2 }
 0x475   : > { %7624 = vmatprep.mubr.bf16.mxu0 %v14669_v47  ;;  %7607 = vmatpush1.bf16.msra.mxu0 %v7575_v45  ;;  %v13791_v45 = vld [vmem:[#allocation11 + $0x450] ss:$24 sps:$4 sm:$0xff]  }
 0x476   : > { %9564 = vmatprep.subr.bf16.mxu0 %v13793_v60  ;;  %v13802_v60 = vld [vmem:[#allocation11 + $0xf4] ss:$24 sps:$4 sm:$0xff]  }
 0x494   : > { %v6808_v42 = vpop.f32.mrf.mxu0 }
 0x495   : > { %v6849_v11 = vpop.f32.mrf.mxu1  ;;  %v6809_v12 = vadd.f32 %v6808_v42, %v6768_v9 }
 0x496   : > { %v6810_v13 = vpop.f32.mrf.mxu0 }
 0x497   : > { %v6851_v50 = vpop.f32.mrf.mxu1  ;;  %v6811_v6 = vadd.f32 %v6810_v13, %v6770_v29  ;;  %v15346_v5 = vadd.f32 %v6849_v11, %v6809_v12  ;;  %v7526_v12 = vpop.permute.xlu0 %7525 }
 0x498   : > { %v6812_v44 = vpop.f32.mrf.mxu0  ;;  %vm7527_vm1 = vcmp.gt.f32.partialorder %v7526_v12, 0.5  ;;  %v13835_v12 = vld [vmem:[#allocation11 + $0x304] ss:$24 sps:$4 sm:$0xff]  }
 0x499   : > { %v6853_v56 = vpop.f32.mrf.mxu1  ;;  %v15348_v20 = vadd.f32 %v6851_v50, %v6811_v6 }
 0x49a   : > { %v6813_v15 = vpop.f32.mrf.mxu0 }
 0x49b   : > { %v6854_v16 = vpop.f32.mrf.mxu1 }
 0x4d4   : > { %v6890_v55 = vpop.f32.mrf.mxu0 }
 0x4d5   : > { %v6931_v25 = vpop.f32.mrf.mxu1  ;;  %v6891_v26 = vadd.f32 %v6890_v55, %v1508_v23 }
 0x4d6   : > { %v6892_v27 = vpop.f32.mrf.mxu0 }
 0x4d7   : > { %v6933_v34 = vpop.f32.mrf.mxu1  ;;  %v6893_v32 = vadd.f32 %v6892_v27, %v1512_v19  ;;  %v6932_v30 = vadd.f32 %v6931_v25, %v6891_v26 }
 0x4d8   : > { %v6894_v33 = vpop.f32.mrf.mxu0 }
 0x4d9   : > { %v6935_v35 = vpop.f32.mrf.mxu1  ;;  %v6934_v36 = vadd.f32 %v6933_v34, %v6893_v32 }
 0x4da   : > { %v6895_v37 = vpop.f32.mrf.mxu0 }
 0x4db   : > { %v6936_v39 = vpop.f32.mrf.mxu1 }
 0x4f5   : > { %v12176_v46 = vpop.f32.mrf.mxu1 }
 0x4f7   : > { %v12177_v61 = vpop.f32.mrf.mxu1 }
 0x4f8   : > { %v12178_v29 = vadd.f32 %v12177_v61, %v12176_v46  ;;  %v13797_v46 = vld [vmem:[#allocation11 + $0x420] ss:$24 sps:$4 sm:$0xff]   ;;  %v13805_v61 = vld [vmem:[#allocation11 + $0x3f4] ss:$24 sps:$4 sm:$0xff]  }
 0x4f9   : > { %v12179_v7 = vpop.f32.mrf.mxu1 }
 0x4fa   : > { %v13788_v7 = vld [vmem:[#allocation11 + $0x150] ss:$24 sps:$4 sm:$0xff]  }
 0x4fb   : > { %v12180_v53 = vpop.f32.mrf.mxu1 }
 0x4fc   : > { %v13796_v53 = vld [vmem:[#allocation11 + $0x124] ss:$24 sps:$4 sm:$0xff]  }
 0x514   : > { %v6972_v57 = vpop.f32.mrf.mxu0 }
 0x515   : > { %v12198_v58 = vpop.f32.mrf.mxu1  ;;  %v15360_v63 = vadd.f32 %v6972_v57, %v6932_v30  ;;  %v13800_v57 = vld [vmem:[#allocation11 + $0xf0] ss:$24 sps:$4 sm:$0xff]  }
 0x516   : > { %v6974_v24 = vpop.f32.mrf.mxu0 }
 0x517   : > { %v12199_v4 = vpop.f32.mrf.mxu1  ;;  %v15362_v1 = vadd.f32 %v6974_v24, %v6934_v36  ;;  %v13815_v24 = vld [vmem:[#allocation11 + $0x390] ss:$24 sps:$4 sm:$0xff]  }
 0x518   : > { %v6976_v2 = vpop.f32.mrf.mxu0  ;;  %v12200_v42 = vadd.f32 %v12199_v4, %v12198_v58  ;;  %v13808_v58 = vld [vmem:[#allocation11 + $0xc4] ss:$24 sps:$4 sm:$0xff]  }
 0x519   : > { %v12201_v62 = vpop.f32.mrf.mxu1  ;;  %v13823_v4 = vld [vmem:[#allocation11 + $0x364] ss:$24 sps:$4 sm:$0xff]   ;;  %v13806_v2 = vld [vmem:[#allocation11 + $0xc0] ss:$24 sps:$4 sm:$0xff]  }
 0x51a   : > { %v6977_v8 = vpop.f32.mrf.mxu0  ;;  %v7474_v50 = vadd.f32 %v12200_v42, %v12178_v29  ;;  %v13814_v62 = vld [vmem:[#allocation11 + $0x94] ss:$24 sps:$4 sm:$0xff]   ;;  %v13812_v42 = vld [vmem:[#allocation11 + $0x90] ss:$24 sps:$4 sm:$0xff]  }
 0x51b   : > { %v12202_v9 = vpop.f32.mrf.mxu1  ;;  %v13821_v8 = vld [vmem:[#allocation11 + $0x360] ss:$24 sps:$4 sm:$0xff]   ;;  %v13827_v29 = vld [vmem:[#allocation11 + $0x330] ss:$24 sps:$4 sm:$0xff]  }
 0x51c   : > { %v13829_v9 = vld [vmem:[#allocation11 + $0x334] ss:$24 sps:$4 sm:$0xff]  }
 0x534   : > { %v12220_v11 = vpop.f32.mrf.mxu0 }
 0x536   : > { %v12221_v13 = vpop.f32.mrf.mxu0 }
 0x537   : > { %v12222_v6 = vadd.f32 %v12221_v13, %v12220_v11  ;;  %v13820_v11 = vld [vmem:[#allocation11 + $0x64] ss:$24 sps:$4 sm:$0xff]   ;;  %v13818_v13 = vld [vmem:[#allocation11 + $0x60] ss:$24 sps:$4 sm:$0xff]  }
 0x538   : > { %v12223_v44 = vpop.f32.mrf.mxu0 }
 0x539   : > { %v7514_v56 = vadd.f32 %v12222_v6, %v7474_v50  ;;  %v13826_v50 = vld [vmem:[#allocation11 + $0x34] ss:$24 sps:$4 sm:$0xff]   ;;  %v13833_v6 = vld [vmem:[#allocation11 + $0x300] ss:$24 sps:$4 sm:$0xff]  }
 0x53a   : > { %v12224_v15 = vpop.f32.mrf.mxu0  ;;  %v13841_v44 = vld [vmem:[#allocation11 + $0x5d4] ss:$24 sps:$4 sm:$0xff]  }
 0x53b   : > { %v7530_v16 = vsel %vm7527_vm1, %v7514_v56, -1e+30  ;;  %v13824_v56 = vld [vmem:[#allocation11 + $0x30] ss:$24 sps:$4 sm:$0xff]   ;;  %v13832_v15 = vld [vmem:[#allocation11 + $0x4] ss:$24 sps:$4 sm:$0xff]  }
 0x53c   : > { %v7532_v22 = vsel %vm7531_vm2, %v7530_v16, -inf }
 0x53d   : > { %v7533_v23 = vrot.slane %v7532_v22, 4 }
 0x53f   : > { %v7534_v19 = vmax.f32 %v7532_v22, %v7533_v23  ;;  %v13847_v22 = vld [vmem:[#allocation11 + $0x5a4] ss:$24 sps:$4 sm:$0xff]   ;;  %v13830_v23 = vld [vmem:[#allocation11] ss:$24 sps:$4 sm:$0xff]  }
 0x541   : > { %v7535_v55 = vrot.slane %v7534_v19, 2 }
 0x543   : > { %v7536_v25 = vmax.f32 %v7534_v19, %v7535_v55  ;;  %v13838_v19 = vld [vmem:[#allocation11 + $0x2d4] ss:$24 sps:$4 sm:$0xff]   ;;  %v13845_v55 = vld [vmem:[#allocation11 + $0x5a0] ss:$24 sps:$4 sm:$0xff]  }
 0x545   : > { %v7537_v26 = vrot.slane %v7536_v25, 1 }
 0x547   : > { %v7538_v27 = vmax.f32 %v7536_v25, %v7537_v26  ;;  %v13853_v25 = vld [vmem:[#allocation11 + $0x574] ss:$24 sps:$4 sm:$0xff]   ;;  %v13836_v26 = vld [vmem:[#allocation11 + $0x2d0] ss:$24 sps:$4 sm:$0xff]  }
 0x549   : > { %v7539_v34 = vsub.f32 %v7530_v16, %v7538_v27  ;;  %v13839_v16 = vld [vmem:[#allocation11 + $0x5d0] ss:$24 sps:$4 sm:$0xff]   ;;  %v13844_v27 = vld [vmem:[#allocation11 + $0x2a4] ss:$24 sps:$4 sm:$0xff]  }
 0x54b   : > { %v7540_v32 = vmul.f32 1.442695, %v7539_v34  ;;  %v13851_v34 = vld [vmem:[#allocation11 + $0x570] ss:$24 sps:$4 sm:$0xff]  }
 0x54d   : > { %14268 = vpow2.f32 %v7540_v32  ;;  %v13859_v32 = vld [vmem:[#allocation11 + $0x544] ss:$24 sps:$4 sm:$0xff]  }
 0x55a   : > { %v14269_v30 = vpop.eup %14268 }
 0x55b   : > { %v7542_v33 = vsel %vm7531_vm2, %v14269_v30, 0.0 }
 0x55c   : > { %v7543_v35 = vrot.slane %v7542_v33, 4 }
 0x55e   : > { %v7544_v36 = vadd.f32 %v7543_v35, %v7542_v33  ;;  %v13850_v33 = vld [vmem:[#allocation11 + $0x274] ss:$24 sps:$4 sm:$0xff]   ;;  %v13857_v35 = vld [vmem:[#allocation11 + $0x540] ss:$24 sps:$4 sm:$0xff]  }
 0x560   : > { %v7545_v37 = vrot.slane %v7544_v36, 2 }
 0x562   : > { %v7546_v39 = vadd.f32 %v7545_v37, %v7544_v36  ;;  %v13848_v36 = vld [vmem:[#allocation11 + $0x270] ss:$24 sps:$4 sm:$0xff]   ;;  %v13856_v37 = vld [vmem:[#allocation11 + $0x244] ss:$24 sps:$4 sm:$0xff]  }
 0x564   : > { %v7547_v43 = vrot.slane %v7546_v39, 1 }
 0x566   : > { %v7548_v40 = vadd.f32 %v7547_v43, %v7546_v39  ;;  %v13854_v39 = vld [vmem:[#allocation11 + $0x240] ss:$24 sps:$4 sm:$0xff]   ;;  %v13862_v43 = vld [vmem:[#allocation11 + $0x214] ss:$24 sps:$4 sm:$0xff]  }
 0x568   : > { %14270 = vrcp.f32 %v7548_v40  ;;  %v13865_v40 = vld [vmem:[#allocation11 + $0x514] ss:$24 sps:$4 sm:$0xff]  }
 0x575   : > { %v14271_v41 = vpop.eup %14270 }
 0x576   : > { %v7550_v3 = vmul.f32 %v14271_v41, %v14269_v30  ;;  %v13842_v30 = vld [vmem:[#allocation11 + $0x2a0] ss:$24 sps:$4 sm:$0xff]   ;;  %v13860_v41 = vld [vmem:[#allocation11 + $0x210] ss:$24 sps:$4 sm:$0xff]  }
 0x578   : > { %v7551_v54 = vpack.c.bf16 %v7550_v3, %v7550_v3  ;;  %v13863_v3 = vld [vmem:[#allocation11 + $0x510] ss:$24 sps:$4 sm:$0xff]  }
 0x57a   : > { %11816 = vmatmul.mubr.msk.bf16.vlgmr.msra.gmra.mxu0 %vm7531_vm2, %v7551_v54  ;;  %11818 = vmatmul.mubr.msk.bf16.vlgmr.msra.gmra.mxu1 %vm7531_vm2, %v7551_v54 }
 0x57b   : > { %7689 = vmatpush1.bf16.msra.mxu1 %v7587_v52  ;;  %7706 = vmatprep.mubr.bf16.mxu1 %v14669_v47  ;;  %v13809_v52 = vld [vmem:[#allocation11 + $0x3c0] ss:$24 sps:$4 sm:$0xff]   ;;  %v13817_v47 = vld [vmem:[#allocation11 + $0x394] ss:$24 sps:$4 sm:$0xff]  }
 0x57c   : > { %9523 = vmatprep.subr.bf16.mxu1 %v13790_v38  ;;  %9565 = vmatpush1.bf16.msra.mxu0 %v13791_v45  ;;  %v13871_v38 = vld [vmem:[#allocation11 + $0x4e4] ss:$24 sps:$4 sm:$0xff]   ;;  %v13866_v45 = vld [vmem:[#allocation11 + $0x1e0] ss:$24 sps:$4 sm:$0xff]  }
 0x57d   : > { %9566 = vmatprep.subr.bf16.mxu0 %v13799_v51  ;;  %v13869_v51 = vld [vmem:[#allocation11 + $0x4e0] ss:$24 sps:$4 sm:$0xff]  }
 0x580   : > { %9567 = vmatpush1.bf16.msra.mxu0 %v13797_v46  ;;  %v13874_v46 = vld [vmem:[#allocation11 + $0x1b4] ss:$24 sps:$4 sm:$0xff]  }
 0x581   : > { %9568 = vmatprep.subr.bf16.mxu0 %v13805_v61  ;;  %v13877_v61 = vld [vmem:[#allocation11 + $0x4b4] ss:$24 sps:$4 sm:$0xff]  }
 0x582   : > { %11820 = vmatmul.mubr.msk.bf16.vlgmr.msra.gmra.mxu1 %vm7531_vm2, %v7551_v54  ;;  %v13868_v54 = vld [vmem:[#allocation11 + $0x1e4] ss:$24 sps:$4 sm:$0xff]  }
 0x583   : > { %9524 = vmatpush1.bf16.msra.mxu1 %v13788_v7  ;;  %v13872_v7 = vld [vmem:[#allocation11 + $0x1b0] ss:$24 sps:$4 sm:$0xff]  }
 0x584   : > { %9525 = vmatprep.subr.bf16.mxu1 %v13796_v53  ;;  %9569 = vmatpush1.bf16.msra.mxu0 %v13803_v48  ;;  %v13875_v53 = vld [vmem:[#allocation11 + $0x4b0] ss:$24 sps:$4 sm:$0xff]   ;;  %v13880_v48 = vld [vmem:[#allocation11 + $0x184] ss:$24 sps:$4 sm:$0xff]  }
 0x585   : > { %9570 = vmatprep.subr.bf16.mxu0 %v13811_v10  ;;  %v13883_v10 = vld [vmem:[#allocation11 + $0x484] ss:$24 sps:$4 sm:$0xff]  }
 0x587   : > { %9526 = vmatpush1.bf16.msra.mxu1 %v13794_v21  ;;  %v13878_v21 = vld [vmem:[#allocation11 + $0x180] ss:$24 sps:$4 sm:$0xff]  }
 0x588   : > { %9527 = vmatprep.subr.bf16.mxu1 %v13802_v60  ;;  %9571 = vmatpush1.bf16.msra.mxu0 %v13809_v52  ;;  %v13881_v60 = vld [vmem:[#allocation11 + $0x480] ss:$24 sps:$4 sm:$0xff]   ;;  %v13886_v52 = vld [vmem:[#allocation11 + $0x754] ss:$24 sps:$4 sm:$0xff]  }
 0x589   : > { %9572 = vmatprep.subr.bf16.mxu0 %v13817_v47  ;;  %v13889_v47 = vld [vmem:[#allocation11 + $0x15c] ss:$24 sps:$4 sm:$0xff]  }
 0x58b   : > { %9528 = vmatpush1.bf16.msra.mxu1 %v13800_v57 }
 0x58c   : > { %9529 = vmatprep.subr.bf16.mxu1 %v13808_v58  ;;  %9573 = vmatpush1.bf16.msra.mxu0 %v13815_v24 }
 0x58d   : > { %9574 = vmatprep.subr.bf16.mxu0 %v13823_v4 }
 0x58f   : > { %9530 = vmatpush1.bf16.msra.mxu1 %v13806_v2 }
 0x590   : > { %9531 = vmatprep.subr.bf16.mxu1 %v13814_v62  ;;  %9575 = vmatpush1.bf16.msra.mxu0 %v13821_v8 }
 0x591   : > { %9576 = vmatprep.subr.bf16.mxu0 %v13829_v9 }
 0x593   : > { %9532 = vmatpush1.bf16.msra.mxu1 %v13812_v42 }
 0x594   : > { %9533 = vmatprep.subr.bf16.mxu1 %v13820_v11  ;;  %9577 = vmatpush1.bf16.msra.mxu0 %v13827_v29 }
 0x595   : > { %9578 = vmatprep.subr.bf16.mxu0 %v13835_v12 }
 0x597   : > { %9534 = vmatpush1.bf16.msra.mxu1 %v13818_v13 }
 0x598   : > { %9535 = vmatprep.subr.bf16.mxu1 %v13826_v50  ;;  %9579 = vmatpush1.bf16.msra.mxu0 %v13833_v6 }
 0x599   : > { %9580 = vmatprep.subr.bf16.mxu0 %v13841_v44 }
 0x59b   : > { %9536 = vmatpush1.bf16.msra.mxu1 %v13824_v56 }
 0x59c   : > { %9537 = vmatprep.subr.bf16.mxu1 %v13832_v15  ;;  %9581 = vmatpush2.bf16.msra.mxu0 %v13839_v16 }
 0x59d   : > { %9582 = vmatprep.subr.bf16.mxu0 %v13847_v22 }
 0x59f   : > { %9538 = vmatpush1.bf16.msra.mxu1 %v13830_v23 }
 0x5a0   : > { %9539 = vmatprep.subr.bf16.mxu1 %v13838_v19  ;;  %9583 = vmatpush2.bf16.msra.mxu0 %v13845_v55 }
 0x5a1   : > { %9584 = vmatprep.subr.bf16.mxu0 %v13853_v25 }
 0x5a3   : > { %9540 = vmatpush2.bf16.msra.mxu1 %v13836_v26 }
 0x5a4   : > { %9541 = vmatprep.subr.bf16.mxu1 %v13844_v27  ;;  %9585 = vmatpush2.bf16.msra.mxu0 %v13851_v34 }
 0x5a5   : > { %9586 = vmatprep.subr.bf16.mxu0 %v13859_v32 }
 0x5a7   : > { %9542 = vmatpush2.bf16.msra.mxu1 %v13842_v30 }
 0x5a8   : > { %9543 = vmatprep.subr.bf16.mxu1 %v13850_v33  ;;  %9587 = vmatpush2.bf16.msra.mxu0 %v13857_v35 }
 0x5a9   : > { %9588 = vmatprep.subr.bf16.mxu0 %v13865_v40 }
 0x5ab   : > { %9544 = vmatpush2.bf16.msra.mxu1 %v13848_v36 }
 0x5ac   : > { %9545 = vmatprep.subr.bf16.mxu1 %v13856_v37  ;;  %9589 = vmatpush2.bf16.msra.mxu0 %v13863_v3 }
 0x5ad   : > { %9590 = vmatprep.subr.bf16.mxu0 %v13871_v38 }
 0x5af   : > { %9546 = vmatpush2.bf16.msra.mxu1 %v13854_v39 }
 0x5b0   : > { %9547 = vmatprep.subr.bf16.mxu1 %v13862_v43  ;;  %9591 = vmatpush2.bf16.msra.mxu0 %v13869_v51  ;;  %v13884_v51 = vld [vmem:[#allocation11 + $0x750] ss:$24 sps:$4 sm:$0xff]  }
 0x5b1   : > { %9592 = vmatprep.subr.bf16.mxu0 %v13877_v61 }
 0x5b3   : > { %9548 = vmatpush2.bf16.msra.mxu1 %v13860_v41 }
 0x5b4   : > { %9549 = vmatprep.subr.bf16.mxu1 %v13868_v54  ;;  %9593 = vmatpush2.bf16.msra.mxu0 %v13875_v53  ;;  %v13892_v53 = vld [vmem:[#allocation11 + $0x724] ss:$24 sps:$4 sm:$0xff]  }
 0x5b5   : > { %9594 = vmatprep.subr.bf16.mxu0 %v13883_v10 }
 0x5b7   : > { %9550 = vmatpush2.bf16.msra.mxu1 %v13866_v45 }
 0x5b8   : > { %9551 = vmatprep.subr.bf16.mxu1 %v13874_v46  ;;  %9595 = vmatpush2.bf16.msra.mxu0 %v13881_v60  ;;  %v13887_v46 = vld [vmem:[#allocation11 + $0x158] ss:$24 sps:$4 sm:$0xff]   ;;  %v13893_v60 = vld [vmem:[#allocation11 + $0x128] ss:$24 sps:$4 sm:$0xff]  }
 0x5b9   : > { %9646 = vmatprep.subr.bf16.mxu0 %v13889_v47 }
 0x5bb   : > { %9552 = vmatpush2.bf16.msra.mxu1 %v13872_v7 }
 0x5bc   : > { %9553 = vmatprep.subr.bf16.mxu1 %v13880_v48  ;;  %v13895_v48 = vld [vmem:[#allocation11 + $0x12c] ss:$24 sps:$4 sm:$0xff]  }
 0x5bf   : > { %9554 = vmatpush2.bf16.msra.mxu1 %v13878_v21  ;;  %v13890_v21 = vld [vmem:[#allocation11 + $0x720] ss:$24 sps:$4 sm:$0xff]  }
 0x5c0   : > { %9605 = vmatprep.subr.bf16.mxu1 %v13886_v52  ;;  %v13898_v52 = vld [vmem:[#allocation11 + $0x6f4] ss:$24 sps:$4 sm:$0xff]  }
 0x63a   : > { %v7626_v57 = vpop.f32.mrf.mxu0  ;;  %v7667_v58 = vpop.f32.mrf.mxu1 }
 0x63b   : > { %v7715_v24 = vmul.f32 %v7626_v57, %v15294_v49  ;;  %v7717_v4 = vmul.f32 %v7667_v58, %v15346_v5  ;;  %v13901_v57 = vld [vmem:[#allocation11 + $0xfc] ss:$24 sps:$4 sm:$0xff]  }
 0x63c   : > { %v7628_v2 = vpop.f32.mrf.mxu0  ;;  %v7669_v62 = vpop.f32.mrf.mxu1 }
 0x63d   : > { %v7721_v8 = vrot.slane %v7715_v24, 4  ;;  %v7733_v9 = vrot.slane %v7717_v4, 4  ;;  %v7716_v42 = vmul.f32 %v7628_v2, %v15303_v14  ;;  %v7718_v11 = vmul.f32 %v7669_v62, %v15348_v20  ;;  %v13904_v62 = vld [vmem:[#allocation11 + $0x6c4] ss:$24 sps:$4 sm:$0xff]  }
 0x63e   : > { %v7630_v29 = vpop.f32.mrf.mxu0  ;;  %v7671_v12 = vpop.f32.mrf.mxu1 }
 0x63f   : > { %v7722_v13 = vadd.f32 %v7721_v8, %v7715_v24  ;;  %v7734_v50 = vadd.f32 %v7733_v9, %v7717_v4  ;;  %v7727_v6 = vrot.slane %v7716_v42, 4  ;;  %v7739_v44 = vrot.slane %v7718_v11, 4  ;;  %v13896_v24 = vld [vmem:[#allocation11 + $0x6f0] ss:$24 sps:$4 sm:$0xff]   ;;  %v13907_v8 = vld [vmem:[#allocation11 + $0xcc] ss:$24 sps:$4 sm:$0xff]  }
 0x640   : > { %v7631_v56 = vpop.f32.mrf.mxu0  ;;  %v7672_v15 = vpop.f32.mrf.mxu1  ;;  %v13899_v4 = vld [vmem:[#allocation11 + $0xf8] ss:$24 sps:$4 sm:$0xff]   ;;  %v13913_v29 = vld [vmem:[#allocation11 + $0x9c] ss:$24 sps:$4 sm:$0xff]  }
 0x641   : > { %v7723_v16 = vrot.slane %v7722_v13, 2  ;;  %v7735_v49 = vrot.slane %v7734_v50, 2  ;;  %v7728_v22 = vadd.f32 %v7727_v6, %v7716_v42  ;;  %v7740_v5 = vadd.f32 %v7739_v44, %v7718_v11  ;;  %v13902_v9 = vld [vmem:[#allocation11 + $0x6c0] ss:$24 sps:$4 sm:$0xff]   ;;  %v13910_v11 = vld [vmem:[#allocation11 + $0x694] ss:$24 sps:$4 sm:$0xff]  }
 0x642   : > { %v15374_v23 = vpop.f32.mrf.mxu1  ;;  %v13905_v42 = vld [vmem:[#allocation11 + $0xc8] ss:$24 sps:$4 sm:$0xff]   ;;  %v13919_v6 = vld [vmem:[#allocation11 + $0x6c] ss:$24 sps:$4 sm:$0xff]  }
 0x643   : > { %v7724_v19 = vadd.f32 %v7723_v16, %v7722_v13  ;;  %v7736_v55 = vadd.f32 %v7735_v49, %v7734_v50  ;;  %v7729_v25 = vrot.slane %v7728_v22, 2  ;;  %v7741_v14 = vrot.slane %v7740_v5, 2  ;;  %v13908_v12 = vld [vmem:[#allocation11 + $0x690] ss:$24 sps:$4 sm:$0xff]   ;;  %v13916_v50 = vld [vmem:[#allocation11 + $0x664] ss:$24 sps:$4 sm:$0xff]  }
 0x644   : > { %v7710_v26 = vpop.f32.mrf.mxu1  ;;  %v13911_v13 = vld [vmem:[#allocation11 + $0x98] ss:$24 sps:$4 sm:$0xff]   ;;  %v13917_v56 = vld [vmem:[#allocation11 + $0x68] ss:$24 sps:$4 sm:$0xff]   ;;  %v13922_v15 = vld [vmem:[#allocation11 + $0x634] ss:$24 sps:$4 sm:$0xff]  }
 0x645   : > { %v7725_v20 = vrot.slane %v7724_v19, 1  ;;  %v7737_v27 = vrot.slane %v7736_v55, 1  ;;  %v7730_v34 = vadd.f32 %v7729_v25, %v7728_v22  ;;  %v7742_v32 = vadd.f32 %v7741_v14, %v7740_v5  ;;  %v13914_v44 = vld [vmem:[#allocation11 + $0x660] ss:$24 sps:$4 sm:$0xff]   ;;  %v13925_v16 = vld [vmem:[#allocation11 + $0x3c] ss:$24 sps:$4 sm:$0xff]  }
 0x646   : > { %v7720_v30 = vmul.f32 %v7710_v26, %v15362_v1  ;;  %v7712_v33 = vpop.f32.mrf.mxu1  ;;  %v13920_v49 = vld [vmem:[#allocation11 + $0x630] ss:$24 sps:$4 sm:$0xff]   ;;  %v13928_v5 = vld [vmem:[#allocation11 + $0x604] ss:$24 sps:$4 sm:$0xff]   ;;  %v13934_v14 = vld [vmem:[#allocation11 + $0x8d4] ss:$24 sps:$4 sm:$0xff]  }
 0x647   : > { %v7731_v35 = vrot.slane %v7730_v34, 1  ;;  %v7743_v36 = vrot.slane %v7742_v32, 1  ;;  %v7726_v37 = vadd.f32 %v7725_v20, %v7724_v19  ;;  %v7738_v39 = vadd.f32 %v7737_v27, %v7736_v55  ;;  %v13923_v22 = vld [vmem:[#allocation11 + $0x38] ss:$24 sps:$4 sm:$0xff]   ;;  %v13931_v19 = vld [vmem:[#allocation11 + $0xc] ss:$24 sps:$4 sm:$0xff]  }
 0x648   : > { %v7751_v43 = vrot.slane %v7720_v30, 4  ;;  %v7713_v40 = vpop.f32.mrf.mxu1  ;;  %v13926_v55 = vld [vmem:[#allocation11 + $0x600] ss:$24 sps:$4 sm:$0xff]   ;;  %v13937_v26 = vld [vmem:[#allocation11 + $0x2dc] ss:$24 sps:$4 sm:$0xff]  }
 0x649   : > { %v7732_v41 = vadd.f32 %v7731_v35, %v7730_v34  ;;  %v7744_v3 = vadd.f32 %v7743_v36, %v7742_v32  ;;  %v15381_v61 = vpack.c.bf16 %v7726_v37, %v7726_v37  ;;  %v15383_v7 = vpack.c.bf16 %v7738_v39, %v7738_v39  ;;  %v13929_v25 = vld [vmem:[#allocation11 + $0x8] ss:$24 sps:$4 sm:$0xff]   ;;  %v13935_v27 = vld [vmem:[#allocation11 + $0x2d8] ss:$24 sps:$4 sm:$0xff]   ;;  %v13940_v34 = vld [vmem:[#allocation11 + $0x8a4] ss:$24 sps:$4 sm:$0xff]  }
 0x64a   : > { %v7752_v54 = vadd.f32 %v7751_v43, %v7720_v30  ;;  %v13932_v20 = vld [vmem:[#allocation11 + $0x8d0] ss:$24 sps:$4 sm:$0xff]   ;;  %v13943_v32 = vld [vmem:[#allocation11 + $0x2ac] ss:$24 sps:$4 sm:$0xff]   ;;  %v13938_v30 = vld [vmem:[#allocation11 + $0x8a0] ss:$24 sps:$4 sm:$0xff]   ;;  %v7719_v35 = vmul.f32 %v15374_v23, %v15360_v63 }
 0x64b   : > { %v15377_v38 = vpack.c.bf16 %v7732_v41, %v7732_v41  ;;  %v15379_v45 = vpack.c.bf16 %v7744_v3, %v7744_v3  ;;  %v13941_v33 = vld [vmem:[#allocation11 + $0x2a8] ss:$24 sps:$4 sm:$0xff]   ;;  %v13946_v36 = vld [vmem:[#allocation11 + $0x874] ss:$24 sps:$4 sm:$0xff]   ;;  %v13947_v43 = vld [vmem:[#allocation11 + $0x278] ss:$24 sps:$4 sm:$0xff]  }
 0x64c   : > { %v7753_v1 = vrot.slane %v7752_v54, 2  ;;  %v13949_v37 = vld [vmem:[#allocation11 + $0x27c] ss:$24 sps:$4 sm:$0xff]   ;;  %v13944_v39 = vld [vmem:[#allocation11 + $0x870] ss:$24 sps:$4 sm:$0xff]   ;;  %v7745_v40 = vrot.slane %v7719_v35, 4 }
 0x64d   : > { %9555 = vmatprep.mubr.bf16.mxu1 %v15377_v38  ;;  %9596 = vmatprep.mubr.bf16.mxu0 %v15379_v45  ;;  %v13952_v41 = vld [vmem:[#allocation11 + $0x844] ss:$24 sps:$4 sm:$0xff]   ;;  %v13958_v63 = vld [vmem:[#allocation11 + $0x814] ss:$24 sps:$4 sm:$0xff]  }
 0x64e   : > { %v7754_v10 = vadd.f32 %v7753_v1, %v7752_v54  ;;  %9556 = vmatmul.mubr.bf16.vlgmr.msra.gmra.mxu1 %v15381_v61  ;;  %9597 = vmatmul.mubr.bf16.vlgmr.msra.gmra.mxu0 %v15383_v7  ;;  %v13955_v3 = vld [vmem:[#allocation11 + $0x24c] ss:$24 sps:$4 sm:$0xff]   ;;  %v13950_v54 = vld [vmem:[#allocation11 + $0x840] ss:$24 sps:$4 sm:$0xff]   ;;  %v13961_v23 = vld [vmem:[#allocation11 + $0x21c] ss:$24 sps:$4 sm:$0xff]  }
 0x64f   : > { %9606 = vmatpush1.bf16.msra.mxu1 %v13884_v51  ;;  %9647 = vmatpush1.bf16.msra.mxu0 %v13887_v46  ;;  %v13953_v51 = vld [vmem:[#allocation11 + $0x248] ss:$24 sps:$4 sm:$0xff]   ;;  %v7746_v46 = vadd.f32 %v7745_v40, %v7719_v35  ;;  %v14015_v35 = vld [vmem:[#allocation11 + $0x66c] ss:$24 sps:$4 sm:$0xff]   ;;  %v14016_v40 = vld [vmem:[#allocation11 + $0x338] ss:$24 sps:$4 sm:$0xff]  }
 0x650   : > { %9678 = vmatprep.mubr.bf16.mxu0 %v15377_v38  ;;  %9607 = vmatprep.subr.bf16.mxu1 %v13892_v53  ;;  %v7755_v47 = vrot.slane %v7754_v10, 1  ;;  %v13956_v1 = vld [vmem:[#allocation11 + $0x810] ss:$24 sps:$4 sm:$0xff]  }
 0x651   : > { %9648 = vmatprep.subr.bf16.mxu0 %v13895_v48  ;;  %v13959_v53 = vld [vmem:[#allocation11 + $0x218] ss:$24 sps:$4 sm:$0xff]   ;;  %v7747_v48 = vrot.slane %v7746_v46, 2 }
 0x652   : > { %v7756_v58 = vadd.f32 %v7755_v47, %v7754_v10  ;;  %v13964_v10 = vld [vmem:[#allocation11 + $0x7e4] ss:$24 sps:$4 sm:$0xff]  }
 0x653   : > { %9608 = vmatpush1.bf16.msra.mxu1 %v13890_v21  ;;  %9649 = vmatpush1.bf16.msra.mxu0 %v13893_v60  ;;  %v13967_v21 = vld [vmem:[#allocation11 + $0x1ec] ss:$24 sps:$4 sm:$0xff]   ;;  %v13962_v60 = vld [vmem:[#allocation11 + $0x7e0] ss:$24 sps:$4 sm:$0xff]   ;;  %v7748_v47 = vadd.f32 %v7747_v48, %v7746_v46 }
 0x654   : > { %9609 = vmatprep.subr.bf16.mxu1 %v13898_v52  ;;  %v15390_v2 = vpack.c.bf16 %v7756_v58, %v7756_v58  ;;  %9650 = vmatprep.subr.bf16.mxu0 %v13901_v57  ;;  %v13965_v52 = vld [vmem:[#allocation11 + $0x1e8] ss:$24 sps:$4 sm:$0xff]   ;;  %v13970_v57 = vld [vmem:[#allocation11 + $0x7b4] ss:$24 sps:$4 sm:$0xff]  }
 0x655   : > { %v13973_v58 = vld [vmem:[#allocation11 + $0x1bc] ss:$24 sps:$4 sm:$0xff]   ;;  %v14025_v46 = vld [vmem:[#allocation11 + $0x608] ss:$24 sps:$4 sm:$0xff]   ;;  %v14036_v48 = vld [vmem:[#allocation11 + $0x5ac] ss:$24 sps:$4 sm:$0xff]  }
 0x656   : > { %9637 = vmatprep.mubr.bf16.mxu1 %v15390_v2 }
 0x657   : > { %9610 = vmatpush1.bf16.msra.mxu1 %v13896_v24  ;;  %9651 = vmatpush1.bf16.msra.mxu0 %v13899_v4  ;;  %v13968_v24 = vld [vmem:[#allocation11 + $0x7b0] ss:$24 sps:$4 sm:$0xff]  }
 0x658   : > { %9611 = vmatprep.subr.bf16.mxu1 %v13904_v62  ;;  %9652 = vmatprep.subr.bf16.mxu0 %v13907_v8  ;;  %v13971_v4 = vld [vmem:[#allocation11 + $0x1b8] ss:$24 sps:$4 sm:$0xff]   ;;  %v7749_v62 = vrot.slane %v7748_v47, 1  ;;  %v13976_v8 = vld [vmem:[#allocation11 + $0x784] ss:$24 sps:$4 sm:$0xff]  }
 0x65b   : > { %9612 = vmatpush1.bf16.msra.mxu1 %v13902_v9  ;;  %9653 = vmatpush1.bf16.msra.mxu0 %v13905_v42  ;;  %v13979_v9 = vld [vmem:[#allocation11 + $0x18c] ss:$24 sps:$4 sm:$0xff]   ;;  %v13974_v42 = vld [vmem:[#allocation11 + $0x780] ss:$24 sps:$4 sm:$0xff]  }
 0x65c   : > { %9613 = vmatprep.subr.bf16.mxu1 %v13910_v11  ;;  %9654 = vmatprep.subr.bf16.mxu0 %v13913_v29  ;;  %v13977_v11 = vld [vmem:[#allocation11 + $0x188] ss:$24 sps:$4 sm:$0xff]   ;;  %v7750_v29 = vadd.f32 %v7749_v62, %v7748_v47  ;;  %v14045_v47 = vld [vmem:[#allocation11 + $0x87c] ss:$24 sps:$4 sm:$0xff]  }
 0x65d   : > { %v14046_v62 = vld [vmem:[#allocation11 + $0x548] ss:$24 sps:$4 sm:$0xff]  }
 0x65f   : > { %9614 = vmatpush1.bf16.msra.mxu1 %v13908_v12  ;;  %9655 = vmatpush1.bf16.msra.mxu0 %v13911_v13  ;;  %v13982_v12 = vld [vmem:[#allocation11 + $0x45c] ss:$24 sps:$4 sm:$0xff]  }
 0x660   : > { %9615 = vmatprep.subr.bf16.mxu1 %v13916_v50  ;;  %9656 = vmatprep.subr.bf16.mxu0 %v13919_v6  ;;  %v13985_v13 = vld [vmem:[#allocation11 + $0x75c] ss:$24 sps:$4 sm:$0xff]   ;;  %v13980_v50 = vld [vmem:[#allocation11 + $0x458] ss:$24 sps:$4 sm:$0xff]   ;;  %v15395_v6 = vpack.c.bf16 %v7750_v29, %v7750_v29 }
 0x661   : > { %v14055_v29 = vld [vmem:[#allocation11 + $0x818] ss:$24 sps:$4 sm:$0xff]  }
 0x663   : > { %9616 = vmatpush1.bf16.msra.mxu1 %v13914_v44  ;;  %9657 = vmatpush1.bf16.msra.mxu0 %v13917_v56  ;;  %v13983_v44 = vld [vmem:[#allocation11 + $0x758] ss:$24 sps:$4 sm:$0xff]   ;;  %v13988_v56 = vld [vmem:[#allocation11 + $0x42c] ss:$24 sps:$4 sm:$0xff]  }
 0x664   : > { %9617 = vmatprep.subr.bf16.mxu1 %v13922_v15  ;;  %9658 = vmatprep.subr.bf16.mxu0 %v13925_v16  ;;  %v13991_v15 = vld [vmem:[#allocation11 + $0x72c] ss:$24 sps:$4 sm:$0xff]   ;;  %v13986_v16 = vld [vmem:[#allocation11 + $0x428] ss:$24 sps:$4 sm:$0xff]  }
 0x667   : > { %9618 = vmatpush1.bf16.msra.mxu1 %v13920_v49  ;;  %9659 = vmatpush1.bf16.msra.mxu0 %v13923_v22  ;;  %v13989_v49 = vld [vmem:[#allocation11 + $0x728] ss:$24 sps:$4 sm:$0xff]   ;;  %v13994_v22 = vld [vmem:[#allocation11 + $0x3fc] ss:$24 sps:$4 sm:$0xff]  }
 0x668   : > { %9619 = vmatprep.subr.bf16.mxu1 %v13928_v5  ;;  %9660 = vmatprep.subr.bf16.mxu0 %v13931_v19  ;;  %v13997_v5 = vld [vmem:[#allocation11 + $0x6fc] ss:$24 sps:$4 sm:$0xff]   ;;  %v13992_v19 = vld [vmem:[#allocation11 + $0x3f8] ss:$24 sps:$4 sm:$0xff]  }
 0x66b   : > { %9620 = vmatpush1.bf16.msra.mxu1 %v13926_v55  ;;  %9661 = vmatpush1.bf16.msra.mxu0 %v13929_v25  ;;  %v13995_v55 = vld [vmem:[#allocation11 + $0x6f8] ss:$24 sps:$4 sm:$0xff]   ;;  %v14000_v25 = vld [vmem:[#allocation11 + $0x3cc] ss:$24 sps:$4 sm:$0xff]  }
 0x66c   : > { %9621 = vmatprep.subr.bf16.mxu1 %v13934_v14  ;;  %9662 = vmatprep.subr.bf16.mxu0 %v13937_v26  ;;  %v14003_v14 = vld [vmem:[#allocation11 + $0x6cc] ss:$24 sps:$4 sm:$0xff]   ;;  %v13998_v26 = vld [vmem:[#allocation11 + $0x3c8] ss:$24 sps:$4 sm:$0xff]  }
 0x66f   : > { %9622 = vmatpush2.bf16.msra.mxu1 %v13932_v20  ;;  %9663 = vmatpush2.bf16.msra.mxu0 %v13935_v27  ;;  %v14001_v20 = vld [vmem:[#allocation11 + $0x6c8] ss:$24 sps:$4 sm:$0xff]   ;;  %v14006_v27 = vld [vmem:[#allocation11 + $0x39c] ss:$24 sps:$4 sm:$0xff]  }
 0x670   : > { %9623 = vmatprep.subr.bf16.mxu1 %v13940_v34  ;;  %9664 = vmatprep.subr.bf16.mxu0 %v13943_v32  ;;  %v14009_v34 = vld [vmem:[#allocation11 + $0x69c] ss:$24 sps:$4 sm:$0xff]   ;;  %v14004_v32 = vld [vmem:[#allocation11 + $0x398] ss:$24 sps:$4 sm:$0xff]  }
 0x673   : > { %9624 = vmatpush2.bf16.msra.mxu1 %v13938_v30  ;;  %9665 = vmatpush2.bf16.msra.mxu0 %v13941_v33  ;;  %v14007_v30 = vld [vmem:[#allocation11 + $0x698] ss:$24 sps:$4 sm:$0xff]   ;;  %v14012_v33 = vld [vmem:[#allocation11 + $0x36c] ss:$24 sps:$4 sm:$0xff]  }
 0x674   : > { %9625 = vmatprep.subr.bf16.mxu1 %v13946_v36  ;;  %9666 = vmatprep.subr.bf16.mxu0 %v13949_v37  ;;  %v14010_v36 = vld [vmem:[#allocation11 + $0x368] ss:$24 sps:$4 sm:$0xff]  }
 0x675   : > { %v14013_v37 = vld [vmem:[#allocation11 + $0x668] ss:$24 sps:$4 sm:$0xff]  }
 0x677   : > { %9626 = vmatpush2.bf16.msra.mxu1 %v13944_v39  ;;  %9667 = vmatpush2.bf16.msra.mxu0 %v13947_v43  ;;  %v14018_v39 = vld [vmem:[#allocation11 + $0x33c] ss:$24 sps:$4 sm:$0xff]  }
 0x678   : > { %9627 = vmatprep.subr.bf16.mxu1 %v13952_v41  ;;  %9668 = vmatprep.subr.bf16.mxu0 %v13955_v3  ;;  %v14021_v43 = vld [vmem:[#allocation11 + $0x63c] ss:$24 sps:$4 sm:$0xff]   ;;  %v14019_v41 = vld [vmem:[#allocation11 + $0x638] ss:$24 sps:$4 sm:$0xff]   ;;  %v14024_v3 = vld [vmem:[#allocation11 + $0x30c] ss:$24 sps:$4 sm:$0xff]  }
 0x67b   : > { %9628 = vmatpush2.bf16.msra.mxu1 %v13950_v54  ;;  %9669 = vmatpush2.bf16.msra.mxu0 %v13953_v51  ;;  %v14027_v54 = vld [vmem:[#allocation11 + $0x60c] ss:$24 sps:$4 sm:$0xff]   ;;  %v14022_v51 = vld [vmem:[#allocation11 + $0x308] ss:$24 sps:$4 sm:$0xff]  }
 0x67c   : > { %9629 = vmatprep.subr.bf16.mxu1 %v13958_v63  ;;  %9670 = vmatprep.subr.bf16.mxu0 %v13961_v23  ;;  %v14030_v63 = vld [vmem:[#allocation11 + $0x5dc] ss:$24 sps:$4 sm:$0xff]  }
 0x67d   : > { %v14033_v23 = vld [vmem:[#allocation11 + $0x8dc] ss:$24 sps:$4 sm:$0xff]  }
 0x67f   : > { %9630 = vmatpush2.bf16.msra.mxu1 %v13956_v1  ;;  %9671 = vmatpush2.bf16.msra.mxu0 %v13959_v53  ;;  %v14028_v1 = vld [vmem:[#allocation11 + $0x5d8] ss:$24 sps:$4 sm:$0xff]  }
 0x680   : > { %9631 = vmatprep.subr.bf16.mxu1 %v13964_v10  ;;  %9672 = vmatprep.subr.bf16.mxu0 %v13967_v21  ;;  %v14031_v53 = vld [vmem:[#allocation11 + $0x8d8] ss:$24 sps:$4 sm:$0xff]   ;;  %v14039_v10 = vld [vmem:[#allocation11 + $0x8ac] ss:$24 sps:$4 sm:$0xff]   ;;  %v14034_v21 = vld [vmem:[#allocation11 + $0x5a8] ss:$24 sps:$4 sm:$0xff]  }
 0x683   : > { %9632 = vmatpush2.bf16.msra.mxu1 %v13962_v60  ;;  %9673 = vmatpush2.bf16.msra.mxu0 %v13965_v52  ;;  %v14037_v60 = vld [vmem:[#allocation11 + $0x8a8] ss:$24 sps:$4 sm:$0xff]   ;;  %v14042_v52 = vld [vmem:[#allocation11 + $0x57c] ss:$24 sps:$4 sm:$0xff]  }
 0x684   : > { %9633 = vmatprep.subr.bf16.mxu1 %v13970_v57  ;;  %9674 = vmatprep.subr.bf16.mxu0 %v13973_v58  ;;  %v14040_v57 = vld [vmem:[#allocation11 + $0x578] ss:$24 sps:$4 sm:$0xff]  }
 0x685   : > { %v14043_v58 = vld [vmem:[#allocation11 + $0x878] ss:$24 sps:$4 sm:$0xff]  }
 0x687   : > { %9634 = vmatpush2.bf16.msra.mxu1 %v13968_v24  ;;  %9675 = vmatpush2.bf16.msra.mxu0 %v13971_v4  ;;  %v14048_v24 = vld [vmem:[#allocation11 + $0x54c] ss:$24 sps:$4 sm:$0xff]  }
 0x688   : > { %9635 = vmatprep.subr.bf16.mxu1 %v13976_v8  ;;  %9676 = vmatprep.subr.bf16.mxu0 %v13979_v9  ;;  %v14051_v4 = vld [vmem:[#allocation11 + $0x84c] ss:$24 sps:$4 sm:$0xff]   ;;  %v14049_v8 = vld [vmem:[#allocation11 + $0x848] ss:$24 sps:$4 sm:$0xff]   ;;  %v14054_v9 = vld [vmem:[#allocation11 + $0x51c] ss:$24 sps:$4 sm:$0xff]  }
 0x68b   : > { %9636 = vmatpush2.bf16.msra.mxu1 %v13974_v42  ;;  %9677 = vmatpush2.bf16.msra.mxu0 %v13977_v11  ;;  %v14057_v42 = vld [vmem:[#allocation11 + $0x81c] ss:$24 sps:$4 sm:$0xff]   ;;  %v14052_v11 = vld [vmem:[#allocation11 + $0x518] ss:$24 sps:$4 sm:$0xff]  }
 0x68c   : > { %9687 = vmatprep.subr.bf16.mxu1 %v13982_v12  ;;  %9728 = vmatprep.subr.bf16.mxu0 %v13985_v13  ;;  %v14060_v12 = vld [vmem:[#allocation11 + $0x4ec] ss:$24 sps:$4 sm:$0xff]  }
 0x68d   : > { %v14063_v13 = vld [vmem:[#allocation11 + $0x7ec] ss:$24 sps:$4 sm:$0xff]  }
 0x68e   : > { %9638 = vmatmul.mubr.bf16.vlgmr.msra.gmra.mxu1 %v15395_v6  ;;  %9679 = vmatmul.mubr.bf16.vlgmr.msra.gmra.mxu0 %v15381_v61 }
 0x68f   : > { %9688 = vmatpush1.bf16.msra.mxu1 %v13980_v50  ;;  %9719 = vmatprep.mubr.bf16.mxu1 %v15379_v45  ;;  %v14058_v50 = vld [vmem:[#allocation11 + $0x4e8] ss:$24 sps:$4 sm:$0xff]  }
 0x690   : > { %9729 = vmatpush1.bf16.msra.mxu0 %v13983_v44  ;;  %9760 = vmatprep.mubr.bf16.mxu0 %v15390_v2  ;;  %v14061_v44 = vld [vmem:[#allocation11 + $0x7e8] ss:$24 sps:$4 sm:$0xff]  }
 0x691   : > { %9689 = vmatprep.subr.bf16.mxu1 %v13988_v56  ;;  %9730 = vmatprep.subr.bf16.mxu0 %v13991_v15  ;;  %v14066_v56 = vld [vmem:[#allocation11 + $0x4bc] ss:$24 sps:$4 sm:$0xff]  }
 0x692   : > { %v14069_v15 = vld [vmem:[#allocation11 + $0x7bc] ss:$24 sps:$4 sm:$0xff]  }
 0x693   : > { %9690 = vmatpush1.bf16.msra.mxu1 %v13986_v16  ;;  %v14064_v16 = vld [vmem:[#allocation11 + $0x4b8] ss:$24 sps:$4 sm:$0xff]  }
 0x694   : > { %9731 = vmatpush1.bf16.msra.mxu0 %v13989_v49  ;;  %9691 = vmatprep.subr.bf16.mxu1 %v13994_v22  ;;  %v14067_v49 = vld [vmem:[#allocation11 + $0x7b8] ss:$24 sps:$4 sm:$0xff]   ;;  %v14072_v22 = vld [vmem:[#allocation11 + $0x48c] ss:$24 sps:$4 sm:$0xff]  }
 0x695   : > { %9732 = vmatprep.subr.bf16.mxu0 %v13997_v5  ;;  %v14075_v5 = vld [vmem:[#allocation11 + $0x78c] ss:$24 sps:$4 sm:$0xff]  }
 0x697   : > { %9692 = vmatpush1.bf16.msra.mxu1 %v13992_v19  ;;  %v14070_v19 = vld [vmem:[#allocation11 + $0x488] ss:$24 sps:$4 sm:$0xff]  }
 0x698   : > { %9733 = vmatpush1.bf16.msra.mxu0 %v13995_v55  ;;  %9693 = vmatprep.subr.bf16.mxu1 %v14000_v25  ;;  %v14073_v55 = vld [vmem:[#allocation11 + $0x788] ss:$24 sps:$4 sm:$0xff]   ;;  %v14078_v25 = vld [vmem:[#allocation11 + $0x164] ss:$24 sps:$4 sm:$0xff]  }
 0x699   : > { %9734 = vmatprep.subr.bf16.mxu0 %v14003_v14  ;;  %v14081_v14 = vld [vmem:[#allocation11 + $0x464] ss:$24 sps:$4 sm:$0xff]  }
 0x69b   : > { %9694 = vmatpush1.bf16.msra.mxu1 %v13998_v26  ;;  %v14076_v26 = vld [vmem:[#allocation11 + $0x160] ss:$24 sps:$4 sm:$0xff]  }
 0x69c   : > { %9735 = vmatpush1.bf16.msra.mxu0 %v14001_v20  ;;  %9695 = vmatprep.subr.bf16.mxu1 %v14006_v27  ;;  %v14079_v20 = vld [vmem:[#allocation11 + $0x460] ss:$24 sps:$4 sm:$0xff]   ;;  %v14084_v27 = vld [vmem:[#allocation11 + $0x134] ss:$24 sps:$4 sm:$0xff]  }
 0x69d   : > { %9736 = vmatprep.subr.bf16.mxu0 %v14009_v34  ;;  %v14087_v34 = vld [vmem:[#allocation11 + $0x434] ss:$24 sps:$4 sm:$0xff]  }
 0x69f   : > { %9696 = vmatpush1.bf16.msra.mxu1 %v14004_v32  ;;  %v14082_v32 = vld [vmem:[#allocation11 + $0x130] ss:$24 sps:$4 sm:$0xff]  }
 0x6a0   : > { %9737 = vmatpush1.bf16.msra.mxu0 %v14007_v30  ;;  %9697 = vmatprep.subr.bf16.mxu1 %v14012_v33  ;;  %v14085_v30 = vld [vmem:[#allocation11 + $0x430] ss:$24 sps:$4 sm:$0xff]   ;;  %v14090_v33 = vld [vmem:[#allocation11 + $0x104] ss:$24 sps:$4 sm:$0xff]  }
 0x6a1   : > { %9738 = vmatprep.subr.bf16.mxu0 %v14015_v35  ;;  %v14093_v35 = vld [vmem:[#allocation11 + $0x404] ss:$24 sps:$4 sm:$0xff]  }
 0x6a3   : > { %9698 = vmatpush1.bf16.msra.mxu1 %v14010_v36  ;;  %v14088_v36 = vld [vmem:[#allocation11 + $0x100] ss:$24 sps:$4 sm:$0xff]  }
 0x6a4   : > { %9739 = vmatpush1.bf16.msra.mxu0 %v14013_v37  ;;  %9699 = vmatprep.subr.bf16.mxu1 %v14018_v39  ;;  %v14091_v37 = vld [vmem:[#allocation11 + $0x400] ss:$24 sps:$4 sm:$0xff]   ;;  %v14096_v39 = vld [vmem:[#allocation11 + $0xd4] ss:$24 sps:$4 sm:$0xff]  }
 0x6a5   : > { %9740 = vmatprep.subr.bf16.mxu0 %v14021_v43  ;;  %v14099_v43 = vld [vmem:[#allocation11 + $0x3d4] ss:$24 sps:$4 sm:$0xff]  }
 0x6a7   : > { %9700 = vmatpush1.bf16.msra.mxu1 %v14016_v40  ;;  %v14094_v40 = vld [vmem:[#allocation11 + $0xd0] ss:$24 sps:$4 sm:$0xff]  }
 0x6a8   : > { %9741 = vmatpush1.bf16.msra.mxu0 %v14019_v41  ;;  %9701 = vmatprep.subr.bf16.mxu1 %v14024_v3  ;;  %v14102_v41 = vld [vmem:[#allocation11 + $0xa4] ss:$24 sps:$4 sm:$0xff]  }
 0x6a9   : > { %9742 = vmatprep.subr.bf16.mxu0 %v14027_v54  ;;  %v14105_v3 = vld [vmem:[#allocation11 + $0x3a4] ss:$24 sps:$4 sm:$0xff]   ;;  %v14103_v54 = vld [vmem:[#allocation11 + $0x3a0] ss:$24 sps:$4 sm:$0xff]  }
 0x6ab   : > { %9702 = vmatpush1.bf16.msra.mxu1 %v14022_v51  ;;  %v14108_v51 = vld [vmem:[#allocation11 + $0x74] ss:$24 sps:$4 sm:$0xff]  }
 0x6ac   : > { %9743 = vmatpush1.bf16.msra.mxu0 %v14025_v46  ;;  %9703 = vmatprep.subr.bf16.mxu1 %v14030_v63  ;;  %v14111_v46 = vld [vmem:[#allocation11 + $0x374] ss:$24 sps:$4 sm:$0xff]   ;;  %v14106_v63 = vld [vmem:[#allocation11 + $0x70] ss:$24 sps:$4 sm:$0xff]  }
 0x6ad   : > { %9744 = vmatprep.subr.bf16.mxu0 %v14033_v23  ;;  %v14109_v23 = vld [vmem:[#allocation11 + $0x370] ss:$24 sps:$4 sm:$0xff]  }
 0x6af   : > { %9704 = vmatpush2.bf16.msra.mxu1 %v14028_v1  ;;  %v14114_v1 = vld [vmem:[#allocation11 + $0x44] ss:$24 sps:$4 sm:$0xff]  }
 0x6b0   : > { %9745 = vmatpush2.bf16.msra.mxu0 %v14031_v53  ;;  %9705 = vmatprep.subr.bf16.mxu1 %v14036_v48  ;;  %v14117_v53 = vld [vmem:[#allocation11 + $0x344] ss:$24 sps:$4 sm:$0xff]   ;;  %v14112_v48 = vld [vmem:[#allocation11 + $0x40] ss:$24 sps:$4 sm:$0xff]  }
 0x6b1   : > { %9746 = vmatprep.subr.bf16.mxu0 %v14039_v10  ;;  %v14115_v10 = vld [vmem:[#allocation11 + $0x340] ss:$24 sps:$4 sm:$0xff]  }
 0x6b3   : > { %9706 = vmatpush2.bf16.msra.mxu1 %v14034_v21  ;;  %v14120_v21 = vld [vmem:[#allocation11 + $0x14] ss:$24 sps:$4 sm:$0xff]  }
 0x6b4   : > { %9747 = vmatpush2.bf16.msra.mxu0 %v14037_v60  ;;  %9707 = vmatprep.subr.bf16.mxu1 %v14042_v52  ;;  %v14123_v60 = vld [vmem:[#allocation11 + $0x314] ss:$24 sps:$4 sm:$0xff]   ;;  %v14118_v52 = vld [vmem:[#allocation11 + $0x10] ss:$24 sps:$4 sm:$0xff]  }
 0x6b5   : > { %9748 = vmatprep.subr.bf16.mxu0 %v14045_v47  ;;  %v14121_v47 = vld [vmem:[#allocation11 + $0x310] ss:$24 sps:$4 sm:$0xff]  }
 0x6b7   : > { %9708 = vmatpush2.bf16.msra.mxu1 %v14040_v57  ;;  %v14126_v57 = vld [vmem:[#allocation11 + $0x2e4] ss:$24 sps:$4 sm:$0xff]  }
 0x6b8   : > { %9749 = vmatpush2.bf16.msra.mxu0 %v14043_v58  ;;  %9709 = vmatprep.subr.bf16.mxu1 %v14048_v24  ;;  %v14129_v58 = vld [vmem:[#allocation11 + $0x5e4] ss:$24 sps:$4 sm:$0xff]   ;;  %v14124_v24 = vld [vmem:[#allocation11 + $0x2e0] ss:$24 sps:$4 sm:$0xff]  }
 0x6b9   : > { %9750 = vmatprep.subr.bf16.mxu0 %v14051_v4  ;;  %v14127_v4 = vld [vmem:[#allocation11 + $0x5e0] ss:$24 sps:$4 sm:$0xff]  }
 0x6bb   : > { %9710 = vmatpush2.bf16.msra.mxu1 %v14046_v62  ;;  %v14132_v62 = vld [vmem:[#allocation11 + $0x2b4] ss:$24 sps:$4 sm:$0xff]  }
 0x6bc   : > { %9751 = vmatpush2.bf16.msra.mxu0 %v14049_v8  ;;  %9711 = vmatprep.subr.bf16.mxu1 %v14054_v9  ;;  %v14135_v8 = vld [vmem:[#allocation11 + $0x5b4] ss:$24 sps:$4 sm:$0xff]   ;;  %v14130_v9 = vld [vmem:[#allocation11 + $0x2b0] ss:$24 sps:$4 sm:$0xff]  }
 0x6bd   : > { %9752 = vmatprep.subr.bf16.mxu0 %v14057_v42  ;;  %v14133_v42 = vld [vmem:[#allocation11 + $0x5b0] ss:$24 sps:$4 sm:$0xff]  }
 0x6bf   : > { %9712 = vmatpush2.bf16.msra.mxu1 %v14052_v11  ;;  %v14138_v11 = vld [vmem:[#allocation11 + $0x284] ss:$24 sps:$4 sm:$0xff]  }
 0x6c0   : > { %9753 = vmatpush2.bf16.msra.mxu0 %v14055_v29  ;;  %9713 = vmatprep.subr.bf16.mxu1 %v14060_v12  ;;  %v14141_v29 = vld [vmem:[#allocation11 + $0x584] ss:$24 sps:$4 sm:$0xff]   ;;  %v14136_v12 = vld [vmem:[#allocation11 + $0x280] ss:$24 sps:$4 sm:$0xff]  }
 0x6c1   : > { %9754 = vmatprep.subr.bf16.mxu0 %v14063_v13  ;;  %v14139_v13 = vld [vmem:[#allocation11 + $0x580] ss:$24 sps:$4 sm:$0xff]  }
 0x6c3   : > { %9714 = vmatpush2.bf16.msra.mxu1 %v14058_v50  ;;  %v14144_v50 = vld [vmem:[#allocation11 + $0x254] ss:$24 sps:$4 sm:$0xff]  }
 0x6c4   : > { %9755 = vmatpush2.bf16.msra.mxu0 %v14061_v44  ;;  %9715 = vmatprep.subr.bf16.mxu1 %v14066_v56  ;;  %v14147_v44 = vld [vmem:[#allocation11 + $0x554] ss:$24 sps:$4 sm:$0xff]   ;;  %v14142_v56 = vld [vmem:[#allocation11 + $0x250] ss:$24 sps:$4 sm:$0xff]  }
 0x6c5   : > { %9756 = vmatprep.subr.bf16.mxu0 %v14069_v15  ;;  %v14145_v15 = vld [vmem:[#allocation11 + $0x550] ss:$24 sps:$4 sm:$0xff]  }
 0x6c7   : > { %9716 = vmatpush2.bf16.msra.mxu1 %v14064_v16  ;;  %v14150_v16 = vld [vmem:[#allocation11 + $0x224] ss:$24 sps:$4 sm:$0xff]  }
 0x6c8   : > { %9757 = vmatpush2.bf16.msra.mxu0 %v14067_v49  ;;  %9717 = vmatprep.subr.bf16.mxu1 %v14072_v22  ;;  %v14153_v49 = vld [vmem:[#allocation11 + $0x524] ss:$24 sps:$4 sm:$0xff]   ;;  %v14148_v22 = vld [vmem:[#allocation11 + $0x220] ss:$24 sps:$4 sm:$0xff]  }
 0x6c9   : > { %9758 = vmatprep.subr.bf16.mxu0 %v14075_v5  ;;  %v14151_v5 = vld [vmem:[#allocation11 + $0x520] ss:$24 sps:$4 sm:$0xff]  }
 0x6cb   : > { %9718 = vmatpush2.bf16.msra.mxu1 %v14070_v19  ;;  %v14156_v19 = vld [vmem:[#allocation11 + $0x1f4] ss:$24 sps:$4 sm:$0xff]  }
 0x6cc   : > { %9759 = vmatpush2.bf16.msra.mxu0 %v14073_v55  ;;  %9769 = vmatprep.subr.bf16.mxu1 %v14078_v25  ;;  %v14159_v55 = vld [vmem:[#allocation11 + $0x4f4] ss:$24 sps:$4 sm:$0xff]   ;;  %v14154_v25 = vld [vmem:[#allocation11 + $0x1f0] ss:$24 sps:$4 sm:$0xff]  }
 0x6cd   : > { %9810 = vmatprep.subr.bf16.mxu0 %v14081_v14  ;;  %v14157_v14 = vld [vmem:[#allocation11 + $0x4f0] ss:$24 sps:$4 sm:$0xff]  }
 0x6ce   : > { %9720 = vmatmul.mubr.bf16.vlgmr.msra.gmra.mxu1 %v15383_v7 }
 0x6cf   : > { %9761 = vmatmul.mubr.bf16.vlgmr.msra.gmra.mxu0 %v15395_v6  ;;  %9770 = vmatpush1.bf16.msra.mxu1 %v14076_v26  ;;  %v14162_v26 = vld [vmem:[#allocation11 + $0x1c4] ss:$24 sps:$4 sm:$0xff]  }
 0x6d0   : > { %9801 = vmatprep.mubr.bf16.mxu1 %v15377_v38  ;;  %9811 = vmatpush1.bf16.msra.mxu0 %v14079_v20  ;;  %v14097_v38 = vld [vmem:[#allocation11 + $0x3d0] ss:$24 sps:$4 sm:$0xff]   ;;  %v14165_v20 = vld [vmem:[#allocation11 + $0x4c4] ss:$24 sps:$4 sm:$0xff]  }
 0x6d1   : > { %9842 = vmatprep.mubr.bf16.mxu0 %v15379_v45  ;;  %9771 = vmatprep.subr.bf16.mxu1 %v14084_v27  ;;  %v14100_v45 = vld [vmem:[#allocation11 + $0xa0] ss:$24 sps:$4 sm:$0xff]  }
 0x6d2   : > { %9812 = vmatprep.subr.bf16.mxu0 %v14087_v34  ;;  %v14160_v27 = vld [vmem:[#allocation11 + $0x1c0] ss:$24 sps:$4 sm:$0xff]  }
 0x6d3   : > { %9772 = vmatpush1.bf16.msra.mxu1 %v14082_v32  ;;  %v14163_v34 = vld [vmem:[#allocation11 + $0x4c0] ss:$24 sps:$4 sm:$0xff]   ;;  %v14168_v32 = vld [vmem:[#allocation11 + $0x194] ss:$24 sps:$4 sm:$0xff]  }
 0x6d4   : > { %9813 = vmatpush1.bf16.msra.mxu0 %v14085_v30  ;;  %9773 = vmatprep.subr.bf16.mxu1 %v14090_v33  ;;  %v14171_v30 = vld [vmem:[#allocation11 + $0x494] ss:$24 sps:$4 sm:$0xff]   ;;  %v14166_v33 = vld [vmem:[#allocation11 + $0x190] ss:$24 sps:$4 sm:$0xff]  }
 0x6d5   : > { %9814 = vmatprep.subr.bf16.mxu0 %v14093_v35  ;;  %v14169_v35 = vld [vmem:[#allocation11 + $0x490] ss:$24 sps:$4 sm:$0xff]  }
 0x6d7   : > { %9774 = vmatpush1.bf16.msra.mxu1 %v14088_v36  ;;  %v14174_v36 = vld [vmem:[#allocation11 + $0x764] ss:$24 sps:$4 sm:$0xff]  }
 0x6d8   : > { %9815 = vmatpush1.bf16.msra.mxu0 %v14091_v37  ;;  %9775 = vmatprep.subr.bf16.mxu1 %v14096_v39  ;;  %v15405_v37 = vld [vmem:[#allocation13] sm:$0x3f] }
 0x6d9   : > { %9816 = vmatprep.subr.bf16.mxu0 %v14099_v43  ;;  %v14172_v39 = vld [vmem:[#allocation11 + $0x760] ss:$24 sps:$4 sm:$0xff]   ;;  %v9496_v43 = vrot.slane %v15405_v37, %v15009_v28 }
 0x6db   : > { %9776 = vmatpush1.bf16.msra.mxu1 %v14094_v40  ;;  %v14177_v40 = vld [vmem:[#allocation11 + $0x734] ss:$24 sps:$4 sm:$0xff]  }
 0x6dc   : > { %9817 = vmatpush1.bf16.msra.mxu0 %v14097_v38  ;;  %9777 = vmatprep.subr.bf16.mxu1 %v14102_v41  ;;  %v9500_v38 = vrot.slane %v15405_v37, %v15012_v31 }
 0x6dd   : > { %9818 = vmatprep.subr.bf16.mxu0 %v14105_v3 }
 0x6df   : > { %9778 = vmatpush1.bf16.msra.mxu1 %v14100_v45 }
 0x6e0   : > { %9819 = vmatpush1.bf16.msra.mxu0 %v14103_v54  ;;  %9779 = vmatprep.subr.bf16.mxu1 %v14108_v51  ;;  %v14175_v54 = vld [vmem:[#allocation11 + $0x730] ss:$24 sps:$4 sm:$0xff]  }
 0x6e1   : > { %9820 = vmatprep.subr.bf16.mxu0 %v14111_v46 }
 0x6e3   : > { %9780 = vmatpush1.bf16.msra.mxu1 %v14106_v63  ;;  %v14180_v63 = vld [vmem:[#allocation11 + $0x704] ss:$24 sps:$4 sm:$0xff]  }
 0x6e4   : > { %9821 = vmatpush1.bf16.msra.mxu0 %v14109_v23  ;;  %9781 = vmatprep.subr.bf16.mxu1 %v14114_v1 }
 0x6e5   : > { %9822 = vmatprep.subr.bf16.mxu0 %v14117_v53 }
 0x6e7   : > { %9782 = vmatpush1.bf16.msra.mxu1 %v14112_v48 }
 0x6e8   : > { %9823 = vmatpush1.bf16.msra.mxu0 %v14115_v10  ;;  %9783 = vmatprep.subr.bf16.mxu1 %v14120_v21 }
 0x6e9   : > { %9824 = vmatprep.subr.bf16.mxu0 %v14123_v60  ;;  %v14183_v60 = vld [vmem:[#allocation11 + $0x6d4] ss:$24 sps:$4 sm:$0xff]  }
 0x6eb   : > { %9784 = vmatpush1.bf16.msra.mxu1 %v14118_v52  ;;  %v14181_v52 = vld [vmem:[#allocation11 + $0x6d0] ss:$24 sps:$4 sm:$0xff]  }
 0x6ec   : > { %9825 = vmatpush1.bf16.msra.mxu0 %v14121_v47  ;;  %9785 = vmatprep.subr.bf16.mxu1 %v14126_v57  ;;  %v14184_v47 = vld [vmem:[#allocation11 + $0x6a0] ss:$24 sps:$4 sm:$0xff]   ;;  %v14189_v57 = vld [vmem:[#allocation11 + $0x674] ss:$24 sps:$4 sm:$0xff]  }
 0x6ed   : > { %9826 = vmatprep.subr.bf16.mxu0 %v14129_v58  ;;  %v14187_v58 = vld [vmem:[#allocation11 + $0x670] ss:$24 sps:$4 sm:$0xff]  }
 0x6ef   : > { %9786 = vmatpush2.bf16.msra.mxu1 %v14124_v24  ;;  %v14192_v24 = vld [vmem:[#allocation11 + $0x644] ss:$24 sps:$4 sm:$0xff]  }
 0x6f0   : > { %9827 = vmatpush2.bf16.msra.mxu0 %v14127_v4  ;;  %9787 = vmatprep.subr.bf16.mxu1 %v14132_v62  ;;  %v14190_v4 = vld [vmem:[#allocation11 + $0x640] ss:$24 sps:$4 sm:$0xff]   ;;  %v14195_v62 = vld [vmem:[#allocation11 + $0x614] ss:$24 sps:$4 sm:$0xff]  }
 0x6f1   : > { %9828 = vmatprep.subr.bf16.mxu0 %v14135_v8  ;;  %v14193_v8 = vld [vmem:[#allocation11 + $0x610] ss:$24 sps:$4 sm:$0xff]  }
 0x6f3   : > { %9788 = vmatpush2.bf16.msra.mxu1 %v14130_v9  ;;  %v14198_v9 = vld [vmem:[#allocation11 + $0x8e4] ss:$24 sps:$4 sm:$0xff]  }
 0x6f4   : > { %9829 = vmatpush2.bf16.msra.mxu0 %v14133_v42  ;;  %9789 = vmatprep.subr.bf16.mxu1 %v14138_v11  ;;  %v14196_v42 = vld [vmem:[#allocation11 + $0x8e0] ss:$24 sps:$4 sm:$0xff]   ;;  %v14201_v11 = vld [vmem:[#allocation11 + $0x8b4] ss:$24 sps:$4 sm:$0xff]  }
 0x6f5   : > { %9830 = vmatprep.subr.bf16.mxu0 %v14141_v29  ;;  %v14199_v29 = vld [vmem:[#allocation11 + $0x8b0] ss:$24 sps:$4 sm:$0xff]  }
 0x6f7   : > { %9790 = vmatpush2.bf16.msra.mxu1 %v14136_v12  ;;  %v14204_v12 = vld [vmem:[#allocation11 + $0x884] ss:$24 sps:$4 sm:$0xff]  }
 0x6f8   : > { %9831 = vmatpush2.bf16.msra.mxu0 %v14139_v13  ;;  %9791 = vmatprep.subr.bf16.mxu1 %v14144_v50  ;;  %v14202_v13 = vld [vmem:[#allocation11 + $0x880] ss:$24 sps:$4 sm:$0xff]   ;;  %v14207_v50 = vld [vmem:[#allocation11 + $0x854] ss:$24 sps:$4 sm:$0xff]  }
 0x6f9   : > { %9832 = vmatprep.subr.bf16.mxu0 %v14147_v44  ;;  %v14205_v44 = vld [vmem:[#allocation11 + $0x850] ss:$24 sps:$4 sm:$0xff]  }
 0x6fb   : > { %9792 = vmatpush2.bf16.msra.mxu1 %v14142_v56  ;;  %v14210_v56 = vld [vmem:[#allocation11 + $0x824] ss:$24 sps:$4 sm:$0xff]  }
 0x6fc   : > { %9833 = vmatpush2.bf16.msra.mxu0 %v14145_v15  ;;  %9793 = vmatprep.subr.bf16.mxu1 %v14150_v16  ;;  %v14208_v15 = vld [vmem:[#allocation11 + $0x820] ss:$24 sps:$4 sm:$0xff]   ;;  %v14213_v16 = vld [vmem:[#allocation11 + $0x7f4] ss:$24 sps:$4 sm:$0xff]  }
 0x6fd   : > { %9834 = vmatprep.subr.bf16.mxu0 %v14153_v49  ;;  %v14211_v49 = vld [vmem:[#allocation11 + $0x7f0] ss:$24 sps:$4 sm:$0xff]  }
 0x6ff   : > { %9794 = vmatpush2.bf16.msra.mxu1 %v14148_v22  ;;  %v14216_v22 = vld [vmem:[#allocation11 + $0x7c4] ss:$24 sps:$4 sm:$0xff]  }
 0x700   : > { %9835 = vmatpush2.bf16.msra.mxu0 %v14151_v5  ;;  %9795 = vmatprep.subr.bf16.mxu1 %v14156_v19  ;;  %v14214_v5 = vld [vmem:[#allocation11 + $0x7c0] ss:$24 sps:$4 sm:$0xff]   ;;  %v14219_v19 = vld [vmem:[#allocation11 + $0x794] ss:$24 sps:$4 sm:$0xff]  }
 0x701   : > { %9836 = vmatprep.subr.bf16.mxu0 %v14159_v55  ;;  %v14217_v55 = vld [vmem:[#allocation11 + $0x790] ss:$24 sps:$4 sm:$0xff]  }
 0x703   : > { %9796 = vmatpush2.bf16.msra.mxu1 %v14154_v25 }
 0x704   : > { %9837 = vmatpush2.bf16.msra.mxu0 %v14157_v14  ;;  %9797 = vmatprep.subr.bf16.mxu1 %v14162_v26 }
 0x705   : > { %9838 = vmatprep.subr.bf16.mxu0 %v14165_v20 }
 0x707   : > { %9798 = vmatpush2.bf16.msra.mxu1 %v14160_v27 }
 0x708   : > { %9839 = vmatpush2.bf16.msra.mxu0 %v14163_v34  ;;  %9799 = vmatprep.subr.bf16.mxu1 %v14168_v32 }
 0x709   : > { %9840 = vmatprep.subr.bf16.mxu0 %v14171_v30 }
 0x70b   : > { %9800 = vmatpush2.bf16.msra.mxu1 %v14166_v33 }
 0x70c   : > { %9841 = vmatpush2.bf16.msra.mxu0 %v14169_v35  ;;  %9851 = vmatprep.subr.bf16.mxu1 %v14174_v36  ;;  %v9504_v36 = vrot.slane %v15405_v37, %v15039_v17 }
 0x70e   : > { %9802 = vmatmul.mubr.bf16.vlgmr.msra.gmra.mxu1 %v15381_v61  ;;  %v9557_v41 = vpop.f32.mrf.mxu1  ;;  %v9598_v3 = vpop.f32.mrf.mxu0  ;;  %v14178_v61 = vld [vmem:[#allocation11 + $0x700] ss:$24 sps:$4 sm:$0xff]  }
 0x70f   : > { %9843 = vmatmul.mubr.bf16.vlgmr.msra.gmra.mxu0 %v15383_v7  ;;  %v9558_v45 = vadd.f32 %v9557_v41, %v9496_v43  ;;  %9852 = vmatpush1.bf16.msra.mxu1 %v14172_v39  ;;  %v9508_v39 = vrot.slane %v15405_v37, %v15042_v18 }
 0x710   : > { %9883 = vmatprep.mubr.bf16.mxu1 %v15390_v2  ;;  %v9559_v51 = vpop.f32.mrf.mxu1  ;;  %v9600_v46 = vpop.f32.mrf.mxu0  ;;  %9853 = vmatprep.subr.bf16.mxu1 %v14177_v40  ;;  %v14186_v2 = vld [vmem:[#allocation11 + $0x6a4] ss:$24 sps:$4 sm:$0xff]  }
 0x711   : > { %v15414_v23 = vadd.f32 %v9598_v3, %v9558_v45  ;;  %v9560_v1 = vadd.f32 %v9559_v51, %v9500_v38 }
 0x712   : > { %v9561_v53 = vpop.f32.mrf.mxu1  ;;  %v9602_v48 = vpop.f32.mrf.mxu0 }
 0x713   : > { %v15416_v10 = vadd.f32 %v9600_v46, %v9560_v1  ;;  %9854 = vmatpush1.bf16.msra.mxu1 %v14175_v54 }
 0x714   : > { %v9562_v21 = vpop.f32.mrf.mxu1  ;;  %v9603_v7 = vpop.f32.mrf.mxu0  ;;  %9855 = vmatprep.subr.bf16.mxu1 %v14180_v63 }
 0x717   : > { %9856 = vmatpush1.bf16.msra.mxu1 %v14178_v61 }
 0x718   : > { %9857 = vmatprep.subr.bf16.mxu1 %v14183_v60 }
 0x71b   : > { %9858 = vmatpush1.bf16.msra.mxu1 %v14181_v52 }
 0x71c   : > { %9859 = vmatprep.subr.bf16.mxu1 %v14186_v2 }
 0x71f   : > { %9860 = vmatpush1.bf16.msra.mxu1 %v14184_v47  ;;  %v9512_v47 = vrot.slane %v15405_v37, %v15061_v59 }
 0x720   : > { %9861 = vmatprep.subr.bf16.mxu1 %v14189_v57 }
 0x723   : > { %9862 = vmatpush1.bf16.msra.mxu1 %v14187_v58  ;;  %v9516_v58 = vrot.slane %v15405_v37, %v15064_v0 }
 0x724   : > { %9863 = vmatprep.subr.bf16.mxu1 %v14192_v24 }
 0x727   : > { %9864 = vmatpush1.bf16.msra.mxu1 %v14190_v4 }
 0x728   : > { %9865 = vmatprep.subr.bf16.mxu1 %v14195_v62 }
 0x72b   : > { %9866 = vmatpush1.bf16.msra.mxu1 %v14193_v8 }
 0x72c   : > { %9867 = vmatprep.subr.bf16.mxu1 %v14198_v9 }
 0x72f   : > { %9868 = vmatpush2.bf16.msra.mxu1 %v14196_v42 }
 0x730   : > { %9869 = vmatprep.subr.bf16.mxu1 %v14201_v11 }
 0x733   : > { %9870 = vmatpush2.bf16.msra.mxu1 %v14199_v29 }
 0x734   : > { %9871 = vmatprep.subr.bf16.mxu1 %v14204_v12 }
 0x737   : > { %9872 = vmatpush2.bf16.msra.mxu1 %v14202_v13 }
 0x738   : > { %9873 = vmatprep.subr.bf16.mxu1 %v14207_v50 }
 0x73b   : > { %9874 = vmatpush2.bf16.msra.mxu1 %v14205_v44 }
 0x73c   : > { %9875 = vmatprep.subr.bf16.mxu1 %v14210_v56 }
 0x73f   : > { %9876 = vmatpush2.bf16.msra.mxu1 %v14208_v15 }
 0x740   : > { %9877 = vmatprep.subr.bf16.mxu1 %v14213_v16 }
 0x743   : > { %9878 = vmatpush2.bf16.msra.mxu1 %v14211_v49 }
 0x744   : > { %9879 = vmatprep.subr.bf16.mxu1 %v14216_v22 }
 0x747   : > { %9880 = vmatpush2.bf16.msra.mxu1 %v14214_v5 }
 0x748   : > { %9881 = vmatprep.subr.bf16.mxu1 %v14219_v19 }
 0x74b   : > { %9882 = vmatpush2.bf16.msra.mxu1 %v14217_v55 }
 0x74e   : > { %v9639_v25 = vpop.f32.mrf.mxu1  ;;  %v9680_v14 = vpop.f32.mrf.mxu0  ;;  %9884 = vmatmul.mubr.bf16.vlgmr.msra.gmra.mxu1 %v15395_v6 }
 0x74f   : > { %v9640_v26 = vadd.f32 %v9639_v25, %v15414_v23  ;;  %v9681_v43 = vadd.f32 %v9680_v14, %v9504_v36 }
 0x750   : > { %v9641_v20 = vpop.f32.mrf.mxu1  ;;  %v9682_v27 = vpop.f32.mrf.mxu0 }
 0x751   : > { %v9642_v34 = vadd.f32 %v9641_v20, %v15416_v10  ;;  %v9683_v38 = vadd.f32 %v9682_v27, %v9508_v39  ;;  %v9893_v24 = vsel %vm9892_vm3, %v9640_v26, 0.0 }
 0x752   : > { %v9643_v32 = vpop.f32.mrf.mxu1  ;;  %v9684_v30 = vpop.f32.mrf.mxu0 }
 0x753   : > { %v9894_v57 = vsel %vm9892_vm3, %v9642_v34, 0.0 }
 0x754   : > { %v9644_v33 = vpop.f32.mrf.mxu1  ;;  %v9685_v35 = vpop.f32.mrf.mxu0  ;;  %v9895_v8 = vadd.f32 %v9894_v57, %v9893_v24  ;;  %v14231_v57 = vld [vmem:[%s15747_s10 + $0x128] sm:$0xff]   ;;  %v14234_v24 = vld [vmem:[%s15747_s10 + $0x160] sm:$0xff]  }
 0x78e   : > { %v9721_v40 = vpop.f32.mrf.mxu1 }
 0x78f   : > { %v9722_v6 = vadd.f32 %v9721_v40, %v9681_v43  ;;  %v9762_v41 = vpop.f32.mrf.mxu0 }
 0x790   : > { %v9723_v3 = vpop.f32.mrf.mxu1 }
 0x791   : > { %v9763_v45 = vadd.f32 %v9762_v41, %v9722_v6  ;;  %v9724_v54 = vadd.f32 %v9723_v3, %v9683_v38  ;;  %v9764_v51 = vpop.f32.mrf.mxu0 }
 0x792   : > { %v9725_v46 = vpop.f32.mrf.mxu1 }
 0x793   : > { %v9765_v63 = vadd.f32 %v9764_v51, %v9724_v54  ;;  %v9766_v23 = vpop.f32.mrf.mxu0  ;;  %v9896_v4 = vsel %vm9892_vm3, %v9763_v45, 0.0 }
 0x794   : > { %v9726_v1 = vpop.f32.mrf.mxu1  ;;  %v9897_v42 = vadd.f32 %v9896_v4, %v9895_v8  ;;  %v14233_v4 = vld [vmem:[%s15747_s10 + $0x20] sm:$0xff]   ;;  %v14236_v8 = vld [vmem:[%s15747_s10 + $0x58] sm:$0xff]  }
 0x795   : > { %v9767_v53 = vpop.f32.mrf.mxu0  ;;  %v9898_v11 = vsel %vm9892_vm3, %v9765_v63, 0.0  ;;  %v14220_v1 = vld [vmem:[%s15747_s10 + $0x78] sm:$0xff]  }
 0x796   : > { %v9899_v44 = vadd.f32 %v9898_v11, %v9897_v42  ;;  %v14221_v53 = vld [vmem:[%s15747_s10 + $0x38] sm:$0xff]   ;;  %12226 = vmatprep.subr.bf16.mxu0 %v14220_v1 }
 0x797   : > { %12227 = vmatpush3.bf16.msra.mxu0 %v14221_v53  ;;  %v14237_v42 = vld [vmem:[%s15747_s10 + $0x18] sm:$0xff]  }
 0x798   : > { %v14239_v11 = vld [vmem:[%s15747_s10 + $0x118] sm:$0xff]  }
 0x7ce   : > { %v9803_v48 = vpop.f32.mrf.mxu1 }
 0x7cf   : > { %v9844_v10 = vpop.f32.mrf.mxu0  ;;  %v9804_v62 = vadd.f32 %v9803_v48, %v9512_v47  ;;  %v14222_v48 = vld [vmem:[%s15747_s10 + $0x178] sm:$0xff]   ;;  %v14229_v47 = vld [vmem:[%s15747_s10 + $0x28] sm:$0xff]  }
 0x7d0   : > { %v9805_v61 = vpop.f32.mrf.mxu1  ;;  %12270 = vmatprep.subr.bf16.mxu1 %v14222_v48 }
 0x7d1   : > { %v9846_v21 = vpop.f32.mrf.mxu0  ;;  %v9806_v9 = vadd.f32 %v9805_v61, %v9516_v58  ;;  %v9845_v29 = vadd.f32 %v9844_v10, %v9804_v62  ;;  %v14223_v10 = vld [vmem:[%s15747_s10 + $0x138] sm:$0xff]   ;;  %v14224_v61 = vld [vmem:[%s15747_s10 + $0x70] sm:$0xff]   ;;  %v14232_v58 = vld [vmem:[%s15747_s10 + $0x60] sm:$0xff]  }
 0x7d2   : > { %v9807_v7 = vpop.f32.mrf.mxu1  ;;  %12271 = vmatpush3.bf16.msra.mxu1 %v14223_v10  ;;  %12228 = vmatprep.subr.bf16.mxu0 %v14224_v61  ;;  %v14235_v62 = vld [vmem:[%s15747_s10 + $0x120] sm:$0xff]  }
 0x7d3   : > { %v9848_v60 = vpop.f32.mrf.mxu0  ;;  %v9847_v13 = vadd.f32 %v9846_v21, %v9806_v9  ;;  %v14226_v21 = vld [vmem:[%s15747_s10 + $0x170] sm:$0xff]   ;;  %v14238_v9 = vld [vmem:[%s15747_s10 + $0x158] sm:$0xff]  }
 0x7d4   : > { %v9808_v52 = vpop.f32.mrf.mxu1  ;;  %v14225_v7 = vld [vmem:[%s15747_s10 + $0x30] sm:$0xff]   ;;  %12272 = vmatprep.subr.bf16.mxu1 %v14226_v21 }
 0x7d5   : > { %v9849_v2 = vpop.f32.mrf.mxu0  ;;  %v14227_v60 = vld [vmem:[%s15747_s10 + $0x130] sm:$0xff]   ;;  %v14228_v52 = vld [vmem:[%s15747_s10 + $0x68] sm:$0xff]   ;;  %12229 = vmatpush3.bf16.msra.mxu0 %v14225_v7 }
 0x7d6   : > { %v14230_v2 = vld [vmem:[%s15747_s10 + $0x168] sm:$0xff]   ;;  %12273 = vmatpush3.bf16.msra.mxu1 %v14227_v60  ;;  %12230 = vmatprep.subr.bf16.mxu0 %v14228_v52 }
 0x7d7   : > { %12274 = vmatprep.subr.bf16.mxu1 %v14230_v2 }
 0x7d9   : > { %12231 = vmatpush3.bf16.msra.mxu0 %v14229_v47 }
 0x7da   : > { %12275 = vmatpush3.bf16.msra.mxu1 %v14231_v57  ;;  %12232 = vmatprep.subr.bf16.mxu0 %v14232_v58 }
 0x7db   : > { %12276 = vmatprep.subr.bf16.mxu1 %v14234_v24 }
 0x7dd   : > { %12233 = vmatpush3.bf16.msra.mxu0 %v14233_v4 }
 0x7de   : > { %12277 = vmatpush3.bf16.msra.mxu1 %v14235_v62  ;;  %12234 = vmatprep.subr.bf16.mxu0 %v14236_v8 }
 0x7df   : > { %12278 = vmatprep.subr.bf16.mxu1 %v14238_v9 }
 0x7e1   : > { %12235 = vmatpush3.bf16.msra.mxu0 %v14237_v42 }
 0x7e2   : > { %12279 = vmatpush3.bf16.msra.mxu1 %v14239_v11 }
 0x80e   : > { %v9885_v12 = vpop.f32.mrf.mxu1 }
 0x80f   : > { %v9886_v50 = vadd.f32 %v9885_v12, %v9845_v29  ;;  %v14240_v29 = vld [vmem:[%s15747_s10 + $0x50] sm:$0xff]  }
 0x810   : > { %v9887_v56 = vpop.f32.mrf.mxu1  ;;  %v14242_v12 = vld [vmem:[%s15747_s10 + $0x150] sm:$0xff]   ;;  %12236 = vmatprep.subr.bf16.mxu0 %v14240_v29 }
 0x811   : > { %v9900_v15 = vsel %vm9892_vm3, %v9886_v50, 0.0  ;;  %v9888_v16 = vadd.f32 %v9887_v56, %v9847_v13  ;;  %v14241_v13 = vld [vmem:[%s15747_s10 + $0x10] sm:$0xff]   ;;  %12280 = vmatprep.subr.bf16.mxu1 %v14242_v12  ;;  %v14246_v56 = vld [vmem:[%s15747_s10 + $0x148] sm:$0xff]  }
 0x812   : > { %v9889_v37 = vpop.f32.mrf.mxu1  ;;  %v9901_v49 = vadd.f32 %v9900_v15, %v9899_v44  ;;  %v14244_v44 = vld [vmem:[%s15747_s10 + $0x48] sm:$0xff]   ;;  %12237 = vmatpush3.bf16.msra.mxu0 %v14241_v13 }
 0x813   : > { %v9902_v22 = vsel %vm9892_vm3, %v9888_v16, 0.0  ;;  %v14245_v15 = vld [vmem:[%s15747_s10 + $0x8] sm:$0xff]   ;;  %12238 = vmatprep.subr.bf16.mxu0 %v14244_v44  ;;  %v14248_v37 = vld [vmem:[%s15747_s10 + $0x40] sm:$0xff]  }
 0x814   : > { %v9890_v5 = vpop.f32.mrf.mxu1  ;;  %v9903_v19 = vadd.f32 %v9902_v22, %v9901_v49  ;;  %v14250_v49 = vld [vmem:[%s15747_s10 + $0x140] sm:$0xff]  }
 0x815   : > { %v14249_v22 = vld [vmem:[%s15747_s10] sm:$0xff]  }
 0x816   : > { %9904 = vadd.xlane.f32.xlu0 %v9903_v19  ;;  %12239 = vmatpush3.bf16.msra.mxu0 %v14245_v15  ;;  %v14251_v5 = vld [vmem:[%s15747_s10 + $0x100] sm:$0xff]   ;;  %v14252_v19 = vld [vmem:[%s15747_s10 + $0xf8] sm:$0xff]  }
 0x817   : > { %12240 = vmatprep.subr.bf16.mxu0 %v14248_v37 }
 0x81a   : > { %12241 = vmatpush3.bf16.msra.mxu0 %v14249_v22 }
 0x81b   : > { %12248 = vmatprep.subr.bf16.mxu0 %v14252_v19 }
 0x89f   : > { %v9905_v55 = vpop.xlane.xlu0 %9904 }
 0x8a0   : > { %v9907_v25 = vmul.f32 0.0013020834, %v9905_v55 }
 0x8a2   : > { %v15435_v14 = vsub.f32 %v9640_v26, %v9907_v25  ;;  %v15437_v20 = vsub.f32 %v9642_v34, %v9907_v25  ;;  %v15439_v27 = vsub.f32 %v9763_v45, %v9907_v25  ;;  %v15441_v32 = vsub.f32 %v9765_v63, %v9907_v25 }
 0x8a3   : > { %v15443_v30 = vsub.f32 %v9886_v50, %v9907_v25  ;;  %v15451_v39 = vsub.f32 %v9888_v16, %v9907_v25  ;;  %v14243_v50 = vld [vmem:[%s15747_s10 + $0x110] sm:$0xff]   ;;  %v14247_v16 = vld [vmem:[%s15747_s10 + $0x108] sm:$0xff]  }
 0x8a4   : > { %v9914_v33 = vmul.f32 %v15435_v14, %v15435_v14  ;;  %v9915_v35 = vmul.f32 %v15437_v20, %v15437_v20  ;;  %v9916_v36 = vmul.f32 %v15439_v27, %v15439_v27  ;;  %v9917_v26 = vmul.f32 %v15441_v32, %v15441_v32  ;;  %12281 = vmatpush3.bf16.msra.mxu1 %v14243_v50 }
 0x8a5   : > { %v9918_v38 = vmul.f32 %v15443_v30, %v15443_v30  ;;  %v9919_v3 = vmul.f32 %v15451_v39, %v15451_v39  ;;  %12282 = vmatprep.subr.bf16.mxu1 %v14246_v56 }
 0x8a6   : > { %v9920_v34 = vsel %vm9892_vm3, %v9914_v33, 0.0  ;;  %v9921_v43 = vsel %vm9892_vm3, %v9915_v35, 0.0  ;;  %v9923_v6 = vsel %vm9892_vm3, %v9916_v36, 0.0  ;;  %v9925_v45 = vsel %vm9892_vm3, %v9917_v26, 0.0  ;;  %v9942_v35 = vld [vmem:[#allocation14] sm:$0x3f] }
 0x8a7   : > { %v9922_v40 = vadd.f32 %v9921_v43, %v9920_v34  ;;  %v9927_v51 = vsel %vm9892_vm3, %v9918_v38, 0.0  ;;  %v9929_v63 = vsel %vm9892_vm3, %v9919_v3, 0.0  ;;  %v9980_v36 = vld [vmem:[#allocation16] sm:$0x3f]  ;;  %v9951_v26 = vrot.slane %v9942_v35, %v15012_v31 }
 0x8a8   : > { %12283 = vmatpush3.bf16.msra.mxu1 %v14247_v16  ;;  %v9967_v34 = vrot.slane %v9942_v35, %v15064_v0  ;;  %v9947_v43 = vrot.slane %v9942_v35, %v15009_v28  ;;  %v9985_v3 = vrot.slane %v9980_v36, %v15009_v28  ;;  %v9997_v7 = vrot.slane %v9980_v36, %v15042_v18 }
 0x8a9   : > { %v9924_v41 = vadd.f32 %v9923_v6, %v9922_v40  ;;  %12284 = vmatprep.subr.bf16.mxu1 %v14250_v49  ;;  %v9963_v40 = vrot.slane %v9942_v35, %v15061_v59  ;;  %v9989_v6 = vrot.slane %v9980_v36, %v15012_v31  ;;  %v9993_v47 = vrot.slane %v9980_v36, %v15039_v17 }
 0x8ab   : > { %v9926_v54 = vadd.f32 %v9925_v45, %v9924_v41  ;;  %v10005_v41 = vrot.slane %v9980_v36, %v15064_v0  ;;  %v10001_v45 = vrot.slane %v9980_v36, %v15061_v59  ;;  %v9959_v0 = vrot.slane %v9942_v35, %v15042_v18 }
 0x8ac   : > { %12285 = vmatpush3.bf16.msra.mxu1 %v14251_v5  ;;  %v9955_v59 = vrot.slane %v9942_v35, %v15039_v17 }
 0x8ad   : > { %v9928_v46 = vadd.f32 %v9927_v51, %v9926_v54 }
 0x8af   : > { %v9930_v23 = vadd.f32 %v9929_v63, %v9928_v46 }
 0x8b1   : > { %9931 = vadd.xlane.f32.xlu1 %v9930_v23 }
 0x93a   : > { %v9932_v55 = vpop.xlane.xlu1 %9931 }
 0x93b   : > { %v9933_v25 = vmul.f32 0.0013020834, %v9932_v55 }
 0x93d   : > { %v9934_v33 = vadd.f32 1e-05, %v9933_v25 }
 0x93f   : > { %14272 = vrsqrt.f32 %v9934_v33 }
 0x94c   : > { %v14273_v38 = vpop.eup %14272 }
 0x94d   : > { %v9937_v54 = vmul.f32 %v14273_v38, %v15437_v20  ;;  %v9941_v51 = vmul.f32 %v14273_v38, %v15451_v39  ;;  %v9936_v46 = vmul.f32 %v14273_v38, %v15435_v14  ;;  %v9940_v63 = vmul.f32 %v14273_v38, %v15443_v30 }
 0x94e   : > { %v9939_v31 = vmul.f32 %v14273_v38, %v15441_v32  ;;  %v9938_v28 = vmul.f32 %v14273_v38, %v15439_v27 }
 0x94f   : > { %v9975_v23 = vmul.f32 %v9951_v26, %v9937_v54  ;;  %v9979_v1 = vmul.f32 %v9967_v34, %v9941_v51  ;;  %v9974_v53 = vmul.f32 %v9947_v43, %v9936_v46  ;;  %v9978_v48 = vmul.f32 %v9963_v40, %v9940_v63 }
 0x950   : > { %v9977_v21 = vmul.f32 %v9959_v0, %v9939_v31  ;;  %v9976_v2 = vmul.f32 %v9955_v59, %v9938_v28 }
 0x951   : > { %v15580_v10 = vadd.f32 %v9989_v6, %v9975_v23  ;;  %v15582_v20 = vadd.f32 %v10005_v41, %v9979_v1  ;;  %v15584_v39 = vadd.f32 %v9985_v3, %v9974_v53  ;;  %v15586_v14 = vadd.f32 %v10001_v45, %v9978_v48 }
 0x952   : > { %v15606_v8 = vadd.f32 %v9997_v7, %v9977_v21  ;;  %v15608_v18 = vadd.f32 %v9993_v47, %v9976_v2 }
 0x953   : > { %v15589_v30 = vmul.f32 0.70710677, %v15580_v10  ;;  %v15592_v61 = vmul.f32 0.70710677, %v15582_v20  ;;  %v15595_v32 = vmul.f32 0.70710677, %v15584_v39 }
 0x954   : > { %v15598_v27 = vmul.f32 0.70710677, %v15586_v14  ;;  %v15611_v12 = vmul.f32 0.70710677, %v15606_v8  ;;  %v15614_v13 = vmul.f32 0.70710677, %v15608_v18 }
 0x955   : > { %v10031_v60 = vand.u32 2147483647, %v15589_v30  ;;  %v10035_v52 = vand.u32 2147483647, %v15592_v61  ;;  %v10030_v57 = vand.u32 2147483647, %v15595_v32 }
 0x956   : > { %v10034_v58 = vand.u32 2147483647, %v15598_v27  ;;  %v10033_v50 = vand.u32 2147483647, %v15611_v12  ;;  %v15618_v44 = vand.u32 2147483647, %v15614_v13 }
 0x957   : > { %v10037_v24 = vmul.f32 0.3275911, %v10031_v60  ;;  %v10041_v4 = vmul.f32 0.3275911, %v10035_v52  ;;  %v10036_v62 = vmul.f32 0.3275911, %v10030_v57 }
 0x958   : > { %v10040_v11 = vmul.f32 0.3275911, %v10034_v58  ;;  %v10039_v56 = vmul.f32 0.3275911, %v10033_v50  ;;  %v10115_v15 = vsub.f32 0.0, %v10031_v60  ;;  %v10119_v37 = vsub.f32 0.0, %v10035_v52 }
 0x959   : > { %v10043_v9 = vadd.f32 1.0, %v10037_v24  ;;  %v10047_v42 = vadd.f32 1.0, %v10041_v4  ;;  %v10042_v29 = vadd.f32 1.0, %v10036_v62  ;;  %v10038_v16 = vmul.f32 0.3275911, %v15618_v44 }
 0x95a   : > { %v10046_v17 = vadd.f32 1.0, %v10040_v11  ;;  %v10045_v49 = vadd.f32 1.0, %v10039_v56  ;;  %v10121_v5 = vmul.f32 %v10115_v15, %v10031_v60  ;;  %v10114_v19 = vsub.f32 0.0, %v10030_v57 }
 0x95b   : > { %14274 = vrcp.f32 %v10043_v9  ;;  %v10044_v22 = vadd.f32 1.0, %v10038_v16  ;;  %v10125_v55 = vmul.f32 %v10119_v37, %v10035_v52  ;;  %v10118_v25 = vsub.f32 0.0, %v10034_v58 }
 0x95c   : > { %14276 = vrcp.f32 %v10047_v42  ;;  %v10128_v26 = vmul.f32 1.442695, %v10121_v5  ;;  %v10120_v34 = vmul.f32 %v10114_v19, %v10030_v57  ;;  %v10117_v6 = vsub.f32 0.0, %v10033_v50 }
 0x95d   : > { %14278 = vrcp.f32 %v10042_v29  ;;  %v10136_v40 = vmul.f32 1.442695, %v10125_v55  ;;  %v10124_v38 = vmul.f32 %v10118_v25, %v10034_v58  ;;  %vm10151_vm4 = vcmp.lt.f32.partialorder %v15589_v30, 0.0 }
 0x95e   : > { %14280 = vrcp.f32 %v10046_v17  ;;  %v10126_v46 = vmul.f32 1.442695, %v10120_v34  ;;  %v10123_v53 = vmul.f32 %v10117_v6, %v10033_v50  ;;  %vm10155_vm5 = vcmp.lt.f32.partialorder %v15592_v61, 0.0 }
 0x95f   : > { %14282 = vrcp.f32 %v10045_v49  ;;  %v10134_v1 = vmul.f32 1.442695, %v10124_v38  ;;  %v10018_v61 = vmul.f32 0.5, %v15584_v39  ;;  %vm10150_vm6 = vcmp.lt.f32.partialorder %v15595_v32, 0.0 }
 0x960   : > { %14284 = vrcp.f32 %v10044_v22  ;;  %v10132_v57 = vmul.f32 1.442695, %v10123_v53  ;;  %vm10154_vm7 = vcmp.lt.f32.partialorder %v15598_v27, 0.0  ;;  %v10022_v39 = vmul.f32 0.5, %v15586_v14 }
 0x961   : > { %14286 = vpow2.f32 %v10128_v26  ;;  %v10116_v26 = vsub.f32 0.0, %v15618_v44  ;;  %vm10153_vm8 = vcmp.lt.f32.partialorder %v15611_v12, 0.0  ;;  %v14256_v12 = vld [vmem:[%s15747_s10 + $0xe8] sm:$0xff]   ;;  %vm10152_vm9 = vcmp.lt.f32.partialorder %v15614_v13, 0.0 }
 0x962   : > { %14288 = vpow2.f32 %v10136_v40 }
 0x963   : > { %14290 = vpow2.f32 %v10126_v46 }
 0x964   : > { %14292 = vpow2.f32 %v10134_v1 }
 0x965   : > { %14294 = vpow2.f32 %v10132_v57 }
 0x968   : > { %v14275_v33 = vpop.eup %14274 }
 0x969   : > { %v14277_v35 = vpop.eup %14276  ;;  %v10061_v36 = vmul.f32 1.0614054, %v14275_v33 }
 0x96a   : > { %v10065_v43 = vmul.f32 1.0614054, %v14277_v35  ;;  %v14279_v3 = vpop.eup %14278 }
 0x96b   : > { %v10067_v41 = vadd.f32 -1.4531521, %v10061_v36  ;;  %v10060_v51 = vmul.f32 1.0614054, %v14279_v3  ;;  %v15621_v63 = vpop.eup %14280 }
 0x96c   : > { %v10071_v45 = vadd.f32 -1.4531521, %v10065_v43  ;;  %v10064_v0 = vmul.f32 1.0614054, %v15621_v63  ;;  %v15624_v59 = vpop.eup %14282 }
 0x96d   : > { %v10073_v54 = vmul.f32 %v14275_v33, %v10067_v41  ;;  %v10066_v31 = vadd.f32 -1.4531521, %v10060_v51  ;;  %v15626_v52 = vpop.eup %14284  ;;  %v10063_v47 = vmul.f32 1.0614054, %v15624_v59 }
 0x96e   : > { %v10077_v23 = vmul.f32 %v14277_v35, %v10071_v45  ;;  %v10070_v60 = vadd.f32 -1.4531521, %v10064_v0  ;;  %v10062_v62 = vmul.f32 1.0614054, %v15626_v52  ;;  %v14287_v34 = vpop.eup %14286 }
 0x96f   : > { %v10079_v48 = vadd.f32 1.4214138, %v10073_v54  ;;  %v10072_v7 = vmul.f32 %v14279_v3, %v10066_v31  ;;  %v10069_v42 = vadd.f32 -1.4531521, %v10063_v47  ;;  %v14289_v38 = vpop.eup %14288  ;;  %v10019_v31 = vmul.f32 0.5, %v15580_v10 }
 0x970   : > { %v10083_v28 = vadd.f32 1.4214138, %v10077_v23  ;;  %v10076_v4 = vmul.f32 %v15621_v63, %v10070_v60  ;;  %v10068_v50 = vadd.f32 -1.4531521, %v10062_v62 }
 0x971   : > { %v10085_v21 = vmul.f32 %v14275_v33, %v10079_v48  ;;  %v10078_v24 = vadd.f32 1.4214138, %v10072_v7  ;;  %v10075_v15 = vmul.f32 %v15624_v59, %v10069_v42  ;;  %v14291_v48 = vpop.eup %14290 }
 0x972   : > { %v10089_v2 = vmul.f32 %v14277_v35, %v10083_v28  ;;  %v10082_v17 = vadd.f32 1.4214138, %v10076_v4  ;;  %v10074_v22 = vmul.f32 %v15626_v52, %v10068_v50  ;;  %v14293_v28 = vpop.eup %14292  ;;  %v10023_v4 = vmul.f32 0.5, %v15582_v20 }
 0x973   : > { %v10091_v58 = vadd.f32 -0.28449672, %v10085_v21  ;;  %v10084_v29 = vmul.f32 %v14279_v3, %v10078_v24  ;;  %v10081_v19 = vadd.f32 1.4214138, %v10075_v15  ;;  %v14295_v42 = vpop.eup %14294 }
 0x974   : > { %v10095_v9 = vadd.f32 -0.28449672, %v10089_v2  ;;  %v10088_v49 = vmul.f32 %v15621_v63, %v10082_v17  ;;  %v10080_v54 = vadd.f32 1.4214138, %v10074_v22 }
 0x975   : > { %v10097_v11 = vmul.f32 %v14275_v33, %v10091_v58  ;;  %v10090_v37 = vadd.f32 -0.28449672, %v10084_v29  ;;  %v10087_v40 = vmul.f32 %v15624_v59, %v10081_v19 }
 0x976   : > { %v10101_v56 = vmul.f32 %v14277_v35, %v10095_v9  ;;  %v10094_v36 = vadd.f32 -0.28449672, %v10088_v49  ;;  %v10086_v2 = vmul.f32 %v15626_v52, %v10080_v54 }
 0x977   : > { %v10103_v16 = vadd.f32 0.2548296, %v10097_v11  ;;  %v10096_v25 = vmul.f32 %v14279_v3, %v10090_v37  ;;  %v10093_v46 = vadd.f32 -0.28449672, %v10087_v40 }
 0x978   : > { %v10107_v5 = vadd.f32 0.2548296, %v10101_v56  ;;  %v10100_v45 = vmul.f32 %v15621_v63, %v10094_v36  ;;  %v10092_v17 = vadd.f32 -0.28449672, %v10086_v2  ;;  %v10020_v2 = vmul.f32 0.5, %v15608_v18 }
 0x979   : > { %v10109_v55 = vmul.f32 %v14275_v33, %v10103_v16  ;;  %v10102_v41 = vadd.f32 0.2548296, %v10096_v25  ;;  %v10122_v33 = vmul.f32 %v10116_v26, %v15618_v44  ;;  %v14253_v25 = vld [vmem:[%s15747_s10 + $0xb8] sm:$0xff]  }
 0x97a   : > { %v10113_v43 = vmul.f32 %v14277_v35, %v10107_v5  ;;  %v10106_v53 = vadd.f32 0.2548296, %v10100_v45  ;;  %v10099_v35 = vmul.f32 %v15624_v59, %v10093_v46  ;;  %v10098_v5 = vmul.f32 %v15626_v52, %v10092_v17  ;;  %v14258_v46 = vld [vmem:[%s15747_s10 + $0xe0] sm:$0xff]  }
 0x97b   : > { %v10139_v6 = vmul.f32 %v14287_v34, %v10109_v55  ;;  %v10108_v1 = vmul.f32 %v14279_v3, %v10102_v41  ;;  %v10130_v10 = vmul.f32 1.442695, %v10122_v33  ;;  %v14254_v34 = vld [vmem:[%s15747_s10 + $0xf0] sm:$0xff]   ;;  %v14261_v33 = vld [vmem:[%s15747_s10 + $0x98] sm:$0xff]  }
 0x97c   : > { %v10143_v51 = vmul.f32 %v14289_v38, %v10113_v43  ;;  %v10112_v60 = vmul.f32 %v15621_v63, %v10106_v53  ;;  %v10105_v47 = vadd.f32 0.2548296, %v10099_v35  ;;  %v10021_v43 = vmul.f32 0.5, %v15606_v8  ;;  %v14255_v41 = vld [vmem:[%s15747_s10 + $0xb0] sm:$0xff]   ;;  %v14257_v8 = vld [vmem:[%s15747_s10 + $0xa8] sm:$0xff]  }
 0x97d   : > { %v10145_v23 = vsub.f32 1.0, %v10139_v6  ;;  %v10138_v7 = vmul.f32 %v14291_v48, %v10108_v1  ;;  %14296 = vpow2.f32 %v10130_v10  ;;  %v10104_v14 = vadd.f32 0.2548296, %v10098_v5  ;;  %v14259_v1 = vld [vmem:[%s15747_s10 + $0xa0] sm:$0xff]   ;;  %v14262_v48 = vld [vmem:[%s15747_s10 + $0xd0] sm:$0xff]   ;;  %v14264_v35 = vld [vmem:[%s15747_s10 + $0xc8] sm:$0xff]  }
 0x97e   : > { %v10149_v0 = vsub.f32 1.0, %v10143_v51  ;;  %v10142_v58 = vmul.f32 %v14293_v28, %v10112_v60  ;;  %v10111_v9 = vmul.f32 %v15624_v59, %v10105_v47 }
 0x97f   : > { %v10157_v21 = vsub.f32 0.0, %v10145_v23  ;;  %v10144_v57 = vsub.f32 1.0, %v10138_v7  ;;  %v10110_v54 = vmul.f32 %v15626_v52, %v10104_v14  ;;  %v14260_v52 = vld [vmem:[%s15747_s10 + $0xd8] sm:$0xff]   ;;  %v14266_v7 = vld [vmem:[%s15747_s10 + $0xc0] sm:$0xff]  }
 0x980   : > { %v10161_v3 = vsub.f32 0.0, %v10149_v0  ;;  %v10148_v29 = vsub.f32 1.0, %v10142_v58  ;;  %v10141_v50 = vmul.f32 %v14295_v42, %v10111_v9  ;;  %v10282_v42 = vld [vmem:[#allocation17] sm:$0x1] }
 0x981   : > { %v10163_v44 = vsel %vm10151_vm4, %v10157_v21, %v10145_v23  ;;  %v10156_v11 = vsub.f32 0.0, %v10144_v57  ;;  %v14265_v21 = vld [vmem:[%s15747_s10 + $0x88] sm:$0xff]  }
 0x982   : > { %v10169_v24 = vadd.f32 1.0, %v10163_v44  ;;  %v10167_v62 = vsel %vm10155_vm5, %v10161_v3, %v10149_v0  ;;  %v10160_v16 = vsub.f32 0.0, %v10148_v29  ;;  %v10147_v59 = vsub.f32 1.0, %v10141_v50  ;;  %v14263_v0 = vld [vmem:[%s15747_s10 + $0x90] sm:$0xff]   ;;  %v14267_v3 = vld [vmem:[%s15747_s10 + $0x80] sm:$0xff]  }
 0x983   : > { %v10173_v63 = vadd.f32 1.0, %v10167_v62  ;;  %v10162_v15 = vsel %vm10150_vm6, %v10156_v11, %v10144_v57 }
 0x984   : > { %v10175_v30 = vmul.f32 %v10169_v24, %v10019_v31  ;;  %v10168_v20 = vadd.f32 1.0, %v10162_v15  ;;  %v10166_v22 = vsel %vm10154_vm7, %v10160_v16, %v10148_v29  ;;  %v10159_v32 = vsub.f32 0.0, %v10147_v59 }
 0x985   : > { %v10179_v56 = vmul.f32 %v10173_v63, %v10023_v4  ;;  %v10172_v55 = vadd.f32 1.0, %v10166_v22 }
 0x986   : > { %v10181_v37 = vpack.c.bf16 %v10175_v30, %v10175_v30  ;;  %v10174_v19 = vmul.f32 %v10168_v20, %v10018_v61  ;;  %v10165_v26 = vsel %vm10153_vm8, %v10159_v32, %v10147_v59 }
 0x987   : > { %v10185_v49 = vpack.c.bf16 %v10179_v56, %v10179_v56  ;;  %v10178_v27 = vmul.f32 %v10172_v55, %v10022_v39  ;;  %v10171_v40 = vadd.f32 1.0, %v10165_v26 }
 0x988   : > { %10603 = vmatprep.mubr.bf16.mxu0 %v10181_v37  ;;  %v10180_v36 = vpack.c.bf16 %v10174_v19, %v10174_v19 }
 0x989   : > { %10683 = vmatprep.mubr.bf16.mxu1 %v10185_v49  ;;  %v10184_v38 = vpack.c.bf16 %v10178_v27, %v10178_v27  ;;  %v10177_v6 = vmul.f32 %v10171_v40, %v10021_v43 }
 0x98a   : > { %10604 = vmatmul.mubr.bf16.vlgmr.msra.gmra.mxu0 %v10180_v36  ;;  %v14297_v51 = vpop.eup %14296 }
 0x98b   : > { %12249 = vmatpush3.bf16.msra.mxu0 %v14253_v25  ;;  %10684 = vmatmul.mubr.bf16.vlgmr.msra.gmra.mxu1 %v10184_v38  ;;  %v10183_v45 = vpack.c.bf16 %v10177_v6, %v10177_v6  ;;  %v10140_v23 = vmul.f32 %v14297_v51, %v10110_v54 }
 0x98c   : > { %12250 = vmatprep.subr.bf16.mxu0 %v14254_v34 }
 0x98d   : > { %10643 = vmatprep.mubr.bf16.mxu0 %v10183_v45  ;;  %v10146_v53 = vsub.f32 1.0, %v10140_v23 }
 0x98f   : > { %12251 = vmatpush3.bf16.msra.mxu0 %v14255_v41  ;;  %v10158_v31 = vsub.f32 0.0, %v10146_v53 }
 0x990   : > { %12252 = vmatprep.subr.bf16.mxu0 %v14256_v12 }
 0x991   : > { %v10164_v28 = vsel %vm10152_vm9, %v10158_v31, %v10146_v53 }
 0x992   : > { %v10170_v60 = vadd.f32 1.0, %v10164_v28 }
 0x993   : > { %12253 = vmatpush3.bf16.msra.mxu0 %v14257_v8 }
 0x994   : > { %12254 = vmatprep.subr.bf16.mxu0 %v14258_v46  ;;  %v10176_v13 = vmul.f32 %v10170_v60, %v10020_v2 }
 0x996   : > { %v10182_v47 = vpack.c.bf16 %v10176_v13, %v10176_v13 }
 0x997   : > { %12255 = vmatpush3.bf16.msra.mxu0 %v14259_v1 }
 0x998   : > { %12256 = vmatprep.subr.bf16.mxu0 %v14260_v52 }
 0x99b   : > { %12257 = vmatpush3.bf16.msra.mxu0 %v14261_v33 }
 0x99c   : > { %12258 = vmatprep.subr.bf16.mxu0 %v14262_v48 }
 0x99f   : > { %12259 = vmatpush3.bf16.msra.mxu0 %v14263_v0 }
 0x9a0   : > { %12260 = vmatprep.subr.bf16.mxu0 %v14264_v35 }
 0x9a3   : > { %12261 = vmatpush3.bf16.msra.mxu0 %v14265_v21 }
 0x9a4   : > { %12262 = vmatprep.subr.bf16.mxu0 %v14266_v7 }
 0x9a7   : > { %12263 = vmatpush3.bf16.msra.mxu0 %v14267_v3 }
 0x9aa   : > { %10644 = vmatmul.mubr.bf16.vlgmr.msra.gmra.mxu0 %v10182_v47 }
 0xa4a   : > { %v12242_v44 = vpop.f32.mrf.mxu0 }
 0xa4b   : > { %v12286_v57 = vpop.f32.mrf.mxu1 }
 0xa4c   : > { %v12243_v58 = vpop.f32.mrf.mxu0 }
 0xa4d   : > { %v12287_v10 = vpop.f32.mrf.mxu1  ;;  %v12244_v9 = vadd.f32 %v12243_v58, %v12242_v44 }
 0xa4e   : > { %v12245_v24 = vpop.f32.mrf.mxu0  ;;  %v12288_v61 = vadd.f32 %v12287_v10, %v12286_v57 }
 0xa4f   : > { %v12289_v4 = vpop.f32.mrf.mxu1  ;;  %v10606_v29 = vadd.f32 %v12244_v9, %v10282_v42 }
 0xa50   : > { %v12246_v62 = vpop.f32.mrf.mxu0 }
 0xa51   : > { %v12290_v18 = vpop.f32.mrf.mxu1 }
 0xa6a   : > { %v12264_v63 = vpop.f32.mrf.mxu0 }
 0xa6c   : > { %v12265_v11 = vpop.f32.mrf.mxu0 }
 0xa6d   : > { %v12266_v17 = vadd.f32 %v12265_v11, %v12264_v63 }
 0xa6e   : > { %v12267_v30 = vpop.f32.mrf.mxu0 }
 0xa6f   : > { %v10646_v50 = vadd.f32 %v12266_v17, %v10606_v29 }
 0xa70   : > { %v12268_v56 = vpop.f32.mrf.mxu0 }
 0xa71   : > { %v10686_v15 = vadd.f32 %v12288_v61, %v10646_v50 }
 0xa73   : > { %10692 = vst.msk [vmem:[%s566_s2] sm:$0x1] %vm10691_vm10, %v10686_v15 }
 0xa74   : > { %14578 = shalt.err (!%p14575_p9)
}
 0xa75   : > { %s14579_s14 = scalar_lea.hbm %s10704_s0, 16  ;;  %s14583_s25 = scalar_lea.hbm %s15749_s12, 32 }
 0xa76   : > { %p14580_p11 = scmp.ne.s32.totalorder %s10704_s0, %s14579_s14  ;;  %p14584_p13 = scmp.lt.s32.totalorder %s10704_s0, %s15749_s12 }
 0xa77   : > { %p14585_p1 = scmp.lt.s32.totalorder %s14583_s25, %s14579_s14 }
 0xa78   : > { %p14581_p6 = pnand %p14580_p11, %p15793_p3 }
 0xa79   : > { %p14586_p2 = por %p14585_p1, %p14584_p13 }
 0xa7a   : > { %p14582_p12 = pneg %p14581_p6 }
 0xa7c   : > { %p14587_p10 = pnand %p14586_p2, %p14582_p12 }
 0xa7e   : > { %14590 = shalt.err (!%p14587_p10)
}
 0xa7f   : > { %12331 = dma.vmem_to_hbm [thread:$0]  (%p15793_p3), %s10707_s20, 16, %s10704_s0, %s10694_s16  }
 0xa80 PF: > { %s10718_s8 = sand.u32 1, %s14641_s21   ;;  %p15794_p0 = scmp.ne.s32.totalorder %s15777_s19, 0 }
 0xa81   : > { %p15795_p7 = scmp.ge.s32.totalorder %s14653_s24, 2  ;;  %s10719_s5 = scalar_lea.sflag [#allocation4], %s10718_s8 }
 0xa83   : > { %p12366_p4 = pnand %p15795_p7, %p15794_p0 }
 0xa85   : > { %p12367_p5 = pneg %p12366_p4 }
 0xa87   : > { %14636 = dma.done.wait (%p12367_p5), %s10719_s5, 16  }
 0xa88   : > { %14638 = vsyncadd (%p12367_p5), %s10719_s5, 4294967280  ;;  %p32_p8 = scmp.ge.s32.totalorder %s14846_s13, 4   ;;  %s15796_s21 = smov %s14645_s22 }
 0xa89   : > { %s15797_s22 = smov %s14649_s23  ;;  %s15798_s23 = smov %s14857_s17 }
 0xa8a   : > { %s15799_s24 = smov %s14846_s13  ;;  %34 = sbr.rel (!%p32_p8) target bundleno = 21 (0x15), region = 158 }
 0xa8f   :  { %10723 = vsyncpa [#allocation3], 1 }
 0xa90   :  { %10725 = vsyncpa [#allocation3 + $0x1], 1 }
 0xa91   :  { %10726 = vsyncpa [#allocation6], 1 }
 0xa92   :  { %10728 = vsyncpa [#allocation6 + $0x1], 1 }
 0xa93   :  { %10729 = vsyncpa [#allocation9], 1 }
 0xa94   :  { %10730 = vsyncpa [#allocation12], 1 }
 0xa95   :  { %10731 = vsyncpa [#allocation15], 1 }
 0xa96   :  { %10732 = vsyncpa [#allocation18], 1 }
 0xa97   :  { %10733 = vsyncpa [#allocation4], 1 }
 0xa98   :  { %10735 = vsyncpa [#allocation4 + $0x1], 1 }

</bundles_post_ra>
